<compile_context>
chip_gen: v7x
topology: tpu7x:2x2x1
jax: 0.10.0
libtpu: 0.0.40
codegen_flags: <defaults>
</compile_context>

<pallas_src>
import functools

import jax
import jax.numpy as jnp
from jax.experimental import pallas as pl
from jax.experimental.pallas import tpu as pltpu

LN_EPS = 1e-5                                      # torch.nn.LayerNorm default
MASK_VALUE = float(-jnp.finfo(jnp.float32).max)    # max_neg_value (local_attention)


# -----------------------------------------------------------------------------
# math helpers (shared by the kernel and the pure-JAX reference)
# -----------------------------------------------------------------------------
def _erf(x):
    # Abramowitz & Stegun 7.1.26 rational approximation (|err| <= 1.5e-7):
    # Mosaic has no erf lowering; matches torch's exact (erf-based) GELU to
    # ~float32 precision using only exp/abs/where.
    a1, a2, a3, a4, a5 = (0.254829592, -0.284496736, 1.421413741,
                          -1.453152027, 1.061405429)
    p = 0.3275911
    s = jnp.where(x >= 0.0, 1.0, -1.0)
    z = jnp.abs(x)
    t = 1.0 / (1.0 + p * z)
    poly = ((((a5 * t + a4) * t + a3) * t + a2) * t + a1) * t
    return s * (1.0 - poly * jnp.exp(-z * z))


def _gelu_exact(x):
    return 0.5 * x * (1.0 + _erf(x * 0.7071067811865476))


def _layer_norm(x, g, b):
    mu = jnp.mean(x, axis=-1, keepdims=True)
    var = jnp.mean(jnp.square(x - mu), axis=-1, keepdims=True)
    return (x - mu) * jax.lax.rsqrt(var + LN_EPS) * g + b


# -----------------------------------------------------------------------------
# host-precomputed tables
# -----------------------------------------------------------------------------
def _upsample_matrix(n_in, rate):
    # nn.Upsample(scale_factor=rate, mode='linear', align_corners=False) along
    # the sequence axis, expressed as a (n_out, n_in) interpolation matrix.
    n_out = n_in * rate
    i = jnp.arange(n_out, dtype=jnp.float32)
    src = jnp.maximum((i + 0.5) / rate - 0.5, 0.0)        # torch clamps below 0
    idx0 = jnp.minimum(jnp.floor(src).astype(jnp.int32), n_in - 1)
    idx1 = jnp.minimum(idx0 + 1, n_in - 1)
    frac = src - idx0.astype(jnp.float32)
    w0 = jax.nn.one_hot(idx0, n_in, dtype=jnp.float32) * (1.0 - frac)[:, None]
    w1 = jax.nn.one_hot(idx1, n_in, dtype=jnp.float32) * frac[:, None]
    return w0 + w1


def _rotary_tables(n, dh):
    # local_attention SinusoidalEmbeddings
    inv_freq = 1.0 / (10000.0 ** (jnp.arange(0, dh, 2, dtype=jnp.float32) / dh))
    t = jnp.arange(n, dtype=jnp.float32)
    freqs = t[:, None] * inv_freq[None, :]
    freqs = jnp.concatenate([freqs, freqs], axis=-1)      # (n, dh)
    return jnp.cos(freqs), jnp.sin(freqs)


def _rotate_half_matrix(dh):
    # rotate_half(v) == v @ r for a single head (dh, dh)
    half = dh // 2
    idx = jnp.arange(half)
    r = jnp.zeros((dh, dh), jnp.float32)
    r = r.at[idx + half, idx].set(-1.0)
    r = r.at[idx, idx + half].set(1.0)
    return r


def _band_mask(n, window):
    # causal local attention (look_backward=1, look_forward=0,
    # exact_windowsize=False): query i attends keys j with
    #   (i//W - 1)*W <= j <= i.   Returned as bool, True = masked.
    qpos = jnp.arange(n)[:, None]
    kpos = jnp.arange(n)[None, :]
    win0 = (qpos // window) * window
    return jnp.logical_or(kpos > qpos, kpos < win0 - window)


# -----------------------------------------------------------------------------
# fused Pallas kernel: upsample + all transformer layers, one batch per grid pt
# -----------------------------------------------------------------------------
def _uptrans_kernel(x_ref, up_ref, cos_ref, sin_ref, rot_ref, bias_ref,
                    ln1g_ref, ln1b_ref, wqkv_ref, wo_ref,
                    ln2g_ref, ln2b_ref, wffa_ref, wffg_ref, wff2_ref,
                    o_ref, *, heads):
    f32 = jnp.float32
    depth = wqkv_ref.shape[0]
    HD = wqkv_ref.shape[2] // 3
    H = heads
    Dh = HD // H

    # nn.Upsample(linear, align_corners=False) as one (N, N_in) @ (N_in, D) dot.
    x = jnp.dot(up_ref[...], x_ref[0], preferred_element_type=f32)   # (N, D)

    cos = cos_ref[...]                    # (N, Dh), shared by all heads/layers
    sin = sin_ref[...]
    rot = rot_ref[...]                    # (Dh, Dh) rotate_half matrix
    bias = bias_ref[...]                  # (N, N) additive mask (0 / -max)

    def rotary(t):                        # t: (N, Dh) per-head slice
        return t * cos + jnp.dot(t, rot, preferred_element_type=f32) * sin

    # TODO(synk): attn/ff dropout omitted (rates are 0.0 in this config) and the
    # optional padding `mask` argument is not implemented (mask=None path only).
    for l in range(depth):                # static unroll; x stays VMEM-resident
        # ---------------------- LocalMHA (prenorm) ----------------------
        xn = _layer_norm(x, ln1g_ref[l], ln1b_ref[l])
        # single fused QKV projection (Dh**-0.5 folded into the q columns)
        qkv = jnp.dot(xn, wqkv_ref[l], preferred_element_type=f32)   # (N, 3*HD)

        # Per-head scores from static lane slices of the fused tensor; rotary
        # applied on the (N, Dh) slices with a tiny (Dh, Dh) matmul.  Masking /
        # softmax below are batched over all heads at once.
        sims = []
        for h in range(H):
            qh = rotary(qkv[:, h * Dh:(h + 1) * Dh])
            kh = rotary(qkv[:, HD + h * Dh:HD + (h + 1) * Dh])
            sims.append(jax.lax.dot_general(
                qh, kh, (((1,), (1,)), ((), ())), preferred_element_type=f32))
        sim = jnp.stack(sims, axis=0) + bias[None]                   # (H, N, N)
        m = jnp.max(sim, axis=-1, keepdims=True)
        p = jnp.exp(sim - m)
        attn = p * pl.reciprocal(jnp.sum(p, axis=-1, keepdims=True), approx=True)

        # attention-weighted values reassembled into the fused (N, H*Dh) layout
        # so the output projection is ONE full-width matmul per layer.
        ctx = jnp.concatenate(
            [jnp.dot(attn[h], qkv[:, 2 * HD + h * Dh:2 * HD + (h + 1) * Dh],
                     preferred_element_type=f32) for h in range(H)], axis=1)
        x = x + jnp.dot(ctx, wo_ref[l], preferred_element_type=f32)  # residual 1

        # ---------------------- FeedForward (GEGLU) ----------------------
        xn2 = _layer_norm(x, ln2g_ref[l], ln2b_ref[l])
        ha = jnp.dot(xn2, wffa_ref[l], preferred_element_type=f32)
        hg = jnp.dot(xn2, wffg_ref[l], preferred_element_type=f32)
        x = x + jnp.dot(ha * _gelu_exact(hg), wff2_ref[l],
                        preferred_element_type=f32)                  # residual 2

    o_ref[0] = x


# -----------------------------------------------------------------------------
# wrapper
# -----------------------------------------------------------------------------
def up_trans_v2_forward(x, params, *, window_size, compress_rate, heads):
    B, n_in, D = x.shape
    n_out = n_in * compress_rate
    depth = len(params)
    HD = params[0]["wq"].shape[1]
    Dh = HD // heads
    F = params[0]["wff_a"].shape[1]
    assert window_size % compress_rate == 0
    assert n_out % window_size == 0, "keep upsampled seq a multiple of window"
    assert HD % heads == 0

    up = _upsample_matrix(n_in, compress_rate)                 # (n_out, n_in)
    cos, sin = _rotary_tables(n_out, Dh)                       # (n_out, Dh)
    rot = _rotate_half_matrix(Dh)                              # (Dh, Dh)
    bias = jnp.where(_band_mask(n_out, window_size),
                     MASK_VALUE, 0.0).astype(jnp.float32)      # additive mask

    stk = lambda name: jnp.stack([p[name] for p in params], axis=0)
    scale = Dh ** -0.5
    # fold attention scale into the q columns, fuse q/k/v host-side
    wqkv = jnp.stack(
        [jnp.concatenate([p["wq"] * scale, p["wk"], p["wv"]], axis=1)
         for p in params], axis=0)                             # (depth, D, 3HD)

    args = (x, up, cos, sin, rot, bias,
            stk("ln1_g"), stk("ln1_b"), wqkv, stk("wo"),
            stk("ln2_g"), stk("ln2_b"), stk("wff_a"), stk("wff_g"), stk("wff2"))

    def bcast(shape):
        return pl.BlockSpec(shape, lambda b, _n=len(shape): (0,) * _n)

    in_specs = [
        pl.BlockSpec((1, n_in, D), lambda b: (b, 0, 0)),       # x (per batch)
        bcast((n_out, n_in)),                                  # upsample matrix
        bcast((n_out, Dh)), bcast((n_out, Dh)),                # cos, sin
        bcast((Dh, Dh)),                                       # rotate_half
        bcast((n_out, n_out)),                                 # additive mask
        bcast((depth, 1, D)), bcast((depth, 1, D)),            # ln1 g/b
        bcast((depth, D, 3 * HD)),                             # fused qkv
        bcast((depth, HD, D)),                                 # wo
        bcast((depth, 1, D)), bcast((depth, 1, D)),            # ln2 g/b
        bcast((depth, D, F)), bcast((depth, D, F)), bcast((depth, F, D)),
    ]
    out_spec = pl.BlockSpec((1, n_out, D), lambda b: (b, 0, 0))

    kernel = functools.partial(_uptrans_kernel, heads=heads)
    return pl.pallas_call(
        kernel,
        out_shape=jax.ShapeDtypeStruct((B, n_out, D), jnp.float32),
        grid=(B,),
        in_specs=in_specs,
        out_specs=out_spec,
        compiler_params=pltpu.CompilerParams(
            dimension_semantics=("parallel",)),   # batch entries shard per core
    )(*args)


# -----------------------------------------------------------------------------
# pure-JAX (XLA) reference of the same forward pass, for a correctness check
# -----------------------------------------------------------------------------
def up_trans_v2_reference(x, params, *, window_size, compress_rate, heads):
    B, n_in, D = x.shape
    HD = params[0]["wq"].shape[1]
    Dh = HD // heads
    n = n_in * compress_rate
    up = _upsample_matrix(n_in, compress_rate)
    cos, sin = _rotary_tables(n, Dh)
    banned = _band_mask(n, window_size)

    def rot_half(t):                    # t: (..., Dh)
        t1, t2 = t[..., :Dh // 2], t[..., Dh // 2:]
        return jnp.concatenate([-t2, t1], axis=-1)

    x = jnp.einsum('oi,bid->bod', up, x)
    for p in params:
        xn = _layer_norm(x, p["ln1_g"], p["ln1_b"])
        q = (xn @ p["wq"]).reshape(B, n, heads, Dh)
        k = (xn @ p["wk"]).reshape(B, n, heads, Dh)
        v = (xn @ p["wv"]).reshape(B, n, heads, Dh)
        q = q * cos[None, :, None, :] + rot_half(q) * sin[None, :, None, :]
        k = k * cos[None, :, None, :] + rot_half(k) * sin[None, :, None, :]
        q = q * (Dh ** -0.5)
        sim = jnp.einsum('bnhd,bmhd->bhnm', q, k)
        sim = jnp.where(banned[None, None], MASK_VALUE, sim)
        attn = jax.nn.softmax(sim, axis=-1)
        ctx = jnp.einsum('bhnm,bmhd->bnhd', attn, v).reshape(B, n, HD)
        x = x + ctx @ p["wo"]
        xn2 = _layer_norm(x, p["ln2_g"], p["ln2_b"])
        x = x + ((xn2 @ p["wff_a"]) * _gelu_exact(xn2 @ p["wff_g"])) @ p["wff2"]
    return x


def init_params(key, depth, D, H, Dh, ff_inner):
    HD = H * Dh
    params = []
    for _ in range(depth):
        keys = jax.random.split(key, 8)
        key = keys[0]
        params.append(dict(
            ln1_g=jnp.ones((1, D), jnp.float32),
            ln1_b=jnp.zeros((1, D), jnp.float32),
            wq=jax.random.normal(keys[1], (D, HD), jnp.float32) * (D ** -0.5),
            wk=jax.random.normal(keys[2], (D, HD), jnp.float32) * (D ** -0.5),
            wv=jax.random.normal(keys[3], (D, HD), jnp.float32) * (D ** -0.5),
            wo=jax.random.normal(keys[4], (HD, D), jnp.float32) * (HD ** -0.5),
            ln2_g=jnp.ones((1, D), jnp.float32),
            ln2_b=jnp.zeros((1, D), jnp.float32),
            wff_a=jax.random.normal(keys[5], (D, ff_inner), jnp.float32) * (D ** -0.5),
            wff_g=jax.random.normal(keys[6], (D, ff_inner), jnp.float32) * (D ** -0.5),
            wff2=jax.random.normal(keys[7], (ff_inner, D), jnp.float32) * (ff_inner ** -0.5),
        ))
    return params


if __name__ == "__main__":
    # Small config consistent with UpTransV2 defaults / LocalTrans.builder:
    # feature_dim=128 -> dim_head=128//4=32, heads=6, ff_mult=4,
    # ff_inner=int(128*4*2/3)=341; compress_rate=2; depth=2; local attention
    # window=8 (window % compress_rate == 0).  Input seq 16 -> upsampled 32.
    B, n_in, D = 2, 16, 128
    compress_rate = 2
    window = 8
    depth = 2
    heads = 6
    dim_head = D // 4
    ff_inner = int(D * 4 * 2 / 3)

    key = jax.random.PRNGKey(0)
    kx, kp = jax.random.split(key)
    x = jax.random.normal(kx, (B, n_in, D), jnp.float32)
    params = init_params(kp, depth, D, heads, dim_head, ff_inner)

    out = up_trans_v2_forward(x, params, window_size=window,
                              compress_rate=compress_rate, heads=heads)
    out = jax.block_until_ready(out)

    assert out.shape == (B, n_in * compress_rate, D)
    assert bool(jnp.all(jnp.isfinite(out)))

    ref = up_trans_v2_reference(x, params, window_size=window,
                                compress_rate=compress_rate, heads=heads)
    assert bool(jnp.allclose(out, ref, rtol=2e-2, atol=2e-2)), \
        float(jnp.max(jnp.abs(out - ref)))

    print("KERNEL_OK")
</pallas_src>

<mosaic_0001>
module attributes {stable_mosaic.version = 11 : i64} {
  func.func @_uptrans_kernel(%arg0: i32, %arg1: memref<1x16x128xf32, #tpu.memory_space<vmem>>, %arg2: memref<32x16xf32, #tpu.memory_space<vmem>>, %arg3: memref<32x32xf32, #tpu.memory_space<vmem>>, %arg4: memref<32x32xf32, #tpu.memory_space<vmem>>, %arg5: memref<32x32xf32, #tpu.memory_space<vmem>>, %arg6: memref<32x32xf32, #tpu.memory_space<vmem>>, %arg7: memref<2x1x128xf32, #tpu.memory_space<vmem>>, %arg8: memref<2x1x128xf32, #tpu.memory_space<vmem>>, %arg9: memref<2x128x576xf32, #tpu.memory_space<vmem>>, %arg10: memref<2x192x128xf32, #tpu.memory_space<vmem>>, %arg11: memref<2x1x128xf32, #tpu.memory_space<vmem>>, %arg12: memref<2x1x128xf32, #tpu.memory_space<vmem>>, %arg13: memref<2x128x341xf32, #tpu.memory_space<vmem>>, %arg14: memref<2x128x341xf32, #tpu.memory_space<vmem>>, %arg15: memref<2x341x128xf32, #tpu.memory_space<vmem>>, %arg16: memref<1x32x128xf32, #tpu.memory_space<vmem>>) attributes {dimension_semantics = [#tpu.dimension_semantics<parallel>], iteration_bounds = array<i64: 2>, scalar_prefetch = 0 : i64, scratch_operands = 0 : i64, tpu.core_type = #tpu.core_type<tc>, window_params = [{transform_indices = @transform_0, window_bounds = array<i64: 1, 16, 128>}, {pipeline_mode = #tpu.pipeline_mode<synchronous>, transform_indices = @transform_1, window_bounds = array<i64: 32, 16>}, {pipeline_mode = #tpu.pipeline_mode<synchronous>, transform_indices = @transform_2, window_bounds = array<i64: 32, 32>}, {pipeline_mode = #tpu.pipeline_mode<synchronous>, transform_indices = @transform_3, window_bounds = array<i64: 32, 32>}, {pipeline_mode = #tpu.pipeline_mode<synchronous>, transform_indices = @transform_4, window_bounds = array<i64: 32, 32>}, {pipeline_mode = #tpu.pipeline_mode<synchronous>, transform_indices = @transform_5, window_bounds = array<i64: 32, 32>}, {pipeline_mode = #tpu.pipeline_mode<synchronous>, transform_indices = @transform_6, window_bounds = array<i64: 2, 1, 128>}, {pipeline_mode = #tpu.pipeline_mode<synchronous>, transform_indices = @transform_7, window_bounds = array<i64: 2, 1, 128>}, {pipeline_mode = #tpu.pipeline_mode<synchronous>, transform_indices = @transform_8, window_bounds = array<i64: 2, 128, 576>}, {pipeline_mode = #tpu.pipeline_mode<synchronous>, transform_indices = @transform_9, window_bounds = array<i64: 2, 192, 128>}, {pipeline_mode = #tpu.pipeline_mode<synchronous>, transform_indices = @transform_10, window_bounds = array<i64: 2, 1, 128>}, {pipeline_mode = #tpu.pipeline_mode<synchronous>, transform_indices = @transform_11, window_bounds = array<i64: 2, 1, 128>}, {pipeline_mode = #tpu.pipeline_mode<synchronous>, transform_indices = @transform_12, window_bounds = array<i64: 2, 128, 341>}, {pipeline_mode = #tpu.pipeline_mode<synchronous>, transform_indices = @transform_13, window_bounds = array<i64: 2, 128, 341>}, {pipeline_mode = #tpu.pipeline_mode<synchronous>, transform_indices = @transform_14, window_bounds = array<i64: 2, 341, 128>}, {transform_indices = @transform_15, window_bounds = array<i64: 1, 32, 128>}]} {
    %c0 = arith.constant 0 : index
    %c0_0 = arith.constant 0 : index
    %0 = vector.load %arg2[%c0, %c0_0] : memref<32x16xf32, #tpu.memory_space<vmem>>, vector<32x16xf32>
    %c0_1 = arith.constant 0 : index
    %c0_2 = arith.constant 0 : index
    %c0_3 = arith.constant 0 : index
    %1 = vector.load %arg1[%c0_1, %c0_2, %c0_3] : memref<1x16x128xf32, #tpu.memory_space<vmem>>, vector<1x16x128xf32>
    %2 = vector.shape_cast %1 : vector<1x16x128xf32> to vector<16x128xf32>
    %cst = arith.constant dense<0.000000e+00> : vector<32x128xf32>
    %3 = tpu.matmul %0, %2, %cst {dimension_numbers = #tpu.dot_dimension_numbers<[1], [0], [0], [1], [0, 0, 1, 1], [], []>} : vector<32x16xf32>, vector<16x128xf32>, vector<32x128xf32> -> vector<32x128xf32>
    %c0_4 = arith.constant 0 : index
    %c0_5 = arith.constant 0 : index
    %4 = vector.load %arg3[%c0_4, %c0_5] : memref<32x32xf32, #tpu.memory_space<vmem>>, vector<32x32xf32>
    %c0_6 = arith.constant 0 : index
    %c0_7 = arith.constant 0 : index
    %5 = vector.load %arg4[%c0_6, %c0_7] : memref<32x32xf32, #tpu.memory_space<vmem>>, vector<32x32xf32>
    %c0_8 = arith.constant 0 : index
    %c0_9 = arith.constant 0 : index
    %6 = vector.load %arg5[%c0_8, %c0_9] : memref<32x32xf32, #tpu.memory_space<vmem>>, vector<32x32xf32>
    %c0_10 = arith.constant 0 : index
    %c0_11 = arith.constant 0 : index
    %7 = vector.load %arg6[%c0_10, %c0_11] : memref<32x32xf32, #tpu.memory_space<vmem>>, vector<32x32xf32>
    %c0_12 = arith.constant 0 : index
    %c0_13 = arith.constant 0 : index
    %c0_14 = arith.constant 0 : index
    %8 = vector.load %arg7[%c0_12, %c0_13, %c0_14] : memref<2x1x128xf32, #tpu.memory_space<vmem>>, vector<1x1x128xf32>
    %9 = vector.shape_cast %8 : vector<1x1x128xf32> to vector<1x128xf32>
    %c0_15 = arith.constant 0 : index
    %c0_16 = arith.constant 0 : index
    %c0_17 = arith.constant 0 : index
    %10 = vector.load %arg8[%c0_15, %c0_16, %c0_17] : memref<2x1x128xf32, #tpu.memory_space<vmem>>, vector<1x1x128xf32>
    %11 = vector.shape_cast %10 : vector<1x1x128xf32> to vector<1x128xf32>
    %cst_18 = arith.constant dense<0.000000e+00> : vector<32xf32>
    %12 = vector.multi_reduction <add>, %3, %cst_18 [1] : vector<32x128xf32> to vector<32xf32>
    %13 = vector.shape_cast %12 : vector<32xf32> to vector<32x1xf32>
    %cst_19 = arith.constant 1.280000e+02 : f32
    %14 = vector.broadcast %cst_19 : f32 to vector<32x1xf32>
    %15 = arith.divf %13, %14 : vector<32x1xf32>
    %16 = vector.broadcast %15 : vector<32x1xf32> to vector<32x128xf32>
    %17 = arith.subf %3, %16 : vector<32x128xf32>
    %18 = arith.mulf %17, %17 : vector<32x128xf32>
    %cst_20 = arith.constant dense<0.000000e+00> : vector<32xf32>
    %19 = vector.multi_reduction <add>, %18, %cst_20 [1] : vector<32x128xf32> to vector<32xf32>
    %20 = vector.shape_cast %19 : vector<32xf32> to vector<32x1xf32>
    %cst_21 = arith.constant 1.280000e+02 : f32
    %21 = vector.broadcast %cst_21 : f32 to vector<32x1xf32>
    %22 = arith.divf %20, %21 : vector<32x1xf32>
    %23 = vector.broadcast %15 : vector<32x1xf32> to vector<32x128xf32>
    %24 = arith.subf %3, %23 : vector<32x128xf32>
    %cst_22 = arith.constant 9.99999974E-6 : f32
    %25 = vector.broadcast %cst_22 : f32 to vector<32x1xf32>
    %26 = arith.addf %22, %25 : vector<32x1xf32>
    %27 = math.rsqrt %26 : vector<32x1xf32>
    %28 = vector.broadcast %27 : vector<32x1xf32> to vector<32x128xf32>
    %29 = arith.mulf %24, %28 : vector<32x128xf32>
    %30 = vector.broadcast %9 : vector<1x128xf32> to vector<32x128xf32>
    %31 = arith.mulf %29, %30 : vector<32x128xf32>
    %32 = vector.broadcast %11 : vector<1x128xf32> to vector<32x128xf32>
    %33 = arith.addf %31, %32 : vector<32x128xf32>
    %c0_23 = arith.constant 0 : index
    %c0_24 = arith.constant 0 : index
    %c0_25 = arith.constant 0 : index
    %34 = vector.load %arg9[%c0_23, %c0_24, %c0_25] : memref<2x128x576xf32, #tpu.memory_space<vmem>>, vector<1x128x576xf32>
    %35 = vector.shape_cast %34 : vector<1x128x576xf32> to vector<128x576xf32>
    %cst_26 = arith.constant dense<0.000000e+00> : vector<32x576xf32>
    %36 = tpu.matmul %33, %35, %cst_26 {dimension_numbers = #tpu.dot_dimension_numbers<[1], [0], [0], [1], [0, 0, 1, 1], [], []>} : vector<32x128xf32>, vector<128x576xf32>, vector<32x576xf32> -> vector<32x576xf32>
    %37 = vector.extract_strided_slice %36 {offsets = [0, 0], sizes = [32, 32], strides = [1, 1]} : vector<32x576xf32> to vector<32x32xf32>
    %38 = arith.mulf %37, %4 : vector<32x32xf32>
    %cst_27 = arith.constant dense<0.000000e+00> : vector<32x32xf32>
    %39 = tpu.matmul %37, %6, %cst_27 {dimension_numbers = #tpu.dot_dimension_numbers<[1], [0], [0], [1], [0, 0, 1, 1], [], []>} : vector<32x32xf32>, vector<32x32xf32>, vector<32x32xf32> -> vector<32x32xf32>
    %40 = arith.mulf %39, %5 : vector<32x32xf32>
    %41 = arith.addf %38, %40 : vector<32x32xf32>
    %42 = vector.extract_strided_slice %36 {offsets = [0, 192], sizes = [32, 32], strides = [1, 1]} : vector<32x576xf32> to vector<32x32xf32>
    %43 = arith.mulf %42, %4 : vector<32x32xf32>
    %cst_28 = arith.constant dense<0.000000e+00> : vector<32x32xf32>
    %44 = tpu.matmul %42, %6, %cst_28 {dimension_numbers = #tpu.dot_dimension_numbers<[1], [0], [0], [1], [0, 0, 1, 1], [], []>} : vector<32x32xf32>, vector<32x32xf32>, vector<32x32xf32> -> vector<32x32xf32>
    %45 = arith.mulf %44, %5 : vector<32x32xf32>
    %46 = arith.addf %43, %45 : vector<32x32xf32>
    %cst_29 = arith.constant dense<0.000000e+00> : vector<32x32xf32>
    %47 = tpu.matmul %41, %46, %cst_29 {dimension_numbers = #tpu.dot_dimension_numbers<[1], [1], [0], [0], [0, 0, 1, 0], [], []>} : vector<32x32xf32>, vector<32x32xf32>, vector<32x32xf32> -> vector<32x32xf32>
    %48 = vector.extract_strided_slice %36 {offsets = [0, 32], sizes = [32, 32], strides = [1, 1]} : vector<32x576xf32> to vector<32x32xf32>
    %49 = arith.mulf %48, %4 : vector<32x32xf32>
    %cst_30 = arith.constant dense<0.000000e+00> : vector<32x32xf32>
    %50 = tpu.matmul %48, %6, %cst_30 {dimension_numbers = #tpu.dot_dimension_numbers<[1], [0], [0], [1], [0, 0, 1, 1], [], []>} : vector<32x32xf32>, vector<32x32xf32>, vector<32x32xf32> -> vector<32x32xf32>
    %51 = arith.mulf %50, %5 : vector<32x32xf32>
    %52 = arith.addf %49, %51 : vector<32x32xf32>
    %53 = vector.extract_strided_slice %36 {offsets = [0, 224], sizes = [32, 32], strides = [1, 1]} : vector<32x576xf32> to vector<32x32xf32>
    %54 = arith.mulf %53, %4 : vector<32x32xf32>
    %cst_31 = arith.constant dense<0.000000e+00> : vector<32x32xf32>
    %55 = tpu.matmul %53, %6, %cst_31 {dimension_numbers = #tpu.dot_dimension_numbers<[1], [0], [0], [1], [0, 0, 1, 1], [], []>} : vector<32x32xf32>, vector<32x32xf32>, vector<32x32xf32> -> vector<32x32xf32>
    %56 = arith.mulf %55, %5 : vector<32x32xf32>
    %57 = arith.addf %54, %56 : vector<32x32xf32>
    %cst_32 = arith.constant dense<0.000000e+00> : vector<32x32xf32>
    %58 = tpu.matmul %52, %57, %cst_32 {dimension_numbers = #tpu.dot_dimension_numbers<[1], [1], [0], [0], [0, 0, 1, 0], [], []>} : vector<32x32xf32>, vector<32x32xf32>, vector<32x32xf32> -> vector<32x32xf32>
    %59 = vector.extract_strided_slice %36 {offsets = [0, 64], sizes = [32, 32], strides = [1, 1]} : vector<32x576xf32> to vector<32x32xf32>
    %60 = arith.mulf %59, %4 : vector<32x32xf32>
    %cst_33 = arith.constant dense<0.000000e+00> : vector<32x32xf32>
    %61 = tpu.matmul %59, %6, %cst_33 {dimension_numbers = #tpu.dot_dimension_numbers<[1], [0], [0], [1], [0, 0, 1, 1], [], []>} : vector<32x32xf32>, vector<32x32xf32>, vector<32x32xf32> -> vector<32x32xf32>
    %62 = arith.mulf %61, %5 : vector<32x32xf32>
    %63 = arith.addf %60, %62 : vector<32x32xf32>
    %64 = vector.extract_strided_slice %36 {offsets = [0, 256], sizes = [32, 32], strides = [1, 1]} : vector<32x576xf32> to vector<32x32xf32>
    %65 = arith.mulf %64, %4 : vector<32x32xf32>
    %cst_34 = arith.constant dense<0.000000e+00> : vector<32x32xf32>
    %66 = tpu.matmul %64, %6, %cst_34 {dimension_numbers = #tpu.dot_dimension_numbers<[1], [0], [0], [1], [0, 0, 1, 1], [], []>} : vector<32x32xf32>, vector<32x32xf32>, vector<32x32xf32> -> vector<32x32xf32>
    %67 = arith.mulf %66, %5 : vector<32x32xf32>
    %68 = arith.addf %65, %67 : vector<32x32xf32>
    %cst_35 = arith.constant dense<0.000000e+00> : vector<32x32xf32>
    %69 = tpu.matmul %63, %68, %cst_35 {dimension_numbers = #tpu.dot_dimension_numbers<[1], [1], [0], [0], [0, 0, 1, 0], [], []>} : vector<32x32xf32>, vector<32x32xf32>, vector<32x32xf32> -> vector<32x32xf32>
    %70 = vector.extract_strided_slice %36 {offsets = [0, 96], sizes = [32, 32], strides = [1, 1]} : vector<32x576xf32> to vector<32x32xf32>
    %71 = arith.mulf %70, %4 : vector<32x32xf32>
    %cst_36 = arith.constant dense<0.000000e+00> : vector<32x32xf32>
    %72 = tpu.matmul %70, %6, %cst_36 {dimension_numbers = #tpu.dot_dimension_numbers<[1], [0], [0], [1], [0, 0, 1, 1], [], []>} : vector<32x32xf32>, vector<32x32xf32>, vector<32x32xf32> -> vector<32x32xf32>
    %73 = arith.mulf %72, %5 : vector<32x32xf32>
    %74 = arith.addf %71, %73 : vector<32x32xf32>
    %75 = vector.extract_strided_slice %36 {offsets = [0, 288], sizes = [32, 32], strides = [1, 1]} : vector<32x576xf32> to vector<32x32xf32>
    %76 = arith.mulf %75, %4 : vector<32x32xf32>
    %cst_37 = arith.constant dense<0.000000e+00> : vector<32x32xf32>
    %77 = tpu.matmul %75, %6, %cst_37 {dimension_numbers = #tpu.dot_dimension_numbers<[1], [0], [0], [1], [0, 0, 1, 1], [], []>} : vector<32x32xf32>, vector<32x32xf32>, vector<32x32xf32> -> vector<32x32xf32>
    %78 = arith.mulf %77, %5 : vector<32x32xf32>
    %79 = arith.addf %76, %78 : vector<32x32xf32>
    %cst_38 = arith.constant dense<0.000000e+00> : vector<32x32xf32>
    %80 = tpu.matmul %74, %79, %cst_38 {dimension_numbers = #tpu.dot_dimension_numbers<[1], [1], [0], [0], [0, 0, 1, 0], [], []>} : vector<32x32xf32>, vector<32x32xf32>, vector<32x32xf32> -> vector<32x32xf32>
    %81 = vector.extract_strided_slice %36 {offsets = [0, 128], sizes = [32, 32], strides = [1, 1]} : vector<32x576xf32> to vector<32x32xf32>
    %82 = arith.mulf %81, %4 : vector<32x32xf32>
    %cst_39 = arith.constant dense<0.000000e+00> : vector<32x32xf32>
    %83 = tpu.matmul %81, %6, %cst_39 {dimension_numbers = #tpu.dot_dimension_numbers<[1], [0], [0], [1], [0, 0, 1, 1], [], []>} : vector<32x32xf32>, vector<32x32xf32>, vector<32x32xf32> -> vector<32x32xf32>
    %84 = arith.mulf %83, %5 : vector<32x32xf32>
    %85 = arith.addf %82, %84 : vector<32x32xf32>
    %86 = vector.extract_strided_slice %36 {offsets = [0, 320], sizes = [32, 32], strides = [1, 1]} : vector<32x576xf32> to vector<32x32xf32>
    %87 = arith.mulf %86, %4 : vector<32x32xf32>
    %cst_40 = arith.constant dense<0.000000e+00> : vector<32x32xf32>
    %88 = tpu.matmul %86, %6, %cst_40 {dimension_numbers = #tpu.dot_dimension_numbers<[1], [0], [0], [1], [0, 0, 1, 1], [], []>} : vector<32x32xf32>, vector<32x32xf32>, vector<32x32xf32> -> vector<32x32xf32>
    %89 = arith.mulf %88, %5 : vector<32x32xf32>
    %90 = arith.addf %87, %89 : vector<32x32xf32>
    %cst_41 = arith.constant dense<0.000000e+00> : vector<32x32xf32>
    %91 = tpu.matmul %85, %90, %cst_41 {dimension_numbers = #tpu.dot_dimension_numbers<[1], [1], [0], [0], [0, 0, 1, 0], [], []>} : vector<32x32xf32>, vector<32x32xf32>, vector<32x32xf32> -> vector<32x32xf32>
    %92 = vector.extract_strided_slice %36 {offsets = [0, 160], sizes = [32, 32], strides = [1, 1]} : vector<32x576xf32> to vector<32x32xf32>
    %93 = arith.mulf %92, %4 : vector<32x32xf32>
    %cst_42 = arith.constant dense<0.000000e+00> : vector<32x32xf32>
    %94 = tpu.matmul %92, %6, %cst_42 {dimension_numbers = #tpu.dot_dimension_numbers<[1], [0], [0], [1], [0, 0, 1, 1], [], []>} : vector<32x32xf32>, vector<32x32xf32>, vector<32x32xf32> -> vector<32x32xf32>
    %95 = arith.mulf %94, %5 : vector<32x32xf32>
    %96 = arith.addf %93, %95 : vector<32x32xf32>
    %97 = vector.extract_strided_slice %36 {offsets = [0, 352], sizes = [32, 32], strides = [1, 1]} : vector<32x576xf32> to vector<32x32xf32>
    %98 = arith.mulf %97, %4 : vector<32x32xf32>
    %cst_43 = arith.constant dense<0.000000e+00> : vector<32x32xf32>
    %99 = tpu.matmul %97, %6, %cst_43 {dimension_numbers = #tpu.dot_dimension_numbers<[1], [0], [0], [1], [0, 0, 1, 1], [], []>} : vector<32x32xf32>, vector<32x32xf32>, vector<32x32xf32> -> vector<32x32xf32>
    %100 = arith.mulf %99, %5 : vector<32x32xf32>
    %101 = arith.addf %98, %100 : vector<32x32xf32>
    %cst_44 = arith.constant dense<0.000000e+00> : vector<32x32xf32>
    %102 = tpu.matmul %96, %101, %cst_44 {dimension_numbers = #tpu.dot_dimension_numbers<[1], [1], [0], [0], [0, 0, 1, 0], [], []>} : vector<32x32xf32>, vector<32x32xf32>, vector<32x32xf32> -> vector<32x32xf32>
    %103 = vector.shape_cast %47 : vector<32x32xf32> to vector<1x32x32xf32>
    %104 = vector.shape_cast %58 : vector<32x32xf32> to vector<1x32x32xf32>
    %105 = vector.shape_cast %69 : vector<32x32xf32> to vector<1x32x32xf32>
    %106 = vector.shape_cast %80 : vector<32x32xf32> to vector<1x32x32xf32>
    %107 = vector.shape_cast %91 : vector<32x32xf32> to vector<1x32x32xf32>
    %108 = vector.shape_cast %102 : vector<32x32xf32> to vector<1x32x32xf32>
    %109 = tpu.concatenate %103, %104, %105, %106, %107, %108 in 0 : vector<1x32x32xf32>, vector<1x32x32xf32>, vector<1x32x32xf32>, vector<1x32x32xf32>, vector<1x32x32xf32>, vector<1x32x32xf32> -> vector<6x32x32xf32>
    %110 = vector.shape_cast %7 : vector<32x32xf32> to vector<1x32x32xf32>
    %111 = vector.broadcast %110 : vector<1x32x32xf32> to vector<6x32x32xf32>
    %112 = arith.addf %109, %111 : vector<6x32x32xf32>
    %cst_45 = arith.constant dense<0xFF800000> : vector<6x32xf32>
    %113 = vector.multi_reduction <maximumf>, %112, %cst_45 [2] : vector<6x32x32xf32> to vector<6x32xf32>
    %114 = vector.shape_cast %113 : vector<6x32xf32> to vector<6x32x1xf32>
    %115 = vector.broadcast %114 : vector<6x32x1xf32> to vector<6x32x32xf32>
    %116 = arith.subf %112, %115 : vector<6x32x32xf32>
    %117 = math.exp %116 : vector<6x32x32xf32>
    %cst_46 = arith.constant dense<0.000000e+00> : vector<6x32xf32>
    %118 = vector.multi_reduction <add>, %117, %cst_46 [2] : vector<6x32x32xf32> to vector<6x32xf32>
    %119 = vector.shape_cast %118 : vector<6x32xf32> to vector<6x32x1xf32>
    %120 = tpu.reciprocal %119 {approx = true} : vector<6x32x1xf32> -> vector<6x32x1xf32>
    %121 = vector.broadcast %120 : vector<6x32x1xf32> to vector<6x32x32xf32>
    %122 = arith.mulf %117, %121 : vector<6x32x32xf32>
    %123 = vector.extract_strided_slice %122 {offsets = [0, 0, 0], sizes = [1, 32, 32], strides = [1, 1, 1]} : vector<6x32x32xf32> to vector<1x32x32xf32>
    %124 = vector.shape_cast %123 : vector<1x32x32xf32> to vector<32x32xf32>
    %125 = vector.extract_strided_slice %36 {offsets = [0, 384], sizes = [32, 32], strides = [1, 1]} : vector<32x576xf32> to vector<32x32xf32>
    %cst_47 = arith.constant dense<0.000000e+00> : vector<32x32xf32>
    %126 = tpu.matmul %124, %125, %cst_47 {dimension_numbers = #tpu.dot_dimension_numbers<[1], [0], [0], [1], [0, 0, 1, 1], [], []>} : vector<32x32xf32>, vector<32x32xf32>, vector<32x32xf32> -> vector<32x32xf32>
    %127 = vector.extract_strided_slice %122 {offsets = [1, 0, 0], sizes = [1, 32, 32], strides = [1, 1, 1]} : vector<6x32x32xf32> to vector<1x32x32xf32>
    %128 = vector.shape_cast %127 : vector<1x32x32xf32> to vector<32x32xf32>
    %129 = vector.extract_strided_slice %36 {offsets = [0, 416], sizes = [32, 32], strides = [1, 1]} : vector<32x576xf32> to vector<32x32xf32>
    %cst_48 = arith.constant dense<0.000000e+00> : vector<32x32xf32>
    %130 = tpu.matmul %128, %129, %cst_48 {dimension_numbers = #tpu.dot_dimension_numbers<[1], [0], [0], [1], [0, 0, 1, 1], [], []>} : vector<32x32xf32>, vector<32x32xf32>, vector<32x32xf32> -> vector<32x32xf32>
    %131 = vector.extract_strided_slice %122 {offsets = [2, 0, 0], sizes = [1, 32, 32], strides = [1, 1, 1]} : vector<6x32x32xf32> to vector<1x32x32xf32>
    %132 = vector.shape_cast %131 : vector<1x32x32xf32> to vector<32x32xf32>
    %133 = vector.extract_strided_slice %36 {offsets = [0, 448], sizes = [32, 32], strides = [1, 1]} : vector<32x576xf32> to vector<32x32xf32>
    %cst_49 = arith.constant dense<0.000000e+00> : vector<32x32xf32>
    %134 = tpu.matmul %132, %133, %cst_49 {dimension_numbers = #tpu.dot_dimension_numbers<[1], [0], [0], [1], [0, 0, 1, 1], [], []>} : vector<32x32xf32>, vector<32x32xf32>, vector<32x32xf32> -> vector<32x32xf32>
    %135 = vector.extract_strided_slice %122 {offsets = [3, 0, 0], sizes = [1, 32, 32], strides = [1, 1, 1]} : vector<6x32x32xf32> to vector<1x32x32xf32>
    %136 = vector.shape_cast %135 : vector<1x32x32xf32> to vector<32x32xf32>
    %137 = vector.extract_strided_slice %36 {offsets = [0, 480], sizes = [32, 32], strides = [1, 1]} : vector<32x576xf32> to vector<32x32xf32>
    %cst_50 = arith.constant dense<0.000000e+00> : vector<32x32xf32>
    %138 = tpu.matmul %136, %137, %cst_50 {dimension_numbers = #tpu.dot_dimension_numbers<[1], [0], [0], [1], [0, 0, 1, 1], [], []>} : vector<32x32xf32>, vector<32x32xf32>, vector<32x32xf32> -> vector<32x32xf32>
    %139 = vector.extract_strided_slice %122 {offsets = [4, 0, 0], sizes = [1, 32, 32], strides = [1, 1, 1]} : vector<6x32x32xf32> to vector<1x32x32xf32>
    %140 = vector.shape_cast %139 : vector<1x32x32xf32> to vector<32x32xf32>
    %141 = vector.extract_strided_slice %36 {offsets = [0, 512], sizes = [32, 32], strides = [1, 1]} : vector<32x576xf32> to vector<32x32xf32>
    %cst_51 = arith.constant dense<0.000000e+00> : vector<32x32xf32>
    %142 = tpu.matmul %140, %141, %cst_51 {dimension_numbers = #tpu.dot_dimension_numbers<[1], [0], [0], [1], [0, 0, 1, 1], [], []>} : vector<32x32xf32>, vector<32x32xf32>, vector<32x32xf32> -> vector<32x32xf32>
    %143 = vector.extract_strided_slice %122 {offsets = [5, 0, 0], sizes = [1, 32, 32], strides = [1, 1, 1]} : vector<6x32x32xf32> to vector<1x32x32xf32>
    %144 = vector.shape_cast %143 : vector<1x32x32xf32> to vector<32x32xf32>
    %145 = vector.extract_strided_slice %36 {offsets = [0, 544], sizes = [32, 32], strides = [1, 1]} : vector<32x576xf32> to vector<32x32xf32>
    %cst_52 = arith.constant dense<0.000000e+00> : vector<32x32xf32>
    %146 = tpu.matmul %144, %145, %cst_52 {dimension_numbers = #tpu.dot_dimension_numbers<[1], [0], [0], [1], [0, 0, 1, 1], [], []>} : vector<32x32xf32>, vector<32x32xf32>, vector<32x32xf32> -> vector<32x32xf32>
    %147 = tpu.concatenate %126, %130, %134, %138, %142, %146 in 1 : vector<32x32xf32>, vector<32x32xf32>, vector<32x32xf32>, vector<32x32xf32>, vector<32x32xf32>, vector<32x32xf32> -> vector<32x192xf32>
    %c0_53 = arith.constant 0 : index
    %c0_54 = arith.constant 0 : index
    %c0_55 = arith.constant 0 : index
    %148 = vector.load %arg10[%c0_53, %c0_54, %c0_55] : memref<2x192x128xf32, #tpu.memory_space<vmem>>, vector<1x192x128xf32>
    %149 = vector.shape_cast %148 : vector<1x192x128xf32> to vector<192x128xf32>
    %cst_56 = arith.constant dense<0.000000e+00> : vector<32x128xf32>
    %150 = tpu.matmul %147, %149, %cst_56 {dimension_numbers = #tpu.dot_dimension_numbers<[1], [0], [0], [1], [0, 0, 1, 1], [], []>} : vector<32x192xf32>, vector<192x128xf32>, vector<32x128xf32> -> vector<32x128xf32>
    %151 = arith.addf %3, %150 : vector<32x128xf32>
    %c0_57 = arith.constant 0 : index
    %c0_58 = arith.constant 0 : index
    %c0_59 = arith.constant 0 : index
    %152 = vector.load %arg11[%c0_57, %c0_58, %c0_59] : memref<2x1x128xf32, #tpu.memory_space<vmem>>, vector<1x1x128xf32>
    %153 = vector.shape_cast %152 : vector<1x1x128xf32> to vector<1x128xf32>
    %c0_60 = arith.constant 0 : index
    %c0_61 = arith.constant 0 : index
    %c0_62 = arith.constant 0 : index
    %154 = vector.load %arg12[%c0_60, %c0_61, %c0_62] : memref<2x1x128xf32, #tpu.memory_space<vmem>>, vector<1x1x128xf32>
    %155 = vector.shape_cast %154 : vector<1x1x128xf32> to vector<1x128xf32>
    %cst_63 = arith.constant dense<0.000000e+00> : vector<32xf32>
    %156 = vector.multi_reduction <add>, %151, %cst_63 [1] : vector<32x128xf32> to vector<32xf32>
    %157 = vector.shape_cast %156 : vector<32xf32> to vector<32x1xf32>
    %cst_64 = arith.constant 1.280000e+02 : f32
    %158 = vector.broadcast %cst_64 : f32 to vector<32x1xf32>
    %159 = arith.divf %157, %158 : vector<32x1xf32>
    %160 = vector.broadcast %159 : vector<32x1xf32> to vector<32x128xf32>
    %161 = arith.subf %151, %160 : vector<32x128xf32>
    %162 = arith.mulf %161, %161 : vector<32x128xf32>
    %cst_65 = arith.constant dense<0.000000e+00> : vector<32xf32>
    %163 = vector.multi_reduction <add>, %162, %cst_65 [1] : vector<32x128xf32> to vector<32xf32>
    %164 = vector.shape_cast %163 : vector<32xf32> to vector<32x1xf32>
    %cst_66 = arith.constant 1.280000e+02 : f32
    %165 = vector.broadcast %cst_66 : f32 to vector<32x1xf32>
    %166 = arith.divf %164, %165 : vector<32x1xf32>
    %167 = vector.broadcast %159 : vector<32x1xf32> to vector<32x128xf32>
    %168 = arith.subf %151, %167 : vector<32x128xf32>
    %cst_67 = arith.constant 9.99999974E-6 : f32
    %169 = vector.broadcast %cst_67 : f32 to vector<32x1xf32>
    %170 = arith.addf %166, %169 : vector<32x1xf32>
    %171 = math.rsqrt %170 : vector<32x1xf32>
    %172 = vector.broadcast %171 : vector<32x1xf32> to vector<32x128xf32>
    %173 = arith.mulf %168, %172 : vector<32x128xf32>
    %174 = vector.broadcast %153 : vector<1x128xf32> to vector<32x128xf32>
    %175 = arith.mulf %173, %174 : vector<32x128xf32>
    %176 = vector.broadcast %155 : vector<1x128xf32> to vector<32x128xf32>
    %177 = arith.addf %175, %176 : vector<32x128xf32>
    %c0_68 = arith.constant 0 : index
    %c0_69 = arith.constant 0 : index
    %c0_70 = arith.constant 0 : index
    %178 = vector.load %arg13[%c0_68, %c0_69, %c0_70] : memref<2x128x341xf32, #tpu.memory_space<vmem>>, vector<1x128x341xf32>
    %179 = vector.shape_cast %178 : vector<1x128x341xf32> to vector<128x341xf32>
    %cst_71 = arith.constant dense<0.000000e+00> : vector<32x341xf32>
    %180 = tpu.matmul %177, %179, %cst_71 {dimension_numbers = #tpu.dot_dimension_numbers<[1], [0], [0], [1], [0, 0, 1, 1], [], []>} : vector<32x128xf32>, vector<128x341xf32>, vector<32x341xf32> -> vector<32x341xf32>
    %c0_72 = arith.constant 0 : index
    %c0_73 = arith.constant 0 : index
    %c0_74 = arith.constant 0 : index
    %181 = vector.load %arg14[%c0_72, %c0_73, %c0_74] : memref<2x128x341xf32, #tpu.memory_space<vmem>>, vector<1x128x341xf32>
    %182 = vector.shape_cast %181 : vector<1x128x341xf32> to vector<128x341xf32>
    %cst_75 = arith.constant dense<0.000000e+00> : vector<32x341xf32>
    %183 = tpu.matmul %177, %182, %cst_75 {dimension_numbers = #tpu.dot_dimension_numbers<[1], [0], [0], [1], [0, 0, 1, 1], [], []>} : vector<32x128xf32>, vector<128x341xf32>, vector<32x341xf32> -> vector<32x341xf32>
    %cst_76 = arith.constant 5.000000e-01 : f32
    %184 = vector.broadcast %cst_76 : f32 to vector<32x341xf32>
    %185 = arith.mulf %184, %183 : vector<32x341xf32>
    %cst_77 = arith.constant 0.707106769 : f32
    %186 = vector.broadcast %cst_77 : f32 to vector<32x341xf32>
    %187 = arith.mulf %183, %186 : vector<32x341xf32>
    %cst_78 = arith.constant 0.000000e+00 : f32
    %188 = vector.broadcast %cst_78 : f32 to vector<32x341xf32>
    %189 = arith.cmpf oge, %187, %188 : vector<32x341xf32>
    %cst_79 = arith.constant 1.000000e+00 : f32
    %cst_80 = arith.constant -1.000000e+00 : f32
    %190 = vector.broadcast %cst_79 : f32 to vector<32x341xf32>
    %191 = vector.broadcast %cst_80 : f32 to vector<32x341xf32>
    %192 = arith.select %189, %190, %191 : vector<32x341xi1>, vector<32x341xf32>
    %193 = math.absf %187 : vector<32x341xf32>
    %cst_81 = arith.constant 0.327591091 : f32
    %194 = vector.broadcast %cst_81 : f32 to vector<32x341xf32>
    %195 = arith.mulf %194, %193 : vector<32x341xf32>
    %cst_82 = arith.constant 1.000000e+00 : f32
    %196 = vector.broadcast %cst_82 : f32 to vector<32x341xf32>
    %197 = arith.addf %196, %195 : vector<32x341xf32>
    %cst_83 = arith.constant 1.000000e+00 : f32
    %198 = vector.broadcast %cst_83 : f32 to vector<32x341xf32>
    %199 = arith.divf %198, %197 : vector<32x341xf32>
    %cst_84 = arith.constant 1.06140542 : f32
    %200 = vector.broadcast %cst_84 : f32 to vector<32x341xf32>
    %201 = arith.mulf %200, %199 : vector<32x341xf32>
    %cst_85 = arith.constant -1.45315206 : f32
    %202 = vector.broadcast %cst_85 : f32 to vector<32x341xf32>
    %203 = arith.addf %201, %202 : vector<32x341xf32>
    %204 = arith.mulf %203, %199 : vector<32x341xf32>
    %cst_86 = arith.constant 1.42141378 : f32
    %205 = vector.broadcast %cst_86 : f32 to vector<32x341xf32>
    %206 = arith.addf %204, %205 : vector<32x341xf32>
    %207 = arith.mulf %206, %199 : vector<32x341xf32>
    %cst_87 = arith.constant -0.284496725 : f32
    %208 = vector.broadcast %cst_87 : f32 to vector<32x341xf32>
    %209 = arith.addf %207, %208 : vector<32x341xf32>
    %210 = arith.mulf %209, %199 : vector<32x341xf32>
    %cst_88 = arith.constant 0.254829586 : f32
    %211 = vector.broadcast %cst_88 : f32 to vector<32x341xf32>
    %212 = arith.addf %210, %211 : vector<32x341xf32>
    %213 = arith.mulf %212, %199 : vector<32x341xf32>
    %cst_89 = arith.constant 0.000000e+00 : f32
    %214 = vector.broadcast %cst_89 : f32 to vector<32x341xf32>
    %215 = arith.subf %214, %193 : vector<32x341xf32>
    %216 = arith.mulf %215, %193 : vector<32x341xf32>
    %217 = math.exp %216 : vector<32x341xf32>
    %218 = arith.mulf %213, %217 : vector<32x341xf32>
    %cst_90 = arith.constant 1.000000e+00 : f32
    %219 = vector.broadcast %cst_90 : f32 to vector<32x341xf32>
    %220 = arith.subf %219, %218 : vector<32x341xf32>
    %221 = arith.mulf %192, %220 : vector<32x341xf32>
    %cst_91 = arith.constant 1.000000e+00 : f32
    %222 = vector.broadcast %cst_91 : f32 to vector<32x341xf32>
    %223 = arith.addf %222, %221 : vector<32x341xf32>
    %224 = arith.mulf %185, %223 : vector<32x341xf32>
    %225 = arith.mulf %180, %224 : vector<32x341xf32>
    %c0_92 = arith.constant 0 : index
    %c0_93 = arith.constant 0 : index
    %c0_94 = arith.constant 0 : index
    %226 = vector.load %arg15[%c0_92, %c0_93, %c0_94] : memref<2x341x128xf32, #tpu.memory_space<vmem>>, vector<1x341x128xf32>
    %227 = vector.shape_cast %226 : vector<1x341x128xf32> to vector<341x128xf32>
    %cst_95 = arith.constant dense<0.000000e+00> : vector<32x128xf32>
    %228 = tpu.matmul %225, %227, %cst_95 {dimension_numbers = #tpu.dot_dimension_numbers<[1], [0], [0], [1], [0, 0, 1, 1], [], []>} : vector<32x341xf32>, vector<341x128xf32>, vector<32x128xf32> -> vector<32x128xf32>
    %229 = arith.addf %151, %228 : vector<32x128xf32>
    %c1 = arith.constant 1 : index
    %c0_96 = arith.constant 0 : index
    %c0_97 = arith.constant 0 : index
    %230 = vector.load %arg7[%c1, %c0_96, %c0_97] : memref<2x1x128xf32, #tpu.memory_space<vmem>>, vector<1x1x128xf32>
    %231 = vector.shape_cast %230 : vector<1x1x128xf32> to vector<1x128xf32>
    %c1_98 = arith.constant 1 : index
    %c0_99 = arith.constant 0 : index
    %c0_100 = arith.constant 0 : index
    %232 = vector.load %arg8[%c1_98, %c0_99, %c0_100] : memref<2x1x128xf32, #tpu.memory_space<vmem>>, vector<1x1x128xf32>
    %233 = vector.shape_cast %232 : vector<1x1x128xf32> to vector<1x128xf32>
    %cst_101 = arith.constant dense<0.000000e+00> : vector<32xf32>
    %234 = vector.multi_reduction <add>, %229, %cst_101 [1] : vector<32x128xf32> to vector<32xf32>
    %235 = vector.shape_cast %234 : vector<32xf32> to vector<32x1xf32>
    %cst_102 = arith.constant 1.280000e+02 : f32
    %236 = vector.broadcast %cst_102 : f32 to vector<32x1xf32>
    %237 = arith.divf %235, %236 : vector<32x1xf32>
    %238 = vector.broadcast %237 : vector<32x1xf32> to vector<32x128xf32>
    %239 = arith.subf %229, %238 : vector<32x128xf32>
    %240 = arith.mulf %239, %239 : vector<32x128xf32>
    %cst_103 = arith.constant dense<0.000000e+00> : vector<32xf32>
    %241 = vector.multi_reduction <add>, %240, %cst_103 [1] : vector<32x128xf32> to vector<32xf32>
    %242 = vector.shape_cast %241 : vector<32xf32> to vector<32x1xf32>
    %cst_104 = arith.constant 1.280000e+02 : f32
    %243 = vector.broadcast %cst_104 : f32 to vector<32x1xf32>
    %244 = arith.divf %242, %243 : vector<32x1xf32>
    %245 = vector.broadcast %237 : vector<32x1xf32> to vector<32x128xf32>
    %246 = arith.subf %229, %245 : vector<32x128xf32>
    %cst_105 = arith.constant 9.99999974E-6 : f32
    %247 = vector.broadcast %cst_105 : f32 to vector<32x1xf32>
    %248 = arith.addf %244, %247 : vector<32x1xf32>
    %249 = math.rsqrt %248 : vector<32x1xf32>
    %250 = vector.broadcast %249 : vector<32x1xf32> to vector<32x128xf32>
    %251 = arith.mulf %246, %250 : vector<32x128xf32>
    %252 = vector.broadcast %231 : vector<1x128xf32> to vector<32x128xf32>
    %253 = arith.mulf %251, %252 : vector<32x128xf32>
    %254 = vector.broadcast %233 : vector<1x128xf32> to vector<32x128xf32>
    %255 = arith.addf %253, %254 : vector<32x128xf32>
    %c1_106 = arith.constant 1 : index
    %c0_107 = arith.constant 0 : index
    %c0_108 = arith.constant 0 : index
    %256 = vector.load %arg9[%c1_106, %c0_107, %c0_108] : memref<2x128x576xf32, #tpu.memory_space<vmem>>, vector<1x128x576xf32>
    %257 = vector.shape_cast %256 : vector<1x128x576xf32> to vector<128x576xf32>
    %cst_109 = arith.constant dense<0.000000e+00> : vector<32x576xf32>
    %258 = tpu.matmul %255, %257, %cst_109 {dimension_numbers = #tpu.dot_dimension_numbers<[1], [0], [0], [1], [0, 0, 1, 1], [], []>} : vector<32x128xf32>, vector<128x576xf32>, vector<32x576xf32> -> vector<32x576xf32>
    %259 = vector.extract_strided_slice %258 {offsets = [0, 0], sizes = [32, 32], strides = [1, 1]} : vector<32x576xf32> to vector<32x32xf32>
    %260 = arith.mulf %259, %4 : vector<32x32xf32>
    %cst_110 = arith.constant dense<0.000000e+00> : vector<32x32xf32>
    %261 = tpu.matmul %259, %6, %cst_110 {dimension_numbers = #tpu.dot_dimension_numbers<[1], [0], [0], [1], [0, 0, 1, 1], [], []>} : vector<32x32xf32>, vector<32x32xf32>, vector<32x32xf32> -> vector<32x32xf32>
    %262 = arith.mulf %261, %5 : vector<32x32xf32>
    %263 = arith.addf %260, %262 : vector<32x32xf32>
    %264 = vector.extract_strided_slice %258 {offsets = [0, 192], sizes = [32, 32], strides = [1, 1]} : vector<32x576xf32> to vector<32x32xf32>
    %265 = arith.mulf %264, %4 : vector<32x32xf32>
    %cst_111 = arith.constant dense<0.000000e+00> : vector<32x32xf32>
    %266 = tpu.matmul %264, %6, %cst_111 {dimension_numbers = #tpu.dot_dimension_numbers<[1], [0], [0], [1], [0, 0, 1, 1], [], []>} : vector<32x32xf32>, vector<32x32xf32>, vector<32x32xf32> -> vector<32x32xf32>
    %267 = arith.mulf %266, %5 : vector<32x32xf32>
    %268 = arith.addf %265, %267 : vector<32x32xf32>
    %cst_112 = arith.constant dense<0.000000e+00> : vector<32x32xf32>
    %269 = tpu.matmul %263, %268, %cst_112 {dimension_numbers = #tpu.dot_dimension_numbers<[1], [1], [0], [0], [0, 0, 1, 0], [], []>} : vector<32x32xf32>, vector<32x32xf32>, vector<32x32xf32> -> vector<32x32xf32>
    %270 = vector.extract_strided_slice %258 {offsets = [0, 32], sizes = [32, 32], strides = [1, 1]} : vector<32x576xf32> to vector<32x32xf32>
    %271 = arith.mulf %270, %4 : vector<32x32xf32>
    %cst_113 = arith.constant dense<0.000000e+00> : vector<32x32xf32>
    %272 = tpu.matmul %270, %6, %cst_113 {dimension_numbers = #tpu.dot_dimension_numbers<[1], [0], [0], [1], [0, 0, 1, 1], [], []>} : vector<32x32xf32>, vector<32x32xf32>, vector<32x32xf32> -> vector<32x32xf32>
    %273 = arith.mulf %272, %5 : vector<32x32xf32>
    %274 = arith.addf %271, %273 : vector<32x32xf32>
    %275 = vector.extract_strided_slice %258 {offsets = [0, 224], sizes = [32, 32], strides = [1, 1]} : vector<32x576xf32> to vector<32x32xf32>
    %276 = arith.mulf %275, %4 : vector<32x32xf32>
    %cst_114 = arith.constant dense<0.000000e+00> : vector<32x32xf32>
    %277 = tpu.matmul %275, %6, %cst_114 {dimension_numbers = #tpu.dot_dimension_numbers<[1], [0], [0], [1], [0, 0, 1, 1], [], []>} : vector<32x32xf32>, vector<32x32xf32>, vector<32x32xf32> -> vector<32x32xf32>
    %278 = arith.mulf %277, %5 : vector<32x32xf32>
    %279 = arith.addf %276, %278 : vector<32x32xf32>
    %cst_115 = arith.constant dense<0.000000e+00> : vector<32x32xf32>
    %280 = tpu.matmul %274, %279, %cst_115 {dimension_numbers = #tpu.dot_dimension_numbers<[1], [1], [0], [0], [0, 0, 1, 0], [], []>} : vector<32x32xf32>, vector<32x32xf32>, vector<32x32xf32> -> vector<32x32xf32>
    %281 = vector.extract_strided_slice %258 {offsets = [0, 64], sizes = [32, 32], strides = [1, 1]} : vector<32x576xf32> to vector<32x32xf32>
    %282 = arith.mulf %281, %4 : vector<32x32xf32>
    %cst_116 = arith.constant dense<0.000000e+00> : vector<32x32xf32>
    %283 = tpu.matmul %281, %6, %cst_116 {dimension_numbers = #tpu.dot_dimension_numbers<[1], [0], [0], [1], [0, 0, 1, 1], [], []>} : vector<32x32xf32>, vector<32x32xf32>, vector<32x32xf32> -> vector<32x32xf32>
    %284 = arith.mulf %283, %5 : vector<32x32xf32>
    %285 = arith.addf %282, %284 : vector<32x32xf32>
    %286 = vector.extract_strided_slice %258 {offsets = [0, 256], sizes = [32, 32], strides = [1, 1]} : vector<32x576xf32> to vector<32x32xf32>
    %287 = arith.mulf %286, %4 : vector<32x32xf32>
    %cst_117 = arith.constant dense<0.000000e+00> : vector<32x32xf32>
    %288 = tpu.matmul %286, %6, %cst_117 {dimension_numbers = #tpu.dot_dimension_numbers<[1], [0], [0], [1], [0, 0, 1, 1], [], []>} : vector<32x32xf32>, vector<32x32xf32>, vector<32x32xf32> -> vector<32x32xf32>
    %289 = arith.mulf %288, %5 : vector<32x32xf32>
    %290 = arith.addf %287, %289 : vector<32x32xf32>
    %cst_118 = arith.constant dense<0.000000e+00> : vector<32x32xf32>
    %291 = tpu.matmul %285, %290, %cst_118 {dimension_numbers = #tpu.dot_dimension_numbers<[1], [1], [0], [0], [0, 0, 1, 0], [], []>} : vector<32x32xf32>, vector<32x32xf32>, vector<32x32xf32> -> vector<32x32xf32>
    %292 = vector.extract_strided_slice %258 {offsets = [0, 96], sizes = [32, 32], strides = [1, 1]} : vector<32x576xf32> to vector<32x32xf32>
    %293 = arith.mulf %292, %4 : vector<32x32xf32>
    %cst_119 = arith.constant dense<0.000000e+00> : vector<32x32xf32>
    %294 = tpu.matmul %292, %6, %cst_119 {dimension_numbers = #tpu.dot_dimension_numbers<[1], [0], [0], [1], [0, 0, 1, 1], [], []>} : vector<32x32xf32>, vector<32x32xf32>, vector<32x32xf32> -> vector<32x32xf32>
    %295 = arith.mulf %294, %5 : vector<32x32xf32>
    %296 = arith.addf %293, %295 : vector<32x32xf32>
    %297 = vector.extract_strided_slice %258 {offsets = [0, 288], sizes = [32, 32], strides = [1, 1]} : vector<32x576xf32> to vector<32x32xf32>
    %298 = arith.mulf %297, %4 : vector<32x32xf32>
    %cst_120 = arith.constant dense<0.000000e+00> : vector<32x32xf32>
    %299 = tpu.matmul %297, %6, %cst_120 {dimension_numbers = #tpu.dot_dimension_numbers<[1], [0], [0], [1], [0, 0, 1, 1], [], []>} : vector<32x32xf32>, vector<32x32xf32>, vector<32x32xf32> -> vector<32x32xf32>
    %300 = arith.mulf %299, %5 : vector<32x32xf32>
    %301 = arith.addf %298, %300 : vector<32x32xf32>
    %cst_121 = arith.constant dense<0.000000e+00> : vector<32x32xf32>
    %302 = tpu.matmul %296, %301, %cst_121 {dimension_numbers = #tpu.dot_dimension_numbers<[1], [1], [0], [0], [0, 0, 1, 0], [], []>} : vector<32x32xf32>, vector<32x32xf32>, vector<32x32xf32> -> vector<32x32xf32>
    %303 = vector.extract_strided_slice %258 {offsets = [0, 128], sizes = [32, 32], strides = [1, 1]} : vector<32x576xf32> to vector<32x32xf32>
    %304 = arith.mulf %303, %4 : vector<32x32xf32>
    %cst_122 = arith.constant dense<0.000000e+00> : vector<32x32xf32>
    %305 = tpu.matmul %303, %6, %cst_122 {dimension_numbers = #tpu.dot_dimension_numbers<[1], [0], [0], [1], [0, 0, 1, 1], [], []>} : vector<32x32xf32>, vector<32x32xf32>, vector<32x32xf32> -> vector<32x32xf32>
    %306 = arith.mulf %305, %5 : vector<32x32xf32>
    %307 = arith.addf %304, %306 : vector<32x32xf32>
    %308 = vector.extract_strided_slice %258 {offsets = [0, 320], sizes = [32, 32], strides = [1, 1]} : vector<32x576xf32> to vector<32x32xf32>
    %309 = arith.mulf %308, %4 : vector<32x32xf32>
    %cst_123 = arith.constant dense<0.000000e+00> : vector<32x32xf32>
    %310 = tpu.matmul %308, %6, %cst_123 {dimension_numbers = #tpu.dot_dimension_numbers<[1], [0], [0], [1], [0, 0, 1, 1], [], []>} : vector<32x32xf32>, vector<32x32xf32>, vector<32x32xf32> -> vector<32x32xf32>
    %311 = arith.mulf %310, %5 : vector<32x32xf32>
    %312 = arith.addf %309, %311 : vector<32x32xf32>
    %cst_124 = arith.constant dense<0.000000e+00> : vector<32x32xf32>
    %313 = tpu.matmul %307, %312, %cst_124 {dimension_numbers = #tpu.dot_dimension_numbers<[1], [1], [0], [0], [0, 0, 1, 0], [], []>} : vector<32x32xf32>, vector<32x32xf32>, vector<32x32xf32> -> vector<32x32xf32>
    %314 = vector.extract_strided_slice %258 {offsets = [0, 160], sizes = [32, 32], strides = [1, 1]} : vector<32x576xf32> to vector<32x32xf32>
    %315 = arith.mulf %314, %4 : vector<32x32xf32>
    %cst_125 = arith.constant dense<0.000000e+00> : vector<32x32xf32>
    %316 = tpu.matmul %314, %6, %cst_125 {dimension_numbers = #tpu.dot_dimension_numbers<[1], [0], [0], [1], [0, 0, 1, 1], [], []>} : vector<32x32xf32>, vector<32x32xf32>, vector<32x32xf32> -> vector<32x32xf32>
    %317 = arith.mulf %316, %5 : vector<32x32xf32>
    %318 = arith.addf %315, %317 : vector<32x32xf32>
    %319 = vector.extract_strided_slice %258 {offsets = [0, 352], sizes = [32, 32], strides = [1, 1]} : vector<32x576xf32> to vector<32x32xf32>
    %320 = arith.mulf %319, %4 : vector<32x32xf32>
    %cst_126 = arith.constant dense<0.000000e+00> : vector<32x32xf32>
    %321 = tpu.matmul %319, %6, %cst_126 {dimension_numbers = #tpu.dot_dimension_numbers<[1], [0], [0], [1], [0, 0, 1, 1], [], []>} : vector<32x32xf32>, vector<32x32xf32>, vector<32x32xf32> -> vector<32x32xf32>
    %322 = arith.mulf %321, %5 : vector<32x32xf32>
    %323 = arith.addf %320, %322 : vector<32x32xf32>
    %cst_127 = arith.constant dense<0.000000e+00> : vector<32x32xf32>
    %324 = tpu.matmul %318, %323, %cst_127 {dimension_numbers = #tpu.dot_dimension_numbers<[1], [1], [0], [0], [0, 0, 1, 0], [], []>} : vector<32x32xf32>, vector<32x32xf32>, vector<32x32xf32> -> vector<32x32xf32>
    %325 = vector.shape_cast %269 : vector<32x32xf32> to vector<1x32x32xf32>
    %326 = vector.shape_cast %280 : vector<32x32xf32> to vector<1x32x32xf32>
    %327 = vector.shape_cast %291 : vector<32x32xf32> to vector<1x32x32xf32>
    %328 = vector.shape_cast %302 : vector<32x32xf32> to vector<1x32x32xf32>
    %329 = vector.shape_cast %313 : vector<32x32xf32> to vector<1x32x32xf32>
    %330 = vector.shape_cast %324 : vector<32x32xf32> to vector<1x32x32xf32>
    %331 = tpu.concatenate %325, %326, %327, %328, %329, %330 in 0 : vector<1x32x32xf32>, vector<1x32x32xf32>, vector<1x32x32xf32>, vector<1x32x32xf32>, vector<1x32x32xf32>, vector<1x32x32xf32> -> vector<6x32x32xf32>
    %332 = vector.shape_cast %7 : vector<32x32xf32> to vector<1x32x32xf32>
    %333 = vector.broadcast %332 : vector<1x32x32xf32> to vector<6x32x32xf32>
    %334 = arith.addf %331, %333 : vector<6x32x32xf32>
    %cst_128 = arith.constant dense<0xFF800000> : vector<6x32xf32>
    %335 = vector.multi_reduction <maximumf>, %334, %cst_128 [2] : vector<6x32x32xf32> to vector<6x32xf32>
    %336 = vector.shape_cast %335 : vector<6x32xf32> to vector<6x32x1xf32>
    %337 = vector.broadcast %336 : vector<6x32x1xf32> to vector<6x32x32xf32>
    %338 = arith.subf %334, %337 : vector<6x32x32xf32>
    %339 = math.exp %338 : vector<6x32x32xf32>
    %cst_129 = arith.constant dense<0.000000e+00> : vector<6x32xf32>
    %340 = vector.multi_reduction <add>, %339, %cst_129 [2] : vector<6x32x32xf32> to vector<6x32xf32>
    %341 = vector.shape_cast %340 : vector<6x32xf32> to vector<6x32x1xf32>
    %342 = tpu.reciprocal %341 {approx = true} : vector<6x32x1xf32> -> vector<6x32x1xf32>
    %343 = vector.broadcast %342 : vector<6x32x1xf32> to vector<6x32x32xf32>
    %344 = arith.mulf %339, %343 : vector<6x32x32xf32>
    %345 = vector.extract_strided_slice %344 {offsets = [0, 0, 0], sizes = [1, 32, 32], strides = [1, 1, 1]} : vector<6x32x32xf32> to vector<1x32x32xf32>
    %346 = vector.shape_cast %345 : vector<1x32x32xf32> to vector<32x32xf32>
    %347 = vector.extract_strided_slice %258 {offsets = [0, 384], sizes = [32, 32], strides = [1, 1]} : vector<32x576xf32> to vector<32x32xf32>
    %cst_130 = arith.constant dense<0.000000e+00> : vector<32x32xf32>
    %348 = tpu.matmul %346, %347, %cst_130 {dimension_numbers = #tpu.dot_dimension_numbers<[1], [0], [0], [1], [0, 0, 1, 1], [], []>} : vector<32x32xf32>, vector<32x32xf32>, vector<32x32xf32> -> vector<32x32xf32>
    %349 = vector.extract_strided_slice %344 {offsets = [1, 0, 0], sizes = [1, 32, 32], strides = [1, 1, 1]} : vector<6x32x32xf32> to vector<1x32x32xf32>
    %350 = vector.shape_cast %349 : vector<1x32x32xf32> to vector<32x32xf32>
    %351 = vector.extract_strided_slice %258 {offsets = [0, 416], sizes = [32, 32], strides = [1, 1]} : vector<32x576xf32> to vector<32x32xf32>
    %cst_131 = arith.constant dense<0.000000e+00> : vector<32x32xf32>
    %352 = tpu.matmul %350, %351, %cst_131 {dimension_numbers = #tpu.dot_dimension_numbers<[1], [0], [0], [1], [0, 0, 1, 1], [], []>} : vector<32x32xf32>, vector<32x32xf32>, vector<32x32xf32> -> vector<32x32xf32>
    %353 = vector.extract_strided_slice %344 {offsets = [2, 0, 0], sizes = [1, 32, 32], strides = [1, 1, 1]} : vector<6x32x32xf32> to vector<1x32x32xf32>
    %354 = vector.shape_cast %353 : vector<1x32x32xf32> to vector<32x32xf32>
    %355 = vector.extract_strided_slice %258 {offsets = [0, 448], sizes = [32, 32], strides = [1, 1]} : vector<32x576xf32> to vector<32x32xf32>
    %cst_132 = arith.constant dense<0.000000e+00> : vector<32x32xf32>
    %356 = tpu.matmul %354, %355, %cst_132 {dimension_numbers = #tpu.dot_dimension_numbers<[1], [0], [0], [1], [0, 0, 1, 1], [], []>} : vector<32x32xf32>, vector<32x32xf32>, vector<32x32xf32> -> vector<32x32xf32>
    %357 = vector.extract_strided_slice %344 {offsets = [3, 0, 0], sizes = [1, 32, 32], strides = [1, 1, 1]} : vector<6x32x32xf32> to vector<1x32x32xf32>
    %358 = vector.shape_cast %357 : vector<1x32x32xf32> to vector<32x32xf32>
    %359 = vector.extract_strided_slice %258 {offsets = [0, 480], sizes = [32, 32], strides = [1, 1]} : vector<32x576xf32> to vector<32x32xf32>
    %cst_133 = arith.constant dense<0.000000e+00> : vector<32x32xf32>
    %360 = tpu.matmul %358, %359, %cst_133 {dimension_numbers = #tpu.dot_dimension_numbers<[1], [0], [0], [1], [0, 0, 1, 1], [], []>} : vector<32x32xf32>, vector<32x32xf32>, vector<32x32xf32> -> vector<32x32xf32>
    %361 = vector.extract_strided_slice %344 {offsets = [4, 0, 0], sizes = [1, 32, 32], strides = [1, 1, 1]} : vector<6x32x32xf32> to vector<1x32x32xf32>
    %362 = vector.shape_cast %361 : vector<1x32x32xf32> to vector<32x32xf32>
    %363 = vector.extract_strided_slice %258 {offsets = [0, 512], sizes = [32, 32], strides = [1, 1]} : vector<32x576xf32> to vector<32x32xf32>
    %cst_134 = arith.constant dense<0.000000e+00> : vector<32x32xf32>
    %364 = tpu.matmul %362, %363, %cst_134 {dimension_numbers = #tpu.dot_dimension_numbers<[1], [0], [0], [1], [0, 0, 1, 1], [], []>} : vector<32x32xf32>, vector<32x32xf32>, vector<32x32xf32> -> vector<32x32xf32>
    %365 = vector.extract_strided_slice %344 {offsets = [5, 0, 0], sizes = [1, 32, 32], strides = [1, 1, 1]} : vector<6x32x32xf32> to vector<1x32x32xf32>
    %366 = vector.shape_cast %365 : vector<1x32x32xf32> to vector<32x32xf32>
    %367 = vector.extract_strided_slice %258 {offsets = [0, 544], sizes = [32, 32], strides = [1, 1]} : vector<32x576xf32> to vector<32x32xf32>
    %cst_135 = arith.constant dense<0.000000e+00> : vector<32x32xf32>
    %368 = tpu.matmul %366, %367, %cst_135 {dimension_numbers = #tpu.dot_dimension_numbers<[1], [0], [0], [1], [0, 0, 1, 1], [], []>} : vector<32x32xf32>, vector<32x32xf32>, vector<32x32xf32> -> vector<32x32xf32>
    %369 = tpu.concatenate %348, %352, %356, %360, %364, %368 in 1 : vector<32x32xf32>, vector<32x32xf32>, vector<32x32xf32>, vector<32x32xf32>, vector<32x32xf32>, vector<32x32xf32> -> vector<32x192xf32>
    %c1_136 = arith.constant 1 : index
    %c0_137 = arith.constant 0 : index
    %c0_138 = arith.constant 0 : index
    %370 = vector.load %arg10[%c1_136, %c0_137, %c0_138] : memref<2x192x128xf32, #tpu.memory_space<vmem>>, vector<1x192x128xf32>
    %371 = vector.shape_cast %370 : vector<1x192x128xf32> to vector<192x128xf32>
    %cst_139 = arith.constant dense<0.000000e+00> : vector<32x128xf32>
    %372 = tpu.matmul %369, %371, %cst_139 {dimension_numbers = #tpu.dot_dimension_numbers<[1], [0], [0], [1], [0, 0, 1, 1], [], []>} : vector<32x192xf32>, vector<192x128xf32>, vector<32x128xf32> -> vector<32x128xf32>
    %373 = arith.addf %229, %372 : vector<32x128xf32>
    %c1_140 = arith.constant 1 : index
    %c0_141 = arith.constant 0 : index
    %c0_142 = arith.constant 0 : index
    %374 = vector.load %arg11[%c1_140, %c0_141, %c0_142] : memref<2x1x128xf32, #tpu.memory_space<vmem>>, vector<1x1x128xf32>
    %375 = vector.shape_cast %374 : vector<1x1x128xf32> to vector<1x128xf32>
    %c1_143 = arith.constant 1 : index
    %c0_144 = arith.constant 0 : index
    %c0_145 = arith.constant 0 : index
    %376 = vector.load %arg12[%c1_143, %c0_144, %c0_145] : memref<2x1x128xf32, #tpu.memory_space<vmem>>, vector<1x1x128xf32>
    %377 = vector.shape_cast %376 : vector<1x1x128xf32> to vector<1x128xf32>
    %cst_146 = arith.constant dense<0.000000e+00> : vector<32xf32>
    %378 = vector.multi_reduction <add>, %373, %cst_146 [1] : vector<32x128xf32> to vector<32xf32>
    %379 = vector.shape_cast %378 : vector<32xf32> to vector<32x1xf32>
    %cst_147 = arith.constant 1.280000e+02 : f32
    %380 = vector.broadcast %cst_147 : f32 to vector<32x1xf32>
    %381 = arith.divf %379, %380 : vector<32x1xf32>
    %382 = vector.broadcast %381 : vector<32x1xf32> to vector<32x128xf32>
    %383 = arith.subf %373, %382 : vector<32x128xf32>
    %384 = arith.mulf %383, %383 : vector<32x128xf32>
    %cst_148 = arith.constant dense<0.000000e+00> : vector<32xf32>
    %385 = vector.multi_reduction <add>, %384, %cst_148 [1] : vector<32x128xf32> to vector<32xf32>
    %386 = vector.shape_cast %385 : vector<32xf32> to vector<32x1xf32>
    %cst_149 = arith.constant 1.280000e+02 : f32
    %387 = vector.broadcast %cst_149 : f32 to vector<32x1xf32>
    %388 = arith.divf %386, %387 : vector<32x1xf32>
    %389 = vector.broadcast %381 : vector<32x1xf32> to vector<32x128xf32>
    %390 = arith.subf %373, %389 : vector<32x128xf32>
    %cst_150 = arith.constant 9.99999974E-6 : f32
    %391 = vector.broadcast %cst_150 : f32 to vector<32x1xf32>
    %392 = arith.addf %388, %391 : vector<32x1xf32>
    %393 = math.rsqrt %392 : vector<32x1xf32>
    %394 = vector.broadcast %393 : vector<32x1xf32> to vector<32x128xf32>
    %395 = arith.mulf %390, %394 : vector<32x128xf32>
    %396 = vector.broadcast %375 : vector<1x128xf32> to vector<32x128xf32>
    %397 = arith.mulf %395, %396 : vector<32x128xf32>
    %398 = vector.broadcast %377 : vector<1x128xf32> to vector<32x128xf32>
    %399 = arith.addf %397, %398 : vector<32x128xf32>
    %c1_151 = arith.constant 1 : index
    %c0_152 = arith.constant 0 : index
    %c0_153 = arith.constant 0 : index
    %400 = vector.load %arg13[%c1_151, %c0_152, %c0_153] : memref<2x128x341xf32, #tpu.memory_space<vmem>>, vector<1x128x341xf32>
    %401 = vector.shape_cast %400 : vector<1x128x341xf32> to vector<128x341xf32>
    %cst_154 = arith.constant dense<0.000000e+00> : vector<32x341xf32>
    %402 = tpu.matmul %399, %401, %cst_154 {dimension_numbers = #tpu.dot_dimension_numbers<[1], [0], [0], [1], [0, 0, 1, 1], [], []>} : vector<32x128xf32>, vector<128x341xf32>, vector<32x341xf32> -> vector<32x341xf32>
    %c1_155 = arith.constant 1 : index
    %c0_156 = arith.constant 0 : index
    %c0_157 = arith.constant 0 : index
    %403 = vector.load %arg14[%c1_155, %c0_156, %c0_157] : memref<2x128x341xf32, #tpu.memory_space<vmem>>, vector<1x128x341xf32>
    %404 = vector.shape_cast %403 : vector<1x128x341xf32> to vector<128x341xf32>
    %cst_158 = arith.constant dense<0.000000e+00> : vector<32x341xf32>
    %405 = tpu.matmul %399, %404, %cst_158 {dimension_numbers = #tpu.dot_dimension_numbers<[1], [0], [0], [1], [0, 0, 1, 1], [], []>} : vector<32x128xf32>, vector<128x341xf32>, vector<32x341xf32> -> vector<32x341xf32>
    %cst_159 = arith.constant 5.000000e-01 : f32
    %406 = vector.broadcast %cst_159 : f32 to vector<32x341xf32>
    %407 = arith.mulf %406, %405 : vector<32x341xf32>
    %cst_160 = arith.constant 0.707106769 : f32
    %408 = vector.broadcast %cst_160 : f32 to vector<32x341xf32>
    %409 = arith.mulf %405, %408 : vector<32x341xf32>
    %cst_161 = arith.constant 0.000000e+00 : f32
    %410 = vector.broadcast %cst_161 : f32 to vector<32x341xf32>
    %411 = arith.cmpf oge, %409, %410 : vector<32x341xf32>
    %cst_162 = arith.constant 1.000000e+00 : f32
    %cst_163 = arith.constant -1.000000e+00 : f32
    %412 = vector.broadcast %cst_162 : f32 to vector<32x341xf32>
    %413 = vector.broadcast %cst_163 : f32 to vector<32x341xf32>
    %414 = arith.select %411, %412, %413 : vector<32x341xi1>, vector<32x341xf32>
    %415 = math.absf %409 : vector<32x341xf32>
    %cst_164 = arith.constant 0.327591091 : f32
    %416 = vector.broadcast %cst_164 : f32 to vector<32x341xf32>
    %417 = arith.mulf %416, %415 : vector<32x341xf32>
    %cst_165 = arith.constant 1.000000e+00 : f32
    %418 = vector.broadcast %cst_165 : f32 to vector<32x341xf32>
    %419 = arith.addf %418, %417 : vector<32x341xf32>
    %cst_166 = arith.constant 1.000000e+00 : f32
    %420 = vector.broadcast %cst_166 : f32 to vector<32x341xf32>
    %421 = arith.divf %420, %419 : vector<32x341xf32>
    %cst_167 = arith.constant 1.06140542 : f32
    %422 = vector.broadcast %cst_167 : f32 to vector<32x341xf32>
    %423 = arith.mulf %422, %421 : vector<32x341xf32>
    %cst_168 = arith.constant -1.45315206 : f32
    %424 = vector.broadcast %cst_168 : f32 to vector<32x341xf32>
    %425 = arith.addf %423, %424 : vector<32x341xf32>
    %426 = arith.mulf %425, %421 : vector<32x341xf32>
    %cst_169 = arith.constant 1.42141378 : f32
    %427 = vector.broadcast %cst_169 : f32 to vector<32x341xf32>
    %428 = arith.addf %426, %427 : vector<32x341xf32>
    %429 = arith.mulf %428, %421 : vector<32x341xf32>
    %cst_170 = arith.constant -0.284496725 : f32
    %430 = vector.broadcast %cst_170 : f32 to vector<32x341xf32>
    %431 = arith.addf %429, %430 : vector<32x341xf32>
    %432 = arith.mulf %431, %421 : vector<32x341xf32>
    %cst_171 = arith.constant 0.254829586 : f32
    %433 = vector.broadcast %cst_171 : f32 to vector<32x341xf32>
    %434 = arith.addf %432, %433 : vector<32x341xf32>
    %435 = arith.mulf %434, %421 : vector<32x341xf32>
    %cst_172 = arith.constant 0.000000e+00 : f32
    %436 = vector.broadcast %cst_172 : f32 to vector<32x341xf32>
    %437 = arith.subf %436, %415 : vector<32x341xf32>
    %438 = arith.mulf %437, %415 : vector<32x341xf32>
    %439 = math.exp %438 : vector<32x341xf32>
    %440 = arith.mulf %435, %439 : vector<32x341xf32>
    %cst_173 = arith.constant 1.000000e+00 : f32
    %441 = vector.broadcast %cst_173 : f32 to vector<32x341xf32>
    %442 = arith.subf %441, %440 : vector<32x341xf32>
    %443 = arith.mulf %414, %442 : vector<32x341xf32>
    %cst_174 = arith.constant 1.000000e+00 : f32
    %444 = vector.broadcast %cst_174 : f32 to vector<32x341xf32>
    %445 = arith.addf %444, %443 : vector<32x341xf32>
    %446 = arith.mulf %407, %445 : vector<32x341xf32>
    %447 = arith.mulf %402, %446 : vector<32x341xf32>
    %c1_175 = arith.constant 1 : index
    %c0_176 = arith.constant 0 : index
    %c0_177 = arith.constant 0 : index
    %448 = vector.load %arg15[%c1_175, %c0_176, %c0_177] : memref<2x341x128xf32, #tpu.memory_space<vmem>>, vector<1x341x128xf32>
    %449 = vector.shape_cast %448 : vector<1x341x128xf32> to vector<341x128xf32>
    %cst_178 = arith.constant dense<0.000000e+00> : vector<32x128xf32>
    %450 = tpu.matmul %447, %449, %cst_178 {dimension_numbers = #tpu.dot_dimension_numbers<[1], [0], [0], [1], [0, 0, 1, 1], [], []>} : vector<32x341xf32>, vector<341x128xf32>, vector<32x128xf32> -> vector<32x128xf32>
    %451 = arith.addf %373, %450 : vector<32x128xf32>
    %c0_179 = arith.constant 0 : index
    %c0_180 = arith.constant 0 : index
    %c0_181 = arith.constant 0 : index
    %452 = vector.load %arg16[%c0_179, %c0_180, %c0_181] : memref<1x32x128xf32, #tpu.memory_space<vmem>>, vector<1x32x128xf32>
    %453 = vector.shape_cast %452 : vector<1x32x128xf32> to vector<32x128xf32>
    %454 = vector.shape_cast %451 : vector<32x128xf32> to vector<1x32x128xf32>
    tpu.vector_store %arg16[%c0_179, %c0_180, %c0_181], %454 {strides = array<i32>} : memref<1x32x128xf32, #tpu.memory_space<vmem>>, vector<1x32x128xf32>,
    return
  }
  func.func @transform_0(%arg0: i32) -> (i32, i32, i32) {
    %c0_i32 = arith.constant 0 : i32
    %c0_i32_0 = arith.constant 0 : i32
    %c0_i32_1 = arith.constant 0 : i32
    return %arg0, %c0_i32, %c0_i32_0 : i32, i32, i32
  }
  func.func @transform_1(%arg0: i32) -> (i32, i32) {
    %c0_i32 = arith.constant 0 : i32
    %c0_i32_0 = arith.constant 0 : i32
    %c0_i32_1 = arith.constant 0 : i32
    return %c0_i32, %c0_i32_0 : i32, i32
  }
  func.func @transform_2(%arg0: i32) -> (i32, i32) {
    %c0_i32 = arith.constant 0 : i32
    %c0_i32_0 = arith.constant 0 : i32
    %c0_i32_1 = arith.constant 0 : i32
    return %c0_i32, %c0_i32_0 : i32, i32
  }
  func.func @transform_3(%arg0: i32) -> (i32, i32) {
    %c0_i32 = arith.constant 0 : i32
    %c0_i32_0 = arith.constant 0 : i32
    %c0_i32_1 = arith.constant 0 : i32
    return %c0_i32, %c0_i32_0 : i32, i32
  }
  func.func @transform_4(%arg0: i32) -> (i32, i32) {
    %c0_i32 = arith.constant 0 : i32
    %c0_i32_0 = arith.constant 0 : i32
    %c0_i32_1 = arith.constant 0 : i32
    return %c0_i32, %c0_i32_0 : i32, i32
  }
  func.func @transform_5(%arg0: i32) -> (i32, i32) {
    %c0_i32 = arith.constant 0 : i32
    %c0_i32_0 = arith.constant 0 : i32
    %c0_i32_1 = arith.constant 0 : i32
    return %c0_i32, %c0_i32_0 : i32, i32
  }
  func.func @transform_6(%arg0: i32) -> (i32, i32, i32) {
    %c0_i32 = arith.constant 0 : i32
    %c0_i32_0 = arith.constant 0 : i32
    %c0_i32_1 = arith.constant 0 : i32
    %c0_i32_2 = arith.constant 0 : i32
    return %c0_i32, %c0_i32_0, %c0_i32_1 : i32, i32, i32
  }
  func.func @transform_7(%arg0: i32) -> (i32, i32, i32) {
    %c0_i32 = arith.constant 0 : i32
    %c0_i32_0 = arith.constant 0 : i32
    %c0_i32_1 = arith.constant 0 : i32
    %c0_i32_2 = arith.constant 0 : i32
    return %c0_i32, %c0_i32_0, %c0_i32_1 : i32, i32, i32
  }
  func.func @transform_8(%arg0: i32) -> (i32, i32, i32) {
    %c0_i32 = arith.constant 0 : i32
    %c0_i32_0 = arith.constant 0 : i32
    %c0_i32_1 = arith.constant 0 : i32
    %c0_i32_2 = arith.constant 0 : i32
    return %c0_i32, %c0_i32_0, %c0_i32_1 : i32, i32, i32
  }
  func.func @transform_9(%arg0: i32) -> (i32, i32, i32) {
    %c0_i32 = arith.constant 0 : i32
    %c0_i32_0 = arith.constant 0 : i32
    %c0_i32_1 = arith.constant 0 : i32
    %c0_i32_2 = arith.constant 0 : i32
    return %c0_i32, %c0_i32_0, %c0_i32_1 : i32, i32, i32
  }
  func.func @transform_10(%arg0: i32) -> (i32, i32, i32) {
    %c0_i32 = arith.constant 0 : i32
    %c0_i32_0 = arith.constant 0 : i32
    %c0_i32_1 = arith.constant 0 : i32
    %c0_i32_2 = arith.constant 0 : i32
    return %c0_i32, %c0_i32_0, %c0_i32_1 : i32, i32, i32
  }
  func.func @transform_11(%arg0: i32) -> (i32, i32, i32) {
    %c0_i32 = arith.constant 0 : i32
    %c0_i32_0 = arith.constant 0 : i32
    %c0_i32_1 = arith.constant 0 : i32
    %c0_i32_2 = arith.constant 0 : i32
    return %c0_i32, %c0_i32_0, %c0_i32_1 : i32, i32, i32
  }
  func.func @transform_12(%arg0: i32) -> (i32, i32, i32) {
    %c0_i32 = arith.constant 0 : i32
    %c0_i32_0 = arith.constant 0 : i32
    %c0_i32_1 = arith.constant 0 : i32
    %c0_i32_2 = arith.constant 0 : i32
    return %c0_i32, %c0_i32_0, %c0_i32_1 : i32, i32, i32
  }
  func.func @transform_13(%arg0: i32) -> (i32, i32, i32) {
    %c0_i32 = arith.constant 0 : i32
    %c0_i32_0 = arith.constant 0 : i32
    %c0_i32_1 = arith.constant 0 : i32
    %c0_i32_2 = arith.constant 0 : i32
    return %c0_i32, %c0_i32_0, %c0_i32_1 : i32, i32, i32
  }
  func.func @transform_14(%arg0: i32) -> (i32, i32, i32) {
    %c0_i32 = arith.constant 0 : i32
    %c0_i32_0 = arith.constant 0 : i32
    %c0_i32_1 = arith.constant 0 : i32
    %c0_i32_2 = arith.constant 0 : i32
    return %c0_i32, %c0_i32_0, %c0_i32_1 : i32, i32, i32
  }
  func.func @transform_15(%arg0: i32) -> (i32, i32, i32) {
    %c0_i32 = arith.constant 0 : i32
    %c0_i32_0 = arith.constant 0 : i32
    %c0_i32_1 = arith.constant 0 : i32
    return %arg0, %c0_i32, %c0_i32_0 : i32, i32, i32
  }
}

</mosaic_0001>

<bundles_post_ra>
// kernel: tpu_custom_call.1
= control target key start
LH: loop header
LB: loop body
LE: loop exit
PB: predicated region body
PF: predicated region fallthrough
CT: control target
= control target key end

     0   :  { %s18644_s0 = inlined_call_operand.vmem [shape: f32[2,16,128], index: 0, kind: input, shape index: {}]   ;;  %s18645_s1 = inlined_call_operand.vmem [shape: f32[32,16], index: 1, kind: input, shape index: {}]   ;;  %s18646_s2 = inlined_call_operand.vmem [shape: f32[32,32], index: 2, kind: input, shape index: {}]   ;;  %s18647_s3 = inlined_call_operand.vmem [shape: f32[32,32], index: 3, kind: input, shape index: {}]   ;;  %s18648_s4 = inlined_call_operand.vmem [shape: f32[32,32], index: 4, kind: input, shape index: {}]   ;;  %s18649_s5 = inlined_call_operand.vmem [shape: f32[32,32], index: 5, kind: input, shape index: {}]   ;;  %s18650_s6 = inlined_call_operand.vmem [shape: f32[2,1,128], index: 6, kind: input, shape index: {}]   ;;  %s18651_s7 = inlined_call_operand.vmem [shape: f32[2,1,128], index: 7, kind: input, shape index: {}]   ;;  %s18652_s8 = inlined_call_operand.vmem [shape: f32[2,128,576], index: 8, kind: input, shape index: {}]   ;;  %s18653_s9 = inlined_call_operand.vmem [shape: f32[2,192,128], index: 9, kind: input, shape index: {}]   ;;  %s18654_s10 = inlined_call_operand.vmem [shape: f32[2,1,128], index: 10, kind: input, shape index: {}]   ;;  %s18655_s11 = inlined_call_operand.vmem [shape: f32[2,1,128], index: 11, kind: input, shape index: {}]   ;;  %s18656_s12 = inlined_call_operand.vmem [shape: f32[2,128,341], index: 12, kind: input, shape index: {}]   ;;  %s18657_s13 = inlined_call_operand.vmem [shape: f32[2,128,341], index: 13, kind: input, shape index: {}]   ;;  %s18658_s14 = inlined_call_operand.vmem [shape: f32[2,341,128], index: 14, kind: input, shape index: {}]   ;;  %s18659_s15 = inlined_call_operand.hbm [shape: f32[2,32,128], index: 15, kind: output, shape index: {}]  }
   0x1   :  { %18702 = sst [smem:[#allocation22_spill]] %s18644_s0 }
   0x2   :  { %18703 = sst [smem:[#allocation23_spill]] %s18645_s1 }
   0x3   :  { %20 = vsyncpa [#allocation3], 0 }
   0x4   :  { %22 = vsyncpa [#allocation3 + $0x1], 0  ;;  %s14339_s18 = smov 0   ;;  %s14341_s19 = smov 0  }
   0x5   :  { %s14343_s20 = smov 0   ;;  %s14345_s21 = smov 0  }
   0x6 LB: > { %18704 = sst [smem:[#allocation5_spill]] %s14244_s20  ;;  %s14360_s22 = sadd.s32 4294967295, %s14248_s21   ;;  %s14248_s21 = sphi %s14345_s21, %s18761_s21   ;;  %s14244_s20 = sphi %s14343_s20, %s18763_s20   ;;  %s14240_s19 = sphi %s14341_s19, %s18765_s19   ;;  %s14236_s18 = sphi %s14339_s18, %s18764_s18  }
   0x7   : > { %s10412_s23 = sadd.s32 4294967294, %s14248_s21   ;;  %s14364_s24 = sadd.s32 1, %s14248_s21  }
   0x8   : > { %18705 = sst [smem:[#allocation6_spill]] %s14364_s24  ;;  %s355_s25 = sadd.s32 1, %s14244_s20 }
   0x9   : > { %s352_s26 = ssub.s32 %s14248_s21, %s14364_s24  ;;  %p365_p0 = scmp.ne.s32.totalorder %s14244_s20, %s14240_s19 }
   0xa   : > { %p353_p1 = scmp.eq.s32.totalorder %s352_s26, 0  ;;  %p366_p2 = scmp.eq.s32.totalorder %s14360_s22, 1 }
   0xb   : > { %p371_p3 = scmp.ne.s32.totalorder %s14240_s19, %s14236_s18  ;;  %p372_p4 = scmp.eq.s32.totalorder %s10412_s23, 1 }
   0xc   : > { %s14375_s27 = scalar_select %p353_p1, %s14244_s20, %s355_s25  }
   0xd   : > { %p14377_p5 = por %p366_p2, %p365_p0  ;;  %p14381_p6 = por %p372_p4, %p371_p3 }
   0xe   : > { %18706 = sst [smem:[#allocation7_spill]] %s14375_s27  ;;  %p10415_p7 = scmp.ge.s32.totalorder %s14248_s21, 1 }
   0xf   : > { %s18708_s29 = scalar_select %p14381_p6, 1, 0 }
  0x10   : > { %p440_p8 = scmp.lt.s32.totalorder %s14248_s21, 3 }
  0x11   : > { %18709 = sst [smem:[#allocation8_spill]] %s18708_s29 }
  0x12   : > { %p441_p9 = pnand %p10415_p7, %p440_p8 }
  0x14   : > { %444 = sbr.rel (%p441_p9) target bundleno = 6719 (0x1a3f), region = 80 }
  0x1b   : > { %p488_p10 = scmp.lt.s32.totalorder %s14360_s22, 1  ;;  %s18710_s1 = sld [smem:[#allocation23_spill]]  ;;  %vm499_vm0 = vcmask 130048   ;;  %v681_v11 = vld [vmem:[%s18652_s8 + $0x8] sm:$0xff]  ;;  %v686_v12 = vld [vmem:[%s18652_s8 + $0x30] sm:$0xff]  ;;  %v680_v13 = vld [vmem:[%s18652_s8] sm:$0xff] }
  0x1c   : > { %s18711_s0 = sld [smem:[#allocation22_spill]]  ;;  %v12541_v14 = vpack.c.bf16 %v686_v12, %v681_v11  ;;  %v685_v15 = vld [vmem:[%s18652_s8 + $0x28] sm:$0xff]  ;;  %v683_v16 = vld [vmem:[%s18652_s8 + $0x18] sm:$0xff]  ;;  %v688_v17 = vld [vmem:[%s18652_s8 + $0x40] sm:$0xff]  ;;  %vm1027_vm1 = vcmask 261120   ;;  %s18674_s30 = smov 96  }
  0x1d   : > { %s489_s17 = scalar_select %p488_p10, %s14360_s22, 1  ;;  %v12543_v18 = vpack.c.bf16 %v685_v15, %v680_v13  ;;  %v12573_v19 = vpack.c.bf16 %v688_v17, %v683_v16  ;;  %v682_v20 = vld [vmem:[%s18652_s8 + $0x10] sm:$0xff]  ;;  %v687_v21 = vld [vmem:[%s18652_s8 + $0x38] sm:$0xff]  ;;  %v696_v24 = vld [vmem:[%s18652_s8 + $0x80] sm:$0xff]  ;;  %vm4272_vm3 = vcmask 523264   ;;  %vm4277_vm4 = vcmask 785408  }
  0x1e   : > { %v691_v22 = vld [vmem:[%s18652_s8 + $0x58] sm:$0xff]  ;;  %12542 = vmatprep.subr.bf16.mxu1 %v12541_v14  ;;  %v12575_v23 = vpack.c.bf16 %v687_v21, %v682_v20  ;;  %v690_v25 = vld [vmem:[%s18652_s8 + $0x50] sm:$0xff]  ;;  %v693_v29 = vld [vmem:[%s18652_s8 + $0x68] sm:$0xff]  ;;  %s18676_s16 = smov 64   ;;  %vm5313_vm5 = vcmask 1044480   ;;  %s18735_s25 = smov 64  }
  0x1f   : > { %s10941_s23 = sshll.u32 %s489_s17, 4  ;;  %v695_v26 = vld [vmem:[%s18652_s8 + $0x78] sm:$0xff]  ;;  %12544 = vmatpush1.bf16.msra.mxu1 %v12543_v18  ;;  %v12545_v27 = vpack.c.bf16 %v696_v24, %v691_v22  ;;  %v698_v30 = vld [vmem:[%s18652_s8 + $0x90] sm:$0xff]  ;;  %v692_v31 = vld [vmem:[%s18652_s8 + $0x60] sm:$0xff]  ;;  %s10942_s17 = sshll.u32 %s14360_s22, 9 }
  0x20   : > { %v12547_v28 = vpack.c.bf16 %v695_v26, %v690_v25  ;;  %v12577_v32 = vpack.c.bf16 %v698_v30, %v693_v29  ;;  %v697_v33 = vld [vmem:[%s18652_s8 + $0x88] sm:$0xff]  ;;  %v706_v35 = vld [vmem:[%s18652_s8 + $0xd0] sm:$0xff]  ;;  %v700_v38 = vld [vmem:[%s18652_s8 + $0xa0] sm:$0xff]  ;;  %s14256_s24 = smov [#allocation2]  }
  0x21   : > { %v493_v0 = vld [vmem:[%s18710_s1] sm:$0xff]  ;;  %v494_v4 = vld [vmem:[%s18710_s1 + $0x8] sm:$0xff]  ;;  %v495_v5 = vld [vmem:[%s18710_s1 + $0x10] sm:$0xff]  ;;  %12546 = vmatprep.subr.bf16.mxu1 %v12545_v27  ;;  %v12579_v36 = vpack.c.bf16 %v697_v33, %v692_v31 }
  0x22   : > { %11575 = vmatprep.mubr.msk.f32.mxu0 %vm499_vm0, %v493_v0  ;;  %s492_s27 = scalar_lea.vmem %s18711_s0, %s10941_s23  ;;  %v496_v6 = vld [vmem:[%s18710_s1 + $0x18] sm:$0xff]  ;;  %v701_v34 = vld [vmem:[%s18652_s8 + $0xa8] sm:$0xff]  ;;  %v708_v41 = vld [vmem:[%s18652_s8 + $0xe0] sm:$0xff]  ;;  %s18672_s0 = smov 32  }
  0x23   : > { %v497_v1 = vld [vmem:[%s492_s27] sm:$0xff]  ;;  %v498_v2 = vld [vmem:[%s492_s27 + $0x8] sm:$0xff]  ;;  %v12549_v37 = vpack.c.bf16 %v706_v35, %v701_v34  ;;  %v703_v40 = vld [vmem:[%s18652_s8 + $0xb8] sm:$0xff]  ;;  %12548 = vmatpush1.bf16.msra.mxu1 %v12547_v28  ;;  %s485_s1 = sand.u32 1, %s14240_s19   ;;  %s14190_s27 = sshll.u32 %s14256_s24, 4  ;;  %s14191_s27 = int_to_ptr.vmem [resolvable:$false] %s14190_s27 }
  0x24   : > { %v12537_v3 = vpack.c.bf16 %v498_v2, %v497_v1  ;;  %v705_v39 = vld [vmem:[%s18652_s8 + $0xc8] sm:$0xff]  ;;  %v702_v42 = vld [vmem:[%s18652_s8 + $0xb0] sm:$0xff]  ;;  %v707_v43 = vld [vmem:[%s18652_s8 + $0xd8] sm:$0xff]  ;;  %v12581_v45 = vpack.c.bf16 %v708_v41, %v703_v40  ;;  %s10416_s23 = sshll.u32 %s485_s1, 5  ;;  %s14192_s29 = scalar_lea.vmem %s14191_s27, 1024 }
  0x25   : > { %v12551_v44 = vpack.c.bf16 %v705_v39, %v700_v38  ;;  %12550 = vmatprep.subr.bf16.mxu1 %v12549_v37  ;;  %v12583_v46 = vpack.c.bf16 %v707_v43, %v702_v42  ;;  %v711_v63 = vld [vmem:[%s18652_s8 + $0xf8] sm:$0xff]  ;;  %v716_v0 = vld [vmem:[%s18652_s8 + $0x120] sm:$0xff]  ;;  %v710_v2 = vld [vmem:[%s18652_s8 + $0xf0] sm:$0xff] }
  0x26   : > { %12538 = vmatprep.subr.bf16.mxu0 %v12537_v3  ;;  %v12553_v1 = vpack.c.bf16 %v716_v0, %v711_v63  ;;  %v712_v11 = vld [vmem:[%s18652_s8 + $0x100] sm:$0xff]  ;;  %v717_v12 = vld [vmem:[%s18652_s8 + $0x128] sm:$0xff]  ;;  %v726_v16 = vld [vmem:[%s18652_s8 + $0x170] sm:$0xff] }
  0x27   : > { %12540 = vmatpush3.bf16.msra.mxu0 %v12537_v3  ;;  %12552 = vmatpush1.bf16.msra.mxu1 %v12551_v44  ;;  %v715_v3 = vld [vmem:[%s18652_s8 + $0x118] sm:$0xff]  ;;  %v12587_v14 = vpack.c.bf16 %v717_v12, %v712_v11  ;;  %v721_v15 = vld [vmem:[%s18652_s8 + $0x148] sm:$0xff]  ;;  %v720_v18 = vld [vmem:[%s18652_s8 + $0x140] sm:$0xff] }
  0x28   : > { %12574 = vmatprep.subr.bf16.mxu0 %v12573_v19  ;;  %12554 = vmatprep.subr.bf16.mxu1 %v12553_v1  ;;  %v12557_v17 = vpack.c.bf16 %v726_v16, %v721_v15  ;;  %v725_v19 = vld [vmem:[%s18652_s8 + $0x168] sm:$0xff]  ;;  %v723_v20 = vld [vmem:[%s18652_s8 + $0x158] sm:$0xff]  ;;  %v728_v22 = vld [vmem:[%s18652_s8 + $0x180] sm:$0xff] }
  0x29   : > { %v12559_v21 = vpack.c.bf16 %v725_v19, %v720_v18  ;;  %v727_v24 = vld [vmem:[%s18652_s8 + $0x178] sm:$0xff]  ;;  %v12589_v25 = vpack.c.bf16 %v728_v22, %v723_v20  ;;  %v736_v28 = vld [vmem:[%s18652_s8 + $0x1c0] sm:$0xff]  ;;  %v730_v30 = vld [vmem:[%s18652_s8 + $0x190] sm:$0xff] }
  0x2a   : > { %11576 = vmatmul.mubr.msk.f32.vlgmr.msra.gmra.mrb[0].mxu0 %vm499_vm0, %v494_v4  ;;  %v713_v4 = vld [vmem:[%s18652_s8 + $0x108] sm:$0xff]  ;;  %v731_v27 = vld [vmem:[%s18652_s8 + $0x198] sm:$0xff]  ;;  %v738_v34 = vld [vmem:[%s18652_s8 + $0x1d0] sm:$0xff] }
  0x2b   : > { %11578 = vmatprep.mubr.msk.f32.mxu0 %vm499_vm0, %v495_v5  ;;  %12576 = vmatpush1.bf16.msra.mxu0 %v12575_v23  ;;  %v12555_v5 = vpack.c.bf16 %v715_v3, %v710_v2  ;;  %v722_v23 = vld [vmem:[%s18652_s8 + $0x150] sm:$0xff]  ;;  %v12561_v29 = vpack.c.bf16 %v736_v28, %v731_v27  ;;  %v735_v31 = vld [vmem:[%s18652_s8 + $0x1b8] sm:$0xff]  ;;  %v732_v35 = vld [vmem:[%s18652_s8 + $0x1a0] sm:$0xff] }
  0x2c   : > { %12578 = vmatprep.subr.bf16.mxu0 %v12577_v32  ;;  %v12591_v26 = vpack.c.bf16 %v727_v24, %v722_v23  ;;  %v733_v32 = vld [vmem:[%s18652_s8 + $0x1a8] sm:$0xff]  ;;  %v12563_v33 = vpack.c.bf16 %v735_v31, %v730_v30  ;;  %v746_v40 = vld [vmem:[%s18652_s8 + $0x210] sm:$0xff]  ;;  %v740_v42 = vld [vmem:[%s18652_s8 + $0x1e0] sm:$0xff] }
  0x2d   : > { %12556 = vmatpush1.bf16.msra.mxu1 %v12555_v5  ;;  %v12593_v37 = vpack.c.bf16 %v738_v34, %v733_v32  ;;  %v741_v39 = vld [vmem:[%s18652_s8 + $0x1e8] sm:$0xff]  ;;  %v743_v44 = vld [vmem:[%s18652_s8 + $0x1f8] sm:$0xff]  ;;  %v752_v1 = vld [vmem:[%s18652_s8 + $0x240] sm:$0xff] }
  0x2e   : > { %11579 = vmatmul.mubr.msk.f32.gmra.mrb[2].mxu0 %vm499_vm0, %v496_v6  ;;  %v718_v6 = vld [vmem:[%s18652_s8 + $0x130] sm:$0xff]  ;;  %12558 = vmatprep.subr.bf16.mxu1 %v12557_v17  ;;  %v12565_v41 = vpack.c.bf16 %v746_v40, %v741_v39  ;;  %v745_v43 = vld [vmem:[%s18652_s8 + $0x208] sm:$0xff]  ;;  %v684_v3 = vld [vmem:[%s18652_s8 + $0x20] sm:$0xff] }
  0x2f   : > { %12580 = vmatpush1.bf16.msra.mxu0 %v12579_v36  ;;  %v12585_v13 = vpack.c.bf16 %v718_v6, %v713_v4  ;;  %v737_v36 = vld [vmem:[%s18652_s8 + $0x1c8] sm:$0xff]  ;;  %v605_v11 = vld [vmem:[%s18648_s4] sm:$0xff]  ;;  %v694_v30 = vld [vmem:[%s18652_s8 + $0x70] sm:$0xff] }
  0x30   : > { %12582 = vmatprep.subr.bf16.mxu0 %v12581_v45  ;;  %v12595_v38 = vpack.c.bf16 %v737_v36, %v732_v35  ;;  %v12567_v45 = vpack.c.bf16 %v745_v43, %v740_v42  ;;  %v757_v2 = vld [vmem:[%s18652_s8 + $0x268] sm:$0xff]  ;;  %v10423_v27 = vld [vmem:[%s18650_s6] ss:$0 sm:$0xff]  ;;  %v699_v31 = vld [vmem:[%s18652_s8 + $0x98] sm:$0xff] }
  0x31   : > { %12560 = vmatpush1.bf16.msra.mxu1 %v12559_v21  ;;  %v12603_v4 = vpack.c.bf16 %v757_v2, %v752_v1  ;;  %v689_v5 = vld [vmem:[%s18652_s8 + $0x48] sm:$0xff]  ;;  %v12609_v36 = vpack.c.bf16 %v699_v31, %v694_v30  ;;  %v607_v2 = vld [vmem:[%s18648_s4 + $0x10] sm:$0xff]  ;;  %vm15246_vm2 = vmpackc.low %vm1027_vm1, %vm1027_vm1 }
  0x32   : > { %12562 = vmatprep.subr.bf16.mxu1 %v12561_v29  ;;  %v12605_v6 = vpack.c.bf16 %v689_v5, %v684_v3  ;;  %v606_v12 = vld [vmem:[%s18648_s4 + $0x8] sm:$0xff]  ;;  %v10424_v29 = vld [vmem:[%s18651_s7] ss:$0 sm:$0xff]  ;;  %v608_v3 = vld [vmem:[%s18648_s4 + $0x18] sm:$0xff] }
  0x33   : > { %12584 = vmatpush1.bf16.msra.mxu0 %v12583_v46  ;;  %v748_v46 = vld [vmem:[%s18652_s8 + $0x220] sm:$0xff]  ;;  %v709_v39 = vld [vmem:[%s18652_s8 + $0xe8] sm:$0xff] }
  0x34   : > { %12586 = vmatprep.subr.bf16.mxu0 %v12585_v13  ;;  %v14642_v13 = vpack.c.bf16 %v606_v12, %v605_v11 }
  0x35   : > { %12564 = vmatpush1.bf16.msra.mxu1 %v12563_v33 }
  0x36   : > { %12566 = vmatprep.subr.bf16.mxu1 %v12565_v41  ;;  %18714 = vst [vmem:[#allocation11_spill] sm:$0xff] %v14642_v13 }
  0x37   : > { %12588 = vmatpush1.bf16.msra.mxu0 %v12587_v14 }
  0x38   : > { %12590 = vmatprep.subr.bf16.mxu0 %v12589_v25 }
  0x39   : > { %12568 = vmatpush1.bf16.msra.mxu1 %v12567_v45  ;;  %v719_v45 = vld [vmem:[%s18652_s8 + $0x138] sm:$0xff] }
  0x3b   : > { %12592 = vmatpush1.bf16.msra.mxu0 %v12591_v26 }
  0x3c   : > { %12594 = vmatprep.subr.bf16.mxu0 %v12593_v37 }
  0x3f   : > { %12596 = vmatpush1.bf16.msra.mxu0 %v12595_v38  ;;  %v704_v38 = vld [vmem:[%s18652_s8 + $0xc0] sm:$0xff] }
  0xfd   : > { %v14404_v7 = vpop.f32.mrb[0].mxu0 }
  0xfe   : > { %v14406_v8 = vpop.f32.mrb[1].mxu0 }
  0xff   : > { %615 = vadd.xlane.f32.xlu0 %v14406_v8 }
 0x101   : > { %v14409_v9 = vpop.f32.mrb[2].mxu0 }
 0x102   : > { %18712 = vst [vmem:[#allocation9_spill] sm:$0xff] %v14409_v9  ;;  %v14411_v10 = vpop.f32.mrb[3].mxu0 }
 0x103   : > { %18713 = vst [vmem:[#allocation10_spill] sm:$0xff] %v14411_v10  ;;  %617 = vadd.xlane.f32.xlu0 %v14404_v7  ;;  %619 = vadd.xlane.f32.xlu1 %v14411_v10 }
 0x107   : > { %621 = vadd.xlane.f32.xlu1 %v14409_v9 }
 0x18c   : > { %v616_v47 = vpop.xlane.xlu0 %615 }
 0x18d   : > { %v624_v48 = vmul.f32 0.0078125, %v616_v47  ;;  %v742_v47 = vld [vmem:[%s18652_s8 + $0x1f0] sm:$0xff] }
 0x18f   : > { %v14489_v49 = vsub.f32 %v14406_v8, %v624_v48  ;;  %v747_v48 = vld [vmem:[%s18652_s8 + $0x218] sm:$0xff] }
 0x190   : > { %v618_v50 = vpop.xlane.xlu0 %617  ;;  %v620_v51 = vpop.xlane.xlu1 %619 }
 0x191   : > { %v625_v52 = vmul.f32 0.0078125, %v618_v50  ;;  %v626_v53 = vmul.f32 0.0078125, %v620_v51  ;;  %v632_v54 = vmul.f32 %v14489_v49, %v14489_v49  ;;  %v12597_v50 = vpack.c.bf16 %v748_v46, %v743_v44  ;;  %v714_v44 = vld [vmem:[%s18652_s8 + $0x110] sm:$0xff] }
 0x192   : > { %v12599_v51 = vpack.c.bf16 %v747_v48, %v742_v47  ;;  %v724_v48 = vld [vmem:[%s18652_s8 + $0x160] sm:$0xff] }
 0x193   : > { %636 = vadd.xlane.f32.xlu0 %v632_v54  ;;  %v14494_v55 = vsub.f32 %v14404_v7, %v625_v52  ;;  %v14497_v56 = vsub.f32 %v14411_v10, %v626_v53  ;;  %v751_v52 = vld [vmem:[%s18652_s8 + $0x238] sm:$0xff]  ;;  %v756_v53 = vld [vmem:[%s18652_s8 + $0x260] sm:$0xff]  ;;  %v750_v54 = vld [vmem:[%s18652_s8 + $0x230] sm:$0xff]  ;;  %12598 = vmatprep.subr.bf16.mxu0 %v12597_v50 }
 0x194   : > { %v622_v57 = vpop.xlane.xlu1 %621  ;;  %12600 = vmatpush1.bf16.msra.mxu0 %v12599_v51  ;;  %v729_v50 = vld [vmem:[%s18652_s8 + $0x188] sm:$0xff] }
 0x195   : > { %v627_v58 = vmul.f32 0.0078125, %v622_v57  ;;  %v633_v59 = vmul.f32 %v14494_v55, %v14494_v55  ;;  %v634_v60 = vmul.f32 %v14497_v56, %v14497_v56  ;;  %v18664_v57 = vmov 0.0  }
 0x196   : > { %824 = vmatprep.mubr.f32.mxu1 %v18664_v57  ;;  %913 = vmatprep.mubr.f32.mxu0 %v18664_v57 }
 0x197   : > { %638 = vadd.xlane.f32.xlu1 %v633_v59  ;;  %640 = vadd.xlane.f32.xlu0 %v634_v60  ;;  %v14504_v61 = vsub.f32 %v14409_v9, %v627_v58  ;;  %v12569_v58 = vpack.c.bf16 %v756_v53, %v751_v52  ;;  %v755_v59 = vld [vmem:[%s18652_s8 + $0x258] sm:$0xff]  ;;  %v753_v60 = vld [vmem:[%s18652_s8 + $0x248] sm:$0xff]  ;;  %v12621_v52 = vpack.c.bf16 %v729_v50, %v724_v48  ;;  %v734_v53 = vld [vmem:[%s18652_s8 + $0x1b0] sm:$0xff] }
 0x198   : > { %v12571_v63 = vpack.c.bf16 %v755_v59, %v750_v54  ;;  %v739_v54 = vld [vmem:[%s18652_s8 + $0x1d8] sm:$0xff]  ;;  %v744_v59 = vld [vmem:[%s18652_s8 + $0x200] sm:$0xff] }
 0x199   : > { %v635_v62 = vmul.f32 %v14504_v61, %v14504_v61  ;;  %12570 = vmatprep.subr.bf16.mxu1 %v12569_v58  ;;  %v12625_v58 = vpack.c.bf16 %v739_v54, %v734_v53 }
 0x19a   : > { %12572 = vmatpush1.bf16.msra.mxu1 %v12571_v63  ;;  %v754_v63 = vld [vmem:[%s18652_s8 + $0x250] sm:$0xff] }
 0x19b   : > { %642 = vadd.xlane.f32.xlu1 %v635_v62  ;;  %v758_v62 = vld [vmem:[%s18652_s8 + $0x270] sm:$0xff]  ;;  %12606 = vmatprep.subr.bf16.mxu1 %v12605_v6 }
 0x19c   : > { %v12601_v0 = vpack.c.bf16 %v758_v62, %v753_v60  ;;  %v749_v60 = vld [vmem:[%s18652_s8 + $0x228] sm:$0xff] }
 0x19d   : > { %v12629_v62 = vpack.c.bf16 %v749_v60, %v744_v59 }
 0x19e   : > { %12602 = vmatprep.subr.bf16.mxu0 %v12601_v0  ;;  %v759_v0 = vld [vmem:[%s18652_s8 + $0x278] sm:$0xff] }
 0x19f   : > { %12604 = vmatpush1.bf16.msra.mxu0 %v12603_v4  ;;  %v12633_v1 = vpack.c.bf16 %v759_v0, %v754_v63  ;;  %v14712_v4 = vpack.c.bf16 %v608_v3, %v607_v2 }
 0x1a0   : > { %12638 = vmatprep.subr.bf16.mxu0 %v14642_v13 }
 0x1a1   : > { %18715 = vst [vmem:[#allocation12_spill] sm:$0xff] %v14712_v4 }
 0x220   : > { %v637_v14 = vpop.xlane.xlu0 %636 }
 0x221   : > { %v644_v15 = vmul.f32 0.0078125, %v637_v14 }
 0x223   : > { %v648_v16 = vadd.f32 1e-05, %v644_v15 }
 0x224   : > { %v641_v17 = vpop.xlane.xlu0 %640  ;;  %v639_v18 = vpop.xlane.xlu1 %638 }
 0x225   : > { %13854 = vrsqrt.f32 %v648_v16  ;;  %v646_v19 = vmul.f32 0.0078125, %v641_v17  ;;  %v645_v20 = vmul.f32 0.0078125, %v639_v18 }
 0x227   : > { %v650_v21 = vadd.f32 1e-05, %v646_v19  ;;  %v649_v22 = vadd.f32 1e-05, %v645_v20 }
 0x228   : > { %v643_v23 = vpop.xlane.xlu1 %642 }
 0x229   : > { %13856 = vrsqrt.f32 %v650_v21  ;;  %v647_v24 = vmul.f32 0.0078125, %v643_v23 }
 0x22a   : > { %13858 = vrsqrt.f32 %v649_v22 }
 0x22b   : > { %v651_v25 = vadd.f32 1e-05, %v647_v24 }
 0x22d   : > { %13860 = vrsqrt.f32 %v651_v25 }
 0x22f   : > { %v13855_v26 = vpop.eup %13854 }
 0x230   : > { %v656_v28 = vmul.f32 %v13855_v26, %v14489_v49 }
 0x232   : > { %v666_v32 = vmul.f32 %v10423_v27, %v656_v28 }
 0x233   : > { %v13857_v33 = vpop.eup %13856 }
 0x234   : > { %v13859_v34 = vpop.eup %13858  ;;  %v676_v35 = vadd.f32 %v10424_v29, %v666_v32  ;;  %v658_v49 = vmul.f32 %v13857_v33, %v14497_v56  ;;  %v12613_v56 = vpack.c.bf16 %v709_v39, %v704_v38  ;;  %v14863_v38 = vld [vmem:[%s18646_s2 + $0x8] sm:$0xff]  ;;  %v14872_v39 = vld [vmem:[%s18646_s2 + $0x10] sm:$0xff] }
 0x235   : > { %v657_v37 = vmul.f32 %v13859_v34, %v14494_v55 }
 0x236   : > { %825 = vmatmul.mubr.f32.vlgmr.msra.gmra.mrb[0].mxu1 %v676_v35  ;;  %914 = vmatmul.mubr.f32.vlgmr.msra.gmra.mrb[4].mxu0 %v676_v35  ;;  %v668_v42 = vmul.f32 %v10423_v27, %v658_v49  ;;  %v14858_v49 = vld [vmem:[%s18646_s2] sm:$0xff] }
 0x237   : > { %v13861_v40 = vpop.eup %13860  ;;  %12608 = vmatpush3.bf16.msra.mxu1 %v12605_v6  ;;  %830 = vmatprep.mubr.f32.mxu1 %v18664_v57  ;;  %v667_v41 = vmul.f32 %v10423_v27, %v657_v37 }
 0x238   : > { %919 = vmatprep.mubr.f32.mxu0 %v18664_v57  ;;  %12610 = vmatprep.subr.bf16.mxu1 %v12609_v36  ;;  %v659_v43 = vmul.f32 %v13861_v40, %v14504_v61  ;;  %v678_v46 = vadd.f32 %v10424_v29, %v668_v42  ;;  %v12617_v61 = vpack.c.bf16 %v719_v45, %v714_v44 }
 0x239   : > { %v677_v55 = vadd.f32 %v10424_v29, %v667_v41  ;;  %12640 = vmatpush3.bf16.msra.mxu0 %v14642_v13 }
 0x23a   : > { %v669_v47 = vmul.f32 %v10423_v27, %v659_v43  ;;  %12642 = vmatprep.subr.bf16.mxu0 %v14712_v4 }
 0x23b   : > { %831 = vmatmul.mubr.f32.gmra.mrb[2].mxu1 %v677_v55  ;;  %920 = vmatmul.mubr.f32.gmra.mrb[6].mxu0 %v677_v55 }
 0x23c   : > { %12612 = vmatpush3.bf16.msra.mxu1 %v12609_v36  ;;  %836 = vmatprep.mubr.f32.mxu1 %v18664_v57  ;;  %v679_v51 = vadd.f32 %v10424_v29, %v669_v47 }
 0x23d   : > { %925 = vmatprep.mubr.f32.mxu0 %v18664_v57  ;;  %12614 = vmatprep.subr.bf16.mxu1 %v12613_v56 }
 0x23e   : > { %12644 = vmatpush3.bf16.msra.mxu0 %v14712_v4 }
 0x23f   : > { %837 = vmatmul.mubr.f32.gmra.mrb[4].mxu1 %v678_v46  ;;  %926 = vmatmul.mubr.f32.gmra.mrb[8].mxu0 %v678_v46 }
 0x240   : > { %12616 = vmatpush3.bf16.msra.mxu1 %v12613_v56  ;;  %842 = vmatprep.mubr.f32.mxu1 %v18664_v57 }
 0x241   : > { %931 = vmatprep.mubr.f32.mxu0 %v18664_v57  ;;  %12618 = vmatprep.subr.bf16.mxu1 %v12617_v61 }
 0x242   : > { %12646 = vmatprep.subr.bf16.mxu0 %v14642_v13 }
 0x243   : > { %843 = vmatmul.mubr.f32.gmra.mrb[6].mxu1 %v679_v51  ;;  %932 = vmatmul.mubr.f32.gmra.mrb[10].mxu0 %v679_v51 }
 0x244   : > { %12620 = vmatpush3.bf16.msra.mxu1 %v12617_v61  ;;  %11613 = vmatprep.mubr.f32.mxu1 %v676_v35 }
 0x245   : > { %12622 = vmatprep.subr.bf16.mxu1 %v12621_v52 }
 0x248   : > { %12624 = vmatpush3.bf16.msra.mxu1 %v12621_v52 }
 0x249   : > { %12626 = vmatprep.subr.bf16.mxu1 %v12625_v58 }
 0x24c   : > { %12628 = vmatpush3.bf16.msra.mxu1 %v12625_v58 }
 0x24d   : > { %12630 = vmatprep.subr.bf16.mxu1 %v12629_v62 }
 0x250   : > { %12632 = vmatpush3.bf16.msra.mxu1 %v12629_v62 }
 0x251   : > { %12634 = vmatprep.subr.bf16.mxu1 %v12633_v1 }
 0x254   : > { %12636 = vmatpush3.bf16.msra.mxu1 %v12633_v1 }
 0x255   : > { %12666 = vmatprep.subr.bf16.mxu1 %v14642_v13 }
 0x257   : > { %11614 = vmatmul.mubr.f32.vlgmr.msra.gmra.mrb[8].mxu1 %v677_v55 }
 0x258   : > { %11616 = vmatprep.mubr.f32.mxu1 %v678_v46  ;;  %12668 = vmatpush3.bf16.msra.mxu1 %v14642_v13 }
 0x259   : > { %12670 = vmatprep.subr.bf16.mxu1 %v14712_v4 }
 0x25b   : > { %11617 = vmatmul.mubr.f32.gmra.mrb[10].mxu1 %v679_v51 }
 0x25c   : > { %12672 = vmatpush3.bf16.msra.mxu1 %v14712_v4 }
 0x25d   : > { %12674 = vmatprep.subr.bf16.mxu1 %v14642_v13 }
 0x309   : > { %v14720_v5 = vpop.f32.mrb[0].mxu1  ;;  %v14722_v6 = vpop.f32.mrb[4].mxu0 }
 0x30a   : > { %v14724_v11 = vpop.f32.mrb[1].mxu1  ;;  %1415 = vrot.lane.b32.xlu1 %v14720_v5, %s18674_s30  ;;  %v917_v12 = vpop.f32.mrb[5].mxu0  ;;  %11627 = vmatprep.mubr.msk.f32.mxu0 %vm1027_vm1, %v14720_v5 }
 0x30b   : > { %1157 = vrot.lane.b32.xlu0 %v14724_v11, %s18676_s16 }
 0x30e   : > { %v14732_v14 = vpop.f32.mrb[2].mxu1  ;;  %v14734_v15 = vpop.f32.mrb[6].mxu0 }
 0x30f   : > { %v14736_v16 = vpop.f32.mrb[3].mxu1  ;;  %v923_v17 = vpop.f32.mrb[7].mxu0  ;;  %11628 = vmatmul.mubr.msk.f32.vlgmr.msra.gmra.mrb[12].mxu0 %vm1027_vm1, %v14732_v14 }
 0x310   : > { %v14740_v18 = vpack.i.bf16 %v923_v17, %v917_v12  ;;  %1159 = vrot.lane.b32.xlu1 %v14736_v16, %s18676_s16  ;;  %12648 = vmatpush3.bf16.msra.mxu0 %v14642_v13  ;;  %v14746_v19 = vpack.c.bf16 %v923_v17, %v917_v12 }
 0x311   : > { %12650 = vmatprep.subr.bf16.mxu0 %v14712_v4 }
 0x312   : > { %v14748_v20 = vpop.f32.mrb[4].mxu1  ;;  %v14750_v21 = vpop.f32.mrb[8].mxu0 }
 0x313   : > { %v14752_v22 = vpop.f32.mrb[5].mxu1  ;;  %v929_v23 = vpop.f32.mrb[9].mxu0  ;;  %11630 = vmatprep.mubr.msk.f32.mxu0 %vm1027_vm1, %v14748_v20 }
 0x314   : > { %1161 = vrot.lane.b32.xlu1 %v14752_v22, %s18676_s16  ;;  %12652 = vmatpush3.bf16.msra.mxu0 %v14712_v4 }
 0x316   : > { %v14759_v24 = vpop.f32.mrb[6].mxu1  ;;  %v14761_v25 = vpop.f32.mrb[10].mxu0 }
 0x317   : > { %v14763_v26 = vpop.f32.mrb[7].mxu1  ;;  %v935_v27 = vpop.f32.mrb[11].mxu0  ;;  %11631 = vmatmul.mubr.msk.f32.gmra.mrb[14].mxu0 %vm1027_vm1, %v14759_v24 }
 0x318   : > { %v14767_v28 = vpack.i.bf16 %v935_v27, %v929_v23  ;;  %1417 = vrot.lane.b32.xlu1 %v14732_v14, %s18674_s30  ;;  %1163 = vrot.lane.b32.xlu0 %v14763_v26, %s18676_s16  ;;  %v14773_v29 = vpack.c.bf16 %v935_v27, %v929_v23 }
 0x31c   : > { %1421 = vrot.lane.b32.xlu1 %v14759_v24, %s18674_s30  ;;  %1419 = vrot.lane.b32.xlu0 %v14748_v20, %s18674_s30 }
 0x320   : > { %1558 = vrot.lane.b32.xlu1 %v14736_v16, %s18672_s0  ;;  %1556 = vrot.lane.b32.xlu0 %v14724_v11, %s18672_s0 }
 0x324   : > { %1562 = vrot.lane.b32.xlu1 %v14763_v26, %s18672_s0  ;;  %1560 = vrot.lane.b32.xlu0 %v14752_v22, %s18672_s0 }
 0x328   : > { %1812 = vrot.lane.b32.xlu1 %v14732_v14, %s18676_s16  ;;  %1810 = vrot.lane.b32.xlu0 %v14720_v5, %s18676_s16 }
 0x32a   : > { %v14791_v30 = vpop.f32.mrb[8].mxu1 }
 0x32b   : > { %v14793_v31 = vpop.f32.mrb[9].mxu1 }
 0x32c   : > { %v14799_v33 = vpack.c.bf16 %v14791_v30, %v14793_v31  ;;  %1816 = vrot.lane.b32.xlu1 %v14759_v24, %s18676_s16  ;;  %1814 = vrot.lane.b32.xlu0 %v14748_v20, %s18676_s16 }
 0x32e   : > { %v14805_v34 = vpop.f32.mrb[10].mxu1 }
 0x32f   : > { %v14807_v35 = vpop.f32.mrb[11].mxu1 }
 0x330   : > { %v14813_v37 = vpack.c.bf16 %v14805_v34, %v14807_v35  ;;  %2167 = vrot.lane.b32.xlu1 %v14732_v14, %s18672_s0  ;;  %2165 = vrot.lane.b32.xlu0 %v14720_v5, %s18672_s0 }
 0x334   : > { %2171 = vrot.lane.b32.xlu1 %v14759_v24, %s18672_s0  ;;  %2169 = vrot.lane.b32.xlu0 %v14748_v20, %s18672_s0 }
 0x338   : > { %2294 = vrot.lane.b32.xlu0 %v14722_v6, %s18674_s30  ;;  %2296 = vrot.lane.b32.xlu1 %v14734_v15, %s18674_s30 }
 0x33c   : > { %2298 = vrot.lane.b32.xlu0 %v14750_v21, %s18674_s30  ;;  %2300 = vrot.lane.b32.xlu1 %v14761_v25, %s18674_s30 }
 0x340   : > { %2653 = vrot.lane.b32.xlu0 %v14722_v6, %s18676_s16  ;;  %2655 = vrot.lane.b32.xlu1 %v14734_v15, %s18676_s16 }
 0x344   : > { %2657 = vrot.lane.b32.xlu0 %v14750_v21, %s18676_s16  ;;  %2659 = vrot.lane.b32.xlu1 %v14761_v25, %s18676_s16 }
 0x348   : > { %2899 = vrot.lane.b32.xlu0 %v14724_v11, %s18674_s30  ;;  %2901 = vrot.lane.b32.xlu1 %v14736_v16, %s18674_s30 }
 0x34c   : > { %2903 = vrot.lane.b32.xlu0 %v14752_v22, %s18674_s30  ;;  %2905 = vrot.lane.b32.xlu1 %v14763_v26, %s18674_s30 }
 0x350   : > { %3028 = vrot.lane.b32.xlu0 %v14722_v6, %s18672_s0  ;;  %3030 = vrot.lane.b32.xlu1 %v14734_v15, %s18672_s0 }
 0x354   : > { %3032 = vrot.lane.b32.xlu0 %v14750_v21, %s18672_s0  ;;  %3034 = vrot.lane.b32.xlu1 %v14761_v25, %s18672_s0 }
 0x358   : > { %1137 = vrot.lane.b32.xlu0 %v14858_v49, %s18676_s16  ;;  %1139 = vrot.lane.b32.xlu1 %v14863_v38, %s18676_s16 }
 0x35c   : > { %1141 = vrot.lane.b32.xlu0 %v14872_v39, %s18676_s16 }
 0x37c   : > { %v1416_v40 = vpop.permute.xlu1 %1415 }
 0x37d   : > { %v1158_v41 = vpop.permute.xlu0 %1157  ;;  %11669 = vmatprep.mubr.msk.f32.mxu1 %vm1027_vm1, %v1416_v40 }
 0x37e   : > { %11641 = vmatprep.mubr.msk.f32.mxu0 %vm1027_vm1, %v1158_v41 }
 0x382   : > { %v1160_v55 = vpop.permute.xlu1 %1159 }
 0x383   : > { %11642 = vmatmul.mubr.msk.f32.vlgmr.msra.gmra.mrb[16].mxu0 %vm1027_vm1, %v1160_v55 }
 0x386   : > { %v1162_v56 = vpop.permute.xlu1 %1161 }
 0x387   : > { %11644 = vmatprep.mubr.msk.f32.mxu0 %vm1027_vm1, %v1162_v56 }
 0x38a   : > { %v1164_v42 = vpop.permute.xlu0 %1163  ;;  %v1418_v43 = vpop.permute.xlu1 %1417 }
 0x38b   : > { %11645 = vmatmul.mubr.msk.f32.gmra.mrb[18].mxu0 %vm1027_vm1, %v1164_v42  ;;  %11670 = vmatmul.mubr.msk.f32.vlgmr.msra.gmra.mrb[12].mxu1 %vm1027_vm1, %v1418_v43 }
 0x38c   : > { %12676 = vmatpush3.bf16.msra.mxu1 %v14642_v13 }
 0x38d   : > { %12678 = vmatprep.subr.bf16.mxu1 %v14712_v4 }
 0x38e   : > { %v1420_v44 = vpop.permute.xlu0 %1419  ;;  %v1422_v45 = vpop.permute.xlu1 %1421 }
 0x38f   : > { %11672 = vmatprep.mubr.msk.f32.mxu1 %vm1027_vm1, %v1420_v44  ;;  %v14970_v44 = vld [vmem:[%s18647_s3 + $0x8] sm:$0xff] }
 0x390   : > { %11673 = vmatmul.mubr.msk.f32.gmra.mrb[14].mxu1 %vm1027_vm1, %v1422_v45  ;;  %v14975_v45 = vld [vmem:[%s18647_s3] sm:$0xff] }
 0x391   : > { %12680 = vmatpush3.bf16.msra.mxu1 %v14712_v4 }
 0x392   : > { %v1557_v46 = vpop.permute.xlu0 %1556  ;;  %v1559_v61 = vpop.permute.xlu1 %1558  ;;  %12694 = vmatprep.subr.bf16.mxu1 %v14642_v13 }
 0x393   : > { %11683 = vmatprep.mubr.msk.f32.mxu1 %vm1027_vm1, %v1557_v46  ;;  %v1024_v46 = vmul.f32 %v14732_v14, %v14863_v38 }
 0x394   : > { %11684 = vmatmul.mubr.msk.f32.vlgmr.msra.gmra.mrb[16].mxu1 %vm1027_vm1, %v1559_v61 }
 0x395   : > { %12696 = vmatpush3.bf16.msra.mxu1 %v14642_v13 }
 0x396   : > { %v1561_v47 = vpop.permute.xlu0 %1560  ;;  %v1563_v48 = vpop.permute.xlu1 %1562  ;;  %12698 = vmatprep.subr.bf16.mxu1 %v14712_v4 }
 0x397   : > { %11686 = vmatprep.mubr.msk.f32.mxu1 %vm1027_vm1, %v1561_v47 }
 0x398   : > { %11687 = vmatmul.mubr.msk.f32.gmra.mrb[18].mxu1 %vm1027_vm1, %v1563_v48 }
 0x399   : > { %12700 = vmatpush3.bf16.msra.mxu1 %v14712_v4 }
 0x39a   : > { %v1811_v50 = vpop.permute.xlu0 %1810  ;;  %v1813_v51 = vpop.permute.xlu1 %1812  ;;  %12702 = vmatprep.subr.bf16.mxu1 %v14642_v13 }
 0x39b   : > { %11711 = vmatprep.mubr.msk.f32.mxu1 %vm1027_vm1, %v1811_v50 }
 0x39c   : > { %11712 = vmatmul.mubr.msk.f32.vlgmr.msra.gmra.mrb[20].mxu1 %vm1027_vm1, %v1813_v51 }
 0x39d   : > { %12704 = vmatpush3.bf16.msra.mxu1 %v14642_v13 }
 0x39e   : > { %v1815_v52 = vpop.permute.xlu0 %1814  ;;  %v1817_v53 = vpop.permute.xlu1 %1816  ;;  %12706 = vmatprep.subr.bf16.mxu1 %v14712_v4 }
 0x39f   : > { %11714 = vmatprep.mubr.msk.f32.mxu1 %vm1027_vm1, %v1815_v52  ;;  %v14989_v52 = vld [vmem:[%s18646_s2 + $0x18] sm:$0xff] }
 0x3a0   : > { %11715 = vmatmul.mubr.msk.f32.gmra.mrb[22].mxu1 %vm1027_vm1, %v1817_v53  ;;  %v14994_v53 = vld [vmem:[%s18647_s3 + $0x18] sm:$0xff] }
 0x3a1   : > { %12708 = vmatpush3.bf16.msra.mxu1 %v14712_v4  ;;  %11725 = vmatprep.mubr.msk.f32.mxu1 %vm1027_vm1, %v14722_v6 }
 0x3a2   : > { %v2166_v54 = vpop.permute.xlu0 %2165  ;;  %v2168_v58 = vpop.permute.xlu1 %2167  ;;  %12722 = vmatprep.subr.bf16.mxu1 %v14642_v13 }
 0x3a4   : > { %11726 = vmatmul.mubr.msk.f32.vlgmr.msra.gmra.mrb[24].mxu1 %vm1027_vm1, %v14734_v15 }
 0x3a5   : > { %12724 = vmatpush3.bf16.msra.mxu1 %v14642_v13  ;;  %11728 = vmatprep.mubr.msk.f32.mxu1 %vm1027_vm1, %v14750_v21 }
 0x3a6   : > { %v2170_v59 = vpop.permute.xlu0 %2169  ;;  %12726 = vmatprep.subr.bf16.mxu1 %v14712_v4  ;;  %v2172_v60 = vpop.permute.xlu1 %2171 }
 0x3a8   : > { %11729 = vmatmul.mubr.msk.f32.gmra.mrb[26].mxu1 %vm1027_vm1, %v14761_v25 }
 0x3a9   : > { %12728 = vmatpush3.bf16.msra.mxu1 %v14712_v4  ;;  %11753 = vmatprep.mubr.msk.f32.mxu1 %vm1027_vm1, %v2166_v54  ;;  %v14999_v54 = vld [vmem:[%s18647_s3 + $0x10] sm:$0xff] }
 0x3aa   : > { %v2295_v62 = vpop.permute.xlu0 %2294  ;;  %12730 = vmatprep.subr.bf16.mxu1 %v14642_v13  ;;  %v2297_v63 = vpop.permute.xlu1 %2296 }
 0x3ac   : > { %11754 = vmatmul.mubr.msk.f32.vlgmr.msra.gmra.mrb[28].mxu1 %vm1027_vm1, %v2168_v58 }
 0x3ad   : > { %12732 = vmatpush3.bf16.msra.mxu1 %v14642_v13  ;;  %11756 = vmatprep.mubr.msk.f32.mxu1 %vm1027_vm1, %v2170_v59  ;;  %v1026_v59 = vmul.f32 %v14759_v24, %v14989_v52 }
 0x3ae   : > { %12734 = vmatprep.subr.bf16.mxu1 %v14712_v4  ;;  %v2299_v0 = vpop.permute.xlu0 %2298  ;;  %v2301_v1 = vpop.permute.xlu1 %2300 }
 0x3b0   : > { %11757 = vmatmul.mubr.msk.f32.gmra.mrb[30].mxu1 %vm1027_vm1, %v2172_v60 }
 0x3b1   : > { %12736 = vmatpush3.bf16.msra.mxu1 %v14712_v4  ;;  %11767 = vmatprep.mubr.msk.f32.mxu1 %vm1027_vm1, %v2295_v62 }
 0x3b2   : > { %12750 = vmatprep.subr.bf16.mxu1 %v14642_v13  ;;  %v2654_v2 = vpop.permute.xlu0 %2653  ;;  %v2656_v3 = vpop.permute.xlu1 %2655 }
 0x3b4   : > { %11768 = vmatmul.mubr.msk.f32.vlgmr.msra.gmra.mrb[32].mxu1 %vm1027_vm1, %v2297_v63  ;;  %v1025_v63 = vmul.f32 %v14748_v20, %v14872_v39 }
 0x3b5   : > { %12752 = vmatpush3.bf16.msra.mxu1 %v14642_v13  ;;  %11770 = vmatprep.mubr.msk.f32.mxu1 %vm1027_vm1, %v2299_v0 }
 0x3b6   : > { %12754 = vmatprep.subr.bf16.mxu1 %v14712_v4  ;;  %v2658_v12 = vpop.permute.xlu0 %2657  ;;  %v2660_v17 = vpop.permute.xlu1 %2659 }
 0x3b8   : > { %11771 = vmatmul.mubr.msk.f32.gmra.mrb[34].mxu1 %vm1027_vm1, %v2301_v1 }
 0x3b9   : > { %12756 = vmatpush3.bf16.msra.mxu1 %v14712_v4  ;;  %11795 = vmatprep.mubr.msk.f32.mxu1 %vm1027_vm1, %v14724_v11 }
 0x3ba   : > { %12758 = vmatprep.subr.bf16.mxu1 %v14642_v13  ;;  %v2900_v23 = vpop.permute.xlu0 %2899  ;;  %v2902_v27 = vpop.permute.xlu1 %2901 }
 0x3bc   : > { %11796 = vmatmul.mubr.msk.f32.vlgmr.msra.gmra.mrb[36].mxu1 %vm1027_vm1, %v14736_v16 }
 0x3bd   : > { %12760 = vmatpush3.bf16.msra.mxu1 %v14642_v13  ;;  %11798 = vmatprep.mubr.msk.f32.mxu1 %vm1027_vm1, %v14752_v22 }
 0x3be   : > { %12762 = vmatprep.subr.bf16.mxu1 %v14712_v4  ;;  %v2904_v40 = vpop.permute.xlu0 %2903  ;;  %v2906_v41 = vpop.permute.xlu1 %2905 }
 0x3c0   : > { %11799 = vmatmul.mubr.msk.f32.gmra.mrb[38].mxu1 %vm1027_vm1, %v14763_v26 }
 0x3c1   : > { %12764 = vmatpush3.bf16.msra.mxu1 %v14712_v4  ;;  %11809 = vmatprep.mubr.msk.f32.mxu1 %vm1027_vm1, %v2654_v2 }
 0x3c2   : > { %12778 = vmatprep.subr.bf16.mxu1 %v14642_v13  ;;  %v3029_v55 = vpop.permute.xlu0 %3028  ;;  %v3031_v56 = vpop.permute.xlu1 %3030 }
 0x3c4   : > { %11810 = vmatmul.mubr.msk.f32.vlgmr.msra.gmra.mrb[40].mxu1 %vm1027_vm1, %v2656_v3 }
 0x3c5   : > { %12780 = vmatpush3.bf16.msra.mxu1 %v14642_v13  ;;  %11812 = vmatprep.mubr.msk.f32.mxu1 %vm1027_vm1, %v2658_v12 }
 0x3c6   : > { %12782 = vmatprep.subr.bf16.mxu1 %v14712_v4  ;;  %v3033_v42 = vpop.permute.xlu0 %3032  ;;  %v3035_v43 = vpop.permute.xlu1 %3034 }
 0x3c8   : > { %11813 = vmatmul.mubr.msk.f32.gmra.mrb[42].mxu1 %vm1027_vm1, %v2660_v17 }
 0x3c9   : > { %12784 = vmatpush3.bf16.msra.mxu1 %v14712_v4  ;;  %11837 = vmatprep.mubr.msk.f32.mxu1 %vm1027_vm1, %v2900_v23 }
 0x3ca   : > { %12786 = vmatprep.subr.bf16.mxu1 %v14642_v13 }
 0x3cc   : > { %11838 = vmatmul.mubr.msk.f32.vlgmr.msra.gmra.mrb[44].mxu1 %vm1027_vm1, %v2902_v27 }
 0x3cd   : > { %12788 = vmatpush3.bf16.msra.mxu1 %v14642_v13  ;;  %11840 = vmatprep.mubr.msk.f32.mxu1 %vm1027_vm1, %v2904_v40 }
 0x3ce   : > { %12790 = vmatprep.subr.bf16.mxu1 %v14712_v4 }
 0x3d0   : > { %11841 = vmatmul.mubr.msk.f32.gmra.mrb[46].mxu1 %vm1027_vm1, %v2906_v41 }
 0x3d1   : > { %12792 = vmatpush3.bf16.msra.mxu1 %v14712_v4  ;;  %11851 = vmatprep.mubr.msk.f32.mxu1 %vm1027_vm1, %v3029_v55 }
 0x3d2   : > { %12806 = vmatprep.subr.bf16.mxu1 %v14746_v19 }
 0x3d4   : > { %11852 = vmatmul.mubr.msk.f32.vlgmr.msra.gmra.mrb[48].mxu1 %vm1027_vm1, %v3031_v56 }
 0x3d5   : > { %12808 = vmatpush3.bf16.msra.mxu1 %v14746_v19  ;;  %11854 = vmatprep.mubr.msk.f32.mxu1 %vm1027_vm1, %v3033_v42 }
 0x3d6   : > { %12810 = vmatprep.subr.bf16.mxu1 %v14773_v29 }
 0x3d8   : > { %11855 = vmatmul.mubr.msk.f32.gmra.mrb[50].mxu1 %vm1027_vm1, %v3035_v43 }
 0x3d9   : > { %12812 = vmatpush3.bf16.msra.mxu1 %v14773_v29  ;;  %v1023_v29 = vmul.f32 %v14720_v5, %v14858_v49 }
 0x3e2   : > { %v11629_v19 = vpop.f32.mrb[12].mxu0 }
 0x3e3   : > { %v1126_v61 = vmul.f32 %v11629_v19, %v14970_v44  ;;  %v1106_v47 = vpop.f32.mrb[13].mxu0 }
 0x3e4   : > { %v1125_v48 = vmul.f32 %v1106_v47, %v14975_v45 }
 0x3e5   : > { %v14983_v50 = vadd.f32 %v1126_v61, %v1024_v46 }
 0x3e6   : > { %v1129_v51 = vadd.f32 %v1125_v48, %v1023_v29 }
 0x3e8   : > { %11655 = vmatprep.mubr.msk.f32.mxu0 %vm1027_vm1, %v1129_v51 }
 0x3ea   : > { %v11632_v58 = vpop.f32.mrb[14].mxu0 }
 0x3eb   : > { %v1128_v60 = vmul.f32 %v11632_v58, %v14994_v53  ;;  %v1116_v62 = vpop.f32.mrb[15].mxu0 }
 0x3ec   : > { %v1127_v0 = vmul.f32 %v1116_v62, %v14999_v54 }
 0x3ed   : > { %v15007_v1 = vadd.f32 %v1128_v60, %v1026_v59 }
 0x3ee   : > { %v15009_v2 = vadd.f32 %v1127_v0, %v1025_v63 }
 0x456   : > { %v11643_v3 = vpop.f32.mrb[16].mxu0 }
 0x457   : > { %v1259_v12 = vmul.f32 %v11643_v3, %v14970_v44  ;;  %v1239_v17 = vpop.f32.mrb[17].mxu0 }
 0x458   : > { %v1258_v23 = vmul.f32 %v1239_v17, %v14975_v45 }
 0x459   : > { %1268 = vrot.lane.b32.xlu1 %v1259_v12, %s18676_s16 }
 0x45a   : > { %1266 = vrot.lane.b32.xlu0 %v1258_v23, %s18676_s16  ;;  %v1936_v23 = vmul.f32 %v14734_v15, %v14863_v38 }
 0x45d   : > { %1143 = vrot.lane.b32.xlu1 %v14989_v52, %s18676_s16 }
 0x45e   : > { %v11671_v27 = vpop.f32.mrb[12].mxu1  ;;  %1540 = vrot.lane.b32.xlu0 %v14858_v49, %s18674_s30  ;;  %v11646_v40 = vpop.f32.mrb[18].mxu0 }
 0x45f   : > { %v1261_v41 = vmul.f32 %v11646_v40, %v14994_v53  ;;  %v1249_v55 = vpop.f32.mrb[19].mxu0  ;;  %v1497_v56 = vpop.f32.mrb[13].mxu1  ;;  %v1517_v17 = vmul.f32 %v11671_v27, %v14970_v44  ;;  %v1938_v27 = vmul.f32 %v14761_v25, %v14989_v52 }
 0x460   : > { %v1260_v42 = vmul.f32 %v1249_v55, %v14999_v54  ;;  %v1516_v3 = vmul.f32 %v1497_v56, %v14975_v45  ;;  %v1935_v55 = vmul.f32 %v14722_v6, %v14858_v49 }
 0x461   : > { %1272 = vrot.lane.b32.xlu1 %v1261_v41, %s18676_s16 }
 0x462   : > { %1270 = vrot.lane.b32.xlu0 %v1260_v42, %s18676_s16 }
 0x463   : > { %v11674_v43 = vpop.f32.mrb[14].mxu1 }
 0x464   : > { %v1507_v19 = vpop.f32.mrb[15].mxu1 }
 0x465   : > { %1542 = vrot.lane.b32.xlu1 %v14863_v38, %s18674_s30 }
 0x466   : > { %1544 = vrot.lane.b32.xlu0 %v14872_v39, %s18674_s30 }
 0x467   : > { %v11685_v46 = vpop.f32.mrb[16].mxu1 }
 0x468   : > { %v1658_v61 = vmul.f32 %v11685_v46, %v14970_v44  ;;  %v1638_v47 = vpop.f32.mrb[17].mxu1 }
 0x469   : > { %v1657_v29 = vmul.f32 %v1638_v47, %v14975_v45 }
 0x46a   : > { %1667 = vrot.lane.b32.xlu1 %v1658_v61, %s18674_s30 }
 0x46b   : > { %v11688_v48 = vpop.f32.mrb[18].mxu1  ;;  %1665 = vrot.lane.b32.xlu0 %v1657_v29, %s18674_s30 }
 0x46c   : > { %v1648_v51 = vpop.f32.mrb[19].mxu1  ;;  %v1660_v59 = vmul.f32 %v11688_v48, %v14994_v53  ;;  %v1518_v48 = vmul.f32 %v1507_v19, %v14999_v54 }
 0x46d   : > { %v1659_v62 = vmul.f32 %v1648_v51, %v14999_v54 }
 0x46e   : > { %1546 = vrot.lane.b32.xlu1 %v14989_v52, %s18674_s30 }
 0x46f   : > { %v11713_v58 = vpop.f32.mrb[20].mxu1  ;;  %1399 = vrot.lane.b32.xlu0 %v14858_v49, %s18672_s0 }
 0x470   : > { %v1892_v60 = vpop.f32.mrb[21].mxu1 }
 0x471   : > { %v1911_v19 = vmul.f32 %v1892_v60, %v14975_v45 }
 0x472   : > { %1671 = vrot.lane.b32.xlu1 %v1660_v59, %s18674_s30  ;;  %v1937_v59 = vmul.f32 %v14750_v21, %v14872_v39 }
 0x473   : > { %v11716_v63 = vpop.f32.mrb[22].mxu1  ;;  %1669 = vrot.lane.b32.xlu0 %v1659_v62, %s18674_s30 }
 0x474   : > { %v1902_v0 = vpop.f32.mrb[23].mxu1 }
 0x476   : > { %1401 = vrot.lane.b32.xlu1 %v14863_v38, %s18672_s0 }
 0x477   : > { %v11727_v12 = vpop.f32.mrb[24].mxu1  ;;  %1524 = vrot.lane.b32.xlu0 %v1516_v3, %s18672_s0 }
 0x478   : > { %v2037_v40 = vmul.f32 %v11727_v12, %v14970_v44  ;;  %v2017_v41 = vpop.f32.mrb[25].mxu1 }
 0x479   : > { %v2036_v42 = vmul.f32 %v2017_v41, %v14975_v45 }
 0x47a   : > { %v2041_v56 = vadd.f32 %v2037_v40, %v1936_v23  ;;  %1526 = vrot.lane.b32.xlu1 %v1517_v17, %s18672_s0  ;;  %v1519_v23 = vmul.f32 %v11674_v43, %v14994_v53 }
 0x47b   : > { %v2040_v46 = vadd.f32 %v2036_v42, %v1935_v55  ;;  %v11730_v61 = vpop.f32.mrb[26].mxu1  ;;  %1403 = vrot.lane.b32.xlu0 %v14872_v39, %s18672_s0  ;;  %v1912_v42 = vmul.f32 %v11713_v58, %v14970_v44  ;;  %v1913_v58 = vmul.f32 %v1902_v0, %v14999_v54 }
 0x47c   : > { %v2039_v47 = vmul.f32 %v11730_v61, %v14994_v53  ;;  %v2027_v29 = vpop.f32.mrb[27].mxu1 }
 0x47d   : > { %v15057_v51 = vpack.c.bf16 %v2041_v56, %v2040_v46  ;;  %v2038_v62 = vmul.f32 %v2027_v29, %v14999_v54  ;;  %v1914_v46 = vmul.f32 %v11716_v63, %v14994_v53 }
 0x47e   : > { %v2043_v3 = vadd.f32 %v2039_v47, %v1938_v27  ;;  %1405 = vrot.lane.b32.xlu1 %v14989_v52, %s18672_s0 }
 0x47f   : > { %v2042_v12 = vadd.f32 %v2038_v62, %v1937_v59  ;;  %v15064_v17 = vpop.f32.mrb[28].mxu1  ;;  %1528 = vrot.lane.b32.xlu0 %v1518_v48, %s18672_s0  ;;  %v2545_v62 = vmul.f32 %v14736_v16, %v14863_v38  ;;  %v2547_v38 = vmul.f32 %v14763_v26, %v14989_v52 }
 0x480   : > { %v2247_v40 = vpop.f32.mrb[29].mxu1  ;;  %v2267_v13 = vmul.f32 %v15064_v17, %v14970_v44 }
 0x481   : > { %v15069_v41 = vpack.c.bf16 %v2043_v3, %v2042_v12 }
 0x482   : > { %1530 = vrot.lane.b32.xlu1 %v1519_v23, %s18672_s0  ;;  %v2544_v23 = vmul.f32 %v14724_v11, %v14858_v49  ;;  %v2546_v49 = vmul.f32 %v14752_v22, %v14872_v39 }
 0x483   : > { %v15072_v55 = vpop.f32.mrb[30].mxu1  ;;  %1919 = vrot.lane.b32.xlu0 %v1911_v19, %s18676_s16 }
 0x484   : > { %v15076_v56 = vpop.f32.mrb[31].mxu1  ;;  %v2269_v17 = vmul.f32 %v15072_v55, %v14994_v53 }
 0x486   : > { %1921 = vrot.lane.b32.xlu1 %v1912_v42, %s18676_s16 }
 0x487   : > { %v11769_v43 = vpop.f32.mrb[32].mxu1  ;;  %1925 = vrot.lane.b32.xlu0 %v1914_v46, %s18676_s16 }
 0x488   : > { %v2396_v60 = vmul.f32 %v11769_v43, %v14970_v44  ;;  %v2376_v61 = vpop.f32.mrb[33].mxu1  ;;  %v2266_v43 = vmul.f32 %v2247_v40, %v14975_v45 }
 0x489   : > { %v2395_v27 = vmul.f32 %v2376_v61, %v14975_v45 }
 0x48a   : > { %2405 = vrot.lane.b32.xlu1 %v2396_v60, %s18672_s0 }
 0x48b   : > { %v11772_v47 = vpop.f32.mrb[34].mxu1  ;;  %2403 = vrot.lane.b32.xlu0 %v2395_v27, %s18672_s0 }
 0x48c   : > { %v2386_v29 = vpop.f32.mrb[35].mxu1  ;;  %v2398_v59 = vmul.f32 %v11772_v47, %v14994_v53 }
 0x48d   : > { %v2397_v63 = vmul.f32 %v2386_v29, %v14999_v54 }
 0x48e   : > { %1923 = vrot.lane.b32.xlu1 %v1913_v58, %s18676_s16 }
 0x48f   : > { %v11797_v48 = vpop.f32.mrb[36].mxu1  ;;  %2407 = vrot.lane.b32.xlu0 %v2397_v63, %s18672_s0 }
 0x490   : > { %v2642_v3 = vmul.f32 %v11797_v48, %v14970_v44  ;;  %v2622_v12 = vpop.f32.mrb[37].mxu1 }
 0x491   : > { %v2641_v0 = vmul.f32 %v2622_v12, %v14975_v45 }
 0x492   : > { %v15096_v19 = vadd.f32 %v2642_v3, %v2545_v62  ;;  %2409 = vrot.lane.b32.xlu1 %v2398_v59, %s18672_s0 }
 0x493   : > { %v15099_v42 = vadd.f32 %v2641_v0, %v2544_v23  ;;  %v11800_v46 = vpop.f32.mrb[38].mxu1 }
 0x494   : > { %v2644_v60 = vmul.f32 %v11800_v46, %v14994_v53  ;;  %v2632_v61 = vpop.f32.mrb[39].mxu1 }
 0x495   : > { %v2643_v27 = vmul.f32 %v2632_v61, %v14999_v54 }
 0x496   : > { %v15108_v47 = vadd.f32 %v2644_v60, %v2547_v38  ;;  %2274 = vrot.lane.b32.xlu1 %v2266_v43, %s18674_s30  ;;  %v15125_v38 = vpop.permute.xlu0 %1137  ;;  %v15127_v60 = vpop.permute.xlu1 %1139 }
 0x497   : > { %v15111_v58 = vadd.f32 %v2643_v27, %v2546_v49  ;;  %v11811_v29 = vpop.f32.mrb[40].mxu1  ;;  %v1150_v49 = vmul.f32 %v15127_v60, %v14736_v16 }
 0x498   : > { %v2755_v40 = vmul.f32 %v11811_v29, %v14970_v44  ;;  %v2735_v63 = vpop.f32.mrb[41].mxu1  ;;  %v1149_v29 = vmul.f32 %v15125_v38, %v14724_v11 }
 0x499   : > { %v2754_v52 = vmul.f32 %v2735_v63, %v14975_v45 }
 0x49a   : > { %2764 = vrot.lane.b32.xlu0 %v2755_v40, %s18676_s16  ;;  %v15129_v61 = vpop.permute.xlu0 %1141 }
 0x49b   : > { %v11814_v48 = vpop.f32.mrb[42].mxu1  ;;  %2762 = vrot.lane.b32.xlu1 %v2754_v52, %s18676_s16  ;;  %v1151_v10 = vmul.f32 %v15129_v61, %v14752_v22 }
 0x49c   : > { %v2745_v39 = vpop.f32.mrb[43].mxu1 }
 0x49f   : > { %v15117_v59 = vpop.f32.mrb[44].mxu1 }
 0x4a0   : > { %v15119_v62 = vpop.f32.mrb[45].mxu1 }
 0x4a3   : > { %v15121_v3 = vpop.f32.mrb[46].mxu1 }
 0x4a4   : > { %v15123_v12 = vpop.f32.mrb[47].mxu1 }
 0x4a7   : > { %v11853_v23 = vpop.f32.mrb[48].mxu1 }
 0x4a8   : > { %v3110_v0 = vpop.f32.mrb[49].mxu1 }
 0x4ab   : > { %v11856_v46 = vpop.f32.mrb[50].mxu1 }
 0x4ac   : > { %v3120_v43 = vpop.f32.mrb[51].mxu1 }
 0x4cb   : > { %v1269_v27 = vpop.permute.xlu1 %1268 }
 0x4cc   : > { %v1279_v40 = vadd.f32 %v1269_v27, %v1150_v49  ;;  %v1267_v63 = vpop.permute.xlu0 %1266 }
 0x4cd   : > { %v1278_v52 = vadd.f32 %v1267_v63, %v1149_v29 }
 0x4cf   : > { %v13644_v57 = vpack.i.bf16 %v1279_v40, %v1278_v52  ;;  %v15135_v36 = vpop.permute.xlu1 %1143  ;;  %v2756_v40 = vmul.f32 %v2745_v39, %v14999_v54 }
 0x4d0   : > { %v15137_v32 = vpop.permute.xlu0 %1540  ;;  %v1152_v4 = vmul.f32 %v15135_v36, %v14763_v26 }
 0x4d1   : > { %13645 = vrot.lane.b32.xlu0 %v13644_v57, %s18676_s16 }
 0x4d3   : > { %v1273_v9 = vpop.permute.xlu1 %1272 }
 0x4d4   : > { %v1281_v49 = vadd.f32 %v1273_v9, %v1152_v4  ;;  %v1271_v27 = vpop.permute.xlu0 %1270  ;;  %v2757_v9 = vmul.f32 %v11814_v48, %v14994_v53  ;;  %v1552_v4 = vmul.f32 %v15137_v32, %v14724_v11 }
 0x4d5   : > { %v1280_v29 = vadd.f32 %v1271_v27, %v1151_v10  ;;  %2276 = vrot.lane.b32.xlu0 %v2267_v13, %s18674_s30 }
 0x4d7   : > { %v13649_v63 = vpack.i.bf16 %v1281_v49, %v1280_v29  ;;  %v15148_v52 = vpop.permute.xlu1 %1542  ;;  %v2268_v29 = vmul.f32 %v15076_v56, %v14999_v54 }
 0x4d8   : > { %v15150_v57 = vpop.permute.xlu0 %1544  ;;  %v1553_v10 = vmul.f32 %v15148_v52, %v14736_v16 }
 0x4d9   : > { %2766 = vrot.lane.b32.xlu0 %v2756_v40, %s18676_s16  ;;  %13650 = vrot.lane.b32.xlu1 %v13649_v63, %s18676_s16  ;;  %v3129_v63 = vmul.f32 %v3110_v0, %v14975_v45  ;;  %v1554_v56 = vmul.f32 %v15150_v57, %v14752_v22 }
 0x4dc   : > { %v1668_v13 = vpop.permute.xlu1 %1667 }
 0x4dd   : > { %v1678_v39 = vadd.f32 %v1668_v13, %v1553_v10  ;;  %2280 = vrot.lane.b32.xlu0 %v2269_v17, %s18674_s30  ;;  %2768 = vrot.lane.b32.xlu1 %v2757_v9, %s18676_s16  ;;  %v1666_v49 = vpop.permute.xlu0 %1665  ;;  %v3130_v9 = vmul.f32 %v11853_v23, %v14970_v44 }
 0x4de   : > { %v1677_v27 = vadd.f32 %v1666_v49, %v1552_v4  ;;  %v3131_v49 = vmul.f32 %v3120_v43, %v14999_v54 }
 0x4e0   : > { %v13654_v55 = vpack.i.bf16 %v1678_v39, %v1677_v27  ;;  %v15165_v40 = vpop.permute.xlu1 %1546 }
 0x4e1   : > { %2278 = vrot.lane.b32.xlu1 %v2268_v29, %s18674_s30  ;;  %v15168_v48 = vpop.permute.xlu0 %1399  ;;  %v1555_v17 = vmul.f32 %v15165_v40, %v14763_v26 }
 0x4e2   : > { %18716 = vst [vmem:[#allocation13_spill] sm:$0xff] %v15168_v48  ;;  %13655 = vrot.lane.b32.xlu0 %v13654_v55, %s18672_s0  ;;  %v1411_v23 = vmul.f32 %v15168_v48, %v14720_v5  ;;  %v3132_v55 = vmul.f32 %v11856_v46, %v14994_v53 }
 0x4e4   : > { %v1672_v10 = vpop.permute.xlu1 %1671 }
 0x4e5   : > { %v1680_v13 = vadd.f32 %v1672_v10, %v1555_v17  ;;  %3137 = vrot.lane.b32.xlu1 %v3129_v63, %s18674_s30  ;;  %v1670_v4 = vpop.permute.xlu0 %1669 }
 0x4e6   : > { %v1679_v39 = vadd.f32 %v1670_v4, %v1554_v56  ;;  %3139 = vrot.lane.b32.xlu0 %v3130_v9, %s18674_s30  ;;  %v3000_v9 = vmul.f32 %v15119_v62, %v14975_v45 }
 0x4e8   : > { %v13659_v27 = vpack.i.bf16 %v1680_v13, %v1679_v39  ;;  %v15180_v0 = vpop.permute.xlu1 %1401  ;;  %v3001_v39 = vmul.f32 %v15117_v59, %v14970_v44 }
 0x4e9   : > { %18717 = vst [vmem:[#allocation14_spill] sm:$0xff] %v15180_v0  ;;  %v1525_v29 = vpop.permute.xlu0 %1524  ;;  %v1412_v43 = vmul.f32 %v15180_v0, %v14732_v14  ;;  %v2291_v44 = vmul.f32 %v15180_v0, %v14734_v15 }
 0x4ea   : > { %3141 = vrot.lane.b32.xlu0 %v3131_v49, %s18674_s30  ;;  %13660 = vrot.lane.b32.xlu1 %v13659_v27, %s18672_s0  ;;  %v1536_v63 = vadd.f32 %v1525_v29, %v1411_v23 }
 0x4ec   : > { %v1527_v17 = vpop.permute.xlu1 %1526 }
 0x4ed   : > { %v15187_v10 = vpop.permute.xlu0 %1403  ;;  %v1537_v56 = vadd.f32 %v1527_v17, %v1412_v43  ;;  %v2290_v43 = vmul.f32 %v15168_v48, %v14722_v6 }
 0x4ee   : > { %18718 = vst [vmem:[#allocation15_spill] sm:$0xff] %v15187_v10  ;;  %3143 = vrot.lane.b32.xlu1 %v3132_v55, %s18674_s30  ;;  %1685 = vrot.lane.b32.xlu0 %v1536_v63, %s18674_s30  ;;  %v1413_v46 = vmul.f32 %v15187_v10, %v14748_v20  ;;  %v1806_v63 = vmul.f32 %v15125_v38, %v14720_v5 }
 0x4f0   : > { %v15195_v13 = vpop.permute.xlu1 %1405 }
 0x4f1   : > { %18719 = vst [vmem:[#allocation16_spill] sm:$0xff] %v15195_v13  ;;  %v1529_v4 = vpop.permute.xlu0 %1528  ;;  %v1414_v45 = vmul.f32 %v15195_v13, %v14759_v24 }
 0x4f2   : > { %1687 = vrot.lane.b32.xlu1 %v1537_v56, %s18674_s30  ;;  %3008 = vrot.lane.b32.xlu0 %v3000_v9, %s18672_s0  ;;  %v1538_v49 = vadd.f32 %v1529_v4, %v1413_v46 }
 0x4f4   : > { %v1531_v27 = vpop.permute.xlu1 %1530 }
 0x4f5   : > { %v1920_v29 = vpop.permute.xlu0 %1919  ;;  %v1539_v62 = vadd.f32 %v1531_v27, %v1414_v45  ;;  %v2293_v45 = vmul.f32 %v15195_v13, %v14761_v25 }
 0x4f6   : > { %3010 = vrot.lane.b32.xlu1 %v3001_v39, %s18672_s0  ;;  %1689 = vrot.lane.b32.xlu0 %v1538_v49, %s18674_s30  ;;  %v1931_v59 = vadd.f32 %v1920_v29, %v1806_v63  ;;  %v1807_v49 = vmul.f32 %v15127_v60, %v14732_v14  ;;  %v2292_v29 = vmul.f32 %v15187_v10, %v14750_v21 }
 0x4f8   : > { %v1922_v23 = vpop.permute.xlu1 %1921 }
 0x4f9   : > { %v1926_v55 = vpop.permute.xlu0 %1925 }
 0x4fa   : > { %1691 = vrot.lane.b32.xlu1 %v1539_v62, %s18674_s30  ;;  %v1932_v62 = vadd.f32 %v1922_v23, %v1807_v49  ;;  %v2650_v23 = vmul.f32 %v15127_v60, %v14734_v15 }
 0x4fc   : > { %v2406_v17 = vpop.permute.xlu1 %2405 }
 0x4fd   : > { %v2416_v9 = vadd.f32 %v2406_v17, %v2291_v44  ;;  %v2404_v56 = vpop.permute.xlu0 %2403 }
 0x4fe   : > { %v2415_v4 = vadd.f32 %v2404_v56, %v2290_v43  ;;  %2048 = vrot.lane.b32.xlu1 %v1931_v59, %s18676_s16  ;;  %v3002_v43 = vmul.f32 %v15123_v12, %v14999_v54  ;;  %v1808_v56 = vmul.f32 %v15129_v61, %v14748_v20  ;;  %v1809_v54 = vmul.f32 %v15135_v36, %v14759_v24 }
 0x500   : > { %v13664_v46 = vpack.i.bf16 %v2416_v9, %v2415_v4  ;;  %v1924_v39 = vpop.permute.xlu1 %1923 }
 0x501   : > { %v2408_v27 = vpop.permute.xlu0 %2407  ;;  %v1933_v4 = vadd.f32 %v1924_v39, %v1808_v56  ;;  %v1934_v39 = vadd.f32 %v1926_v55, %v1809_v54 }
 0x502   : > { %13665 = vrot.lane.b32.xlu0 %v13664_v46, %s18674_s30  ;;  %v2417_v44 = vadd.f32 %v2408_v27, %v2292_v29  ;;  %v3003_v46 = vmul.f32 %v15121_v3, %v14994_v53  ;;  %v2649_v27 = vmul.f32 %v15125_v38, %v14722_v6 }
 0x504   : > { %v2410_v63 = vpop.permute.xlu1 %2409 }
 0x505   : > { %v2418_v17 = vadd.f32 %v2410_v63, %v2293_v45  ;;  %v2161_v63 = vmul.f32 %v15137_v32, %v14720_v5  ;;  %v2162_v5 = vmul.f32 %v15148_v52, %v14732_v14  ;;  %v2652_v14 = vmul.f32 %v15135_v36, %v14761_v25 }
 0x506   : > { %2050 = vrot.lane.b32.xlu0 %v1932_v62, %s18676_s16 }
 0x507   : > { %v13669_v59 = vpack.i.bf16 %v2418_v17, %v2417_v44 }
 0x508   : > { %v2275_v9 = vpop.permute.xlu1 %2274 }
 0x509   : > { %13670 = vrot.lane.b32.xlu1 %v13669_v59, %s18674_s30  ;;  %v2286_v53 = vadd.f32 %v2275_v9, %v2161_v63  ;;  %v18720_v59 = vmov 0 }
 0x50a   : > { %3012 = vrot.lane.b32.xlu0 %v3002_v43, %s18672_s0  ;;  %v18721_v59 = vsel %vm15246_vm2, 4294967295, %v18720_v59 }
 0x50b   : > { %18722 = vst [vmem:[#allocation17_spill] sm:$0xff] %v18721_v59 }
 0x50c   : > { %v2765_v49 = vpop.permute.xlu0 %2764 }
 0x50d   : > { %v2775_v12 = vadd.f32 %v2765_v49, %v2650_v23  ;;  %v2763_v29 = vpop.permute.xlu1 %2762  ;;  %2052 = vrot.lane.b32.xlu1 %v1933_v4, %s18676_s16 }
 0x50e   : > { %v2774_v45 = vadd.f32 %v2763_v29, %v2649_v27  ;;  %3014 = vrot.lane.b32.xlu0 %v3003_v46, %s18672_s0  ;;  %v2651_v27 = vmul.f32 %v15129_v61, %v14750_v21 }
 0x510   : > { %v13674_v62 = vpack.i.bf16 %v2775_v12, %v2774_v45 }
 0x511   : > { %2054 = vrot.lane.b32.xlu1 %v1934_v39, %s18676_s16 }
 0x512   : > { %13675 = vrot.lane.b32.xlu0 %v13674_v62, %s18676_s16  ;;  %v2163_v62 = vmul.f32 %v15150_v57, %v14748_v20  ;;  %v3025_v20 = vmul.f32 %v15148_v52, %v14734_v15 }
 0x515   : > { %2423 = vrot.lane.b32.xlu1 %v2286_v53, %s18672_s0  ;;  %v2164_v53 = vmul.f32 %v15165_v40, %v14759_v24 }
 0x543   : > { %v13646_v3 = vpop.permute.xlu0 %13645 }
 0x544   : > { %v13648_v44 = vunpack.i.h.bf16 %v13646_v3  ;;  %v13647_v17 = vunpack.i.l.bf16 %v13646_v3 }
 0x546   : > { %v12653_v55 = vpack.c.bf16 %v13648_v44, %v13647_v17 }
 0x547   : > { %v2277_v43 = vpop.permute.xlu0 %2276 }
 0x548   : > { %v2287_v56 = vadd.f32 %v2277_v43, %v2162_v5  ;;  %12655 = vmatprep.subr.msk.bf16.mxu0 %vm15246_vm2, %v12653_v55  ;;  %v3024_v43 = vmul.f32 %v15137_v32, %v14722_v6 }
 0x549   : > { %12658 = vmatpush3.bf16.xpose.msk.msra.mxu0 %vm15246_vm2, %v12653_v55 }
 0x54a   : > { %2425 = vrot.lane.b32.xlu0 %v2287_v56, %s18672_s0 }
 0x54b   : > { %v13651_v9 = vpop.permute.xlu1 %13650  ;;  %v2767_v4 = vpop.permute.xlu0 %2766 }
 0x54c   : > { %v13653_v23 = vunpack.i.h.bf16 %v13651_v9  ;;  %v13652_v46 = vunpack.i.l.bf16 %v13651_v9  ;;  %v2776_v29 = vadd.f32 %v2767_v4, %v2651_v27 }
 0x54e   : > { %v12659_v49 = vpack.c.bf16 %v13653_v23, %v13652_v46 }
 0x54f   : > { %v2769_v54 = vpop.permute.xlu1 %2768  ;;  %v2281_v12 = vpop.permute.xlu0 %2280 }
 0x550   : > { %v2777_v45 = vadd.f32 %v2769_v54, %v2652_v14  ;;  %12661 = vmatprep.subr.msk.bf16.mxu0 %vm15246_vm2, %v12659_v49  ;;  %v2289_v5 = vadd.f32 %v2281_v12, %v2164_v53  ;;  %v3027_v14 = vmul.f32 %v15165_v40, %v14761_v25 }
 0x551   : > { %12664 = vmatpush3.bf16.xpose.msk.msra.mxu0 %vm15246_vm2, %v12659_v49 }
 0x552   : > { %v13679_v39 = vpack.i.bf16 %v2777_v45, %v2776_v29 }
 0x553   : > { %v2279_v63 = vpop.permute.xlu1 %2278 }
 0x554   : > { %v2288_v3 = vadd.f32 %v2279_v63, %v2163_v62  ;;  %13680 = vrot.lane.b32.xlu1 %v13679_v39, %s18676_s16  ;;  %v13656_v44 = vpop.permute.xlu0 %13655  ;;  %v2896_v63 = vmul.f32 %v15180_v0, %v14736_v16 }
 0x555   : > { %v13658_v17 = vunpack.i.h.bf16 %v13656_v44  ;;  %v13657_v55 = vunpack.i.l.bf16 %v13656_v44 }
 0x556   : > { %2427 = vrot.lane.b32.xlu0 %v2288_v3, %s18672_s0 }
 0x557   : > { %v12681_v56 = vpack.c.bf16 %v13658_v17, %v13657_v55  ;;  %v3138_v9 = vpop.permute.xlu1 %3137 }
 0x558   : > { %v3149_v4 = vadd.f32 %v3138_v9, %v3024_v43  ;;  %2429 = vrot.lane.b32.xlu1 %v2289_v5, %s18672_s0  ;;  %v3140_v24 = vpop.permute.xlu0 %3139  ;;  %11656 = vmatmul.mubr.msk.f32.vlgmr.msra.gmra.mrb[20].mxu0 %vm1027_vm1, %v14983_v50  ;;  %v2897_v9 = vmul.f32 %v15187_v10, %v14752_v22 }
 0x559   : > { %v3150_v23 = vadd.f32 %v3140_v24, %v3025_v20  ;;  %11658 = vmatprep.mubr.msk.f32.mxu0 %vm1027_vm1, %v15009_v2  ;;  %12683 = vmatprep.subr.msk.bf16.mxu0 %vm15246_vm2, %v12681_v56  ;;  %v3026_v2 = vmul.f32 %v15150_v57, %v14750_v21  ;;  %v2895_v21 = vmul.f32 %v15168_v48, %v14724_v11 }
 0x55a   : > { %12686 = vmatpush3.bf16.xpose.msk.msra.mxu0 %vm15246_vm2, %v12681_v56 }
 0x55b   : > { %v13684_v6 = vpack.i.bf16 %v3150_v23, %v3149_v4 }
 0x55c   : > { %v13661_v46 = vpop.permute.xlu1 %13660  ;;  %v3142_v15 = vpop.permute.xlu0 %3141  ;;  %11659 = vmatmul.mubr.msk.f32.gmra.mrb[22].mxu0 %vm1027_vm1, %v15007_v1 }
 0x55d   : > { %v13663_v49 = vunpack.i.h.bf16 %v13661_v46  ;;  %v13662_v27 = vunpack.i.l.bf16 %v13661_v46  ;;  %13685 = vrot.lane.b32.xlu0 %v13684_v6, %s18672_s0  ;;  %v3151_v29 = vadd.f32 %v3142_v15, %v3026_v2  ;;  %v2898_v46 = vmul.f32 %v15195_v13, %v14763_v26 }
 0x55e   : > { %v18728_v13 = vmov -1.0  }
 0x55f   : > { %v12687_v50 = vpack.c.bf16 %v13663_v49, %v13662_v27 }
 0x560   : > { %v3144_v54 = vpop.permute.xlu1 %3143  ;;  %v1686_v12 = vpop.permute.xlu0 %1685 }
 0x561   : > { %v3152_v45 = vadd.f32 %v3144_v54, %v3027_v14  ;;  %12689 = vmatprep.subr.msk.bf16.mxu0 %vm15246_vm2, %v12687_v50  ;;  %11697 = vmatprep.mubr.msk.f32.mxu0 %vm1027_vm1, %v1686_v12 }
 0x562   : > { %12692 = vmatpush3.bf16.xpose.msk.msra.mxu0 %vm15246_vm2, %v12687_v50 }
 0x563   : > { %v13689_v1 = vpack.i.bf16 %v3152_v45, %v3151_v29  ;;  %12711 = vmatprep.subr.msk.bf16.mxu0 %vm15246_vm2, %v15057_v51 }
 0x564   : > { %v1688_v25 = vpop.permute.xlu1 %1687  ;;  %v3009_v39 = vpop.permute.xlu0 %3008 }
 0x565   : > { %v3020_v62 = vadd.f32 %v3009_v39, %v2895_v21  ;;  %13690 = vrot.lane.b32.xlu1 %v13689_v1, %s18672_s0 }
 0x567   : > { %3157 = vrot.lane.b32.xlu0 %v3020_v62, %s18674_s30 }
 0x568   : > { %v3011_v53 = vpop.permute.xlu1 %3010  ;;  %v1690_v3 = vpop.permute.xlu0 %1689 }
 0x569   : > { %v3021_v44 = vadd.f32 %v3011_v53, %v2896_v63  ;;  %11698 = vmatmul.mubr.msk.f32.vlgmr.msra.gmra.mrb[24].mxu0 %vm1027_vm1, %v1688_v25 }
 0x56a   : > { %11700 = vmatprep.mubr.msk.f32.mxu0 %vm1027_vm1, %v1690_v3  ;;  %12714 = vmatpush3.bf16.xpose.msk.msra.mxu0 %vm15246_vm2, %v15057_v51 }
 0x56b   : > { %3159 = vrot.lane.b32.xlu1 %v3021_v44, %s18674_s30  ;;  %12717 = vmatprep.subr.msk.bf16.mxu0 %vm15246_vm2, %v15069_v41 }
 0x56c   : > { %v1692_v11 = vpop.permute.xlu1 %1691 }
 0x56d   : > { %11701 = vmatmul.mubr.msk.f32.gmra.mrb[26].mxu0 %vm1027_vm1, %v1692_v11 }
 0x570   : > { %v2049_v16 = vpop.permute.xlu1 %2048 }
 0x571   : > { %11739 = vmatprep.mubr.msk.f32.mxu0 %vm1027_vm1, %v2049_v16 }
 0x572   : > { %12720 = vmatpush3.bf16.xpose.msk.msra.mxu0 %vm15246_vm2, %v15069_v41 }
 0x574   : > { %v13666_v17 = vpop.permute.xlu0 %13665 }
 0x575   : > { %v13668_v55 = vunpack.i.h.bf16 %v13666_v17  ;;  %v13667_v5 = vunpack.i.l.bf16 %v13666_v17 }
 0x577   : > { %v12737_v51 = vpack.c.bf16 %v13668_v55, %v13667_v5 }
 0x578   : > { %v2051_v43 = vpop.permute.xlu0 %2050 }
 0x579   : > { %11740 = vmatmul.mubr.msk.f32.vlgmr.msra.gmra.mrb[28].mxu0 %vm1027_vm1, %v2051_v43  ;;  %12739 = vmatprep.subr.msk.bf16.mxu0 %vm15246_vm2, %v12737_v51  ;;  %v15382_v43 = vld [vmem:[%s18649_s5 + $0x8] sm:$0xff] }
 0x57a   : > { %12742 = vmatpush3.bf16.xpose.msk.msra.mxu0 %vm15246_vm2, %v12737_v51 }
 0x57b   : > { %v13671_v56 = vpop.permute.xlu1 %13670 }
 0x57c   : > { %v13673_v20 = vunpack.i.h.bf16 %v13671_v56  ;;  %v13672_v4 = vunpack.i.l.bf16 %v13671_v56  ;;  %v3013_v41 = vpop.permute.xlu0 %3012  ;;  %v15387_v56 = vld [vmem:[%s18649_s5] sm:$0xff] }
 0x57d   : > { %v3022_v24 = vadd.f32 %v3013_v41, %v2897_v9 }
 0x57e   : > { %v12743_v23 = vpack.c.bf16 %v13673_v20, %v13672_v4 }
 0x57f   : > { %v2053_v6 = vpop.permute.xlu1 %2052  ;;  %3161 = vrot.lane.b32.xlu0 %v3022_v24, %s18674_s30  ;;  %v15398_v24 = vld [vmem:[%s18649_s5 + $0x18] sm:$0xff] }
 0x580   : > { %v3015_v15 = vpop.permute.xlu0 %3014  ;;  %11742 = vmatprep.mubr.msk.f32.mxu0 %vm1027_vm1, %v2053_v6  ;;  %12745 = vmatprep.subr.msk.bf16.mxu0 %vm15246_vm2, %v12743_v23 }
 0x581   : > { %v3023_v49 = vadd.f32 %v3015_v15, %v2898_v46 }
 0x582   : > { %12748 = vmatpush3.bf16.xpose.msk.msra.mxu0 %vm15246_vm2, %v12743_v23 }
 0x583   : > { %v2055_v22 = vpop.permute.xlu1 %2054  ;;  %13695 = vrot.lane.b32.xlu0 %v14740_v18, %s18674_s30  ;;  %3163 = vrot.lane.b32.xlu1 %v3023_v49, %s18674_s30  ;;  %v15410_v49 = vld [vmem:[%s18649_s5 + $0x10] sm:$0xff] }
 0x584   : > { %v13676_v27 = vpop.permute.xlu0 %13675  ;;  %11743 = vmatmul.mubr.msk.f32.gmra.mrb[30].mxu0 %vm1027_vm1, %v2055_v22 }
 0x585   : > { %v13678_v26 = vunpack.i.h.bf16 %v13676_v27  ;;  %v13677_v50 = vunpack.i.l.bf16 %v13676_v27 }
 0x587   : > { %v12765_v2 = vpack.c.bf16 %v13678_v26, %v13677_v50  ;;  %v2424_v14 = vpop.permute.xlu1 %2423  ;;  %13700 = vrot.lane.b32.xlu1 %v14767_v28, %s18674_s30 }
 0x588   : > { %11781 = vmatprep.mubr.msk.f32.mxu0 %vm1027_vm1, %v2424_v14 }
 0x589   : > { %12767 = vmatprep.subr.msk.bf16.mxu0 %vm15246_vm2, %v12765_v2 }
 0x58b   : > { %13705 = vrot.lane.b32.xlu1 %v14740_v18, %s18672_s0 }
 0x58f   : > { %13710 = vrot.lane.b32.xlu1 %v14767_v28, %s18672_s0 }
 0x5bc   : > { %v2426_v54 = vpop.permute.xlu0 %2425 }
 0x5bd   : > { %11782 = vmatmul.mubr.msk.f32.vlgmr.msra.gmra.mrb[32].mxu0 %vm1027_vm1, %v2426_v54 }
 0x5be   : > { %12770 = vmatpush3.bf16.xpose.msk.msra.mxu0 %vm15246_vm2, %v12765_v2 }
 0x5c6   : > { %v13681_v12 = vpop.permute.xlu1 %13680 }
 0x5c7   : > { %v13683_v29 = vunpack.i.h.bf16 %v13681_v12  ;;  %v13682_v45 = vunpack.i.l.bf16 %v13681_v12 }
 0x5c8   : > { %v2428_v1 = vpop.permute.xlu0 %2427 }
 0x5c9   : > { %v12771_v21 = vpack.c.bf16 %v13683_v29, %v13682_v45  ;;  %11784 = vmatprep.mubr.msk.f32.mxu0 %vm1027_vm1, %v2428_v1 }
 0x5ca   : > { %v2430_v25 = vpop.permute.xlu1 %2429 }
 0x5cb   : > { %11785 = vmatmul.mubr.msk.f32.gmra.mrb[34].mxu0 %vm1027_vm1, %v2430_v25  ;;  %12773 = vmatprep.subr.msk.bf16.mxu0 %vm15246_vm2, %v12771_v21 }
 0x5cc   : > { %12776 = vmatpush3.bf16.xpose.msk.msra.mxu0 %vm15246_vm2, %v12771_v21  ;;  %11823 = vmatprep.mubr.msk.f32.mxu0 %vm1027_vm1, %v15099_v42 }
 0x5cf   : > { %v13686_v39 = vpop.permute.xlu0 %13685 }
 0x5d0   : > { %v13688_v62 = vunpack.i.h.bf16 %v13686_v39  ;;  %v13687_v63 = vunpack.i.l.bf16 %v13686_v39 }
 0x5d2   : > { %v12793_v53 = vpack.c.bf16 %v13688_v62, %v13687_v63 }
 0x5d3   : > { %11824 = vmatmul.mubr.msk.f32.vlgmr.msra.gmra.mrb[36].mxu0 %vm1027_vm1, %v15096_v19 }
 0x5d4   : > { %11826 = vmatprep.mubr.msk.f32.mxu0 %vm1027_vm1, %v15111_v58  ;;  %12795 = vmatprep.subr.msk.bf16.mxu0 %vm15246_vm2, %v12793_v53 }
 0x5d5   : > { %12798 = vmatpush3.bf16.xpose.msk.msra.mxu0 %vm15246_vm2, %v12793_v53 }
 0x5d7   : > { %v13691_v3 = vpop.permute.xlu1 %13690  ;;  %11827 = vmatmul.mubr.msk.f32.gmra.mrb[38].mxu0 %vm1027_vm1, %v15108_v47 }
 0x5d8   : > { %v13693_v42 = vunpack.i.h.bf16 %v13691_v3  ;;  %v13692_v44 = vunpack.i.l.bf16 %v13691_v3 }
 0x5d9   : > { %v3158_v11 = vpop.permute.xlu0 %3157 }
 0x5da   : > { %v12799_v16 = vpack.c.bf16 %v13693_v42, %v13692_v44  ;;  %11865 = vmatprep.mubr.msk.f32.mxu0 %vm1027_vm1, %v3158_v11 }
 0x5dc   : > { %12801 = vmatprep.subr.msk.bf16.mxu0 %vm15246_vm2, %v12799_v16 }
 0x5dd   : > { %12804 = vmatpush3.bf16.xpose.msk.msra.mxu0 %vm15246_vm2, %v12799_v16  ;;  %v3160_v19 = vpop.permute.xlu1 %3159 }
 0x5e4   : > { %11866 = vmatmul.mubr.msk.f32.vlgmr.msra.gmra.mrb[40].mxu0 %vm1027_vm1, %v3160_v19 }
 0x5f1   : > { %v3162_v58 = vpop.permute.xlu0 %3161 }
 0x5f2   : > { %11868 = vmatprep.mubr.msk.f32.mxu0 %vm1027_vm1, %v3162_v58 }
 0x5f5   : > { %v3164_v17 = vpop.permute.xlu1 %3163  ;;  %v13696_v47 = vpop.permute.xlu0 %13695 }
 0x5f6   : > { %v13698_v55 = vunpack.i.h.bf16 %v13696_v47  ;;  %v13697_v5 = vunpack.i.l.bf16 %v13696_v47  ;;  %11869 = vmatmul.mubr.msk.f32.gmra.mrb[42].mxu0 %vm1027_vm1, %v3164_v17 }
 0x5f8   : > { %v15376_v51 = vpack.c.bf16 %v13698_v55, %v13697_v5 }
 0x5fa   : > { %12814 = vmatprep.subr.bf16.mxu1 %v15376_v51 }
 0x62b   : > { %v11657_v9 = vpop.f32.mrb[20].mxu0 }
 0x62c   : > { %v15390_v20 = vadd.f32 %v11657_v9, %v15382_v43  ;;  %v1380_v4 = vpop.f32.mrb[21].mxu0 }
 0x62d   : > { %v15393_v41 = vadd.f32 %v1380_v4, %v15387_v56 }
 0x62e   : > { %v3305_v23 = vsel %vm1027_vm1, %v15390_v20, -inf }
 0x62f   : > { %3306 = vmax.xlane.f32.xlu1 %v3305_v23  ;;  %v11660_v6 = vpop.f32.mrb[22].mxu0  ;;  %v3302_v46 = vsel %vm1027_vm1, %v15393_v41, -inf }
 0x630   : > { %v15405_v15 = vadd.f32 %v11660_v6, %v15398_v24  ;;  %3303 = vmax.xlane.f32.xlu0 %v3302_v46  ;;  %v1390_v22 = vpop.f32.mrb[23].mxu0 }
 0x631   : > { %v15415_v26 = vadd.f32 %v1390_v22, %v15410_v49 }
 0x632   : > { %v3311_v27 = vsel %vm1027_vm1, %v15405_v15, -inf }
 0x633   : > { %v3308_v50 = vsel %vm1027_vm1, %v15415_v26, -inf }
 0x634   : > { %3312 = vmax.xlane.f32.xlu0 %v3311_v27 }
 0x638   : > { %3309 = vmax.xlane.f32.xlu0 %v3308_v50 }
 0x63c   : > { %v11699_v2 = vpop.f32.mrb[24].mxu0 }
 0x63d   : > { %v15420_v14 = vadd.f32 %v11699_v2, %v15382_v43  ;;  %v1787_v54 = vpop.f32.mrb[25].mxu0 }
 0x63e   : > { %v15423_v12 = vadd.f32 %v1787_v54, %v15387_v56 }
 0x63f   : > { %v3317_v29 = vsel %vm1027_vm1, %v15420_v14, -inf }
 0x640   : > { %3318 = vmax.xlane.f32.xlu1 %v3317_v29  ;;  %v11702_v45 = vpop.f32.mrb[26].mxu0  ;;  %v3314_v1 = vsel %vm1027_vm1, %v15423_v12, -inf }
 0x641   : > { %v15430_v21 = vadd.f32 %v11702_v45, %v15398_v24  ;;  %3315 = vmax.xlane.f32.xlu0 %v3314_v1  ;;  %v1797_v25 = vpop.f32.mrb[27].mxu0 }
 0x642   : > { %v15433_v39 = vadd.f32 %v1797_v25, %v15410_v49 }
 0x643   : > { %v3323_v62 = vsel %vm1027_vm1, %v15430_v21, -inf }
 0x644   : > { %3324 = vmax.xlane.f32.xlu1 %v3323_v62  ;;  %v3320_v63 = vsel %vm1027_vm1, %v15433_v39, -inf }
 0x645   : > { %3321 = vmax.xlane.f32.xlu0 %v3320_v63 }
 0x64c   : > { %v11741_v53 = vpop.f32.mrb[28].mxu0 }
 0x64d   : > { %v15440_v3 = vadd.f32 %v11741_v53, %v15382_v43  ;;  %v2142_v42 = vpop.f32.mrb[29].mxu0 }
 0x64e   : > { %v15443_v44 = vadd.f32 %v2142_v42, %v15387_v56 }
 0x64f   : > { %v3329_v11 = vsel %vm1027_vm1, %v15440_v3, -inf }
 0x650   : > { %3330 = vmax.xlane.f32.xlu0 %v3329_v11  ;;  %v3326_v16 = vsel %vm1027_vm1, %v15443_v44, -inf }
 0x654   : > { %3327 = vmax.xlane.f32.xlu0 %v3326_v16 }
 0x657   : > { %v11744_v19 = vpop.f32.mrb[30].mxu0 }
 0x658   : > { %v15450_v58 = vadd.f32 %v11744_v19, %v15398_v24  ;;  %v2152_v17 = vpop.f32.mrb[31].mxu0 }
 0x659   : > { %v15453_v47 = vadd.f32 %v2152_v17, %v15410_v49 }
 0x65a   : > { %v3335_v55 = vsel %vm1027_vm1, %v15450_v58, -inf }
 0x65b   : > { %3336 = vmax.xlane.f32.xlu0 %v3335_v55  ;;  %v3332_v5 = vsel %vm1027_vm1, %v15453_v47, -inf }
 0x65f   : > { %3333 = vmax.xlane.f32.xlu0 %v3332_v5 }
 0x690   : > { %v11783_v9 = vpop.f32.mrb[32].mxu0 }
 0x691   : > { %v15460_v4 = vadd.f32 %v11783_v9, %v15382_v43  ;;  %v2525_v23 = vpop.f32.mrb[33].mxu0 }
 0x692   : > { %v15463_v6 = vadd.f32 %v2525_v23, %v15387_v56 }
 0x693   : > { %v3341_v46 = vsel %vm1027_vm1, %v15460_v4, -inf }
 0x694   : > { %3342 = vmax.xlane.f32.xlu1 %v3341_v46  ;;  %v3338_v22 = vsel %vm1027_vm1, %v15463_v6, -inf }
 0x695   : > { %3339 = vmax.xlane.f32.xlu0 %v3338_v22 }
 0x69e   : > { %v11786_v27 = vpop.f32.mrb[34].mxu0 }
 0x69f   : > { %v15470_v50 = vadd.f32 %v11786_v27, %v15398_v24  ;;  %v2535_v2 = vpop.f32.mrb[35].mxu0 }
 0x6a0   : > { %v15473_v54 = vadd.f32 %v2535_v2, %v15410_v49 }
 0x6a1   : > { %v3347_v29 = vsel %vm1027_vm1, %v15470_v50, -inf }
 0x6a2   : > { %3348 = vmax.xlane.f32.xlu1 %v3347_v29  ;;  %v3344_v45 = vsel %vm1027_vm1, %v15473_v54, -inf }
 0x6a3   : > { %3345 = vmax.xlane.f32.xlu0 %v3344_v45 }
 0x6a6   : > { %v11825_v1 = vpop.f32.mrb[36].mxu0 }
 0x6a7   : > { %v15480_v25 = vadd.f32 %v11825_v1, %v15382_v43  ;;  %v2876_v62 = vpop.f32.mrb[37].mxu0 }
 0x6a9   : > { %v3353_v63 = vsel %vm1027_vm1, %v15480_v25, -inf }
 0x6aa   : > { %3354 = vmax.xlane.f32.xlu1 %v3353_v63  ;;  %v11828_v53 = vpop.f32.mrb[38].mxu0 }
 0x6ab   : > { %v15485_v42 = vadd.f32 %v11828_v53, %v15398_v24  ;;  %v2886_v11 = vpop.f32.mrb[39].mxu0 }
 0x6ad   : > { %v3359_v16 = vsel %vm1027_vm1, %v15485_v42, -inf }
 0x6ae   : > { %3360 = vmax.xlane.f32.xlu1 %v3359_v16 }
 0x6b7   : > { %v11867_v19 = vpop.f32.mrb[40].mxu0 }
 0x6b8   : > { %v15490_v17 = vadd.f32 %v11867_v19, %v15382_v43  ;;  %v3259_v55 = vpop.f32.mrb[41].mxu0 }
 0x6b9   : > { %13715 = vrot.lane.b32.xlu0 %v14740_v18, %s18676_s16  ;;  %v15495_v5 = vadd.f32 %v3259_v55, %v15387_v56  ;;  %v15517_v55 = vadd.f32 %v2876_v62, %v15387_v56  ;;  %v15529_v56 = vpop.permute.xlu1 %13700 }
 0x6ba   : > { %v3365_v9 = vsel %vm1027_vm1, %v15490_v17, -inf }
 0x6bb   : > { %3366 = vmax.xlane.f32.xlu1 %v3365_v9  ;;  %v3362_v46 = vsel %vm1027_vm1, %v15495_v5, -inf }
 0x6bd   : > { %v3304_v23 = vpop.xlane.xlu0 %3303 }
 0x6be   : > { %v3374_v27 = vsub.f32 %v15393_v41, %v3304_v23 }
 0x6bf   : > { %3363 = vmax.xlane.f32.xlu1 %v3362_v46 }
 0x6c0   : > { %v3398_v63 = vmul.f32 1.442695, %v3374_v27 }
 0x6c1   : > { %v15501_v22 = vpop.xlane.xlu0 %3312 }
 0x6c2   : > { %13862 = vpow2.f32 %v3398_v63 }
 0x6c5   : > { %v3310_v2 = vpop.xlane.xlu0 %3309 }
 0x6c6   : > { %v3376_v53 = vsub.f32 %v15415_v26, %v3310_v2  ;;  %v3350_v26 = vsel %vm1027_vm1, %v15517_v55, -inf }
 0x6c8   : > { %v3402_v41 = vmul.f32 1.442695, %v3376_v53  ;;  %v18723_v53 = vpack.i.bf16 %v14791_v30, %v14793_v31 }
 0x6c9   : > { %v11870_v43 = vpop.f32.mrb[42].mxu0 }
 0x6ca   : > { %v15505_v18 = vadd.f32 %v11870_v43, %v15398_v24  ;;  %v3269_v29 = vpop.f32.mrb[43].mxu0  ;;  %13864 = vpow2.f32 %v3402_v41  ;;  %v15521_v43 = vadd.f32 %v2886_v11, %v15410_v49 }
 0x6cb   : > { %v15508_v45 = vadd.f32 %v3269_v29, %v15410_v49 }
 0x6cc   : > { %v3371_v1 = vsel %vm1027_vm1, %v15505_v18, -inf  ;;  %v15527_v2 = vpop.eup %13862 }
 0x6cd   : > { %3372 = vmax.xlane.f32.xlu1 %v3371_v1  ;;  %v3368_v19 = vsel %vm1027_vm1, %v15508_v45, -inf  ;;  %v3446_v49 = vsel %vm1027_vm1, %v15527_v2, 0.0 }
 0x6ce   : > { %v3316_v16 = vpop.xlane.xlu0 %3315 }
 0x6cf   : > { %v3378_v24 = vsub.f32 %v15423_v12, %v3316_v16  ;;  %v3356_v12 = vsel %vm1027_vm1, %v15521_v43, -inf  ;;  %v15541_v16 = vpop.permute.xlu1 %13705 }
 0x6d1   : > { %3369 = vmax.xlane.f32.xlu1 %v3368_v19  ;;  %v3406_v23 = vmul.f32 1.442695, %v3378_v24 }
 0x6d2   : > { %v3322_v9 = vpop.xlane.xlu0 %3321 }
 0x6d3   : > { %v3380_v46 = vsub.f32 %v15433_v39, %v3322_v9  ;;  %13866 = vpow2.f32 %v3406_v23 }
 0x6d4   : > { %v15534_v11 = vpop.eup %13864 }
 0x6d5   : > { %v3410_v27 = vmul.f32 1.442695, %v3380_v46 }
 0x6d7   : > { %13868 = vpow2.f32 %v3410_v27 }
 0x6d8   : > { %3351 = vmax.xlane.f32.xlu0 %v3350_v26 }
 0x6dc   : > { %3357 = vmax.xlane.f32.xlu0 %v3356_v12 }
 0x6dd   : > { %v3331_v62 = vpop.xlane.xlu0 %3330  ;;  %v15545_v19 = vpop.eup %13866 }
 0x6de   : > { %v3383_v39 = vsub.f32 %v15440_v3, %v3331_v62  ;;  %v3452_v3 = vsel %vm1027_vm1, %v15534_v11, 0.0  ;;  %v3458_v24 = vsel %vm1027_vm1, %v15545_v19, 0.0 }
 0x6e0   : > { %v3416_v29 = vmul.f32 1.442695, %v3383_v39  ;;  %3447 = vadd.xlane.f32.xlu0 %v3446_v49  ;;  %v3377_v49 = vsub.f32 %v15405_v15, %v15501_v22 }
 0x6e1   : > { %v3328_v1 = vpop.xlane.xlu0 %3327  ;;  %v15549_v9 = vpop.eup %13868 }
 0x6e2   : > { %13870 = vpow2.f32 %v3416_v29  ;;  %v3382_v63 = vsub.f32 %v15443_v44, %v3328_v1  ;;  %13720 = vrot.lane.b32.xlu1 %v18723_v53, %s18674_s30  ;;  %v15551_v44 = vpop.permute.xlu1 %13710  ;;  %v3464_v30 = vsel %vm1027_vm1, %v15549_v9, 0.0  ;;  %v3404_v29 = vmul.f32 1.442695, %v3377_v49 }
 0x6e4   : > { %v3414_v41 = vmul.f32 1.442695, %v3382_v63  ;;  %3453 = vadd.xlane.f32.xlu0 %v3452_v3 }
 0x6e6   : > { %13872 = vpow2.f32 %v3414_v41  ;;  %v3307_v23 = vpop.xlane.xlu1 %3306 }
 0x6e7   : > { %v3375_v27 = vsub.f32 %v15390_v20, %v3307_v23 }
 0x6e8   : > { %3459 = vadd.xlane.f32.xlu0 %v3458_v24 }
 0x6e9   : > { %v3400_v39 = vmul.f32 1.442695, %v3375_v27 }
 0x6ea   : > { %v3319_v12 = vpop.xlane.xlu1 %3318 }
 0x6eb   : > { %13874 = vpow2.f32 %v3400_v39  ;;  %v3379_v1 = vsub.f32 %v15420_v14, %v3319_v12 }
 0x6ec   : > { %v15555_v31 = vpop.eup %13870  ;;  %3465 = vadd.xlane.f32.xlu0 %v3464_v30  ;;  %13876 = vpow2.f32 %v3404_v29 }
 0x6ed   : > { %v3473_v46 = vsel %vm1027_vm1, %v15555_v31, 0.0  ;;  %v3408_v53 = vmul.f32 1.442695, %v3379_v1 }
 0x6ee   : > { %v3325_v63 = vpop.xlane.xlu1 %3324 }
 0x6ef   : > { %v3381_v3 = vsub.f32 %v15430_v21, %v3325_v63  ;;  %13878 = vpow2.f32 %v3408_v53 }
 0x6f0   : > { %v15559_v26 = vpop.eup %13872  ;;  %3474 = vadd.xlane.f32.xlu0 %v3473_v46  ;;  %v3337_v46 = vpop.xlane.xlu0 %3336 }
 0x6f1   : > { %v3470_v62 = vsel %vm1027_vm1, %v15559_v26, 0.0  ;;  %v3412_v20 = vmul.f32 1.442695, %v3381_v3 }
 0x6f3   : > { %13880 = vpow2.f32 %v3412_v20 }
 0x6f4   : > { %3471 = vadd.xlane.f32.xlu0 %v3470_v62  ;;  %v3334_v27 = vpop.xlane.xlu0 %3333 }
 0x6f5   : > { %v15568_v41 = vpop.eup %13874 }
 0x6f6   : > { %v3449_v24 = vsel %vm1027_vm1, %v15568_v41, 0.0  ;;  %v15572_v30 = vpop.eup %13876 }
 0x6f7   : > { %v3455_v15 = vsel %vm1027_vm1, %v15572_v30, 0.0 }
 0x6f9   : > { %v15576_v14 = vpop.eup %13878 }
 0x6fa   : > { %v3461_v21 = vsel %vm1027_vm1, %v15576_v14, 0.0 }
 0x6fd   : > { %v15580_v22 = vpop.eup %13880 }
 0x6fe   : > { %v3467_v23 = vsel %vm1027_vm1, %v15580_v22, 0.0 }
 0x706   : > { %3450 = vadd.xlane.f32.xlu1 %v3449_v24 }
 0x70a   : > { %3456 = vadd.xlane.f32.xlu1 %v3455_v15 }
 0x70e   : > { %3462 = vadd.xlane.f32.xlu1 %v3461_v21 }
 0x712   : > { %3468 = vadd.xlane.f32.xlu1 %v3467_v23 }
 0x721   : > { %v3343_v12 = vpop.xlane.xlu1 %3342 }
 0x722   : > { %v3387_v62 = vsub.f32 %v15460_v4, %v3343_v12  ;;  %v3340_v39 = vpop.xlane.xlu0 %3339 }
 0x723   : > { %v3386_v49 = vsub.f32 %v15463_v6, %v3340_v39 }
 0x724   : > { %v3424_v29 = vmul.f32 1.442695, %v3387_v62 }
 0x725   : > { %v3422_v1 = vmul.f32 1.442695, %v3386_v49 }
 0x726   : > { %13882 = vpow2.f32 %v3424_v29 }
 0x727   : > { %13884 = vpow2.f32 %v3422_v1 }
 0x72f   : > { %v3349_v63 = vpop.xlane.xlu1 %3348 }
 0x730   : > { %v15586_v53 = vpop.eup %13882  ;;  %v3389_v3 = vsub.f32 %v15470_v50, %v3349_v63  ;;  %v3346_v20 = vpop.xlane.xlu0 %3345 }
 0x731   : > { %v15589_v24 = vpop.eup %13884  ;;  %v3388_v15 = vsub.f32 %v15473_v54, %v3346_v20  ;;  %v3485_v4 = vsel %vm1027_vm1, %v15586_v53, 0.0 }
 0x732   : > { %v3428_v21 = vmul.f32 1.442695, %v3389_v3  ;;  %3486 = vadd.xlane.f32.xlu1 %v3485_v4  ;;  %v3482_v6 = vsel %vm1027_vm1, %v15589_v24, 0.0 }
 0x733   : > { %v3426_v23 = vmul.f32 1.442695, %v3388_v15  ;;  %3483 = vadd.xlane.f32.xlu0 %v3482_v6 }
 0x734   : > { %13886 = vpow2.f32 %v3428_v21  ;;  %v13716_v12 = vpop.permute.xlu0 %13715 }
 0x735   : > { %13888 = vpow2.f32 %v3426_v23  ;;  %v13718_v62 = vunpack.i.h.bf16 %v13716_v12  ;;  %v13717_v50 = vunpack.i.l.bf16 %v13716_v12 }
 0x737   : > { %v12821_v39 = vpack.c.bf16 %v13718_v62, %v13717_v50  ;;  %v15598_v54 = vpop.xlane.xlu1 %3354 }
 0x739   : > { %12822 = vmatprep.subr.bf16.mxu0 %v12821_v39 }
 0x73a   : > { %12824 = vmatpush3.bf16.msra.mxu0 %v12821_v39  ;;  %v3384_v39 = vsub.f32 %v15453_v47, %v3334_v27 }
 0x73b   : > { %v15606_v3 = vpop.xlane.xlu1 %3360 }
 0x73e   : > { %v15596_v49 = vpop.eup %13886 }
 0x73f   : > { %v15600_v29 = vpop.eup %13888  ;;  %v3491_v1 = vsel %vm1027_vm1, %v15596_v49, 0.0 }
 0x740   : > { %3492 = vadd.xlane.f32.xlu1 %v3491_v1  ;;  %v3488_v63 = vsel %vm1027_vm1, %v15600_v29, 0.0  ;;  %v3418_v1 = vmul.f32 1.442695, %v3384_v39 }
 0x741   : > { %3489 = vadd.xlane.f32.xlu0 %v3488_v63 }
 0x748   : > { %v3367_v20 = vpop.xlane.xlu1 %3366 }
 0x749   : > { %v3395_v15 = vsub.f32 %v15490_v17, %v3367_v20 }
 0x74b   : > { %v3440_v4 = vmul.f32 1.442695, %v3395_v15 }
 0x74c   : > { %v3364_v21 = vpop.xlane.xlu1 %3363 }
 0x74d   : > { %13890 = vpow2.f32 %v3440_v4  ;;  %v3394_v6 = vsub.f32 %v15495_v5, %v3364_v21  ;;  %v3385_v5 = vsub.f32 %v15450_v58, %v3337_v46 }
 0x74f   : > { %v3438_v23 = vmul.f32 1.442695, %v3394_v6  ;;  %v3420_v15 = vmul.f32 1.442695, %v3385_v5 }
 0x751   : > { %13892 = vpow2.f32 %v3438_v23 }
 0x752   : > { %13894 = vpow2.f32 %v3418_v1 }
 0x753   : > { %13896 = vpow2.f32 %v3420_v15 }
 0x757   : > { %v15610_v12 = vpop.eup %13890  ;;  %13725 = vrot.lane.b32.xlu0 %v14767_v28, %s18676_s16 }
 0x758   : > { %v3509_v62 = vsel %vm1027_vm1, %v15610_v12, 0.0 }
 0x759   : > { %3510 = vadd.xlane.f32.xlu1 %v3509_v62  ;;  %v18724_v62 = vpack.i.bf16 %v14805_v34, %v14807_v35 }
 0x75a   : > { %v3373_v63 = vpop.xlane.xlu1 %3372 }
 0x75b   : > { %v15616_v50 = vpop.eup %13892  ;;  %v3397_v28 = vsub.f32 %v15505_v18, %v3373_v63 }
 0x75c   : > { %v3506_v17 = vsel %vm1027_vm1, %v15616_v50, 0.0  ;;  %v15629_v27 = vpop.eup %13894 }
 0x75d   : > { %3507 = vadd.xlane.f32.xlu1 %v3506_v17  ;;  %v3444_v21 = vmul.f32 1.442695, %v3397_v28  ;;  %v15633_v39 = vpop.eup %13896 }
 0x75e   : > { %v3370_v35 = vpop.xlane.xlu1 %3369  ;;  %v3479_v1 = vsel %vm1027_vm1, %v15633_v39, 0.0 }
 0x765   : > { %v3352_v20 = vpop.xlane.xlu0 %3351 }
 0x766   : > { %v3390_v6 = vsub.f32 %v15517_v55, %v3352_v20  ;;  %v3476_v55 = vsel %vm1027_vm1, %v15629_v27, 0.0  ;;  %v3396_v20 = vsub.f32 %v15508_v45, %v3370_v35 }
 0x768   : > { %v3430_v58 = vmul.f32 1.442695, %v3390_v6  ;;  %v3442_v6 = vmul.f32 1.442695, %v3396_v20 }
 0x769   : > { %v3358_v4 = vpop.xlane.xlu0 %3357 }
 0x76a   : > { %v3392_v47 = vsub.f32 %v15521_v43, %v3358_v4 }
 0x76c   : > { %v3434_v18 = vmul.f32 1.442695, %v3392_v47 }
 0x76d   : > { %v3448_v23 = vpop.xlane.xlu0 %3447 }
 0x76e   : > { %13730 = vrot.lane.b32.xlu1 %v18724_v62, %s18674_s30  ;;  %13898 = vrcp.f32 %v3448_v23 }
 0x76f   : > { %13900 = vpow2.f32 %v3444_v21  ;;  %v3391_v21 = vsub.f32 %v15480_v25, %v15598_v54 }
 0x770   : > { %13902 = vpow2.f32 %v3430_v58  ;;  %v3393_v58 = vsub.f32 %v15485_v42, %v15606_v3 }
 0x771   : > { %v3454_v46 = vpop.xlane.xlu0 %3453  ;;  %13904 = vpow2.f32 %v3434_v18  ;;  %v3432_v45 = vmul.f32 1.442695, %v3391_v21 }
 0x772   : > { %v3436_v25 = vmul.f32 1.442695, %v3393_v58 }
 0x775   : > { %v3460_v17 = vpop.xlane.xlu0 %3459 }
 0x776   : > { %3477 = vadd.xlane.f32.xlu0 %v3476_v55 }
 0x778   : > { %v13899_v34 = vpop.eup %13898 }
 0x779   : > { %v3466_v5 = vpop.xlane.xlu0 %3465  ;;  %v15637_v43 = vpop.eup %13900  ;;  %v3542_v63 = vmul.f32 %v13899_v34, %v15527_v2 }
 0x77a   : > { %3480 = vadd.xlane.f32.xlu0 %v3479_v1  ;;  %v3515_v28 = vsel %vm1027_vm1, %v15637_v43, 0.0  ;;  %v15646_v4 = vpop.eup %13902  ;;  %v13721_v34 = vpop.permute.xlu1 %13720 }
 0x77b   : > { %11879 = vmatprep.mubr.msk.f32.mxu1 %vm1027_vm1, %v3542_v63  ;;  %v3494_v2 = vsel %vm1027_vm1, %v15646_v4, 0.0  ;;  %v15652_v62 = vpop.eup %13904 }
 0x77c   : > { %v3500_v47 = vsel %vm1027_vm1, %v15652_v62, 0.0 }
 0x77d   : > { %v15642_v15 = vpop.xlane.xlu0 %3474 }
 0x77e   : > { %3516 = vadd.xlane.f32.xlu0 %v3515_v28 }
 0x781   : > { %v3472_v23 = vpop.xlane.xlu0 %3471 }
 0x782   : > { %13906 = vrcp.f32 %v3472_v23  ;;  %3495 = vadd.xlane.f32.xlu0 %v3494_v2 }
 0x783   : > { %13908 = vpow2.f32 %v3442_v6  ;;  %v13702_v6 = vunpack.i.l.bf16 %v15529_v56 }
 0x784   : > { %13910 = vpow2.f32 %v3432_v45 }
 0x785   : > { %13912 = vpow2.f32 %v3436_v25  ;;  %v13707_v25 = vunpack.i.l.bf16 %v15541_v16 }
 0x786   : > { %3501 = vadd.xlane.f32.xlu0 %v3500_v47  ;;  %13914 = vrcp.f32 %v3454_v46  ;;  %v13703_v46 = vunpack.i.h.bf16 %v15529_v56  ;;  %v13708_v47 = vunpack.i.h.bf16 %v15541_v16 }
 0x788   : > { %v12829_v16 = vpack.c.bf16 %v13708_v47, %v13707_v25 }
 0x78c   : > { %v13907_v54 = vpop.eup %13906 }
 0x78d   : > { %v3550_v18 = vmul.f32 %v13907_v54, %v15559_v26  ;;  %v15659_v55 = vpop.eup %13908 }
 0x78e   : > { %v3512_v35 = vsel %vm1027_vm1, %v15659_v55, 0.0  ;;  %v15664_v42 = vpop.eup %13910 }
 0x78f   : > { %11907 = vmatprep.mubr.msk.f32.mxu0 %vm1027_vm1, %v3550_v18  ;;  %v3497_v1 = vsel %vm1027_vm1, %v15664_v42, 0.0  ;;  %v15668_v63 = vpop.eup %13912 }
 0x790   : > { %v3503_v20 = vsel %vm1027_vm1, %v15668_v63, 0.0  ;;  %v13915_v21 = vpop.eup %13914 }
 0x792   : > { %3513 = vadd.xlane.f32.xlu1 %v3512_v35  ;;  %v13712_v35 = vunpack.i.l.bf16 %v15551_v44 }
 0x793   : > { %v3451_v3 = vpop.xlane.xlu1 %3450 }
 0x794   : > { %13916 = vrcp.f32 %v3451_v3 }
 0x795   : > { %13918 = vrcp.f32 %v3460_v17  ;;  %v3544_v17 = vmul.f32 %v13915_v21, %v15534_v11  ;;  %v13713_v11 = vunpack.i.h.bf16 %v15551_v44 }
 0x796   : > { %3498 = vadd.xlane.f32.xlu1 %v3497_v1 }
 0x797   : > { %v3457_v26 = vpop.xlane.xlu1 %3456 }
 0x798   : > { %13920 = vrcp.f32 %v3457_v26  ;;  %v13722_v26 = vunpack.i.l.bf16 %v13721_v34 }
 0x799   : > { %13922 = vrcp.f32 %v3466_v5  ;;  %v12817_v5 = vpack.c.bf16 %v13703_v46, %v13702_v6 }
 0x79a   : > { %3504 = vadd.xlane.f32.xlu1 %v3503_v20 }
 0x79b   : > { %v3463_v28 = vpop.xlane.xlu1 %3462 }
 0x79c   : > { %13924 = vrcp.f32 %v3463_v28 }
 0x79e   : > { %v13917_v23 = vpop.eup %13916 }
 0x79f   : > { %v3543_v2 = vmul.f32 %v13917_v23, %v15568_v41  ;;  %v3469_v45 = vpop.xlane.xlu1 %3468  ;;  %v13919_v58 = vpop.eup %13918 }
 0x7a0   : > { %13926 = vrcp.f32 %v3469_v45  ;;  %v3546_v41 = vmul.f32 %v13919_v58, %v15545_v19  ;;  %v12833_v19 = vpack.c.bf16 %v13713_v11, %v13712_v35 }
 0x7a1   : > { %11880 = vmatmul.mubr.msk.f32.vlgmr.msra.gmra.mrb[52].mxu1 %vm1027_vm1, %v3543_v2 }
 0x7a2   : > { %v13921_v54 = vpop.eup %13920  ;;  %12816 = vmatpush3.bf16.msra.mxu1 %v15376_v51  ;;  %11882 = vmatprep.mubr.msk.f32.mxu1 %vm1027_vm1, %v3544_v17 }
 0x7a3   : > { %12818 = vmatprep.subr.bf16.mxu1 %v12817_v5  ;;  %v3545_v56 = vmul.f32 %v13921_v54, %v15572_v30  ;;  %v13923_v18 = vpop.eup %13922  ;;  %v13723_v30 = vunpack.i.h.bf16 %v13721_v34 }
 0x7a4   : > { %v3548_v1 = vmul.f32 %v13923_v18, %v15549_v9 }
 0x7a5   : > { %11883 = vmatmul.mubr.msk.f32.gmra.mrb[54].mxu1 %vm1027_vm1, %v3545_v56  ;;  %v12845_v28 = vpack.c.bf16 %v13723_v30, %v13722_v26 }
 0x7a6   : > { %v13925_v3 = vpop.eup %13924  ;;  %12820 = vmatpush3.bf16.msra.mxu1 %v12817_v5  ;;  %11893 = vmatprep.mubr.msk.f32.mxu1 %vm1027_vm1, %v3546_v41 }
 0x7a7   : > { %v3547_v51 = vmul.f32 %v13925_v3, %v15576_v14  ;;  %12830 = vmatprep.subr.bf16.mxu1 %v12829_v16 }
 0x7a9   : > { %11894 = vmatmul.mubr.msk.f32.vlgmr.msra.gmra.mrb[56].mxu1 %vm1027_vm1, %v3547_v51 }
 0x7aa   : > { %v13927_v20 = vpop.eup %13926  ;;  %12832 = vmatpush3.bf16.msra.mxu1 %v12829_v16  ;;  %11896 = vmatprep.mubr.msk.f32.mxu1 %vm1027_vm1, %v3548_v1 }
 0x7ab   : > { %12834 = vmatprep.subr.bf16.mxu1 %v12833_v19  ;;  %v3549_v44 = vmul.f32 %v13927_v20, %v15580_v22 }
 0x7ad   : > { %11897 = vmatmul.mubr.msk.f32.gmra.mrb[58].mxu1 %vm1027_vm1, %v3549_v44 }
 0x7ae   : > { %12836 = vmatpush3.bf16.msra.mxu1 %v12833_v19 }
 0x7af   : > { %12846 = vmatprep.subr.bf16.mxu1 %v12845_v28 }
 0x7bf   : > { %v3487_v14 = vpop.xlane.xlu1 %3486 }
 0x7c0   : > { %13928 = vrcp.f32 %v3487_v14  ;;  %v3484_v9 = vpop.xlane.xlu0 %3483 }
 0x7c1   : > { %13930 = vrcp.f32 %v3484_v9 }
 0x7c2   : > { %13932 = vrcp.f32 %v15642_v15 }
 0x7ca   : > { %v13929_v34 = vpop.eup %13928 }
 0x7cb   : > { %v13931_v21 = vpop.eup %13930  ;;  %v3555_v6 = vmul.f32 %v13929_v34, %v15586_v53 }
 0x7cc   : > { %v3554_v46 = vmul.f32 %v13931_v21, %v15589_v24  ;;  %v13933_v47 = vpop.eup %13932 }
 0x7cd   : > { %v3493_v23 = vpop.xlane.xlu1 %3492  ;;  %v3551_v53 = vmul.f32 %v13933_v47, %v15555_v31 }
 0x7ce   : > { %13934 = vrcp.f32 %v3493_v23  ;;  %v3490_v22 = vpop.xlane.xlu0 %3489  ;;  %11921 = vmatprep.mubr.msk.f32.mxu1 %vm1027_vm1, %v3554_v46 }
 0x7cf   : > { %13936 = vrcp.f32 %v3490_v22  ;;  %11922 = vmatmul.mubr.msk.f32.vlgmr.msra.gmra.mrb[60].mxu1 %vm1027_vm1, %v3555_v6  ;;  %v18725_v6 = vmov 0.0  }
 0x7d0   : > { %12848 = vmatpush3.bf16.msra.mxu1 %v12845_v28 }
 0x7d2   : > { %v13726_v2 = vpop.permute.xlu0 %13725 }
 0x7d3   : > { %v13728_v45 = vunpack.i.h.bf16 %v13726_v2  ;;  %v13727_v17 = vunpack.i.l.bf16 %v13726_v2 }
 0x7d5   : > { %v12825_v58 = vpack.c.bf16 %v13728_v45, %v13727_v17 }
 0x7d7   : > { %12826 = vmatprep.subr.bf16.mxu0 %v12825_v58 }
 0x7d8   : > { %v13935_v15 = vpop.eup %13934  ;;  %12828 = vmatpush3.bf16.msra.mxu0 %v12825_v58 }
 0x7d9   : > { %v13937_v24 = vpop.eup %13936  ;;  %12838 = vmatprep.subr.bf16.mxu0 %v14799_v33  ;;  %v3557_v5 = vmul.f32 %v13935_v15, %v15596_v49 }
 0x7da   : > { %v3556_v25 = vmul.f32 %v13937_v24, %v15600_v29  ;;  %v4287_v24 = vld [vmem:[%s18653_s9 + $0x8] sm:$0xff] }
 0x7db   : > { %11908 = vmatmul.mubr.msk.f32.vlgmr.msra.gmra.mrb[44].mxu0 %vm1027_vm1, %v3551_v53  ;;  %v4288_v53 = vld [vmem:[%s18653_s9 + $0x10] sm:$0xff] }
 0x7dc   : > { %11924 = vmatprep.mubr.msk.f32.mxu1 %vm1027_vm1, %v3556_v25  ;;  %12840 = vmatpush3.bf16.msra.mxu0 %v14799_v33  ;;  %v18678_v25 = vmov 0.0|0.0  }
 0x7dd   : > { %11925 = vmatmul.mubr.msk.f32.gmra.mrb[62].mxu1 %vm1027_vm1, %v3557_v5  ;;  %12842 = vmatprep.subr.bf16.mxu0 %v14813_v37 }
 0x7e0   : > { %12844 = vmatpush3.bf16.msra.mxu0 %v14813_v37 }
 0x7e1   : > { %12853 = vmatprep.subr.bf16.mxu0 %v18678_v25 }
 0x7e6   : > { %v3511_v54 = vpop.xlane.xlu1 %3510 }
 0x7e7   : > { %13938 = vrcp.f32 %v3511_v54  ;;  %v4289_v54 = vld [vmem:[%s18653_s9 + $0x18] sm:$0xff] }
 0x7ea   : > { %v3508_v31 = vpop.xlane.xlu1 %3507 }
 0x7eb   : > { %13940 = vrcp.f32 %v3508_v31  ;;  %v12857_v31 = vpack.c.bf16 %v4289_v54, %v4288_v53 }
 0x7ee   : > { %v13731_v56 = vpop.permute.xlu1 %13730 }
 0x7ef   : > { %v13733_v29 = vunpack.i.h.bf16 %v13731_v56  ;;  %v13732_v41 = vunpack.i.l.bf16 %v13731_v56  ;;  %v4290_v56 = vld [vmem:[%s18653_s9 + $0x20] sm:$0xff] }
 0x7f1   : > { %v12849_v18 = vpack.c.bf16 %v13733_v29, %v13732_v41  ;;  %v13939_v49 = vpop.eup %13938  ;;  %v4291_v29 = vld [vmem:[%s18653_s9 + $0x28] sm:$0xff] }
 0x7f2   : > { %v3563_v35 = vmul.f32 %v13939_v49, %v15610_v12  ;;  %v12860_v41 = vpack.c.bf16 %v4291_v29, %v4290_v56  ;;  %v4293_v49 = vld [vmem:[%s18653_s9 + $0x38] sm:$0xff] }
 0x7f3   : > { %12850 = vmatprep.subr.bf16.mxu1 %v12849_v18 }
 0x7f4   : > { %12852 = vmatpush3.bf16.msra.mxu1 %v12849_v18  ;;  %v4292_v18 = vld [vmem:[%s18653_s9 + $0x30] sm:$0xff] }
 0x7f5   : > { %v13941_v11 = vpop.eup %13940 }
 0x7f6   : > { %v3562_v33 = vmul.f32 %v13941_v11, %v15616_v50 }
 0x7f8   : > { %11949 = vmatprep.mubr.msk.f32.mxu1 %vm1027_vm1, %v3562_v33  ;;  %v12863_v33 = vpack.c.bf16 %v4293_v49, %v4292_v18 }
 0x7f9   : > { %11950 = vmatmul.mubr.msk.f32.vlgmr.msra.gmra.mrb[64].mxu1 %vm1027_vm1, %v3563_v35 }
 0x803   : > { %v3478_v37 = vpop.xlane.xlu0 %3477 }
 0x804   : > { %13942 = vrcp.f32 %v3478_v37  ;;  %v4294_v37 = vld [vmem:[%s18653_s9 + $0x40] sm:$0xff] }
 0x807   : > { %v3481_v16 = vpop.xlane.xlu0 %3480 }
 0x808   : > { %13944 = vrcp.f32 %v3481_v16  ;;  %v4295_v16 = vld [vmem:[%s18653_s9 + $0x48] sm:$0xff] }
 0x80b   : > { %v3517_v3 = vpop.xlane.xlu0 %3516 }
 0x80e   : > { %v13943_v51 = vpop.eup %13942 }
 0x80f   : > { %v3496_v1 = vpop.xlane.xlu0 %3495  ;;  %v3552_v30 = vmul.f32 %v13943_v51, %v15629_v27  ;;  %v4296_v51 = vld [vmem:[%s18653_s9 + $0x50] sm:$0xff] }
 0x810   : > { %13946 = vrcp.f32 %v3496_v1  ;;  %v4297_v1 = vld [vmem:[%s18653_s9 + $0x58] sm:$0xff] }
 0x811   : > { %11910 = vmatprep.mubr.msk.f32.mxu0 %vm1027_vm1, %v3552_v30  ;;  %13948 = vrcp.f32 %v3517_v3  ;;  %v12866_v3 = vpack.c.bf16 %v4295_v16, %v4294_v37  ;;  %v12869_v30 = vpack.c.bf16 %v4297_v1, %v4296_v51 }
 0x812   : > { %v13945_v26 = vpop.eup %13944 }
 0x813   : > { %v3553_v50 = vmul.f32 %v13945_v26, %v15633_v39  ;;  %v3502_v44 = vpop.xlane.xlu0 %3501  ;;  %v4298_v26 = vld [vmem:[%s18653_s9 + $0x60] sm:$0xff] }
 0x815   : > { %11911 = vmatmul.mubr.msk.f32.gmra.mrb[46].mxu0 %vm1027_vm1, %v3553_v50  ;;  %v4299_v50 = vld [vmem:[%s18653_s9 + $0x68] sm:$0xff] }
 0x81a   : > { %v13947_v12 = vpop.eup %13946 }
 0x81b   : > { %v3558_v19 = vmul.f32 %v13947_v12, %v15646_v4  ;;  %v13949_v14 = vpop.eup %13948  ;;  %v12872_v12 = vpack.c.bf16 %v4299_v50, %v4298_v26 }
 0x81c   : > { %v3565_v34 = vmul.f32 %v13949_v14, %v15637_v43 }
 0x81d   : > { %11935 = vmatprep.mubr.msk.f32.mxu0 %vm1027_vm1, %v3558_v19  ;;  %v4300_v19 = vld [vmem:[%s18653_s9 + $0x70] sm:$0xff] }
 0x81f   : > { %v3514_v20 = vpop.xlane.xlu1 %3513 }
 0x820   : > { %13950 = vrcp.f32 %v3514_v20  ;;  %v4301_v20 = vld [vmem:[%s18653_s9 + $0x78] sm:$0xff] }
 0x821   : > { %13952 = vrcp.f32 %v3502_v44  ;;  %v12875_v14 = vpack.c.bf16 %v4301_v20, %v4300_v19 }
 0x823   : > { %v3499_v28 = vpop.xlane.xlu1 %3498 }
 0x824   : > { %13954 = vrcp.f32 %v3499_v28 }
 0x827   : > { %v3505_v27 = vpop.xlane.xlu1 %3504 }
 0x828   : > { %13956 = vrcp.f32 %v3505_v27 }
 0x82a   : > { %v13951_v9 = vpop.eup %13950 }
 0x82b   : > { %v3564_v39 = vmul.f32 %v13951_v9, %v15659_v55  ;;  %v13953_v21 = vpop.eup %13952 }
 0x82c   : > { %v3560_v23 = vmul.f32 %v13953_v21, %v15652_v62 }
 0x82d   : > { %11952 = vmatprep.mubr.msk.f32.mxu1 %vm1027_vm1, %v3564_v39  ;;  %v4302_v39 = vld [vmem:[%s18653_s9 + $0x80] sm:$0xff] }
 0x82e   : > { %v13955_v4 = vpop.eup %13954  ;;  %11953 = vmatmul.mubr.msk.f32.gmra.mrb[66].mxu1 %vm1027_vm1, %v3565_v34  ;;  %v4303_v34 = vld [vmem:[%s18653_s9 + $0x88] sm:$0xff] }
 0x82f   : > { %v3559_v46 = vmul.f32 %v13955_v4, %v15664_v42  ;;  %4589 = vmatprep.mubr.f32.mxu1 %v18725_v6  ;;  %v12878_v4 = vpack.c.bf16 %v4303_v34, %v4302_v39 }
 0x831   : > { %11936 = vmatmul.mubr.msk.f32.vlgmr.msra.gmra.mrb[48].mxu0 %vm1027_vm1, %v3559_v46  ;;  %v4304_v46 = vld [vmem:[%s18653_s9 + $0x90] sm:$0xff] }
 0x832   : > { %v13957_v22 = vpop.eup %13956  ;;  %11938 = vmatprep.mubr.msk.f32.mxu0 %vm1027_vm1, %v3560_v23  ;;  %v4305_v23 = vld [vmem:[%s18653_s9 + $0x98] sm:$0xff] }
 0x833   : > { %v3561_v55 = vmul.f32 %v13957_v22, %v15668_v63  ;;  %v4286_v63 = vld [vmem:[%s18653_s9] sm:$0xff]  ;;  %v12881_v22 = vpack.c.bf16 %v4305_v23, %v4304_v46 }
 0x834   : > { %v12854_v5 = vpack.c.bf16 %v4287_v24, %v4286_v63 }
 0x835   : > { %11939 = vmatmul.mubr.msk.f32.gmra.mrb[50].mxu0 %vm1027_vm1, %v3561_v55  ;;  %v4306_v55 = vld [vmem:[%s18653_s9 + $0xa0] sm:$0xff] }
 0x836   : > { %12855 = vmatpush1.bf16.msra.mxu0 %v12854_v5 }
 0x837   : > { %12856 = vmatprep.subr.bf16.mxu0 %v18678_v25 }
 0x83a   : > { %12858 = vmatpush1.bf16.msra.mxu0 %v12857_v31 }
 0x83b   : > { %12859 = vmatprep.subr.bf16.mxu0 %v18678_v25 }
 0x83e   : > { %12861 = vmatpush1.bf16.msra.mxu0 %v12860_v41 }
 0x83f   : > { %12862 = vmatprep.subr.bf16.mxu0 %v18678_v25 }
 0x842   : > { %12864 = vmatpush1.bf16.msra.mxu0 %v12863_v33 }
 0x843   : > { %12865 = vmatprep.subr.bf16.mxu0 %v18678_v25 }
 0x846   : > { %12867 = vmatpush1.bf16.msra.mxu0 %v12866_v3 }
 0x847   : > { %12868 = vmatprep.subr.bf16.mxu0 %v18678_v25 }
 0x84a   : > { %12870 = vmatpush1.bf16.msra.mxu0 %v12869_v30 }
 0x84b   : > { %12871 = vmatprep.subr.bf16.mxu0 %v18678_v25 }
 0x84e   : > { %12873 = vmatpush1.bf16.msra.mxu0 %v12872_v12 }
 0x84f   : > { %12874 = vmatprep.subr.bf16.mxu0 %v18678_v25 }
 0x852   : > { %12876 = vmatpush1.bf16.msra.mxu0 %v12875_v14 }
 0x853   : > { %12877 = vmatprep.subr.bf16.mxu0 %v18678_v25 }
 0x856   : > { %12879 = vmatpush1.bf16.msra.mxu0 %v12878_v4 }
 0x857   : > { %12880 = vmatprep.subr.bf16.mxu0 %v18678_v25 }
 0x85a   : > { %12882 = vmatpush1.bf16.msra.mxu0 %v12881_v22 }
 0x85b   : > { %12883 = vmatprep.subr.bf16.mxu0 %v18678_v25 }
 0x874   : > { %v15729_v43 = vpop.f32.mrb[52].mxu1 }
 0x875   : > { %v15731_v2 = vpop.f32.mrb[53].mxu1 }
 0x878   : > { %v15733_v45 = vpop.f32.mrb[54].mxu1 }
 0x879   : > { %v15735_v42 = vpop.f32.mrb[55].mxu1 }
 0x87c   : > { %v11895_v17 = vpop.f32.mrb[56].mxu1 }
 0x87d   : > { %v3757_v58 = vpop.f32.mrb[57].mxu1 }
 0x87e   : > { %4208 = vrot.lane.b32.xlu0 %v3757_v58, %s18672_s0 }
 0x880   : > { %v15738_v62 = vpop.f32.mrb[58].mxu1 }
 0x881   : > { %v3767_v47 = vpop.f32.mrb[59].mxu1 }
 0x882   : > { %v13734_v15 = vpack.i.bf16 %v3767_v47, %v11895_v17  ;;  %v4307_v17 = vld [vmem:[%s18653_s9 + $0xa8] sm:$0xff]  ;;  %v4308_v47 = vld [vmem:[%s18653_s9 + $0xb0] sm:$0xff] }
 0x883   : > { %v12884_v58 = vpack.c.bf16 %v4307_v17, %v4306_v55 }
 0x884   : > { %13735 = vrot.lane.b32.xlu0 %v13734_v15, %s18672_s0  ;;  %v4309_v15 = vld [vmem:[%s18653_s9 + $0xb8] sm:$0xff] }
 0x885   : > { %12885 = vmatpush1.bf16.msra.mxu0 %v12884_v58  ;;  %v12887_v63 = vpack.c.bf16 %v4309_v15, %v4308_v47 }
 0x886   : > { %12886 = vmatprep.subr.bf16.mxu0 %v18678_v25 }
 0x889   : > { %12888 = vmatpush1.bf16.msra.mxu0 %v12887_v63 }
 0x8a2   : > { %v11923_v11 = vpop.f32.mrb[60].mxu1 }
 0x8a3   : > { %v3975_v35 = vpop.f32.mrb[61].mxu1 }
 0x8ae   : > { %v11909_v44 = vpop.f32.mrb[44].mxu0 }
 0x8af   : > { %v3866_v28 = vpop.f32.mrb[45].mxu0 }
 0x8b0   : > { %4224 = vrot.lane.b32.xlu1 %v3866_v28, %s18676_s16  ;;  %v11926_v27 = vpop.f32.mrb[62].mxu1 }
 0x8b1   : > { %v3985_v9 = vpop.f32.mrb[63].mxu1 }
 0x8b2   : > { %v13744_v21 = vpack.i.bf16 %v3985_v9, %v11923_v11 }
 0x8cc   : > { %v11951_v24 = vpop.f32.mrb[64].mxu1 }
 0x8cd   : > { %4258 = vrot.lane.b32.xlu0 %v11951_v24, %s18672_s0  ;;  %v4185_v53 = vpop.f32.mrb[65].mxu1 }
 0x8ce   : > { %4256 = vrot.lane.b32.xlu1 %v4185_v53, %s18672_s0 }
 0x8d2   : > { %4240 = vrot.lane.b32.xlu1 %v3975_v35, %s18674_s30 }
 0x8e8   : > { %v11912_v5 = vpop.f32.mrb[46].mxu0 }
 0x8e9   : > { %v3876_v54 = vpop.f32.mrb[47].mxu0 }
 0x8ea   : > { %v13739_v31 = vpack.i.bf16 %v3876_v54, %v11909_v44 }
 0x8ec   : > { %13740 = vrot.lane.b32.xlu1 %v13739_v31, %s18676_s16 }
 0x8f0   : > { %13745 = vrot.lane.b32.xlu1 %v13744_v21, %s18674_s30  ;;  %v4209_v33 = vpop.permute.xlu0 %4208 }
 0x8f1   : > { %v4268_v3 = vsel %vm1027_vm1, %v15731_v2, %v4209_v33 }
 0x8f4   : > { %4214 = vrot.lane.b32.xlu1 %v15738_v62, %s18672_s0 }
 0x8f6   : > { %v13736_v37 = vpop.permute.xlu0 %13735 }
 0x8f7   : > { %v13737_v19 = vunpack.i.l.bf16 %v13736_v37  ;;  %v13738_v9 = vunpack.i.h.bf16 %v13736_v37  ;;  %v4700_v37 = vld [vmem:[%s18657_s13 + $0x8] sm:$0xff] }
 0x8f9   : > { %v4270_v23 = vsel %vm1027_vm1, %v15735_v42, %v13738_v9  ;;  %v4486_v9 = vld [vmem:[%s18656_s12 + $0x48] sm:$0xff] }
 0x901   : > { %v11954_v56 = vpop.f32.mrb[66].mxu1 }
 0x902   : > { %4262 = vrot.lane.b32.xlu1 %v11954_v56, %s18672_s0  ;;  %v4195_v29 = vpop.f32.mrb[67].mxu1 }
 0x903   : > { %4260 = vrot.lane.b32.xlu0 %v4195_v29, %s18672_s0  ;;  %v18726_v29 = vld [vmem:[#allocation10_spill] sm:$0xff]  ;;  %s18737_s0 = smov 32  }
 0x904   : > { %v11937_v41 = vpop.f32.mrb[48].mxu0 }
 0x905   : > { %v4072_v18 = vpop.f32.mrb[49].mxu0 }
 0x907   : > { %4230 = vrot.lane.b32.xlu0 %v11912_v5, %s18676_s16  ;;  %s487_s16 = scalar_lea.vmem [#allocation2], %s10416_s23 }
 0x908   : > { %v11940_v49 = vpop.f32.mrb[50].mxu0  ;;  %s10350_s26 = sshll.u32 %s487_s16, 4  ;;  %s18594_s26 = int_to_ptr.vmem [resolvable:$true] %s10350_s26 }
 0x909   : > { %v4082_v11 = vpop.f32.mrb[51].mxu0  ;;  %s14186_s22 = scalar_lea.vmem %s18594_s26, 512  ;;  %p14193_p0 = scmp.lt.s32.totalorder %s18594_s26, %s14191_s27 }
 0x90a   : > { %p14187_p11 = scmp.ne.s32.totalorder %s18594_s26, %s14186_s22  ;;  %p14194_p1 = scmp.lt.s32.totalorder %s14192_s29, %s14186_s22 }
 0x90b   : > { %4246 = vrot.lane.b32.xlu0 %v11926_v27, %s18674_s30  ;;  %v4269_v27 = vsel %vm1027_vm1, %v15729_v43, %v13737_v19  ;;  %s18736_s30 = smov 96  }
 0x90c   : > { %p14188_p12 = pnand %p14187_p11, %p14377_p5  ;;  %p14195_p2 = por %p14194_p1, %p14193_p0 }
 0x90e   : > { %p14189_p13 = pneg %p14188_p12 }
 0x910   : > { %p14196_p3 = pnand %p14195_p2, %p14189_p13 }
 0x922   : > { %v4225_v35 = vpop.permute.xlu1 %4224 }
 0x923   : > { %v4273_v1 = vsel %vm4272_vm3, %v4268_v3, %v4225_v35  ;;  %v4481_v35 = vld [vmem:[%s18656_s12 + $0x20] sm:$0xff] }
 0x924   : > { %v4477_v3 = vld [vmem:[%s18656_s12] sm:$0xff] }
 0x93f   : > { %v4259_v51 = vpop.permute.xlu0 %4258 }
 0x940   : > { %v4257_v16 = vpop.permute.xlu1 %4256  ;;  %v4283_v50 = vsel %vm1027_vm1, %v11937_v41, %v4259_v51  ;;  %v4480_v51 = vld [vmem:[%s18656_s12 + $0x18] sm:$0xff] }
 0x941   : > { %v4282_v62 = vsel %vm1027_vm1, %v4072_v18, %v4257_v16 }
 0x942   : > { %10545 = vmatprep.mubr.msk.f32.mxu0 %vm4272_vm3, %v4282_v62  ;;  %v4703_v62 = vld [vmem:[%s18657_s13 + $0x20] sm:$0xff] }
 0x944   : > { %v4241_v30 = vpop.permute.xlu1 %4240 }
 0x945   : > { %v4278_v26 = vsel %vm4277_vm4, %v4273_v1, %v4241_v30  ;;  %v12953_v1 = vpack.c.bf16 %v4703_v62, %v4700_v37  ;;  %v12891_v30 = vpack.c.bf16 %v4480_v51, %v4477_v3  ;;  %v4717_v62 = vld [vmem:[%s18657_s13 + $0x90] sm:$0xff]  ;;  %v4720_v3 = vld [vmem:[%s18657_s13 + $0xa8] sm:$0xff] }
 0x946   : > { %4387 = vmatmul.mubr.f32.vlgmr.msra.gmra.mrb[52].mxu0 %v4278_v26  ;;  %v4699_v26 = vld [vmem:[%s18657_s13] sm:$0xff]  ;;  %v12967_v51 = vpack.c.bf16 %v4720_v3, %v4717_v62  ;;  %v4742_v62 = vld [vmem:[%s18657_s13 + $0x158] sm:$0xff] }
 0x947   : > { %10546 = vmatprep.mubr.msk.f32.mxu0 %vm4272_vm3, %v4283_v50  ;;  %v4702_v50 = vld [vmem:[%s18657_s13 + $0x18] sm:$0xff]  ;;  %12954 = vmatprep.subr.bf16.mxu0 %v12953_v1  ;;  %v4502_v1 = vld [vmem:[%s18656_s12 + $0xc8] sm:$0xff] }
 0x948   : > { %v12955_v19 = vpack.c.bf16 %v4702_v50, %v4699_v26  ;;  %v4724_v26 = vld [vmem:[%s18657_s13 + $0xc8] sm:$0xff] }
 0x94a   : > { %12956 = vmatpush1.bf16.msra.mxu0 %v12955_v19  ;;  %v4501_v19 = vld [vmem:[%s18656_s12 + $0xc0] sm:$0xff] }
 0x95e   : > { %v13741_v12 = vpop.permute.xlu1 %13740 }
 0x95f   : > { %v13742_v20 = vunpack.i.l.bf16 %v13741_v12  ;;  %v13743_v34 = vunpack.i.h.bf16 %v13741_v12  ;;  %v4484_v12 = vld [vmem:[%s18656_s12 + $0x38] sm:$0xff] }
 0x961   : > { %v4274_v2 = vsel %vm4272_vm3, %v4269_v27, %v13742_v20  ;;  %v4275_v55 = vsel %vm4272_vm3, %v4270_v23, %v13743_v34  ;;  %v4487_v20 = vld [vmem:[%s18656_s12 + $0x50] sm:$0xff] }
 0x962   : > { %v13746_v44 = vpop.permute.xlu1 %13745  ;;  %v12893_v27 = vpack.c.bf16 %v4487_v20, %v4484_v12  ;;  %v4727_v12 = vld [vmem:[%s18657_s13 + $0xe0] sm:$0xff]  ;;  %v4504_v20 = vld [vmem:[%s18656_s12 + $0xd8] sm:$0xff] }
 0x963   : > { %v13747_v28 = vunpack.i.l.bf16 %v13746_v44  ;;  %v13748_v21 = vunpack.i.h.bf16 %v13746_v44  ;;  %v4706_v44 = vld [vmem:[%s18657_s13 + $0x38] sm:$0xff] }
 0x965   : > { %v4279_v14 = vsel %vm4277_vm4, %v4274_v2, %v13747_v28  ;;  %v4280_v43 = vsel %vm4277_vm4, %v4275_v55, %v13748_v21  ;;  %v4709_v28 = vld [vmem:[%s18657_s13 + $0x50] sm:$0xff]  ;;  %v4708_v21 = vld [vmem:[%s18657_s13 + $0x48] sm:$0xff] }
 0x966   : > { %4392 = vmatmul.mubr.f32.gmra.mrb[54].mxu0 %v4279_v14  ;;  %v4215_v39 = vpop.permute.xlu1 %4214  ;;  %v12957_v2 = vpack.c.bf16 %v4709_v28, %v4706_v44  ;;  %v4483_v14 = vld [vmem:[%s18656_s12 + $0x30] sm:$0xff]  ;;  %v4712_v55 = vld [vmem:[%s18657_s13 + $0x68] sm:$0xff]  ;;  %v12969_v44 = vpack.c.bf16 %v4727_v12, %v4724_v26  ;;  %v12907_v28 = vpack.c.bf16 %v4504_v20, %v4501_v19 }
 0x967   : > { %v4271_v47 = vsel %vm1027_vm1, %v15733_v45, %v4215_v39  ;;  %v4705_v39 = vld [vmem:[%s18657_s13 + $0x30] sm:$0xff]  ;;  %v12895_v34 = vpack.c.bf16 %v4486_v9, %v4483_v14  ;;  %v4508_v9 = vld [vmem:[%s18656_s12 + $0xf8] sm:$0xff]  ;;  %v4522_v26 = vld [vmem:[%s18656_s12 + $0x168] sm:$0xff] }
 0x968   : > { %12958 = vmatprep.subr.bf16.mxu0 %v12957_v2  ;;  %v12959_v23 = vpack.c.bf16 %v4708_v21, %v4705_v39  ;;  %v4726_v2 = vld [vmem:[%s18657_s13 + $0xd8] sm:$0xff]  ;;  %v4511_v39 = vld [vmem:[%s18656_s12 + $0x110] sm:$0xff]  ;;  %v4744_v20 = vld [vmem:[%s18657_s13 + $0x168] sm:$0xff] }
 0x969   : > { %v12909_v21 = vpack.c.bf16 %v4511_v39, %v4508_v9  ;;  %v4741_v19 = vld [vmem:[%s18657_s13 + $0x150] sm:$0xff] }
 0x96a   : > { %12960 = vmatpush1.bf16.msra.mxu0 %v12959_v23  ;;  %v4510_v23 = vld [vmem:[%s18656_s12 + $0x108] sm:$0xff]  ;;  %v4479_v39 = vld [vmem:[%s18656_s12 + $0x10] sm:$0xff] }
 0x974   : > { %v4263_v4 = vpop.permute.xlu1 %4262 }
 0x975   : > { %v4261_v46 = vpop.permute.xlu0 %4260  ;;  %v4285_v17 = vsel %vm1027_vm1, %v11940_v49, %v4263_v4  ;;  %v4490_v4 = vld [vmem:[%s18656_s12 + $0x68] sm:$0xff] }
 0x976   : > { %v4284_v22 = vsel %vm1027_vm1, %v4082_v11, %v4261_v46  ;;  %v4493_v46 = vld [vmem:[%s18656_s12 + $0x80] sm:$0xff] }
 0x977   : > { %10547 = vmatprep.mubr.msk.f32.mxu0 %vm4272_vm3, %v4284_v22  ;;  %v12897_v22 = vpack.c.bf16 %v4493_v46, %v4490_v4  ;;  %v4733_v4 = vld [vmem:[%s18657_s13 + $0x110] sm:$0xff] }
 0x978   : > { %4397 = vmatmul.mubr.f32.gmra.mrb[56].mxu0 %v4280_v43  ;;  %v4715_v43 = vld [vmem:[%s18657_s13 + $0x80] sm:$0xff]  ;;  %v4507_v46 = vld [vmem:[%s18656_s12 + $0xf0] sm:$0xff] }
 0x979   : > { %10548 = vmatprep.mubr.msk.f32.mxu0 %vm4272_vm3, %v4285_v17  ;;  %v4231_v58 = vpop.permute.xlu0 %4230  ;;  %v4489_v17 = vld [vmem:[%s18656_s12 + $0x60] sm:$0xff] }
 0x97a   : > { %v4276_v15 = vsel %vm4272_vm3, %v4271_v47, %v4231_v58  ;;  %v12961_v58 = vpack.c.bf16 %v4715_v43, %v4712_v55  ;;  %v4492_v47 = vld [vmem:[%s18656_s12 + $0x78] sm:$0xff]  ;;  %v12911_v55 = vpack.c.bf16 %v4510_v23, %v4507_v46  ;;  %v4729_v43 = vld [vmem:[%s18657_s13 + $0xf0] sm:$0xff] }
 0x97c   : > { %12962 = vmatprep.subr.bf16.mxu0 %v12961_v58 }
 0x97d   : > { %v4247_v42 = vpop.permute.xlu0 %4246 }
 0x97e   : > { %v4281_v63 = vsel %vm4277_vm4, %v4276_v15, %v4247_v42  ;;  %v4711_v15 = vld [vmem:[%s18657_s13 + $0x60] sm:$0xff]  ;;  %v4714_v42 = vld [vmem:[%s18657_s13 + $0x78] sm:$0xff] }
 0x97f   : > { %4402 = vmatmul.mubr.f32.gmra.mrb[58].mxu0 %v4281_v63  ;;  %v12899_v63 = vpack.c.bf16 %v4492_v47, %v4489_v17  ;;  %v4732_v17 = vld [vmem:[%s18657_s13 + $0x108] sm:$0xff] }
 0x980   : > { %4811 = vmatprep.mubr.f32.mxu0 %v18725_v6  ;;  %v12975_v58 = vpack.c.bf16 %v4732_v17, %v4729_v43 }
 0xa19   : > { %v4388_v24 = vpop.f32.mrb[52].mxu0 }
 0xa1a   : > { %v15863_v53 = vadd.f32 %v4388_v24, %v14406_v8  ;;  %v4390_v5 = vpop.f32.mrb[53].mxu0  ;;  %v18727_v8 = vld [vmem:[#allocation9_spill] sm:$0xff]  ;;  %v12963_v24 = vpack.c.bf16 %v4714_v42, %v4711_v15  ;;  %v4514_v15 = vld [vmem:[%s18656_s12 + $0x128] sm:$0xff] }
 0xa1b   : > { %v4517_v42 = vld [vmem:[%s18656_s12 + $0x140] sm:$0xff] }
 0xa1c   : > { %4413 = vadd.xlane.f32.xlu1 %v15863_v53  ;;  %12964 = vmatpush1.bf16.msra.mxu0 %v12963_v24 }
 0xa39   : > { %v4393_v54 = vpop.f32.mrb[54].mxu0 }
 0xa3a   : > { %v15867_v31 = vadd.f32 %v14404_v7, %v4393_v54  ;;  %v4395_v45 = vpop.f32.mrb[55].mxu0  ;;  %v4478_v7 = vld [vmem:[%s18656_s12 + $0x8] sm:$0xff] }
 0xa3b   : > { %v12889_v16 = vpack.c.bf16 %v4481_v35, %v4478_v7  ;;  %v4495_v7 = vld [vmem:[%s18656_s12 + $0x90] sm:$0xff]  ;;  %v4498_v35 = vld [vmem:[%s18656_s12 + $0xa8] sm:$0xff] }
 0xa3c   : > { %4415 = vadd.xlane.f32.xlu0 %v15867_v31 }
 0xa3d   : > { %12890 = vmatprep.subr.bf16.mxu1 %v12889_v16  ;;  %v12903_v16 = vpack.c.bf16 %v4498_v35, %v4495_v7 }
 0xa3e   : > { %12892 = vmatpush1.bf16.msra.mxu1 %v12891_v30  ;;  %v4505_v30 = vld [vmem:[%s18656_s12 + $0xe0] sm:$0xff] }
 0xa3f   : > { %12894 = vmatprep.subr.bf16.mxu1 %v12893_v27  ;;  %v12905_v50 = vpack.c.bf16 %v4505_v30, %v4502_v1  ;;  %v4723_v27 = vld [vmem:[%s18657_s13 + $0xc0] sm:$0xff]  ;;  %v4745_v1 = vld [vmem:[%s18657_s13 + $0x170] sm:$0xff] }
 0xa40   : > { %v12971_v14 = vpack.c.bf16 %v4726_v2, %v4723_v27  ;;  %v4519_v30 = vld [vmem:[%s18656_s12 + $0x150] sm:$0xff] }
 0xa41   : > { %v12919_v12 = vpack.c.bf16 %v4522_v26, %v4519_v30  ;;  %v4515_v26 = vld [vmem:[%s18656_s12 + $0x130] sm:$0xff] }
 0xa42   : > { %12896 = vmatpush1.bf16.msra.mxu1 %v12895_v34  ;;  %v4730_v34 = vld [vmem:[%s18657_s13 + $0xf8] sm:$0xff] }
 0xa43   : > { %12898 = vmatprep.subr.bf16.mxu1 %v12897_v22  ;;  %v12973_v22 = vpack.c.bf16 %v4733_v4, %v4730_v34  ;;  %v4482_v34 = vld [vmem:[%s18656_s12 + $0x28] sm:$0xff] }
 0xa44   : > { %v12921_v4 = vpack.c.bf16 %v4482_v34, %v4479_v39 }
 0xa46   : > { %12900 = vmatpush1.bf16.msra.mxu1 %v12899_v63  ;;  %v4736_v63 = vld [vmem:[%s18657_s13 + $0x128] sm:$0xff] }
 0xa4b   : > { %v4398_v56 = vpop.f32.mrb[56].mxu0 }
 0xa4c   : > { %v15871_v41 = vadd.f32 %v4398_v56, %v18726_v29  ;;  %v4400_v18 = vpop.f32.mrb[57].mxu0  ;;  %v4496_v29 = vld [vmem:[%s18656_s12 + $0x98] sm:$0xff] }
 0xa4d   : > { %v4499_v18 = vld [vmem:[%s18656_s12 + $0xb0] sm:$0xff] }
 0xa4e   : > { %4417 = vadd.xlane.f32.xlu0 %v15871_v41 }
 0xa52   : > { %v4403_v49 = vpop.f32.mrb[58].mxu0 }
 0xa53   : > { %v15875_v11 = vadd.f32 %v18727_v8, %v4403_v49  ;;  %v4405_v33 = vpop.f32.mrb[59].mxu0  ;;  %v4718_v49 = vld [vmem:[%s18657_s13 + $0x98] sm:$0xff]  ;;  %v12901_v8 = vpack.c.bf16 %v4499_v18, %v4496_v29 }
 0xa54   : > { %v4721_v33 = vld [vmem:[%s18657_s13 + $0xb0] sm:$0xff]  ;;  %v4516_v29 = vld [vmem:[%s18656_s12 + $0x138] sm:$0xff] }
 0xa55   : > { %4419 = vadd.xlane.f32.xlu0 %v15875_v11  ;;  %v12965_v37 = vpack.c.bf16 %v4721_v33, %v4718_v49  ;;  %12902 = vmatprep.subr.bf16.mxu1 %v12901_v8  ;;  %v4735_v8 = vld [vmem:[%s18657_s13 + $0x120] sm:$0xff]  ;;  %v4738_v33 = vld [vmem:[%s18657_s13 + $0x138] sm:$0xff] }
 0xa56   : > { %12904 = vmatpush1.bf16.msra.mxu1 %v12903_v16  ;;  %v12979_v35 = vpack.c.bf16 %v4738_v33, %v4735_v8  ;;  %v4523_v16 = vld [vmem:[%s18656_s12 + $0x170] sm:$0xff] }
 0xa57   : > { %12966 = vmatprep.subr.bf16.mxu0 %v12965_v37  ;;  %12906 = vmatprep.subr.bf16.mxu1 %v12905_v50  ;;  %v4520_v37 = vld [vmem:[%s18656_s12 + $0x158] sm:$0xff]  ;;  %v12981_v50 = vpack.c.bf16 %v4745_v1, %v4742_v62  ;;  %v4503_v33 = vld [vmem:[%s18656_s12 + $0xd0] sm:$0xff] }
 0xa58   : > { %12968 = vmatpush1.bf16.msra.mxu0 %v12967_v51  ;;  %v12917_v51 = vpack.c.bf16 %v4523_v16, %v4520_v37 }
 0xa59   : > { %12970 = vmatprep.subr.bf16.mxu0 %v12969_v44  ;;  %v12983_v44 = vpack.c.bf16 %v4744_v20, %v4741_v19  ;;  %v4521_v19 = vld [vmem:[%s18656_s12 + $0x160] sm:$0xff]  ;;  %v4524_v20 = vld [vmem:[%s18656_s12 + $0x178] sm:$0xff] }
 0xa5a   : > { %12908 = vmatpush1.bf16.msra.mxu1 %v12907_v28 }
 0xa5b   : > { %12910 = vmatprep.subr.bf16.mxu1 %v12909_v21 }
 0xa5c   : > { %12972 = vmatpush1.bf16.msra.mxu0 %v12971_v14 }
 0xa5d   : > { %12974 = vmatprep.subr.bf16.mxu0 %v12973_v22 }
 0xa5e   : > { %12912 = vmatpush1.bf16.msra.mxu1 %v12911_v55 }
 0xa60   : > { %12976 = vmatpush1.bf16.msra.mxu0 %v12975_v58  ;;  %v16099_v58 = vld [vmem:[%s18654_s10] ss:$0 sm:$0xff] }
 0xaa9   : > { %v4414_v5 = vpop.xlane.xlu1 %4413 }
 0xaaa   : > { %v4421_v54 = vmul.f32 0.0078125, %v4414_v5  ;;  %v12913_v5 = vpack.c.bf16 %v4517_v42, %v4514_v15  ;;  %v16105_v15 = vld [vmem:[%s18655_s11] ss:$0 sm:$0xff] }
 0xaab   : > { %v4485_v42 = vld [vmem:[%s18656_s12 + $0x40] sm:$0xff] }
 0xaac   : > { %v15951_v45 = vsub.f32 %v15863_v53, %v4421_v54  ;;  %v4739_v54 = vld [vmem:[%s18657_s13 + $0x140] sm:$0xff]  ;;  %12914 = vmatprep.subr.bf16.mxu1 %v12913_v5 }
 0xaad   : > { %v12977_v18 = vpack.c.bf16 %v4739_v54, %v4736_v63  ;;  %v4488_v63 = vld [vmem:[%s18656_s12 + $0x58] sm:$0xff] }
 0xaae   : > { %v4429_v56 = vmul.f32 %v15951_v45, %v15951_v45  ;;  %v12925_v54 = vpack.c.bf16 %v4488_v63, %v4485_v42 }
 0xaaf   : > { %12978 = vmatprep.subr.bf16.mxu0 %v12977_v18  ;;  %v4497_v18 = vld [vmem:[%s18656_s12 + $0xa0] sm:$0xff] }
 0xab0   : > { %4433 = vadd.xlane.f32.xlu1 %v4429_v56  ;;  %v4513_v56 = vld [vmem:[%s18656_s12 + $0x120] sm:$0xff]  ;;  %12980 = vmatpush1.bf16.msra.mxu0 %v12979_v35  ;;  %v4506_v35 = vld [vmem:[%s18656_s12 + $0xe8] sm:$0xff] }
 0xab1   : > { %v12915_v49 = vpack.c.bf16 %v4516_v29, %v4513_v56  ;;  %12982 = vmatprep.subr.bf16.mxu0 %v12981_v50  ;;  %v4494_v56 = vld [vmem:[%s18656_s12 + $0x88] sm:$0xff]  ;;  %v12937_v16 = vpack.c.bf16 %v4506_v35, %v4503_v33  ;;  %v4725_v35 = vld [vmem:[%s18657_s13 + $0xd0] sm:$0xff] }
 0xab2   : > { %v4518_v50 = vld [vmem:[%s18656_s12 + $0x148] sm:$0xff] }
 0xab3   : > { %12916 = vmatpush1.bf16.msra.mxu1 %v12915_v49  ;;  %v4500_v49 = vld [vmem:[%s18656_s12 + $0xb8] sm:$0xff] }
 0xab4   : > { %12918 = vmatprep.subr.bf16.mxu1 %v12917_v51  ;;  %12984 = vmatpush1.bf16.msra.mxu0 %v12983_v44  ;;  %v12933_v8 = vpack.c.bf16 %v4500_v49, %v4497_v18  ;;  %v4512_v51 = vld [vmem:[%s18656_s12 + $0x118] sm:$0xff]  ;;  %v12949_v44 = vpack.c.bf16 %v4524_v20, %v4521_v19  ;;  %v4719_v49 = vld [vmem:[%s18657_s13 + $0xa0] sm:$0xff]  ;;  %v5274_v20 = vld [vmem:[%s18658_s14 + $0x88] sm:$0xff] }
 0xab5   : > { %v5273_v19 = vld [vmem:[%s18658_s14 + $0x80] sm:$0xff] }
 0xab7   : > { %12920 = vmatpush1.bf16.msra.mxu1 %v12919_v12  ;;  %v12945_v12 = vpack.c.bf16 %v4518_v50, %v4515_v26  ;;  %v4743_v26 = vld [vmem:[%s18657_s13 + $0x160] sm:$0xff]  ;;  %v4746_v50 = vld [vmem:[%s18657_s13 + $0x178] sm:$0xff] }
 0xab8   : > { %12922 = vmatprep.subr.bf16.mxu1 %v12921_v4 }
 0xac9   : > { %v4416_v47 = vpop.xlane.xlu0 %4415 }
 0xaca   : > { %v4422_v24 = vmul.f32 0.0078125, %v4416_v47 }
 0xacc   : > { %v16052_v7 = vsub.f32 %v15867_v31, %v4422_v24 }
 0xace   : > { %v4430_v3 = vmul.f32 %v16052_v7, %v16052_v7 }
 0xad0   : > { %4435 = vadd.xlane.f32.xlu0 %v4430_v3  ;;  %v4509_v3 = vld [vmem:[%s18656_s12 + $0x100] sm:$0xff] }
 0xad1   : > { %v12941_v30 = vpack.c.bf16 %v4512_v51, %v4509_v3  ;;  %v4737_v51 = vld [vmem:[%s18657_s13 + $0x130] sm:$0xff] }
 0xadb   : > { %v4418_v28 = vpop.xlane.xlu0 %4417 }
 0xadc   : > { %v4423_v27 = vmul.f32 0.0078125, %v4418_v28  ;;  %v4701_v28 = vld [vmem:[%s18657_s13 + $0x10] sm:$0xff] }
 0xade   : > { %v16081_v2 = vsub.f32 %v15871_v41, %v4423_v27  ;;  %v4704_v27 = vld [vmem:[%s18657_s13 + $0x28] sm:$0xff] }
 0xadf   : > { %v12985_v39 = vpack.c.bf16 %v4704_v27, %v4701_v28  ;;  %v5257_v28 = vld [vmem:[%s18658_s14] sm:$0xff]  ;;  %v5258_v27 = vld [vmem:[%s18658_s14 + $0x8] sm:$0xff] }
 0xae0   : > { %v4431_v14 = vmul.f32 %v16081_v2, %v16081_v2 }
 0xae2   : > { %4437 = vadd.xlane.f32.xlu1 %v4431_v14  ;;  %v4420_v9 = vpop.xlane.xlu0 %4419 }
 0xae3   : > { %v4424_v21 = vmul.f32 0.0078125, %v4420_v9 }
 0xae5   : > { %v16092_v46 = vsub.f32 %v15875_v11, %v4424_v21 }
 0xae7   : > { %v4432_v23 = vmul.f32 %v16092_v46, %v16092_v46 }
 0xae9   : > { %4439 = vadd.xlane.f32.xlu0 %v4432_v23 }
 0xb3d   : > { %v4434_v22 = vpop.xlane.xlu1 %4433 }
 0xb3e   : > { %v4441_v55 = vmul.f32 0.0078125, %v4434_v22 }
 0xb40   : > { %v4445_v43 = vadd.f32 1e-05, %v4441_v55 }
 0xb42   : > { %13958 = vrsqrt.f32 %v4445_v43 }
 0xb4c   : > { %v13959_v17 = vpop.eup %13958 }
 0xb4d   : > { %v4453_v47 = vmul.f32 %v13959_v17, %v15951_v45  ;;  %v4491_v45 = vld [vmem:[%s18656_s12 + $0x70] sm:$0xff] }
 0xb4e   : > { %v12929_v29 = vpack.c.bf16 %v4494_v56, %v4491_v45 }
 0xb4f   : > { %v4463_v24 = vmul.f32 %v16099_v58, %v4453_v47 }
 0xb51   : > { %v16115_v5 = vadd.f32 %v16105_v15, %v4463_v24 }
 0xb53   : > { %4590 = vmatmul.mubr.f32.vlgmr.msra.gmra.mrb[68].mxu1 %v16115_v5  ;;  %4812 = vmatmul.mubr.f32.vlgmr.msra.gmra.mrb[60].mxu0 %v16115_v5 }
 0xb54   : > { %12924 = vmatpush3.bf16.msra.mxu1 %v12921_v4  ;;  %4595 = vmatprep.mubr.f32.mxu1 %v18725_v6 }
 0xb55   : > { %4817 = vmatprep.mubr.f32.mxu0 %v18725_v6  ;;  %12926 = vmatprep.subr.bf16.mxu1 %v12925_v54 }
 0xb58   : > { %12928 = vmatpush3.bf16.msra.mxu1 %v12925_v54 }
 0xb59   : > { %12930 = vmatprep.subr.bf16.mxu1 %v12929_v29 }
 0xb5c   : > { %12932 = vmatpush3.bf16.msra.mxu1 %v12929_v29  ;;  %v4710_v29 = vld [vmem:[%s18657_s13 + $0x58] sm:$0xff] }
 0xb5d   : > { %v4436_v37 = vpop.xlane.xlu0 %4435  ;;  %12934 = vmatprep.subr.bf16.mxu1 %v12933_v8 }
 0xb5e   : > { %v4442_v62 = vmul.f32 0.0078125, %v4436_v37  ;;  %v4728_v37 = vld [vmem:[%s18657_s13 + $0xe8] sm:$0xff] }
 0xb60   : > { %v4446_v1 = vadd.f32 1e-05, %v4442_v62  ;;  %12936 = vmatpush3.bf16.msra.mxu1 %v12933_v8  ;;  %v4722_v8 = vld [vmem:[%s18657_s13 + $0xb8] sm:$0xff]  ;;  %v4731_v62 = vld [vmem:[%s18657_s13 + $0x100] sm:$0xff] }
 0xb61   : > { %12938 = vmatprep.subr.bf16.mxu1 %v12937_v16  ;;  %v12997_v33 = vpack.c.bf16 %v4722_v8, %v4719_v49  ;;  %v5283_v49 = vld [vmem:[%s18658_s14 + $0xd0] sm:$0xff]  ;;  %v5284_v8 = vld [vmem:[%s18658_s14 + $0xd8] sm:$0xff] }
 0xb62   : > { %13960 = vrsqrt.f32 %v4446_v1  ;;  %v4740_v1 = vld [vmem:[%s18657_s13 + $0x148] sm:$0xff] }
 0xb64   : > { %12940 = vmatpush3.bf16.msra.mxu1 %v12937_v16  ;;  %v13001_v16 = vpack.c.bf16 %v4728_v37, %v4725_v35  ;;  %v5267_v35 = vld [vmem:[%s18658_s14 + $0x50] sm:$0xff]  ;;  %v5268_v37 = vld [vmem:[%s18658_s14 + $0x58] sm:$0xff] }
 0xb65   : > { %12942 = vmatprep.subr.bf16.mxu1 %v12941_v30 }
 0xb68   : > { %12944 = vmatpush3.bf16.msra.mxu1 %v12941_v30  ;;  %v13009_v30 = vpack.c.bf16 %v4740_v1, %v4737_v51  ;;  %v5269_v51 = vld [vmem:[%s18658_s14 + $0x60] sm:$0xff]  ;;  %v5270_v1 = vld [vmem:[%s18658_s14 + $0x68] sm:$0xff] }
 0xb69   : > { %12946 = vmatprep.subr.bf16.mxu1 %v12945_v12 }
 0xb6c   : > { %v13961_v14 = vpop.eup %13960  ;;  %12948 = vmatpush3.bf16.msra.mxu1 %v12945_v12  ;;  %v13013_v12 = vpack.c.bf16 %v4746_v50, %v4743_v26  ;;  %v5287_v26 = vld [vmem:[%s18658_s14 + $0xf0] sm:$0xff]  ;;  %v5288_v50 = vld [vmem:[%s18658_s14 + $0xf8] sm:$0xff] }
 0xb6d   : > { %v4454_v9 = vmul.f32 %v13961_v14, %v16052_v7  ;;  %12950 = vmatprep.subr.bf16.mxu1 %v12949_v44  ;;  %v13019_v14 = vpack.c.bf16 %v5258_v27, %v5257_v28  ;;  %v5289_v28 = vld [vmem:[%s18658_s14 + $0x100] sm:$0xff]  ;;  %v5290_v27 = vld [vmem:[%s18658_s14 + $0x108] sm:$0xff] }
 0xb6f   : > { %v4438_v34 = vpop.xlane.xlu1 %4437  ;;  %v4464_v21 = vmul.f32 %v16099_v58, %v4454_v9  ;;  %v5275_v9 = vld [vmem:[%s18658_s14 + $0x90] sm:$0xff] }
 0xb70   : > { %v4443_v4 = vmul.f32 0.0078125, %v4438_v34  ;;  %12952 = vmatpush3.bf16.msra.mxu1 %v12949_v44  ;;  %v13017_v44 = vpack.c.bf16 %v5274_v20, %v5273_v19  ;;  %v5271_v19 = vld [vmem:[%s18658_s14 + $0x70] sm:$0xff]  ;;  %v5272_v20 = vld [vmem:[%s18658_s14 + $0x78] sm:$0xff] }
 0xb71   : > { %v16166_v23 = vadd.f32 %v16105_v15, %v4464_v21  ;;  %12986 = vmatprep.subr.bf16.mxu1 %v12985_v39  ;;  %v5259_v21 = vld [vmem:[%s18658_s14 + $0x10] sm:$0xff] }
 0xb72   : > { %v4447_v22 = vadd.f32 1e-05, %v4443_v4  ;;  %13018 = vmatprep.subr.bf16.mxu0 %v13017_v44  ;;  %v5260_v4 = vld [vmem:[%s18658_s14 + $0x18] sm:$0xff]  ;;  %v13047_v44 = vpack.c.bf16 %v5272_v20, %v5271_v19 }
 0xb73   : > { %4596 = vmatmul.mubr.f32.gmra.mrb[70].mxu1 %v16166_v23  ;;  %4818 = vmatmul.mubr.f32.gmra.mrb[62].mxu0 %v16166_v23 }
 0xb74   : > { %13962 = vrsqrt.f32 %v4447_v22  ;;  %4601 = vmatprep.mubr.f32.mxu1 %v18725_v6  ;;  %4823 = vmatprep.mubr.f32.mxu0 %v18725_v6  ;;  %v5277_v22 = vld [vmem:[%s18658_s14 + $0xa0] sm:$0xff] }
 0xb75   : > { %13020 = vmatpush3.bf16.msra.mxu0 %v13019_v14 }
 0xb76   : > { %v4440_v7 = vpop.xlane.xlu0 %4439 }
 0xb77   : > { %v4444_v55 = vmul.f32 0.0078125, %v4440_v7  ;;  %v5278_v7 = vld [vmem:[%s18658_s14 + $0xa8] sm:$0xff] }
 0xb79   : > { %v4448_v43 = vadd.f32 1e-05, %v4444_v55  ;;  %v13025_v55 = vpack.c.bf16 %v5278_v7, %v5277_v22  ;;  %v5291_v7 = vld [vmem:[%s18658_s14 + $0x110] sm:$0xff] }
 0xb7b   : > { %13964 = vrsqrt.f32 %v4448_v43  ;;  %v5261_v43 = vld [vmem:[%s18658_s14 + $0x20] sm:$0xff] }
 0xb7e   : > { %v13963_v17 = vpop.eup %13962 }
 0xb7f   : > { %v4455_v47 = vmul.f32 %v13963_v17, %v16081_v2  ;;  %v4707_v2 = vld [vmem:[%s18657_s13 + $0x40] sm:$0xff]  ;;  %v5262_v17 = vld [vmem:[%s18658_s14 + $0x28] sm:$0xff] }
 0xb80   : > { %v12989_v18 = vpack.c.bf16 %v4710_v29, %v4707_v2  ;;  %v5281_v2 = vld [vmem:[%s18658_s14 + $0xc0] sm:$0xff]  ;;  %v5282_v29 = vld [vmem:[%s18658_s14 + $0xc8] sm:$0xff] }
 0xb81   : > { %v4465_v42 = vmul.f32 %v16099_v58, %v4455_v47  ;;  %v13027_v47 = vpack.c.bf16 %v5262_v17, %v5261_v43 }
 0xb83   : > { %v4475_v63 = vadd.f32 %v16105_v15, %v4465_v42  ;;  %v5279_v42 = vld [vmem:[%s18658_s14 + $0xb0] sm:$0xff] }
 0xb85   : > { %v13965_v24 = vpop.eup %13964  ;;  %4602 = vmatmul.mubr.f32.gmra.mrb[72].mxu1 %v4475_v63  ;;  %4824 = vmatmul.mubr.f32.gmra.mrb[64].mxu0 %v4475_v63 }
 0xb86   : > { %4607 = vmatprep.mubr.f32.mxu1 %v18725_v6  ;;  %4829 = vmatprep.mubr.f32.mxu0 %v18725_v6  ;;  %v4456_v54 = vmul.f32 %v13965_v24, %v16092_v46  ;;  %v4713_v46 = vld [vmem:[%s18657_s13 + $0x70] sm:$0xff] }
 0xb88   : > { %v4466_v45 = vmul.f32 %v16099_v58, %v4456_v54  ;;  %v4716_v58 = vld [vmem:[%s18657_s13 + $0x88] sm:$0xff]  ;;  %v5263_v54 = vld [vmem:[%s18658_s14 + $0x30] sm:$0xff] }
 0xb8a   : > { %v4476_v56 = vadd.f32 %v16105_v15, %v4466_v45  ;;  %v12993_v15 = vpack.c.bf16 %v4716_v58, %v4713_v46  ;;  %v5264_v45 = vld [vmem:[%s18658_s14 + $0x38] sm:$0xff]  ;;  %v5265_v46 = vld [vmem:[%s18658_s14 + $0x40] sm:$0xff]  ;;  %v5266_v58 = vld [vmem:[%s18658_s14 + $0x48] sm:$0xff] }
 0xb8c   : > { %4608 = vmatmul.mubr.f32.gmra.mrb[74].mxu1 %v4476_v56  ;;  %4830 = vmatmul.mubr.f32.gmra.mrb[66].mxu0 %v4476_v56 }
 0xb8d   : > { %11987 = vmatprep.mubr.f32.mxu1 %v16115_v5 }
 0xb90   : > { %11988 = vmatmul.mubr.f32.vlgmr.msra.gmra.mrb[76].mxu1 %v16166_v23 }
 0xb91   : > { %12988 = vmatpush3.bf16.msra.mxu1 %v12985_v39  ;;  %11990 = vmatprep.mubr.f32.mxu1 %v4475_v63  ;;  %v5276_v39 = vld [vmem:[%s18658_s14 + $0x98] sm:$0xff] }
 0xb92   : > { %12990 = vmatprep.subr.bf16.mxu1 %v12989_v18  ;;  %v13021_v34 = vpack.c.bf16 %v5276_v39, %v5275_v9  ;;  %v13049_v39 = vpack.c.bf16 %v5290_v27, %v5289_v28 }
 0xb94   : > { %11991 = vmatmul.mubr.f32.gmra.mrb[78].mxu1 %v4476_v56  ;;  %13022 = vmatprep.subr.bf16.mxu0 %v13021_v34 }
 0xb95   : > { %12992 = vmatpush3.bf16.msra.mxu1 %v12989_v18  ;;  %12025 = vmatprep.mubr.f32.mxu1 %v16115_v5  ;;  %v4734_v5 = vld [vmem:[%s18657_s13 + $0x118] sm:$0xff]  ;;  %v13033_v18 = vpack.c.bf16 %v5282_v29, %v5281_v2  ;;  %v5295_v2 = vld [vmem:[%s18658_s14 + $0x130] sm:$0xff] }
 0xb96   : > { %12994 = vmatprep.subr.bf16.mxu1 %v12993_v15  ;;  %v13005_v3 = vpack.c.bf16 %v4734_v5, %v4731_v62  ;;  %v5285_v62 = vld [vmem:[%s18658_s14 + $0xe0] sm:$0xff]  ;;  %v5286_v5 = vld [vmem:[%s18658_s14 + $0xe8] sm:$0xff]  ;;  %v5296_v29 = vld [vmem:[%s18658_s14 + $0x138] sm:$0xff] }
 0xb99   : > { %12996 = vmatpush3.bf16.msra.mxu1 %v12993_v15  ;;  %v13035_v15 = vpack.c.bf16 %v5266_v58, %v5265_v46  ;;  %v5297_v58 = vld [vmem:[%s18658_s14 + $0x140] sm:$0xff] }
 0xb9a   : > { %12998 = vmatprep.subr.bf16.mxu1 %v12997_v33 }
 0xb9d   : > { %13000 = vmatpush3.bf16.msra.mxu1 %v12997_v33  ;;  %v13037_v33 = vpack.c.bf16 %v5284_v8, %v5283_v49 }
 0xb9e   : > { %13002 = vmatprep.subr.bf16.mxu1 %v13001_v16 }
 0xba1   : > { %13004 = vmatpush3.bf16.msra.mxu1 %v13001_v16  ;;  %v13039_v16 = vpack.c.bf16 %v5268_v37, %v5267_v35 }
 0xba2   : > { %13006 = vmatprep.subr.bf16.mxu1 %v13005_v3 }
 0xba5   : > { %13008 = vmatpush3.bf16.msra.mxu1 %v13005_v3  ;;  %v13041_v3 = vpack.c.bf16 %v5286_v5, %v5285_v62 }
 0xba6   : > { %13010 = vmatprep.subr.bf16.mxu1 %v13009_v30 }
 0xba9   : > { %13012 = vmatpush3.bf16.msra.mxu1 %v13009_v30  ;;  %v13043_v30 = vpack.c.bf16 %v5270_v1, %v5269_v51 }
 0xbaa   : > { %13014 = vmatprep.subr.bf16.mxu1 %v13013_v12 }
 0xbad   : > { %13016 = vmatpush3.bf16.msra.mxu1 %v13013_v12  ;;  %v13045_v12 = vpack.c.bf16 %v5288_v50, %v5287_v26 }
 0xbae   : > { %13050 = vmatprep.subr.bf16.mxu1 %v13049_v39 }
 0xbb0   : > { %12026 = vmatmul.mubr.f32.vlgmr.msra.gmra.mrb[80].mxu1 %v16166_v23  ;;  %v13023_v23 = vpack.c.bf16 %v5260_v4, %v5259_v21 }
 0xbb1   : > { %12028 = vmatprep.mubr.f32.mxu1 %v4475_v63  ;;  %v5280_v63 = vld [vmem:[%s18658_s14 + $0xb8] sm:$0xff]  ;;  %13052 = vmatpush3.bf16.msra.mxu1 %v13049_v39 }
 0xbb2   : > { %13024 = vmatpush3.bf16.msra.mxu0 %v13023_v23  ;;  %v13029_v24 = vpack.c.bf16 %v5280_v63, %v5279_v42 }
 0xbb3   : > { %13026 = vmatprep.subr.bf16.mxu0 %v13025_v55  ;;  %v5292_v55 = vld [vmem:[%s18658_s14 + $0x118] sm:$0xff] }
 0xbb4   : > { %12029 = vmatmul.mubr.f32.gmra.mrb[82].mxu1 %v4476_v56  ;;  %v13031_v56 = vpack.c.bf16 %v5264_v45, %v5263_v54  ;;  %v13053_v17 = vpack.c.bf16 %v5292_v55, %v5291_v7  ;;  %v5294_v54 = vld [vmem:[%s18658_s14 + $0x128] sm:$0xff] }
 0xbb6   : > { %13028 = vmatpush3.bf16.msra.mxu0 %v13027_v47  ;;  %13054 = vmatprep.subr.bf16.mxu1 %v13053_v17 }
 0xbb7   : > { %13030 = vmatprep.subr.bf16.mxu0 %v13029_v24  ;;  %13056 = vmatpush3.bf16.msra.mxu1 %v13053_v17  ;;  %v5293_v24 = vld [vmem:[%s18658_s14 + $0x120] sm:$0xff] }
 0xbba   : > { %13032 = vmatpush3.bf16.msra.mxu0 %v13031_v56  ;;  %v13057_v56 = vpack.c.bf16 %v5294_v54, %v5293_v24 }
 0xbbb   : > { %13034 = vmatprep.subr.bf16.mxu0 %v13033_v18  ;;  %v13061_v18 = vpack.c.bf16 %v5296_v29, %v5295_v2 }
 0xbbc   : > { %13058 = vmatprep.subr.bf16.mxu1 %v13057_v56 }
 0xbbd   : > { %13060 = vmatpush3.bf16.msra.mxu1 %v13057_v56 }
 0xbbe   : > { %13036 = vmatpush3.bf16.msra.mxu0 %v13035_v15  ;;  %13062 = vmatprep.subr.bf16.mxu1 %v13061_v18  ;;  %v5298_v15 = vld [vmem:[%s18658_s14 + $0x148] sm:$0xff] }
 0xbbf   : > { %13038 = vmatprep.subr.bf16.mxu0 %v13037_v33  ;;  %v13065_v8 = vpack.c.bf16 %v5298_v15, %v5297_v58 }
 0xbc1   : > { %13064 = vmatpush3.bf16.msra.mxu1 %v13061_v18 }
 0xbc2   : > { %13040 = vmatpush3.bf16.msra.mxu0 %v13039_v16  ;;  %13066 = vmatprep.subr.bf16.mxu1 %v13065_v8 }
 0xbc3   : > { %13042 = vmatprep.subr.bf16.mxu0 %v13041_v3  ;;  %v5299_v3 = vld [vmem:[%s18658_s14 + $0x150] sm:$0x1f] }
 0xbc5   : > { %13068 = vmatpush3.bf16.msra.mxu1 %v13065_v8 }
 0xbc6   : > { %13044 = vmatpush3.bf16.msra.mxu0 %v13043_v30  ;;  %12051 = vmatprep.subr.msk.mxu1 %vm5313_vm5, %v5299_v3 }
 0xbc7   : > { %13046 = vmatprep.subr.bf16.mxu0 %v13045_v12 }
 0xbc9   : > { %12052 = vmatpush3.msk.msra.mxu1 %vm5313_vm5, %v5299_v3 }
 0xbca   : > { %13048 = vmatpush3.bf16.msra.mxu0 %v13047_v44 }
 0xc26   : > { %v16328_v14 = vpop.f32.mrb[68].mxu1  ;;  %v16330_v9 = vpop.f32.mrb[60].mxu0 }
 0xc27   : > { %v16333_v34 = vmul.f32 0.70710677, %v16330_v9  ;;  %v16335_v21 = vpop.f32.mrb[69].mxu1  ;;  %v16337_v4 = vpop.f32.mrb[61].mxu0 }
 0xc28   : > { %v16340_v23 = vmul.f32 0.70710677, %v16337_v4 }
 0xc29   : > { %v4969_v22 = vand.u32 2147483647, %v16333_v34  ;;  %vm4945_vm6 = vcmp.ge.f32.partialorder %v16333_v34, 0.0  ;;  %v4921_v34 = vmul.f32 0.5, %v16330_v9 }
 0xc2a   : > { %v4970_v43 = vand.u32 2147483647, %v16340_v23  ;;  %vm4946_vm7 = vcmp.ge.f32.partialorder %v16340_v23, 0.0 }
 0xc2b   : > { %v4981_v47 = vmul.f32 0.3275911, %v4969_v22  ;;  %v5137_v46 = vsub.f32 0.0, %v4969_v22 }
 0xc2c   : > { %v4982_v42 = vmul.f32 0.3275911, %v4970_v43  ;;  %v5138_v49 = vsub.f32 0.0, %v4970_v43 }
 0xc2d   : > { %v4993_v63 = vadd.f32 1.0, %v4981_v47  ;;  %v5149_v35 = vmul.f32 %v5137_v46, %v4969_v22 }
 0xc2e   : > { %v4994_v45 = vadd.f32 1.0, %v4982_v42  ;;  %v5150_v62 = vmul.f32 %v5138_v49, %v4970_v43 }
 0xc2f   : > { %13966 = vrcp.f32 %v4993_v63  ;;  %v5161_v1 = vmul.f32 1.442695, %v5149_v35 }
 0xc30   : > { %13968 = vrcp.f32 %v4994_v45  ;;  %v5163_v50 = vmul.f32 1.442695, %v5150_v62 }
 0xc31   : > { %13970 = vpow2.f32 %v5161_v1 }
 0xc32   : > { %13972 = vpow2.f32 %v5163_v50 }
 0xc39   : > { %v13967_v33 = vpop.eup %13966 }
 0xc3a   : > { %v13969_v37 = vpop.eup %13968  ;;  %v5029_v16 = vmul.f32 1.0614054, %v13967_v33 }
 0xc3b   : > { %v5030_v5 = vmul.f32 1.0614054, %v13969_v37  ;;  %v13971_v29 = vpop.eup %13970 }
 0xc3c   : > { %v5041_v51 = vadd.f32 -1.4531521, %v5029_v16  ;;  %v13973_v58 = vpop.eup %13972 }
 0xc3d   : > { %v5042_v30 = vadd.f32 -1.4531521, %v5030_v5  ;;  %v18680_v5 = vmov -1.0  }
 0xc3e   : > { %v5053_v26 = vmul.f32 %v13967_v33, %v5041_v51  ;;  %v4957_v3 = vsel %vm4945_vm6, 1.0, %v18680_v5 }
 0xc3f   : > { %v5054_v12 = vmul.f32 %v13969_v37, %v5042_v30 }
 0xc40   : > { %v5065_v19 = vadd.f32 1.4214138, %v5053_v26  ;;  %v4922_v26 = vmul.f32 0.5, %v16337_v4 }
 0xc41   : > { %v5066_v20 = vadd.f32 1.4214138, %v5054_v12 }
 0xc42   : > { %v5077_v44 = vmul.f32 %v13967_v33, %v5065_v19 }
 0xc43   : > { %v5078_v28 = vmul.f32 %v13969_v37, %v5066_v20 }
 0xc44   : > { %v5089_v27 = vadd.f32 -0.28449672, %v5077_v44 }
 0xc45   : > { %v5090_v39 = vadd.f32 -0.28449672, %v5078_v28 }
 0xc46   : > { %v5101_v22 = vmul.f32 %v13967_v33, %v5089_v27  ;;  %v16373_v7 = vpop.f32.mrb[70].mxu1  ;;  %v16375_v55 = vpop.f32.mrb[62].mxu0 }
 0xc47   : > { %v5102_v43 = vmul.f32 %v13969_v37, %v5090_v39  ;;  %v16378_v17 = vmul.f32 0.70710677, %v16375_v55  ;;  %v16380_v47 = vpop.f32.mrb[71].mxu1  ;;  %v16382_v42 = vpop.f32.mrb[63].mxu0 }
 0xc48   : > { %v5113_v63 = vadd.f32 0.2548296, %v5101_v22  ;;  %v16385_v24 = vmul.f32 0.70710677, %v16382_v42 }
 0xc49   : > { %v5114_v54 = vadd.f32 0.2548296, %v5102_v43  ;;  %v4972_v45 = vand.u32 2147483647, %v16378_v17  ;;  %vm4948_vm8 = vcmp.ge.f32.partialorder %v16378_v17, 0.0 }
 0xc4a   : > { %v5125_v56 = vmul.f32 %v13967_v33, %v5113_v63  ;;  %v4973_v2 = vand.u32 2147483647, %v16385_v24  ;;  %vm4949_vm9 = vcmp.ge.f32.partialorder %v16385_v24, 0.0 }
 0xc4b   : > { %v5126_v18 = vmul.f32 %v13969_v37, %v5114_v54  ;;  %v4984_v46 = vmul.f32 0.3275911, %v4972_v45  ;;  %v4958_v37 = vsel %vm4946_vm7, 1.0, %v18680_v5  ;;  %v5140_v50 = vsub.f32 0.0, %v4972_v45 }
 0xc4c   : > { %v5185_v15 = vmul.f32 %v13971_v29, %v5125_v56  ;;  %v4985_v49 = vmul.f32 0.3275911, %v4973_v2  ;;  %v5141_v19 = vsub.f32 0.0, %v4973_v2  ;;  %vm5300_vm7 = vcmask 695296  }
 0xc4d   : > { %v5186_v8 = vmul.f32 %v13973_v58, %v5126_v18  ;;  %v4996_v35 = vadd.f32 1.0, %v4984_v46  ;;  %v5152_v28 = vmul.f32 %v5140_v50, %v4972_v45 }
 0xc4e   : > { %v5197_v16 = vsub.f32 1.0, %v5185_v15  ;;  %v4997_v62 = vadd.f32 1.0, %v4985_v49  ;;  %v5153_v39 = vmul.f32 %v5141_v19, %v4973_v2 }
 0xc4f   : > { %v5198_v33 = vsub.f32 1.0, %v5186_v8  ;;  %13974 = vrcp.f32 %v4996_v35 }
 0xc50   : > { %v5209_v51 = vmul.f32 %v5197_v16, %v4957_v3  ;;  %13976 = vrcp.f32 %v4997_v62  ;;  %v5169_v46 = vmul.f32 1.442695, %v5153_v39 }
 0xc51   : > { %v5210_v1 = vmul.f32 %v5198_v33, %v4958_v37 }
 0xc52   : > { %v5221_v30 = vadd.f32 1.0, %v5209_v51 }
 0xc53   : > { %v5222_v23 = vadd.f32 1.0, %v5210_v1 }
 0xc54   : > { %v5233_v12 = vmul.f32 %v5221_v30, %v4921_v34 }
 0xc55   : > { %v5234_v20 = vmul.f32 %v5222_v23, %v4922_v26 }
 0xc56   : > { %v5245_v44 = vmul.f32 %v5233_v12, %v16328_v14 }
 0xc57   : > { %v5246_v27 = vmul.f32 %v5234_v20, %v16335_v21  ;;  %v5167_v21 = vmul.f32 1.442695, %v5152_v28 }
 0xc58   : > { %v16397_v22 = vpop.f32.mrb[72].mxu1  ;;  %v16399_v43 = vpop.f32.mrb[64].mxu0 }
 0xc59   : > { %v13975_v63 = vpop.eup %13974  ;;  %v16402_v9 = vmul.f32 0.70710677, %v16399_v43  ;;  %v16404_v4 = vpop.f32.mrb[73].mxu1  ;;  %5381 = vmatprep.mubr.f32.mxu0 %v5246_v27  ;;  %13978 = vpow2.f32 %v5167_v21 }
 0xc5a   : > { %v16406_v54 = vpop.f32.mrb[65].mxu0  ;;  %v13977_v56 = vpop.eup %13976  ;;  %v5032_v29 = vmul.f32 1.0614054, %v13975_v63  ;;  %5382 = vmatmul.mubr.f32.vlgmr.msra.gmra.mrb[68].mxu0 %v5245_v44  ;;  %13980 = vpow2.f32 %v5169_v46 }
 0xc5b   : > { %v16409_v14 = vmul.f32 0.70710677, %v16406_v54  ;;  %v5033_v45 = vmul.f32 1.0614054, %v13977_v56  ;;  %v4975_v2 = vand.u32 2147483647, %v16402_v9 }
 0xc5c   : > { %v5044_v18 = vadd.f32 -1.4531521, %v5032_v29  ;;  %vm4951_vm11 = vcmp.ge.f32.partialorder %v16402_v9, 0.0 }
 0xc5d   : > { %v4976_v58 = vand.u32 2147483647, %v16409_v14  ;;  %v5045_v15 = vadd.f32 -1.4531521, %v5033_v45  ;;  %v4987_v49 = vmul.f32 0.3275911, %v4975_v2 }
 0xc5e   : > { %v5056_v8 = vmul.f32 %v13975_v63, %v5044_v18  ;;  %v5143_v18 = vsub.f32 0.0, %v4975_v2  ;;  %vm4952_vm10 = vcmp.ge.f32.partialorder %v16409_v14, 0.0 }
 0xc5f   : > { %v4988_v35 = vmul.f32 0.3275911, %v4976_v58  ;;  %v5057_v16 = vmul.f32 %v13977_v56, %v5045_v15  ;;  %v4999_v62 = vadd.f32 1.0, %v4987_v49  ;;  %v16413_v3 = vpop.f32.mrb[74].mxu1  ;;  %v16415_v33 = vpop.f32.mrb[66].mxu0 }
 0xc60   : > { %v5068_v51 = vadd.f32 1.4214138, %v5056_v8  ;;  %v16417_v1 = vpop.f32.mrb[75].mxu1  ;;  %v16419_v34 = vpop.f32.mrb[67].mxu0  ;;  %v16422_v26 = vmul.f32 0.70710677, %v16415_v33 }
 0xc61   : > { %v5000_v37 = vadd.f32 1.0, %v4988_v35  ;;  %v5069_v30 = vadd.f32 1.4214138, %v5057_v16  ;;  %13982 = vrcp.f32 %v4999_v62  ;;  %v16428_v44 = vmul.f32 0.70710677, %v16419_v34 }
 0xc62   : > { %v5080_v23 = vmul.f32 %v13975_v63, %v5068_v51  ;;  %v4978_v12 = vand.u32 2147483647, %v16422_v26  ;;  %v5144_v8 = vsub.f32 0.0, %v4976_v58  ;;  %vm4954_vm12 = vcmp.ge.f32.partialorder %v16422_v26, 0.0 }
 0xc63   : > { %13984 = vrcp.f32 %v5000_v37  ;;  %v5081_v50 = vmul.f32 %v13977_v56, %v5069_v30  ;;  %v16425_v19 = vpop.f32.mrb[76].mxu1  ;;  %v4979_v21 = vand.u32 2147483647, %v16428_v44  ;;  %v13979_v62 = vpop.eup %13978  ;;  %vm4955_vm13 = vcmp.ge.f32.partialorder %v16428_v44, 0.0 }
 0xc64   : > { %v5092_v20 = vadd.f32 -0.28449672, %v5080_v23  ;;  %v16430_v28 = vpop.f32.mrb[77].mxu1  ;;  %v4990_v39 = vmul.f32 0.3275911, %v4978_v12  ;;  %v13981_v37 = vpop.eup %13980  ;;  %v5156_v59 = vmul.f32 %v5144_v8, %v4976_v58  ;;  %v5146_v0 = vsub.f32 0.0, %v4978_v12 }
 0xc65   : > { %v5093_v27 = vadd.f32 -0.28449672, %v5081_v50  ;;  %v4991_v35 = vmul.f32 0.3275911, %v4979_v21  ;;  %v4924_v58 = vmul.f32 0.5, %v16375_v55 }
 0xc66   : > { %v5104_v29 = vmul.f32 %v13975_v63, %v5092_v20  ;;  %v5002_v46 = vadd.f32 1.0, %v4990_v39 }
 0xc67   : > { %v5105_v45 = vmul.f32 %v13977_v56, %v5093_v27  ;;  %v16433_v15 = vpop.f32.mrb[78].mxu1  ;;  %v5003_v23 = vadd.f32 1.0, %v4991_v35  ;;  %v5155_v27 = vmul.f32 %v5143_v18, %v4975_v2  ;;  %v5175_v18 = vmul.f32 1.442695, %v5156_v59 }
 0xc68   : > { %v5116_v49 = vadd.f32 0.2548296, %v5104_v29  ;;  %v16435_v16 = vpop.f32.mrb[79].mxu1  ;;  %13986 = vrcp.f32 %v5002_v46 }
 0xc69   : > { %v5117_v51 = vadd.f32 0.2548296, %v5105_v45  ;;  %13988 = vrcp.f32 %v5003_v23  ;;  %v4960_v45 = vsel %vm4948_vm8, 1.0, %v18728_v13 }
 0xc6a   : > { %v5128_v30 = vmul.f32 %v13975_v63, %v5116_v49  ;;  %v5173_v49 = vmul.f32 1.442695, %v5155_v27 }
 0xc6b   : > { %v13983_v50 = vpop.eup %13982  ;;  %v5129_v20 = vmul.f32 %v13977_v56, %v5117_v51  ;;  %v4961_v56 = vsel %vm4949_vm9, 1.0, %v18728_v13  ;;  %v4925_v51 = vmul.f32 0.5, %v16382_v42 }
 0xc6c   : > { %v5188_v39 = vmul.f32 %v13979_v62, %v5128_v30  ;;  %v5035_v5 = vmul.f32 1.0614054, %v13983_v50  ;;  %v5147_v30 = vsub.f32 0.0, %v4979_v21  ;;  %13990 = vpow2.f32 %v5173_v49 }
 0xc6d   : > { %v13985_v25 = vpop.eup %13984  ;;  %v5189_v29 = vmul.f32 %v13981_v37, %v5129_v20  ;;  %13992 = vpow2.f32 %v5175_v18 }
 0xc6e   : > { %v5036_v10 = vmul.f32 1.0614054, %v13985_v25  ;;  %v5200_v46 = vsub.f32 1.0, %v5188_v39  ;;  %v5047_v48 = vadd.f32 -1.4531521, %v5035_v5 }
 0xc6f   : > { %v5201_v63 = vsub.f32 1.0, %v5189_v29 }
 0xc70   : > { %v5048_v35 = vadd.f32 -1.4531521, %v5036_v10  ;;  %v5212_v17 = vmul.f32 %v5200_v46, %v4960_v45  ;;  %v5059_v2 = vmul.f32 %v13983_v50, %v5047_v48  ;;  %v5158_v10 = vmul.f32 %v5146_v0, %v4978_v12 }
 0xc71   : > { %v5213_v8 = vmul.f32 %v5201_v63, %v4961_v56  ;;  %v5159_v63 = vmul.f32 %v5147_v30, %v4979_v21 }
 0xc72   : > { %v5060_v62 = vmul.f32 %v13985_v25, %v5048_v35  ;;  %v5224_v24 = vadd.f32 1.0, %v5212_v17  ;;  %v5071_v37 = vadd.f32 1.4214138, %v5059_v2  ;;  %v13987_v23 = vpop.eup %13986  ;;  %v5179_v17 = vmul.f32 1.442695, %v5158_v10 }
 0xc73   : > { %v5225_v5 = vadd.f32 1.0, %v5213_v8  ;;  %v5038_v29 = vmul.f32 1.0614054, %v13987_v23  ;;  %v13989_v45 = vpop.eup %13988 }
 0xc74   : > { %v5072_v20 = vadd.f32 1.4214138, %v5060_v62  ;;  %v5236_v27 = vmul.f32 %v5224_v24, %v4924_v58  ;;  %v5083_v39 = vmul.f32 %v13983_v50, %v5071_v37  ;;  %v5039_v56 = vmul.f32 1.0614054, %v13989_v45 }
 0xc75   : > { %v5237_v48 = vmul.f32 %v5225_v5, %v4925_v51  ;;  %v5050_v46 = vadd.f32 -1.4531521, %v5038_v29  ;;  %v5181_v62 = vmul.f32 1.442695, %v5159_v63  ;;  %13994 = vpow2.f32 %v5179_v17 }
 0xc76   : > { %v5084_v59 = vmul.f32 %v13985_v25, %v5072_v20  ;;  %v5095_v55 = vadd.f32 -0.28449672, %v5083_v39  ;;  %v5248_v35 = vmul.f32 %v5236_v27, %v16373_v7  ;;  %v5051_v12 = vadd.f32 -1.4531521, %v5039_v56  ;;  %v13991_v7 = vpop.eup %13990 }
 0xc77   : > { %v5249_v2 = vmul.f32 %v5237_v48, %v16380_v47  ;;  %v5062_v8 = vmul.f32 %v13987_v23, %v5050_v46  ;;  %v13993_v20 = vpop.eup %13992  ;;  %13996 = vpow2.f32 %v5181_v62 }
 0xc78   : > { %v5096_v42 = vadd.f32 -0.28449672, %v5084_v59  ;;  %v5107_v49 = vmul.f32 %v13983_v50, %v5095_v55  ;;  %v5063_v51 = vmul.f32 %v13989_v45, %v5051_v12 }
 0xc79   : > { %5386 = vmatprep.mubr.f32.mxu0 %v5249_v2  ;;  %v5074_v58 = vadd.f32 1.4214138, %v5062_v8 }
 0xc7a   : > { %v5108_v0 = vmul.f32 %v13985_v25, %v5096_v42  ;;  %v5119_v18 = vadd.f32 0.2548296, %v5107_v49  ;;  %5387 = vmatmul.mubr.f32.gmra.mrb[70].mxu0 %v5248_v35  ;;  %v5075_v5 = vadd.f32 1.4214138, %v5063_v51 }
 0xc7b   : > { %v5086_v37 = vmul.f32 %v13987_v23, %v5074_v58  ;;  %v4928_v58 = vmul.f32 0.5, %v16406_v54  ;;  %v4927_v54 = vmul.f32 0.5, %v16399_v43 }
 0xc7c   : > { %v5120_v24 = vadd.f32 0.2548296, %v5108_v0  ;;  %v5131_v21 = vmul.f32 %v13983_v50, %v5119_v18  ;;  %v5087_v39 = vmul.f32 %v13989_v45, %v5075_v5  ;;  %v4964_v50 = vsel %vm4952_vm10, 1.0, %v18728_v13 }
 0xc7d   : > { %v5098_v47 = vadd.f32 -0.28449672, %v5086_v37 }
 0xc7e   : > { %v5132_v30 = vmul.f32 %v13985_v25, %v5120_v24  ;;  %v5191_v10 = vmul.f32 %v13991_v7, %v5131_v21  ;;  %v5099_v55 = vadd.f32 -0.28449672, %v5087_v39  ;;  %v4963_v25 = vsel %vm4951_vm11, 1.0, %v18728_v13 }
 0xc7f   : > { %v5110_v48 = vmul.f32 %v13987_v23, %v5098_v47  ;;  %v13995_v9 = vpop.eup %13994  ;;  %v4966_v21 = vsel %vm4954_vm12, 1.0, %v18728_v13 }
 0xc80   : > { %v5192_v27 = vmul.f32 %v13993_v20, %v5132_v30  ;;  %v5203_v29 = vsub.f32 1.0, %v5191_v10  ;;  %v5111_v35 = vmul.f32 %v13989_v45, %v5099_v55  ;;  %v4967_v55 = vsel %vm4955_vm13, 1.0, %v18728_v13 }
 0xc81   : > { %v5122_v46 = vadd.f32 0.2548296, %v5110_v48  ;;  %v13997_v24 = vpop.eup %13996 }
 0xc82   : > { %v5204_v59 = vsub.f32 1.0, %v5192_v27  ;;  %v5215_v17 = vmul.f32 %v5203_v29, %v4963_v25  ;;  %v5123_v49 = vadd.f32 0.2548296, %v5111_v35  ;;  %v4930_v27 = vmul.f32 0.5, %v16415_v33 }
 0xc83   : > { %v16449_v42 = vpop.f32.mrb[80].mxu1  ;;  %v5134_v56 = vmul.f32 %v13987_v23, %v5122_v46  ;;  %v4931_v35 = vmul.f32 0.5, %v16419_v34 }
 0xc84   : > { %v5216_v63 = vmul.f32 %v5204_v59, %v4964_v50  ;;  %v16452_v14 = vmul.f32 0.70710677, %v16449_v42  ;;  %v16454_v2 = vpop.f32.mrb[81].mxu1  ;;  %v5135_v62 = vmul.f32 %v13989_v45, %v5123_v49  ;;  %v5227_v51 = vadd.f32 1.0, %v5215_v17 }
 0xc85   : > { %v16458_v8 = vmul.f32 0.70710677, %v16454_v2  ;;  %v5194_v12 = vmul.f32 %v13995_v9, %v5134_v56 }
 0xc86   : > { %v5228_v0 = vadd.f32 1.0, %v5216_v63  ;;  %v4974_v18 = vand.u32 2147483647, %v16452_v14  ;;  %v5195_v30 = vmul.f32 %v13997_v24, %v5135_v62  ;;  %v5239_v48 = vmul.f32 %v5227_v51, %v4927_v54 }
 0xc87   : > { %v16462_v23 = vpop.f32.mrb[82].mxu1  ;;  %v5206_v37 = vsub.f32 1.0, %v5194_v12  ;;  %v4971_v5 = vand.u32 2147483647, %v16458_v8  ;;  %vm4950_vm14 = vcmp.ge.f32.partialorder %v16452_v14, 0.0  ;;  %vm4947_vm15 = vcmp.ge.f32.partialorder %v16458_v8, 0.0 }
 0xc88   : > { %v4986_v7 = vmul.f32 0.3275911, %v4974_v18  ;;  %v16465_v26 = vpop.f32.mrb[83].mxu1  ;;  %v16470_v20 = vmul.f32 0.70710677, %v16462_v23  ;;  %v5240_v45 = vmul.f32 %v5228_v0, %v4928_v58  ;;  %v5207_v39 = vsub.f32 1.0, %v5195_v30 }
 0xc89   : > { %v5218_v10 = vmul.f32 %v5206_v37, %v4966_v21  ;;  %v4983_v29 = vmul.f32 0.3275911, %v4971_v5  ;;  %v16477_v63 = vmul.f32 0.70710677, %v16465_v26  ;;  %v5251_v9 = vmul.f32 %v5239_v48, %v16397_v22 }
 0xc8a   : > { %v4998_v47 = vadd.f32 1.0, %v4986_v7  ;;  %v5219_v44 = vmul.f32 %v5207_v39, %v4967_v55  ;;  %v4980_v46 = vand.u32 2147483647, %v16470_v20  ;;  %v5252_v43 = vmul.f32 %v5240_v45, %v16404_v4 }
 0xc8b   : > { %v5230_v59 = vadd.f32 1.0, %v5218_v10  ;;  %v4995_v50 = vadd.f32 1.0, %v4983_v29  ;;  %v4977_v56 = vand.u32 2147483647, %v16477_v63  ;;  %v5142_v12 = vsub.f32 0.0, %v4974_v18 }
 0xc8c   : > { %13998 = vrcp.f32 %v4998_v47  ;;  %v5231_v33 = vadd.f32 1.0, %v5219_v44  ;;  %v4992_v17 = vmul.f32 0.3275911, %v4980_v46  ;;  %5391 = vmatprep.mubr.f32.mxu0 %v5252_v43  ;;  %v5139_v34 = vsub.f32 0.0, %v4971_v5 }
 0xc8d   : > { %v5242_v25 = vmul.f32 %v5230_v59, %v4930_v27  ;;  %14000 = vrcp.f32 %v4995_v50  ;;  %v4989_v58 = vmul.f32 0.3275911, %v4977_v56  ;;  %5392 = vmatmul.mubr.f32.gmra.mrb[72].mxu0 %v5251_v9  ;;  %v5154_v21 = vmul.f32 %v5142_v12, %v4974_v18 }
 0xc8e   : > { %v5243_v49 = vmul.f32 %v5231_v33, %v4931_v35  ;;  %v5004_v0 = vadd.f32 1.0, %v4992_v17  ;;  %v5151_v30 = vmul.f32 %v5139_v34, %v4971_v5  ;;  %v5148_v54 = vsub.f32 0.0, %v4980_v46 }
 0xc8f   : > { %v5254_v62 = vmul.f32 %v5242_v25, %v16413_v3  ;;  %v5001_v24 = vadd.f32 1.0, %v4989_v58  ;;  %v5171_v45 = vmul.f32 1.442695, %v5154_v21  ;;  %v5145_v48 = vsub.f32 0.0, %v4977_v56 }
 0xc90   : > { %14002 = vrcp.f32 %v5004_v0  ;;  %v5255_v4 = vmul.f32 %v5243_v49, %v16417_v1  ;;  %v5165_v39 = vmul.f32 1.442695, %v5151_v30  ;;  %v5160_v29 = vmul.f32 %v5148_v54, %v4980_v46 }
 0xc91   : > { %14004 = vrcp.f32 %v5001_v24  ;;  %v5157_v35 = vmul.f32 %v5145_v48, %v4977_v56  ;;  %vm4956_vm0 = vcmp.ge.f32.partialorder %v16470_v20, 0.0  ;;  %v4923_v8 = vmul.f32 0.5, %v16454_v2 }
 0xc92   : > { %5396 = vmatprep.mubr.f32.mxu0 %v5255_v4  ;;  %14006 = vpow2.f32 %v5171_v45  ;;  %v5183_v5 = vmul.f32 1.442695, %v5160_v29  ;;  %vm4953_vm6 = vcmp.ge.f32.partialorder %v16477_v63, 0.0  ;;  %v4929_v63 = vmul.f32 0.5, %v16465_v26 }
 0xc93   : > { %5397 = vmatmul.mubr.f32.gmra.mrb[74].mxu0 %v5254_v62  ;;  %14008 = vpow2.f32 %v5165_v39  ;;  %v5177_v62 = vmul.f32 1.442695, %v5157_v35 }
 0xc94   : > { %5704 = vmatprep.mubr.f32.mxu0 %v18725_v6  ;;  %14010 = vpow2.f32 %v5183_v5 }
 0xc95   : > { %14012 = vpow2.f32 %v5177_v62 }
 0xc96   : > { %v13999_v51 = vpop.eup %13998 }
 0xc97   : > { %v5034_v37 = vmul.f32 1.0614054, %v13999_v51  ;;  %v14001_v22 = vpop.eup %14000 }
 0xc98   : > { %v5031_v10 = vmul.f32 1.0614054, %v14001_v22 }
 0xc99   : > { %v5046_v7 = vadd.f32 -1.4531521, %v5034_v37 }
 0xc9a   : > { %v5043_v47 = vadd.f32 -1.4531521, %v5031_v10  ;;  %v14003_v27 = vpop.eup %14002 }
 0xc9b   : > { %v5058_v3 = vmul.f32 %v13999_v51, %v5046_v7  ;;  %v5040_v59 = vmul.f32 1.0614054, %v14003_v27  ;;  %v14005_v25 = vpop.eup %14004 }
 0xc9c   : > { %v5055_v18 = vmul.f32 %v14001_v22, %v5043_v47  ;;  %v5037_v9 = vmul.f32 1.0614054, %v14005_v25  ;;  %v14007_v37 = vpop.eup %14006 }
 0xc9d   : > { %v5070_v1 = vadd.f32 1.4214138, %v5058_v3  ;;  %v5052_v50 = vadd.f32 -1.4531521, %v5040_v59  ;;  %v14009_v47 = vpop.eup %14008 }
 0xc9e   : > { %v5067_v44 = vadd.f32 1.4214138, %v5055_v18  ;;  %v5049_v58 = vadd.f32 -1.4531521, %v5037_v9 }
 0xc9f   : > { %v5082_v55 = vmul.f32 %v13999_v51, %v5070_v1  ;;  %v5064_v17 = vmul.f32 %v14003_v27, %v5052_v50  ;;  %v4962_v1 = vsel %vm4950_vm14, 1.0, %v18728_v13  ;;  %v4926_v50 = vmul.f32 0.5, %v16449_v42 }
 0xca0   : > { %v5079_v33 = vmul.f32 %v14001_v22, %v5067_v44  ;;  %v5061_v34 = vmul.f32 %v14005_v25, %v5049_v58  ;;  %v14011_v44 = vpop.eup %14010  ;;  %v4968_v58 = vsel %vm4956_vm0, 1.0, %v18728_v13 }
 0xca1   : > { %v5094_v43 = vadd.f32 -0.28449672, %v5082_v55  ;;  %v5076_v12 = vadd.f32 1.4214138, %v5064_v17 }
 0xca2   : > { %v5091_v0 = vadd.f32 -0.28449672, %v5079_v33  ;;  %v5073_v56 = vadd.f32 1.4214138, %v5061_v34  ;;  %v4965_v34 = vsel %vm4953_vm6, 1.0, %v18728_v13 }
 0xca3   : > { %v5106_v49 = vmul.f32 %v13999_v51, %v5094_v43  ;;  %v5088_v24 = vmul.f32 %v14003_v27, %v5076_v12  ;;  %v14013_v12 = vpop.eup %14012 }
 0xca4   : > { %v5103_v4 = vmul.f32 %v14001_v22, %v5091_v0  ;;  %v5085_v3 = vmul.f32 %v14005_v25, %v5073_v56 }
 0xca5   : > { %v5118_v46 = vadd.f32 0.2548296, %v5106_v49  ;;  %v5100_v30 = vadd.f32 -0.28449672, %v5088_v24 }
 0xca6   : > { %v5115_v7 = vadd.f32 0.2548296, %v5103_v4  ;;  %v5097_v18 = vadd.f32 -0.28449672, %v5085_v3  ;;  %v4932_v4 = vmul.f32 0.5, %v16462_v23 }
 0xca7   : > { %v5130_v21 = vmul.f32 %v13999_v51, %v5118_v46  ;;  %v5112_v10 = vmul.f32 %v14003_v27, %v5100_v30 }
 0xca8   : > { %v5127_v45 = vmul.f32 %v14001_v22, %v5115_v7  ;;  %v5109_v55 = vmul.f32 %v14005_v25, %v5097_v18  ;;  %v4959_v22 = vsel %vm4947_vm15, 1.0, %v18728_v13 }
 0xca9   : > { %v5190_v54 = vmul.f32 %v14007_v37, %v5130_v21  ;;  %v5124_v48 = vadd.f32 0.2548296, %v5112_v10 }
 0xcaa   : > { %v5187_v29 = vmul.f32 %v14009_v47, %v5127_v45  ;;  %v5121_v33 = vadd.f32 0.2548296, %v5109_v55 }
 0xcab   : > { %v5202_v39 = vsub.f32 1.0, %v5190_v54  ;;  %v5136_v59 = vmul.f32 %v14003_v27, %v5124_v48 }
 0xcac   : > { %v5199_v51 = vsub.f32 1.0, %v5187_v29  ;;  %v5133_v0 = vmul.f32 %v14005_v25, %v5121_v33  ;;  %v10568_v33 = vld [vmem:[%s18652_s8 + $0x2c0] sm:$0xff] }
 0xcad   : > { %v5214_v14 = vmul.f32 %v5202_v39, %v4962_v1  ;;  %v5196_v35 = vmul.f32 %v14011_v44, %v5136_v59 }
 0xcae   : > { %v5211_v5 = vmul.f32 %v5199_v51, %v4959_v22  ;;  %v5193_v62 = vmul.f32 %v14013_v12, %v5133_v0  ;;  %v10571_v0 = vld [vmem:[%s18652_s8 + $0x2d8] sm:$0xff] }
 0xcaf   : > { %v5226_v43 = vadd.f32 1.0, %v5214_v14  ;;  %v5208_v49 = vsub.f32 1.0, %v5196_v35  ;;  %v10563_v35 = vld [vmem:[%s18652_s8 + $0x298] sm:$0xff] }
 0xcb0   : > { %v5223_v9 = vadd.f32 1.0, %v5211_v5  ;;  %v5205_v2 = vsub.f32 1.0, %v5193_v62 }
 0xcb1   : > { %v5238_v17 = vmul.f32 %v5226_v43, %v4926_v50  ;;  %v5220_v46 = vmul.f32 %v5208_v49, %v4968_v58  ;;  %v10567_v49 = vld [vmem:[%s18652_s8 + $0x2b8] sm:$0xff]  ;;  %v10570_v58 = vld [vmem:[%s18652_s8 + $0x2d0] sm:$0xff] }
 0xcb2   : > { %v5235_v42 = vmul.f32 %v5223_v9, %v4923_v8  ;;  %v5217_v21 = vmul.f32 %v5205_v2, %v4965_v34  ;;  %v13101_v8 = vpack.c.bf16 %v10568_v33, %v10563_v35  ;;  %v10562_v9 = vld [vmem:[%s18652_s8 + $0x290] sm:$0xff]  ;;  %v10577_v34 = vld [vmem:[%s18652_s8 + $0x308] sm:$0xff]  ;;  %v10595_v33 = vld [vmem:[%s18652_s8 + $0x398] sm:$0xff] }
 0xcb3   : > { %v5250_v27 = vmul.f32 %v16425_v19, %v5238_v17  ;;  %v5232_v24 = vadd.f32 1.0, %v5220_v46  ;;  %v13103_v12 = vpack.c.bf16 %v10567_v49, %v10562_v9  ;;  %v10590_v35 = vld [vmem:[%s18652_s8 + $0x370] sm:$0xff]  ;;  %v10592_v49 = vld [vmem:[%s18652_s8 + $0x380] sm:$0xff] }
 0xcb4   : > { %v5247_v20 = vmul.f32 %v5235_v42, %v16430_v28  ;;  %v5229_v37 = vadd.f32 1.0, %v5217_v21  ;;  %v10575_v42 = vld [vmem:[%s18652_s8 + $0x2f8] sm:$0xff]  ;;  %13102 = vmatprep.subr.bf16.mxu1 %v13101_v8  ;;  %v10586_v21 = vld [vmem:[%s18652_s8 + $0x350] sm:$0xff]  ;;  %v13083_v8 = vpack.c.bf16 %v10595_v33, %v10590_v35  ;;  %v10636_v35 = vld [vmem:[%s18652_s8 + $0x4e0] sm:$0xff] }
 0xcb5   : > { %v5244_v25 = vmul.f32 %v5232_v24, %v4932_v4  ;;  %v13075_v62 = vpack.c.bf16 %v10575_v42, %v10570_v58  ;;  %v10578_v4 = vld [vmem:[%s18652_s8 + $0x310] sm:$0xff]  ;;  %v10572_v24 = vld [vmem:[%s18652_s8 + $0x2e0] sm:$0xff]  ;;  %v10601_v58 = vld [vmem:[%s18652_s8 + $0x3c8] sm:$0xff] }
 0xcb6   : > { %12053 = vmatprep.mubr.msk.f32.mxu1 %vm5300_vm7, %v5247_v20  ;;  %v5241_v7 = vmul.f32 %v5229_v37, %v4929_v63  ;;  %v10573_v20 = vld [vmem:[%s18652_s8 + $0x2e8] sm:$0xff]  ;;  %v10580_v37 = vld [vmem:[%s18652_s8 + $0x320] sm:$0xff]  ;;  %v10598_v9 = vld [vmem:[%s18652_s8 + $0x3b0] sm:$0xff] }
 0xcb7   : > { %12054 = vmatmul.mubr.msk.f32.vlgmr.msra.gmra.mrb[84].mxu1 %vm5300_vm7, %v5250_v27  ;;  %v5256_v19 = vmul.f32 %v16433_v15, %v5244_v25  ;;  %v10576_v27 = vld [vmem:[%s18652_s8 + $0x300] sm:$0xff]  ;;  %v13105_v2 = vpack.c.bf16 %v10578_v4, %v10573_v20  ;;  %v10581_v25 = vld [vmem:[%s18652_s8 + $0x328] sm:$0xff]  ;;  %v10606_v42 = vld [vmem:[%s18652_s8 + $0x3f0] sm:$0xff] }
 0xcb8   : > { %v5253_v28 = vmul.f32 %v5241_v7, %v16435_v16  ;;  %v13073_v46 = vpack.c.bf16 %v10576_v27, %v10571_v0  ;;  %13104 = vmatpush1.bf16.msra.mxu1 %v13103_v12  ;;  %v13077_v63 = vpack.c.bf16 %v10586_v21, %v10581_v25  ;;  %v10585_v7 = vld [vmem:[%s18652_s8 + $0x348] sm:$0xff]  ;;  %v10603_v4 = vld [vmem:[%s18652_s8 + $0x3d8] sm:$0xff]  ;;  %v10630_v33 = vld [vmem:[%s18652_s8 + $0x4b0] sm:$0xff] }
 0xcb9   : > { %13106 = vmatprep.subr.bf16.mxu1 %v13105_v2  ;;  %v10597_v0 = vld [vmem:[%s18652_s8 + $0x3a8] sm:$0xff]  ;;  %v10608_v2 = vld [vmem:[%s18652_s8 + $0x400] sm:$0xff]  ;;  %v10607_v25 = vld [vmem:[%s18652_s8 + $0x3f8] sm:$0xff] }
 0xcba   : > { %12056 = vmatprep.mubr.msk.f32.mxu1 %vm5300_vm7, %v5253_v28  ;;  %v10583_v28 = vld [vmem:[%s18652_s8 + $0x338] sm:$0xff]  ;;  %v13115_v27 = vpack.c.bf16 %v10597_v0, %v10592_v49  ;;  %v10605_v20 = vld [vmem:[%s18652_s8 + $0x3e8] sm:$0xff]  ;;  %v13117_v21 = vpack.c.bf16 %v10608_v2, %v10603_v4  ;;  %v10638_v49 = vld [vmem:[%s18652_s8 + $0x4f0] sm:$0xff] }
 0xcbb   : > { %12057 = vmatmul.mubr.msk.f32.gmra.mrb[86].mxu1 %vm5300_vm7, %v5256_v19  ;;  %v13107_v19 = vpack.c.bf16 %v10577_v34, %v10572_v24  ;;  %v10602_v34 = vld [vmem:[%s18652_s8 + $0x3d0] sm:$0xff] }
 0xcbc   : > { %5793 = vmatprep.mubr.f32.mxu1 %v18725_v6  ;;  %v18733_v4 = vld [vmem:[#allocation11_spill] sm:$0xff] }
 0xcbd   : > { %13108 = vmatpush1.bf16.msra.mxu1 %v13107_v19  ;;  %v13119_v19 = vpack.c.bf16 %v10607_v25, %v10602_v34 }
 0xd2d   : > { %v11233_v23 = vpop.f32.mrb[68].mxu0 }
 0xd2e   : > { %v11234_v30 = vpop.f32.mrb[69].mxu0 }
 0xd2f   : > { %v11235_v56 = vadd.f32 %v11234_v30, %v11233_v23  ;;  %v10588_v23 = vld [vmem:[%s18652_s8 + $0x360] sm:$0xff]  ;;  %v10582_v30 = vld [vmem:[%s18652_s8 + $0x330] sm:$0xff] }
 0xd4d   : > { %v11236_v54 = vpop.f32.mrb[70].mxu0 }
 0xd4e   : > { %v11237_v45 = vpop.f32.mrb[71].mxu0 }
 0xd4f   : > { %v11238_v10 = vadd.f32 %v11237_v45, %v11236_v54  ;;  %v13079_v54 = vpack.c.bf16 %v10585_v7, %v10580_v37  ;;  %v13109_v45 = vpack.c.bf16 %v10588_v23, %v10583_v28  ;;  %v10616_v37 = vld [vmem:[%s18652_s8 + $0x440] sm:$0xff]  ;;  %v10610_v28 = vld [vmem:[%s18652_s8 + $0x410] sm:$0xff]  ;;  %v10615_v23 = vld [vmem:[%s18652_s8 + $0x438] sm:$0xff] }
 0xd51   : > { %13110 = vmatprep.subr.bf16.mxu1 %v13109_v45  ;;  %v10612_v45 = vld [vmem:[%s18652_s8 + $0x420] sm:$0xff] }
 0xd60   : > { %v11239_v3 = vpop.f32.mrb[72].mxu0 }
 0xd61   : > { %v11240_v15 = vpop.f32.mrb[73].mxu0 }
 0xd62   : > { %v11241_v47 = vadd.f32 %v11240_v15, %v11239_v3 }
 0xd66   : > { %v11242_v26 = vpop.f32.mrb[74].mxu0 }
 0xd67   : > { %v11243_v1 = vpop.f32.mrb[75].mxu0 }
 0xd68   : > { %v11244_v39 = vadd.f32 %v11243_v1, %v11242_v26 }
 0xd8a   : > { %v12055_v29 = vpop.f32.mrb[84].mxu1 }
 0xd8b   : > { %v5474_v16 = vadd.f32 %v12055_v29, %v11238_v10  ;;  %v5468_v48 = vpop.f32.mrb[85].mxu1 }
 0xd8c   : > { %v5469_v18 = vadd.f32 %v11235_v56, %v5468_v48  ;;  %v10587_v56 = vld [vmem:[%s18652_s8 + $0x358] sm:$0xff] }
 0xd8d   : > { %v16508_v14 = vadd.f32 %v5474_v16, %v15867_v31  ;;  %v10566_v31 = vld [vmem:[%s18652_s8 + $0x2b0] sm:$0xff]  ;;  %v13111_v10 = vpack.c.bf16 %v10587_v56, %v10582_v30  ;;  %v10613_v30 = vld [vmem:[%s18652_s8 + $0x428] sm:$0xff]  ;;  %v13091_v56 = vpack.c.bf16 %v10615_v23, %v10610_v28 }
 0xd8e   : > { %v16511_v51 = vadd.f32 %v5469_v18, %v15863_v53  ;;  %v12058_v59 = vpop.f32.mrb[86].mxu1  ;;  %v10561_v53 = vld [vmem:[%s18652_s8 + $0x288] sm:$0xff] }
 0xd8f   : > { %18729 = vst [vmem:[#allocation10_spill] sm:$0xff] %v16508_v14  ;;  %5497 = vadd.xlane.f32.xlu0 %v16508_v14  ;;  %v5484_v55 = vadd.f32 %v12058_v59, %v11244_v39  ;;  %v5478_v44 = vpop.f32.mrb[87].mxu1  ;;  %v13069_v5 = vpack.c.bf16 %v10566_v31, %v10561_v53  ;;  %13112 = vmatpush1.bf16.msra.mxu1 %v13111_v10  ;;  %v10617_v10 = vld [vmem:[%s18652_s8 + $0x448] sm:$0xff] }
 0xd90   : > { %18730 = vst [vmem:[#allocation9_spill] sm:$0xff] %v16511_v51  ;;  %5495 = vadd.xlane.f32.xlu1 %v16511_v51  ;;  %v5479_v50 = vadd.f32 %v11241_v47, %v5478_v44 }
 0xd91   : > { %v16516_v43 = vadd.f32 %v5484_v55, %v15875_v11  ;;  %v10560_v11 = vld [vmem:[%s18652_s8 + $0x280] sm:$0xff]  ;;  %13070 = vmatprep.subr.bf16.mxu0 %v13069_v5 }
 0xd92   : > { %v16519_v22 = vadd.f32 %v5479_v50, %v15871_v41  ;;  %v10565_v41 = vld [vmem:[%s18652_s8 + $0x2a8] sm:$0xff]  ;;  %v10596_v5 = vld [vmem:[%s18652_s8 + $0x3a0] sm:$0xff] }
 0xd93   : > { %18731 = vst [vmem:[#allocation18_spill] sm:$0xff] %v16516_v43  ;;  %5501 = vadd.xlane.f32.xlu0 %v16516_v43  ;;  %v13071_v17 = vpack.c.bf16 %v10565_v41, %v10560_v11  ;;  %v10591_v11 = vld [vmem:[%s18652_s8 + $0x378] sm:$0xff] }
 0xd94   : > { %18732 = vst [vmem:[#allocation19_spill] sm:$0xff] %v16519_v22  ;;  %5499 = vadd.xlane.f32.xlu1 %v16519_v22  ;;  %v13081_v41 = vpack.c.bf16 %v10596_v5, %v10591_v11 }
 0xd95   : > { %13072 = vmatpush1.bf16.msra.mxu0 %v13071_v17  ;;  %v10593_v17 = vld [vmem:[%s18652_s8 + $0x388] sm:$0xff] }
 0xd96   : > { %13074 = vmatprep.subr.bf16.mxu0 %v13073_v46  ;;  %v13113_v12 = vpack.c.bf16 %v10598_v9, %v10593_v17  ;;  %v13085_v46 = vpack.c.bf16 %v10606_v42, %v10601_v58  ;;  %v10633_v9 = vld [vmem:[%s18652_s8 + $0x4c8] sm:$0xff]  ;;  %v10564_v42 = vld [vmem:[%s18652_s8 + $0x2a0] sm:$0xff] }
 0xd97   : > { %v10637_v58 = vld [vmem:[%s18652_s8 + $0x4e8] sm:$0xff] }
 0xd98   : > { %13114 = vmatprep.subr.bf16.mxu1 %v13113_v12  ;;  %v13129_v12 = vpack.c.bf16 %v10638_v49, %v10633_v9  ;;  %v10609_v9 = vld [vmem:[%s18652_s8 + $0x408] sm:$0xff]  ;;  %v18734_v49 = vld [vmem:[#allocation12_spill] sm:$0xff] }
 0xd99   : > { %13076 = vmatpush1.bf16.msra.mxu0 %v13075_v62  ;;  %v10600_v62 = vld [vmem:[%s18652_s8 + $0x3c0] sm:$0xff]  ;;  %13116 = vmatpush1.bf16.msra.mxu1 %v13115_v27 }
 0xd9a   : > { %13078 = vmatprep.subr.bf16.mxu0 %v13077_v63  ;;  %v13087_v24 = vpack.c.bf16 %v10605_v20, %v10600_v62  ;;  %v10611_v63 = vld [vmem:[%s18652_s8 + $0x418] sm:$0xff]  ;;  %13118 = vmatprep.subr.bf16.mxu1 %v13117_v21  ;;  %v10632_v27 = vld [vmem:[%s18652_s8 + $0x4c0] sm:$0xff]  ;;  %v10569_v62 = vld [vmem:[%s18652_s8 + $0x2c8] sm:$0xff] }
 0xd9b   : > { %v13089_v7 = vpack.c.bf16 %v10616_v37, %v10611_v63  ;;  %v13133_v20 = vpack.c.bf16 %v10569_v62, %v10564_v42  ;;  %v10629_v62 = vld [vmem:[%s18652_s8 + $0x4a8] sm:$0xff] }
 0xd9d   : > { %13080 = vmatpush1.bf16.msra.mxu0 %v13079_v54  ;;  %13120 = vmatpush1.bf16.msra.mxu1 %v13119_v19  ;;  %v10618_v54 = vld [vmem:[%s18652_s8 + $0x450] sm:$0xff] }
 0xd9e   : > { %13082 = vmatprep.subr.bf16.mxu0 %v13081_v41  ;;  %v10631_v41 = vld [vmem:[%s18652_s8 + $0x4b8] sm:$0xff] }
 0xd9f   : > { %v13097_v17 = vpack.c.bf16 %v10636_v35, %v10631_v41  ;;  %v10594_v41 = vld [vmem:[%s18652_s8 + $0x390] sm:$0xff]  ;;  %v10599_v35 = vld [vmem:[%s18652_s8 + $0x3b8] sm:$0xff] }
 0xda1   : > { %13084 = vmatpush1.bf16.msra.mxu0 %v13083_v8  ;;  %v10635_v8 = vld [vmem:[%s18652_s8 + $0x4d8] sm:$0xff] }
 0xda2   : > { %13086 = vmatprep.subr.bf16.mxu0 %v13085_v46  ;;  %v13099_v0 = vpack.c.bf16 %v10635_v8, %v10630_v33  ;;  %v13131_v46 = vpack.c.bf16 %v10637_v58, %v10632_v27  ;;  %v10604_v8 = vld [vmem:[%s18652_s8 + $0x3e0] sm:$0xff]  ;;  %v10614_v27 = vld [vmem:[%s18652_s8 + $0x430] sm:$0xff]  ;;  %v10619_v58 = vld [vmem:[%s18652_s8 + $0x458] sm:$0xff] }
 0xda3   : > { %v13153_v42 = vpack.c.bf16 %v10619_v58, %v10614_v27 }
 0xda5   : > { %13088 = vmatpush1.bf16.msra.mxu0 %v13087_v24 }
 0xda6   : > { %13090 = vmatprep.subr.bf16.mxu0 %v13089_v7 }
 0xda9   : > { %13092 = vmatpush1.bf16.msra.mxu0 %v13091_v56 }
 0xe1c   : > { %v5498_v3 = vpop.xlane.xlu0 %5497 }
 0xe1d   : > { %v5504_v15 = vmul.f32 0.0078125, %v5498_v3  ;;  %v5496_v47 = vpop.xlane.xlu1 %5495  ;;  %v13121_v3 = vpack.c.bf16 %v10618_v54, %v10613_v30 }
 0xe1e   : > { %v5503_v26 = vmul.f32 0.0078125, %v5496_v47  ;;  %v10621_v47 = vld [vmem:[%s18652_s8 + $0x468] sm:$0xff] }
 0xe1f   : > { %v16596_v1 = vsub.f32 %v16508_v14, %v5504_v15  ;;  %v13123_v15 = vpack.c.bf16 %v10617_v10, %v10612_v45  ;;  %13122 = vmatprep.subr.bf16.mxu1 %v13121_v3  ;;  %v10558_v45 = vld [vmem:[%s18650_s6 + $0x1] ss:$0 sm:$0xff] }
 0xe20   : > { %v16599_v39 = vsub.f32 %v16511_v51, %v5503_v26  ;;  %v5502_v48 = vpop.xlane.xlu0 %5501  ;;  %v10626_v26 = vld [vmem:[%s18652_s8 + $0x490] sm:$0xff] }
 0xe21   : > { %v5512_v29 = vmul.f32 %v16596_v1, %v16596_v1  ;;  %v5506_v18 = vmul.f32 0.0078125, %v5502_v48  ;;  %v5500_v59 = vpop.xlane.xlu1 %5499  ;;  %v10625_v48 = vld [vmem:[%s18652_s8 + $0x488] sm:$0xff]  ;;  %13124 = vmatpush1.bf16.msra.mxu1 %v13123_v15  ;;  %v10559_v15 = vld [vmem:[%s18651_s7 + $0x1] ss:$0 sm:$0xff] }
 0xe22   : > { %v5511_v16 = vmul.f32 %v16599_v39, %v16599_v39  ;;  %v5505_v55 = vmul.f32 0.0078125, %v5500_v59 }
 0xe23   : > { %5517 = vadd.xlane.f32.xlu0 %v5512_v29  ;;  %v16606_v44 = vsub.f32 %v16516_v43, %v5506_v18  ;;  %v13093_v29 = vpack.c.bf16 %v10626_v26, %v10621_v47  ;;  %v10623_v18 = vld [vmem:[%s18652_s8 + $0x478] sm:$0xff]  ;;  %v10574_v47 = vld [vmem:[%s18652_s8 + $0x2f0] sm:$0xff] }
 0xe24   : > { %5515 = vadd.xlane.f32.xlu1 %v5511_v16  ;;  %v16609_v50 = vsub.f32 %v16519_v22, %v5505_v55  ;;  %v10620_v16 = vld [vmem:[%s18652_s8 + $0x460] sm:$0xff]  ;;  %v10579_v26 = vld [vmem:[%s18652_s8 + $0x318] sm:$0xff] }
 0xe25   : > { %v5514_v53 = vmul.f32 %v16606_v44, %v16606_v44  ;;  %v13095_v59 = vpack.c.bf16 %v10625_v48, %v10620_v16  ;;  %v10628_v55 = vld [vmem:[%s18652_s8 + $0x4a0] sm:$0xff]  ;;  %13094 = vmatprep.subr.bf16.mxu0 %v13093_v29  ;;  %v13137_v48 = vpack.c.bf16 %v10579_v26, %v10574_v47 }
 0xe26   : > { %v5513_v31 = vmul.f32 %v16609_v50, %v16609_v50  ;;  %v13125_v11 = vpack.c.bf16 %v10628_v55, %v10623_v18 }
 0xe27   : > { %5521 = vadd.xlane.f32.xlu0 %v5514_v53  ;;  %v10622_v53 = vld [vmem:[%s18652_s8 + $0x470] sm:$0xff]  ;;  %13096 = vmatpush1.bf16.msra.mxu0 %v13095_v59 }
 0xe28   : > { %5519 = vadd.xlane.f32.xlu1 %v5513_v31  ;;  %v10627_v31 = vld [vmem:[%s18652_s8 + $0x498] sm:$0xff]  ;;  %13126 = vmatprep.subr.bf16.mxu1 %v13125_v11 }
 0xe29   : > { %v13127_v5 = vpack.c.bf16 %v10627_v31, %v10622_v53  ;;  %13098 = vmatprep.subr.bf16.mxu0 %v13097_v17 }
 0xe2b   : > { %13128 = vmatpush1.bf16.msra.mxu1 %v13127_v5  ;;  %13100 = vmatpush1.bf16.msra.mxu0 %v13099_v0 }
 0xe2c   : > { %13130 = vmatprep.subr.bf16.mxu1 %v13129_v12  ;;  %13134 = vmatprep.subr.bf16.mxu0 %v13133_v20  ;;  %v13149_v12 = vpack.c.bf16 %v10609_v9, %v10604_v8 }
 0xe2f   : > { %13132 = vmatpush1.bf16.msra.mxu1 %v13131_v46  ;;  %v10624_v46 = vld [vmem:[%s18652_s8 + $0x480] sm:$0xff] }
 0xe30   : > { %13166 = vmatprep.subr.bf16.mxu1 %v18733_v4 }
 0xeb0   : > { %v5518_v24 = vpop.xlane.xlu0 %5517 }
 0xeb1   : > { %v5524_v2 = vmul.f32 0.0078125, %v5518_v24  ;;  %v5516_v34 = vpop.xlane.xlu1 %5515  ;;  %v10634_v24 = vld [vmem:[%s18652_s8 + $0x4d0] sm:$0xff] }
 0xeb2   : > { %v5523_v25 = vmul.f32 0.0078125, %v5516_v34 }
 0xeb3   : > { %v5528_v21 = vadd.f32 1e-05, %v5524_v2  ;;  %v10639_v2 = vld [vmem:[%s18652_s8 + $0x4f8] sm:$0xff] }
 0xeb4   : > { %v5527_v19 = vadd.f32 1e-05, %v5523_v25  ;;  %v5522_v63 = vpop.xlane.xlu0 %5521  ;;  %v13161_v34 = vpack.c.bf16 %v10639_v2, %v10634_v24 }
 0xeb5   : > { %14014 = vrsqrt.f32 %v5528_v21  ;;  %v5526_v37 = vmul.f32 0.0078125, %v5522_v63  ;;  %v5520_v7 = vpop.xlane.xlu1 %5519 }
 0xeb6   : > { %14016 = vrsqrt.f32 %v5527_v19  ;;  %v5525_v28 = vmul.f32 0.0078125, %v5520_v7 }
 0xeb7   : > { %v5530_v23 = vadd.f32 1e-05, %v5526_v37 }
 0xeb8   : > { %v5529_v30 = vadd.f32 1e-05, %v5525_v28 }
 0xeb9   : > { %14018 = vrsqrt.f32 %v5530_v23 }
 0xeba   : > { %14020 = vrsqrt.f32 %v5529_v30 }
 0xebf   : > { %v14015_v56 = vpop.eup %14014 }
 0xec0   : > { %v14017_v54 = vpop.eup %14016  ;;  %v5536_v3 = vmul.f32 %v14015_v56, %v16596_v1  ;;  %v10584_v1 = vld [vmem:[%s18652_s8 + $0x340] sm:$0xff] }
 0xec1   : > { %v5535_v10 = vmul.f32 %v14017_v54, %v16599_v39  ;;  %v10589_v39 = vld [vmem:[%s18652_s8 + $0x368] sm:$0xff] }
 0xec2   : > { %v5546_v18 = vmul.f32 %v10558_v45, %v5536_v3  ;;  %v13141_v53 = vpack.c.bf16 %v10589_v39, %v10584_v1 }
 0xec3   : > { %v5545_v29 = vmul.f32 %v10558_v45, %v5535_v10  ;;  %v14019_v59 = vpop.eup %14018 }
 0xec4   : > { %v14021_v55 = vpop.eup %14020  ;;  %v5556_v31 = vadd.f32 %v10559_v15, %v5546_v18  ;;  %v5538_v5 = vmul.f32 %v14019_v59, %v16606_v44 }
 0xec5   : > { %v5555_v16 = vadd.f32 %v10559_v15, %v5545_v29  ;;  %v5537_v11 = vmul.f32 %v14021_v55, %v16609_v50  ;;  %v13145_v50 = vpack.c.bf16 %v10599_v35, %v10594_v41 }
 0xec6   : > { %v5548_v17 = vmul.f32 %v10558_v45, %v5538_v5 }
 0xec7   : > { %5705 = vmatmul.mubr.f32.vlgmr.msra.gmra.mrb[76].mxu0 %v5555_v16  ;;  %5794 = vmatmul.mubr.f32.vlgmr.msra.gmra.mrb[88].mxu1 %v5555_v16  ;;  %v5547_v33 = vmul.f32 %v10558_v45, %v5537_v11 }
 0xec8   : > { %13136 = vmatpush3.bf16.msra.mxu0 %v13133_v20  ;;  %5710 = vmatprep.mubr.f32.mxu0 %v18725_v6  ;;  %v5558_v0 = vadd.f32 %v10559_v15, %v5548_v17  ;;  %v13157_v20 = vpack.c.bf16 %v10629_v62, %v10624_v46 }
 0xec9   : > { %5799 = vmatprep.mubr.f32.mxu1 %v18725_v6  ;;  %13138 = vmatprep.subr.bf16.mxu0 %v13137_v48  ;;  %v5557_v44 = vadd.f32 %v10559_v15, %v5547_v33 }
 0xeca   : > { %13168 = vmatpush3.bf16.msra.mxu1 %v18733_v4 }
 0xecb   : > { %5711 = vmatmul.mubr.f32.gmra.mrb[78].mxu0 %v5556_v31  ;;  %5800 = vmatmul.mubr.f32.gmra.mrb[90].mxu1 %v5556_v31 }
 0xecc   : > { %13140 = vmatpush3.bf16.msra.mxu0 %v13137_v48  ;;  %5716 = vmatprep.mubr.f32.mxu0 %v18725_v6 }
 0xecd   : > { %5805 = vmatprep.mubr.f32.mxu1 %v18725_v6  ;;  %13142 = vmatprep.subr.bf16.mxu0 %v13141_v53 }
 0xece   : > { %13170 = vmatprep.subr.bf16.mxu1 %v18734_v49 }
 0xecf   : > { %5717 = vmatmul.mubr.f32.gmra.mrb[80].mxu0 %v5557_v44  ;;  %5806 = vmatmul.mubr.f32.gmra.mrb[92].mxu1 %v5557_v44 }
 0xed0   : > { %13144 = vmatpush3.bf16.msra.mxu0 %v13141_v53  ;;  %5722 = vmatprep.mubr.f32.mxu0 %v18725_v6 }
 0xed1   : > { %5811 = vmatprep.mubr.f32.mxu1 %v18725_v6  ;;  %13146 = vmatprep.subr.bf16.mxu0 %v13145_v50 }
 0xed2   : > { %13172 = vmatpush3.bf16.msra.mxu1 %v18734_v49 }
 0xed3   : > { %5723 = vmatmul.mubr.f32.gmra.mrb[82].mxu0 %v5558_v0  ;;  %5812 = vmatmul.mubr.f32.gmra.mrb[94].mxu1 %v5558_v0 }
 0xed4   : > { %13148 = vmatpush3.bf16.msra.mxu0 %v13145_v50  ;;  %12091 = vmatprep.mubr.f32.mxu0 %v5555_v16 }
 0xed5   : > { %13150 = vmatprep.subr.bf16.mxu0 %v13149_v12  ;;  %13174 = vmatprep.subr.bf16.mxu1 %v18733_v4 }
 0xed8   : > { %13152 = vmatpush3.bf16.msra.mxu0 %v13149_v12 }
 0xed9   : > { %13154 = vmatprep.subr.bf16.mxu0 %v13153_v42 }
 0xedc   : > { %13156 = vmatpush3.bf16.msra.mxu0 %v13153_v42 }
 0xedd   : > { %13158 = vmatprep.subr.bf16.mxu0 %v13157_v20 }
 0xee0   : > { %13160 = vmatpush3.bf16.msra.mxu0 %v13157_v20 }
 0xee1   : > { %13162 = vmatprep.subr.bf16.mxu0 %v13161_v34 }
 0xee4   : > { %13164 = vmatpush3.bf16.msra.mxu0 %v13161_v34 }
 0xee7   : > { %12092 = vmatmul.mubr.f32.vlgmr.msra.gmra.mrb[84].mxu0 %v5556_v31 }
 0xee8   : > { %12094 = vmatprep.mubr.f32.mxu0 %v5557_v44 }
 0xeeb   : > { %12095 = vmatmul.mubr.f32.gmra.mrb[86].mxu0 %v5558_v0 }
 0xf9a   : > { %v16804_v25 = vpop.f32.mrb[76].mxu0  ;;  %v16806_v21 = vpop.f32.mrb[88].mxu1 }
 0xf9b   : > { %v16808_v19 = vpop.f32.mrb[77].mxu0  ;;  %v5797_v63 = vpop.f32.mrb[89].mxu1  ;;  %12105 = vmatprep.mubr.msk.f32.mxu1 %vm1027_vm1, %v16804_v25 }
 0xf9c   : > { %6020 = vrot.lane.b32.xlu1 %v16808_v19, %s18735_s25 }
 0xf9e   : > { %v16814_v37 = vpop.f32.mrb[78].mxu0  ;;  %v16816_v7 = vpop.f32.mrb[90].mxu1 }
 0xf9f   : > { %v16818_v28 = vpop.f32.mrb[79].mxu0  ;;  %v5803_v23 = vpop.f32.mrb[91].mxu1  ;;  %12106 = vmatmul.mubr.msk.f32.vlgmr.msra.gmra.mrb[96].mxu1 %vm1027_vm1, %v16814_v37 }
 0xfa0   : > { %v16822_v30 = vpack.i.bf16 %v5803_v23, %v5797_v63  ;;  %6022 = vrot.lane.b32.xlu0 %v16818_v28, %s18735_s25  ;;  %13176 = vmatpush3.bf16.msra.mxu1 %v18733_v4  ;;  %v16828_v56 = vpack.c.bf16 %v5803_v23, %v5797_v63 }
 0xfa1   : > { %13178 = vmatprep.subr.bf16.mxu1 %v18734_v49 }
 0xfa2   : > { %v16830_v54 = vpop.f32.mrb[80].mxu0  ;;  %v16832_v45 = vpop.f32.mrb[92].mxu1 }
 0xfa3   : > { %v16834_v10 = vpop.f32.mrb[81].mxu0  ;;  %v5809_v3 = vpop.f32.mrb[93].mxu1  ;;  %12108 = vmatprep.mubr.msk.f32.mxu1 %vm1027_vm1, %v16830_v54 }
 0xfa4   : > { %6268 = vrot.lane.b32.xlu0 %v16814_v37, %s18736_s30  ;;  %6024 = vrot.lane.b32.xlu1 %v16834_v10, %s18735_s25 }
 0xfa5   : > { %13180 = vmatpush3.bf16.msra.mxu1 %v18734_v49 }
 0xfa6   : > { %v16843_v15 = vpop.f32.mrb[82].mxu0  ;;  %v16845_v47 = vpop.f32.mrb[94].mxu1  ;;  %13194 = vmatprep.subr.bf16.mxu1 %v18733_v4 }
 0xfa7   : > { %v16848_v26 = vpop.f32.mrb[83].mxu0  ;;  %v5815_v29 = vpop.f32.mrb[95].mxu1  ;;  %12109 = vmatmul.mubr.msk.f32.gmra.mrb[98].mxu1 %vm1027_vm1, %v16843_v15 }
 0xfa8   : > { %v16852_v16 = vpack.i.bf16 %v5815_v29, %v5809_v3  ;;  %6272 = vrot.lane.b32.xlu0 %v16843_v15, %s18736_s30  ;;  %6026 = vrot.lane.b32.xlu1 %v16848_v26, %s18735_s25  ;;  %v16858_v48 = vpack.c.bf16 %v5815_v29, %v5809_v3  ;;  %v6015_v14 = vmul.f32 %v16848_v26, %v15135_v36 }
 0xfac   : > { %6397 = vrot.lane.b32.xlu0 %v16818_v28, %s18737_s0  ;;  %6266 = vrot.lane.b32.xlu1 %v16804_v25, %s18736_s30 }
 0xfb0   : > { %6401 = vrot.lane.b32.xlu0 %v16848_v26, %s18737_s0  ;;  %6270 = vrot.lane.b32.xlu1 %v16830_v54, %s18736_s30 }
 0xfb4   : > { %6651 = vrot.lane.b32.xlu0 %v16814_v37, %s18735_s25  ;;  %6395 = vrot.lane.b32.xlu1 %v16808_v19, %s18737_s0 }
 0xfb8   : > { %6655 = vrot.lane.b32.xlu0 %v16843_v15, %s18735_s25  ;;  %6399 = vrot.lane.b32.xlu1 %v16834_v10, %s18737_s0 }
 0xfba   : > { %v16876_v18 = vpop.f32.mrb[84].mxu0 }
 0xfbb   : > { %v16878_v1 = vpop.f32.mrb[85].mxu0 }
 0xfbc   : > { %v16884_v59 = vpack.c.bf16 %v16876_v18, %v16878_v1  ;;  %7006 = vrot.lane.b32.xlu0 %v16814_v37, %s18737_s0  ;;  %6649 = vrot.lane.b32.xlu1 %v16804_v25, %s18735_s25 }
 0xfbe   : > { %18738 = vst [vmem:[#allocation11_spill] sm:$0xff] %v16884_v59  ;;  %v16890_v55 = vpop.f32.mrb[86].mxu0 }
 0xfbf   : > { %18739 = vst [vmem:[#allocation12_spill] sm:$0xff] %v16890_v55  ;;  %v16892_v53 = vpop.f32.mrb[87].mxu0 }
 0xfc0   : > { %18740 = vst [vmem:[#allocation20_spill] sm:$0xff] %v16892_v53  ;;  %v16898_v11 = vpack.c.bf16 %v16890_v55, %v16892_v53  ;;  %7010 = vrot.lane.b32.xlu0 %v16843_v15, %s18737_s0  ;;  %6653 = vrot.lane.b32.xlu1 %v16830_v54, %s18735_s25 }
 0xfc2   : > { %18741 = vst [vmem:[#allocation21_spill] sm:$0xff] %v16898_v11  ;;  %v6014_v11 = vmul.f32 %v16834_v10, %v15129_v61 }
 0xfc4   : > { %7135 = vrot.lane.b32.xlu0 %v16816_v7, %s18736_s30  ;;  %7004 = vrot.lane.b32.xlu1 %v16804_v25, %s18737_s0 }
 0xfc8   : > { %7139 = vrot.lane.b32.xlu0 %v16845_v47, %s18736_s30  ;;  %7008 = vrot.lane.b32.xlu1 %v16830_v54, %s18737_s0 }
 0xfcc   : > { %7494 = vrot.lane.b32.xlu0 %v16816_v7, %s18735_s25  ;;  %7133 = vrot.lane.b32.xlu1 %v16806_v21, %s18736_s30 }
 0xfd0   : > { %7498 = vrot.lane.b32.xlu0 %v16845_v47, %s18735_s25  ;;  %7137 = vrot.lane.b32.xlu1 %v16832_v45, %s18736_s30 }
 0xfd4   : > { %7740 = vrot.lane.b32.xlu0 %v16818_v28, %s18736_s30  ;;  %7492 = vrot.lane.b32.xlu1 %v16806_v21, %s18735_s25 }
 0xfd8   : > { %7744 = vrot.lane.b32.xlu0 %v16848_v26, %s18736_s30  ;;  %7496 = vrot.lane.b32.xlu1 %v16832_v45, %s18735_s25 }
 0xfdc   : > { %7869 = vrot.lane.b32.xlu0 %v16816_v7, %s18737_s0  ;;  %7738 = vrot.lane.b32.xlu1 %v16808_v19, %s18736_s30 }
 0xfe0   : > { %7873 = vrot.lane.b32.xlu0 %v16845_v47, %s18737_s0  ;;  %7742 = vrot.lane.b32.xlu1 %v16834_v10, %s18736_s30 }
 0xfe4   : > { %7867 = vrot.lane.b32.xlu1 %v16806_v21, %s18737_s0 }
 0xfe8   : > { %7871 = vrot.lane.b32.xlu1 %v16832_v45, %s18737_s0 }
0x100e   : > { %v6021_v5 = vpop.permute.xlu1 %6020 }
0x100f   : > { %12119 = vmatprep.mubr.msk.f32.mxu1 %vm1027_vm1, %v6021_v5 }
0x1012   : > { %v6023_v41 = vpop.permute.xlu0 %6022 }
0x1013   : > { %12120 = vmatmul.mubr.msk.f32.vlgmr.msra.gmra.mrb[100].mxu1 %vm1027_vm1, %v6023_v41 }
0x1014   : > { %13196 = vmatpush3.bf16.msra.mxu1 %v18733_v4 }
0x1015   : > { %13198 = vmatprep.subr.bf16.mxu1 %v18734_v49 }
0x1016   : > { %v6269_v35 = vpop.permute.xlu0 %6268  ;;  %v6025_v33 = vpop.permute.xlu1 %6024 }
0x1017   : > { %12122 = vmatprep.mubr.msk.f32.mxu1 %vm1027_vm1, %v6025_v33 }
0x1018   : > { %13200 = vmatpush3.bf16.msra.mxu1 %v18734_v49 }
0x1019   : > { %13202 = vmatprep.subr.bf16.mxu1 %v18733_v4 }
0x101a   : > { %v6273_v44 = vpop.permute.xlu0 %6272  ;;  %v6027_v50 = vpop.permute.xlu1 %6026 }
0x101b   : > { %12123 = vmatmul.mubr.msk.f32.gmra.mrb[102].mxu1 %vm1027_vm1, %v6027_v50 }
0x101e   : > { %v6398_v17 = vpop.permute.xlu0 %6397  ;;  %v6267_v8 = vpop.permute.xlu1 %6266 }
0x101f   : > { %12147 = vmatprep.mubr.msk.f32.mxu1 %vm1027_vm1, %v6267_v8 }
0x1020   : > { %12148 = vmatmul.mubr.msk.f32.vlgmr.msra.gmra.mrb[104].mxu1 %vm1027_vm1, %v6269_v35 }
0x1021   : > { %13204 = vmatpush3.bf16.msra.mxu1 %v18733_v4 }
0x1022   : > { %v6271_v9 = vpop.permute.xlu1 %6270  ;;  %13206 = vmatprep.subr.bf16.mxu1 %v18734_v49  ;;  %v6402_v0 = vpop.permute.xlu0 %6401 }
0x1023   : > { %12150 = vmatprep.mubr.msk.f32.mxu1 %vm1027_vm1, %v6271_v9 }
0x1024   : > { %12151 = vmatmul.mubr.msk.f32.gmra.mrb[106].mxu1 %vm1027_vm1, %v6273_v44 }
0x1025   : > { %13208 = vmatpush3.bf16.msra.mxu1 %v18734_v49 }
0x1026   : > { %v6396_v12 = vpop.permute.xlu1 %6395  ;;  %13222 = vmatprep.subr.bf16.mxu1 %v18733_v4  ;;  %v6652_v27 = vpop.permute.xlu0 %6651 }
0x1027   : > { %12161 = vmatprep.mubr.msk.f32.mxu1 %vm1027_vm1, %v6396_v12 }
0x1028   : > { %12162 = vmatmul.mubr.msk.f32.vlgmr.msra.gmra.mrb[108].mxu1 %vm1027_vm1, %v6398_v17 }
0x1029   : > { %13224 = vmatpush3.bf16.msra.mxu1 %v18733_v4 }
0x102a   : > { %v6400_v58 = vpop.permute.xlu1 %6399  ;;  %13226 = vmatprep.subr.bf16.mxu1 %v18734_v49  ;;  %v6656_v46 = vpop.permute.xlu0 %6655 }
0x102b   : > { %12164 = vmatprep.mubr.msk.f32.mxu1 %vm1027_vm1, %v6400_v58 }
0x102c   : > { %12165 = vmatmul.mubr.msk.f32.gmra.mrb[110].mxu1 %vm1027_vm1, %v6402_v0 }
0x102d   : > { %13228 = vmatpush3.bf16.msra.mxu1 %v18734_v49 }
0x102e   : > { %v6650_v42 = vpop.permute.xlu1 %6649  ;;  %13230 = vmatprep.subr.bf16.mxu1 %v18733_v4  ;;  %v7007_v20 = vpop.permute.xlu0 %7006 }
0x102f   : > { %12189 = vmatprep.mubr.msk.f32.mxu1 %vm1027_vm1, %v6650_v42 }
0x1030   : > { %12190 = vmatmul.mubr.msk.f32.vlgmr.msra.gmra.mrb[112].mxu1 %vm1027_vm1, %v6652_v27 }
0x1031   : > { %13232 = vmatpush3.bf16.msra.mxu1 %v18733_v4 }
0x1032   : > { %v6654_v62 = vpop.permute.xlu1 %6653  ;;  %13234 = vmatprep.subr.bf16.mxu1 %v18734_v49  ;;  %v7011_v34 = vpop.permute.xlu0 %7010 }
0x1033   : > { %12192 = vmatprep.mubr.msk.f32.mxu1 %vm1027_vm1, %v6654_v62 }
0x1034   : > { %12193 = vmatmul.mubr.msk.f32.gmra.mrb[114].mxu1 %vm1027_vm1, %v6656_v46 }
0x1035   : > { %13236 = vmatpush3.bf16.msra.mxu1 %v18734_v49  ;;  %12203 = vmatprep.mubr.msk.f32.mxu1 %vm1027_vm1, %v16806_v21 }
0x1036   : > { %v7005_v24 = vpop.permute.xlu1 %7004  ;;  %13250 = vmatprep.subr.bf16.mxu1 %v18733_v4  ;;  %v7136_v23 = vpop.permute.xlu0 %7135 }
0x1038   : > { %12204 = vmatmul.mubr.msk.f32.vlgmr.msra.gmra.mrb[116].mxu1 %vm1027_vm1, %v16816_v7 }
0x1039   : > { %13252 = vmatpush3.bf16.msra.mxu1 %v18733_v4  ;;  %12206 = vmatprep.mubr.msk.f32.mxu1 %vm1027_vm1, %v16832_v45 }
0x103a   : > { %v7009_v2 = vpop.permute.xlu1 %7008  ;;  %13254 = vmatprep.subr.bf16.mxu1 %v18734_v49  ;;  %v7140_v29 = vpop.permute.xlu0 %7139 }
0x103c   : > { %12207 = vmatmul.mubr.msk.f32.gmra.mrb[118].mxu1 %vm1027_vm1, %v16845_v47 }
0x103d   : > { %13256 = vmatpush3.bf16.msra.mxu1 %v18734_v49  ;;  %12231 = vmatprep.mubr.msk.f32.mxu1 %vm1027_vm1, %v7005_v24 }
0x103e   : > { %v7134_v63 = vpop.permute.xlu1 %7133  ;;  %13258 = vmatprep.subr.bf16.mxu1 %v18733_v4  ;;  %v7495_v41 = vpop.permute.xlu0 %7494 }
0x1040   : > { %12232 = vmatmul.mubr.msk.f32.vlgmr.msra.gmra.mrb[120].mxu1 %vm1027_vm1, %v7007_v20  ;;  %v17058_v20 = vld [vmem:[%s18647_s3] sm:$0xff] }
0x1041   : > { %13260 = vmatpush3.bf16.msra.mxu1 %v18733_v4  ;;  %12234 = vmatprep.mubr.msk.f32.mxu1 %vm1027_vm1, %v7009_v2 }
0x1042   : > { %13262 = vmatprep.subr.bf16.mxu1 %v18734_v49  ;;  %v7138_v3 = vpop.permute.xlu1 %7137  ;;  %v7499_v33 = vpop.permute.xlu0 %7498 }
0x1044   : > { %12235 = vmatmul.mubr.msk.f32.gmra.mrb[122].mxu1 %vm1027_vm1, %v7011_v34 }
0x1045   : > { %13264 = vmatpush3.bf16.msra.mxu1 %v18734_v49  ;;  %12245 = vmatprep.mubr.msk.f32.mxu1 %vm1027_vm1, %v7134_v63 }
0x1046   : > { %13278 = vmatprep.subr.bf16.mxu1 %v18733_v4  ;;  %v7493_v5 = vpop.permute.xlu1 %7492  ;;  %v7741_v50 = vpop.permute.xlu0 %7740 }
0x1048   : > { %12246 = vmatmul.mubr.msk.f32.vlgmr.msra.gmra.mrb[124].mxu1 %vm1027_vm1, %v7136_v23  ;;  %v17067_v23 = vld [vmem:[%s18646_s2 + $0x18] sm:$0xff] }
0x1049   : > { %13280 = vmatpush3.bf16.msra.mxu1 %v18733_v4  ;;  %12248 = vmatprep.mubr.msk.f32.mxu1 %vm1027_vm1, %v7138_v3  ;;  %v5906_v3 = vmul.f32 %v17067_v23, %v16843_v15 }
0x104a   : > { %13282 = vmatprep.subr.bf16.mxu1 %v18734_v49  ;;  %v7497_v35 = vpop.permute.xlu1 %7496  ;;  %v7745_v8 = vpop.permute.xlu0 %7744 }
0x104c   : > { %12249 = vmatmul.mubr.msk.f32.gmra.mrb[126].mxu1 %vm1027_vm1, %v7140_v29  ;;  %v17074_v29 = vld [vmem:[%s18647_s3 + $0x18] sm:$0xff] }
0x104d   : > { %13284 = vmatpush3.bf16.msra.mxu1 %v18734_v49  ;;  %12273 = vmatprep.mubr.msk.f32.mxu1 %vm1027_vm1, %v16808_v19 }
0x104e   : > { %13286 = vmatprep.subr.bf16.mxu1 %v18733_v4  ;;  %v7739_v44 = vpop.permute.xlu1 %7738  ;;  %v7870_v0 = vpop.permute.xlu0 %7869 }
0x1050   : > { %12274 = vmatmul.mubr.msk.f32.vlgmr.msra.gmra.mrb[128].mxu1 %vm1027_vm1, %v16818_v28 }
0x1051   : > { %13288 = vmatpush3.bf16.msra.mxu1 %v18733_v4  ;;  %12276 = vmatprep.mubr.msk.f32.mxu1 %vm1027_vm1, %v16834_v10 }
0x1052   : > { %13290 = vmatprep.subr.bf16.mxu1 %v18734_v49  ;;  %v7743_v17 = vpop.permute.xlu1 %7742 }
0x1054   : > { %12277 = vmatmul.mubr.msk.f32.gmra.mrb[130].mxu1 %vm1027_vm1, %v16848_v26 }
0x1055   : > { %13292 = vmatpush3.bf16.msra.mxu1 %v18734_v49  ;;  %12287 = vmatprep.mubr.msk.f32.mxu1 %vm1027_vm1, %v7493_v5 }
0x1056   : > { %13306 = vmatprep.subr.bf16.mxu1 %v18733_v4  ;;  %v7868_v9 = vpop.permute.xlu1 %7867 }
0x1058   : > { %12288 = vmatmul.mubr.msk.f32.vlgmr.msra.gmra.mrb[132].mxu1 %vm1027_vm1, %v7495_v41 }
0x1059   : > { %13308 = vmatpush3.bf16.msra.mxu1 %v18733_v4  ;;  %12290 = vmatprep.mubr.msk.f32.mxu1 %vm1027_vm1, %v7497_v35  ;;  %v17080_v35 = vld [vmem:[%s18646_s2 + $0x10] sm:$0xff] }
0x105a   : > { %13310 = vmatprep.subr.bf16.mxu1 %v18734_v49  ;;  %v7872_v12 = vpop.permute.xlu1 %7871 }
0x105c   : > { %12291 = vmatmul.mubr.msk.f32.gmra.mrb[134].mxu1 %vm1027_vm1, %v7499_v33  ;;  %v5905_v33 = vmul.f32 %v17080_v35, %v16830_v54 }
0x105d   : > { %13312 = vmatpush3.bf16.msra.mxu1 %v18734_v49  ;;  %12315 = vmatprep.mubr.msk.f32.mxu1 %vm1027_vm1, %v7739_v44  ;;  %v17087_v44 = vld [vmem:[%s18647_s3 + $0x10] sm:$0xff] }
0x105e   : > { %13314 = vmatprep.subr.bf16.mxu1 %v18733_v4 }
0x1060   : > { %12316 = vmatmul.mubr.msk.f32.vlgmr.msra.gmra.mrb[136].mxu1 %vm1027_vm1, %v7741_v50 }
0x1061   : > { %13316 = vmatpush3.bf16.msra.mxu1 %v18733_v4  ;;  %12318 = vmatprep.mubr.msk.f32.mxu1 %vm1027_vm1, %v7743_v17  ;;  %v7874_v4 = vpop.permute.xlu0 %7873 }
0x1062   : > { %13318 = vmatprep.subr.bf16.mxu1 %v18734_v49 }
0x1064   : > { %12319 = vmatmul.mubr.msk.f32.gmra.mrb[138].mxu1 %vm1027_vm1, %v7745_v8 }
0x1065   : > { %13320 = vmatpush3.bf16.msra.mxu1 %v18734_v49  ;;  %12329 = vmatprep.mubr.msk.f32.mxu1 %vm1027_vm1, %v7868_v9  ;;  %v17038_v49 = vld [vmem:[%s18646_s2 + $0x8] sm:$0xff] }
0x1066   : > { %13334 = vmatprep.subr.bf16.mxu1 %v16828_v56  ;;  %v5904_v58 = vmul.f32 %v17038_v49, %v16814_v37 }
0x1068   : > { %12330 = vmatmul.mubr.msk.f32.vlgmr.msra.gmra.mrb[140].mxu1 %vm1027_vm1, %v7870_v0 }
0x1069   : > { %13336 = vmatpush3.bf16.msra.mxu1 %v16828_v56  ;;  %12332 = vmatprep.mubr.msk.f32.mxu1 %vm1027_vm1, %v7872_v12  ;;  %v17045_v56 = vld [vmem:[%s18647_s3 + $0x8] sm:$0xff] }
0x106a   : > { %13338 = vmatprep.subr.bf16.mxu1 %v16858_v48 }
0x106c   : > { %12333 = vmatmul.mubr.msk.f32.gmra.mrb[142].mxu1 %vm1027_vm1, %v7874_v4 }
0x106d   : > { %13340 = vmatpush3.bf16.msra.mxu1 %v16858_v48  ;;  %v17051_v48 = vld [vmem:[%s18646_s2] sm:$0xff] }
0x106e   : > { %v5903_v62 = vmul.f32 %v17051_v48, %v16804_v25 }
0x1072   : > { %v12107_v27 = vpop.f32.mrb[96].mxu1 }
0x1073   : > { %v6005_v42 = vmul.f32 %v17045_v56, %v12107_v27  ;;  %v5985_v46 = vpop.f32.mrb[97].mxu1 }
0x1074   : > { %v6004_v24 = vmul.f32 %v17058_v20, %v5985_v46 }
0x1075   : > { %v17061_v2 = vadd.f32 %v6005_v42, %v5904_v58 }
0x1076   : > { %v6008_v34 = vadd.f32 %v6004_v24, %v5903_v62 }
0x1078   : > { %12133 = vmatprep.mubr.msk.f32.mxu0 %vm1027_vm1, %v6008_v34 }
0x107a   : > { %v12110_v63 = vpop.f32.mrb[98].mxu1 }
0x107b   : > { %v6007_v5 = vmul.f32 %v17074_v29, %v12110_v63  ;;  %v5995_v41 = vpop.f32.mrb[99].mxu1 }
0x107c   : > { %v6006_v50 = vmul.f32 %v17087_v44, %v5995_v41 }
0x107d   : > { %v17090_v17 = vadd.f32 %v6007_v5, %v5906_v3 }
0x107e   : > { %v17092_v8 = vadd.f32 %v6006_v50, %v5905_v33 }
0x10e6   : > { %v12121_v9 = vpop.f32.mrb[100].mxu1 }
0x10e7   : > { %v6122_v0 = vmul.f32 %v17045_v56, %v12121_v9  ;;  %v6102_v12 = vpop.f32.mrb[101].mxu1 }
0x10e8   : > { %v6121_v4 = vmul.f32 %v17058_v20, %v6102_v12 }
0x10e9   : > { %6131 = vrot.lane.b32.xlu0 %v6122_v0, %s18735_s25 }
0x10ea   : > { %6129 = vrot.lane.b32.xlu1 %v6121_v4, %s18735_s25 }
0x10ee   : > { %v12124_v27 = vpop.f32.mrb[102].mxu1 }
0x10ef   : > { %v6124_v58 = vmul.f32 %v17074_v29, %v12124_v27  ;;  %v6112_v42 = vpop.f32.mrb[103].mxu1 }
0x10f0   : > { %v6123_v46 = vmul.f32 %v17087_v44, %v6112_v42 }
0x10f1   : > { %6135 = vrot.lane.b32.xlu0 %v6124_v58, %s18735_s25 }
0x10f2   : > { %6133 = vrot.lane.b32.xlu1 %v6123_v46, %s18735_s25 }
0x10f3   : > { %v12149_v62 = vpop.f32.mrb[104].mxu1 }
0x10f4   : > { %v6348_v24 = vpop.f32.mrb[105].mxu1  ;;  %v6368_v27 = vmul.f32 %v17045_v56, %v12149_v62 }
0x10f5   : > { %v6367_v42 = vmul.f32 %v17058_v20, %v6348_v24  ;;  %v6775_v24 = vmul.f32 %v17038_v49, %v16816_v7 }
0x10f7   : > { %v12152_v34 = vpop.f32.mrb[106].mxu1 }
0x10f8   : > { %v6358_v63 = vpop.f32.mrb[107].mxu1 }
0x10fb   : > { %v12163_v3 = vpop.f32.mrb[108].mxu1 }
0x10fc   : > { %v6497_v5 = vmul.f32 %v17045_v56, %v12163_v3  ;;  %v6477_v41 = vpop.f32.mrb[109].mxu1  ;;  %v6370_v3 = vmul.f32 %v17074_v29, %v12152_v34  ;;  %v6774_v34 = vmul.f32 %v17051_v48, %v16806_v21 }
0x10fd   : > { %v6496_v33 = vmul.f32 %v17058_v20, %v6477_v41  ;;  %v6369_v41 = vmul.f32 %v17087_v44, %v6358_v63 }
0x10fe   : > { %6506 = vrot.lane.b32.xlu0 %v6497_v5, %s18736_s30 }
0x10ff   : > { %6504 = vrot.lane.b32.xlu1 %v6496_v33, %s18736_s30  ;;  %v12166_v50 = vpop.f32.mrb[110].mxu1 }
0x1100   : > { %v6499_v9 = vmul.f32 %v17074_v29, %v12166_v50  ;;  %v6487_v0 = vpop.f32.mrb[111].mxu1 }
0x1101   : > { %v6498_v12 = vmul.f32 %v17087_v44, %v6487_v0 }
0x1102   : > { %6510 = vrot.lane.b32.xlu0 %v6499_v9, %s18736_s30 }
0x1103   : > { %6508 = vrot.lane.b32.xlu1 %v6498_v12, %s18736_s30  ;;  %v12191_v4 = vpop.f32.mrb[112].mxu1 }
0x1104   : > { %v6731_v58 = vpop.f32.mrb[113].mxu1  ;;  %v6751_v62 = vmul.f32 %v17045_v56, %v12191_v4 }
0x1105   : > { %v6750_v0 = vmul.f32 %v17058_v20, %v6731_v58 }
0x1106   : > { %6377 = vrot.lane.b32.xlu0 %v6368_v27, %s18737_s0 }
0x1107   : > { %6375 = vrot.lane.b32.xlu1 %v6367_v42, %s18737_s0  ;;  %v12194_v46 = vpop.f32.mrb[114].mxu1  ;;  %v6777_v42 = vmul.f32 %v17067_v23, %v16845_v47 }
0x1108   : > { %v6741_v5 = vpop.f32.mrb[115].mxu1  ;;  %v6753_v58 = vmul.f32 %v17074_v29, %v12194_v46 }
0x110a   : > { %6381 = vrot.lane.b32.xlu0 %v6370_v3, %s18737_s0 }
0x110b   : > { %6379 = vrot.lane.b32.xlu1 %v6369_v41, %s18737_s0  ;;  %v12205_v33 = vpop.f32.mrb[116].mxu1 }
0x110c   : > { %v6876_v50 = vmul.f32 %v17045_v56, %v12205_v33  ;;  %v6856_v9 = vpop.f32.mrb[117].mxu1 }
0x110d   : > { %v6875_v63 = vmul.f32 %v17058_v20, %v6856_v9  ;;  %v6776_v9 = vmul.f32 %v17080_v35, %v16832_v45 }
0x110e   : > { %v6880_v12 = vadd.f32 %v6876_v50, %v6775_v24  ;;  %6760 = vrot.lane.b32.xlu0 %v6751_v62, %s18735_s25 }
0x110f   : > { %v6879_v27 = vadd.f32 %v6875_v63, %v6774_v34  ;;  %6758 = vrot.lane.b32.xlu1 %v6750_v0, %s18735_s25  ;;  %v12208_v4 = vpop.f32.mrb[118].mxu1 }
0x1110   : > { %v6878_v3 = vmul.f32 %v17074_v29, %v12208_v4  ;;  %v6866_v41 = vpop.f32.mrb[119].mxu1 }
0x1111   : > { %v17132_v33 = vpack.c.bf16 %v6880_v12, %v6879_v27  ;;  %v6877_v24 = vmul.f32 %v17087_v44, %v6866_v41 }
0x1112   : > { %v6882_v62 = vadd.f32 %v6878_v3, %v6777_v42  ;;  %v6752_v3 = vmul.f32 %v17087_v44, %v6741_v5 }
0x1113   : > { %v6881_v50 = vadd.f32 %v6877_v24, %v6776_v9  ;;  %6764 = vrot.lane.b32.xlu1 %v6753_v58, %s18735_s25  ;;  %v12233_v0 = vpop.f32.mrb[120].mxu1 }
0x1114   : > { %v7086_v34 = vpop.f32.mrb[121].mxu1  ;;  %v7106_v51 = vmul.f32 %v17045_v56, %v12233_v0  ;;  %v6394_v0 = vmul.f32 %v16848_v26, %v15165_v40 }
0x1115   : > { %v17138_v63 = vpack.c.bf16 %v6882_v62, %v6881_v50  ;;  %v7384_v62 = vmul.f32 %v17038_v49, %v16818_v28  ;;  %v7386_v49 = vmul.f32 %v17067_v23, %v16848_v26 }
0x1117   : > { %v17140_v31 = vpop.f32.mrb[122].mxu1 }
0x1118   : > { %v17142_v4 = vpop.f32.mrb[123].mxu1 }
0x111b   : > { %v12247_v46 = vpop.f32.mrb[124].mxu1 }
0x111c   : > { %v7235_v12 = vmul.f32 %v17045_v56, %v12247_v46  ;;  %v7215_v27 = vpop.f32.mrb[125].mxu1 }
0x111d   : > { %v7234_v39 = vmul.f32 %v17058_v20, %v7215_v27 }
0x111e   : > { %7244 = vrot.lane.b32.xlu0 %v7235_v12, %s18737_s0 }
0x111f   : > { %7242 = vrot.lane.b32.xlu1 %v7234_v39, %s18737_s0  ;;  %v12250_v42 = vpop.f32.mrb[126].mxu1  ;;  %v7383_v39 = vmul.f32 %v17051_v48, %v16808_v19  ;;  %v7385_v48 = vmul.f32 %v17080_v35, %v16834_v10 }
0x1120   : > { %v7225_v41 = vpop.f32.mrb[127].mxu1  ;;  %v7237_v24 = vmul.f32 %v17074_v29, %v12250_v42  ;;  %v7105_v42 = vmul.f32 %v17058_v20, %v7086_v34 }
0x1121   : > { %v7236_v58 = vmul.f32 %v17087_v44, %v7225_v41 }
0x1122   : > { %6762 = vrot.lane.b32.xlu0 %v6752_v3, %s18735_s25 }
0x1123   : > { %v12275_v9 = vpop.f32.mrb[128].mxu1  ;;  %7246 = vrot.lane.b32.xlu1 %v7236_v58, %s18737_s0 }
0x1124   : > { %v7481_v50 = vmul.f32 %v17045_v56, %v12275_v9  ;;  %v7461_v46 = vpop.f32.mrb[129].mxu1 }
0x1125   : > { %v7480_v5 = vmul.f32 %v17058_v20, %v7461_v46 }
0x1126   : > { %v17159_v12 = vadd.f32 %v7481_v50, %v7384_v62  ;;  %7248 = vrot.lane.b32.xlu0 %v7237_v24, %s18737_s0 }
0x1127   : > { %v17162_v27 = vadd.f32 %v7480_v5, %v7383_v39  ;;  %v12278_v3 = vpop.f32.mrb[130].mxu1 }
0x1128   : > { %v7483_v41 = vmul.f32 %v17074_v29, %v12278_v3  ;;  %v7471_v58 = vpop.f32.mrb[131].mxu1 }
0x1129   : > { %v7482_v9 = vmul.f32 %v17087_v44, %v7471_v58 }
0x112a   : > { %v17171_v62 = vadd.f32 %v7483_v41, %v7386_v49  ;;  %7113 = vrot.lane.b32.xlu0 %v7105_v42, %s18736_s30 }
0x112b   : > { %v17174_v24 = vadd.f32 %v7482_v9, %v7385_v48  ;;  %v12289_v50 = vpop.f32.mrb[132].mxu1 }
0x112c   : > { %v7594_v34 = vmul.f32 %v17045_v56, %v12289_v50  ;;  %v7574_v46 = vpop.f32.mrb[133].mxu1  ;;  %v6013_v50 = vmul.f32 %v16818_v28, %v15127_v60 }
0x112d   : > { %v7593_v23 = vmul.f32 %v17058_v20, %v7574_v46  ;;  %v6012_v46 = vmul.f32 %v16808_v19, %v15125_v38 }
0x112e   : > { %7603 = vrot.lane.b32.xlu1 %v7594_v34, %s18735_s25 }
0x112f   : > { %7601 = vrot.lane.b32.xlu0 %v7593_v23, %s18735_s25  ;;  %v12292_v39 = vpop.f32.mrb[134].mxu1 }
0x1130   : > { %v7584_v35 = vpop.f32.mrb[135].mxu1 }
0x1133   : > { %v17180_v5 = vpop.f32.mrb[136].mxu1 }
0x1134   : > { %v17182_v3 = vpop.f32.mrb[137].mxu1 }
0x1137   : > { %v17184_v49 = vpop.f32.mrb[138].mxu1 }
0x1138   : > { %v17186_v42 = vpop.f32.mrb[139].mxu1 }
0x113b   : > { %v12331_v41 = vpop.f32.mrb[140].mxu1 }
0x113c   : > { %v7949_v58 = vpop.f32.mrb[141].mxu1 }
0x113f   : > { %v12334_v48 = vpop.f32.mrb[142].mxu1 }
0x1140   : > { %v7959_v9 = vpop.f32.mrb[143].mxu1 }
0x115b   : > { %v6132_v34 = vpop.permute.xlu0 %6131 }
0x115c   : > { %v6142_v23 = vadd.f32 %v6132_v34, %v6013_v50  ;;  %v6130_v13 = vpop.permute.xlu1 %6129  ;;  %v7595_v50 = vmul.f32 %v17087_v44, %v7584_v35 }
0x115d   : > { %v6141_v43 = vadd.f32 %v6130_v13, %v6012_v46 }
0x115f   : > { %v13749_v22 = vpack.i.bf16 %v6142_v23, %v6141_v43  ;;  %v7108_v43 = vmul.f32 %v17074_v29, %v17140_v31 }
0x1161   : > { %13750 = vrot.lane.b32.xlu1 %v13749_v22, %s18735_s25  ;;  %v7596_v22 = vmul.f32 %v17074_v29, %v12292_v39 }
0x1163   : > { %v6136_v6 = vpop.permute.xlu0 %6135 }
0x1164   : > { %v6144_v59 = vadd.f32 %v6136_v6, %v6015_v14  ;;  %v6134_v53 = vpop.permute.xlu1 %6133  ;;  %v7107_v6 = vmul.f32 %v17087_v44, %v17142_v4  ;;  %v6392_v14 = vmul.f32 %v16818_v28, %v15148_v52  ;;  %v6393_v4 = vmul.f32 %v16834_v10, %v15150_v57 }
0x1165   : > { %v6143_v55 = vadd.f32 %v6134_v53, %v6014_v11  ;;  %7115 = vrot.lane.b32.xlu1 %v7106_v51, %s18736_s30  ;;  %v7968_v11 = vmul.f32 %v17058_v20, %v7949_v58 }
0x1167   : > { %v13754_v13 = vpack.i.bf16 %v6144_v59, %v6143_v55  ;;  %v6391_v59 = vmul.f32 %v16808_v19, %v15137_v32 }
0x1169   : > { %7605 = vrot.lane.b32.xlu1 %v7595_v50, %s18735_s25  ;;  %13755 = vrot.lane.b32.xlu0 %v13754_v13, %s18735_s25  ;;  %v7969_v50 = vmul.f32 %v17045_v56, %v12331_v41 }
0x116d   : > { %7119 = vrot.lane.b32.xlu1 %v7108_v43, %s18736_s30  ;;  %7607 = vrot.lane.b32.xlu0 %v7596_v22, %s18735_s25  ;;  %v7971_v43 = vmul.f32 %v17074_v29, %v12334_v48  ;;  %v7970_v22 = vmul.f32 %v17087_v44, %v7959_v9  ;;  %v7840_v48 = vmul.f32 %v17045_v56, %v17180_v5 }
0x116e   : > { %v7839_v9 = vmul.f32 %v17058_v20, %v17182_v3  ;;  %v6645_v56 = vmul.f32 %v16804_v25, %v15125_v38 }
0x1170   : > { %v6507_v51 = vpop.permute.xlu0 %6506 }
0x1171   : > { %v6517_v55 = vadd.f32 %v6507_v51, %v6392_v14  ;;  %7117 = vrot.lane.b32.xlu0 %v7107_v6, %s18736_s30  ;;  %v6505_v53 = vpop.permute.xlu1 %6504  ;;  %v18742_v14 = vld [vmem:[#allocation14_spill] sm:$0xff] }
0x1172   : > { %v6516_v31 = vadd.f32 %v6505_v53, %v6391_v59  ;;  %v6263_v51 = vmul.f32 %v16814_v37, %v18742_v14  ;;  %v18743_v59 = vld [vmem:[#allocation13_spill] sm:$0xff] }
0x1174   : > { %v13759_v39 = vpack.i.bf16 %v6517_v55, %v6516_v31  ;;  %v6511_v35 = vpop.permute.xlu0 %6510  ;;  %v6262_v55 = vmul.f32 %v16804_v25, %v18743_v59 }
0x1175   : > { %v6519_v34 = vadd.f32 %v6511_v35, %v6394_v0  ;;  %7976 = vrot.lane.b32.xlu0 %v7968_v11, %s18736_s30  ;;  %v6509_v46 = vpop.permute.xlu1 %6508  ;;  %v18744_v0 = vld [vmem:[#allocation16_spill] sm:$0xff]  ;;  %v18745_v35 = vld [vmem:[#allocation15_spill] sm:$0xff] }
0x1176   : > { %v6518_v23 = vadd.f32 %v6509_v46, %v6393_v4  ;;  %13760 = vrot.lane.b32.xlu1 %v13759_v39, %s18737_s0  ;;  %v6265_v39 = vmul.f32 %v16843_v15, %v18744_v0  ;;  %v6264_v4 = vmul.f32 %v16830_v54, %v18745_v35 }
0x1178   : > { %v13764_v13 = vpack.i.bf16 %v6519_v34, %v6518_v23  ;;  %v6378_v6 = vpop.permute.xlu0 %6377 }
0x1179   : > { %v6376_v58 = vpop.permute.xlu1 %6375  ;;  %v6388_v41 = vadd.f32 %v6378_v6, %v6263_v51 }
0x117a   : > { %7978 = vrot.lane.b32.xlu1 %v7969_v50, %s18736_s30  ;;  %13765 = vrot.lane.b32.xlu0 %v13764_v13, %s18737_s0  ;;  %v6387_v53 = vadd.f32 %v6376_v58, %v6262_v55  ;;  %v7130_v50 = vmul.f32 %v16816_v7, %v18742_v14  ;;  %v7129_v58 = vmul.f32 %v16806_v21, %v18743_v59 }
0x117c   : > { %v6382_v11 = vpop.permute.xlu0 %6381 }
0x117d   : > { %v6380_v31 = vpop.permute.xlu1 %6379  ;;  %v6390_v46 = vadd.f32 %v6382_v11, %v6265_v39 }
0x117e   : > { %7980 = vrot.lane.b32.xlu1 %v7970_v22, %s18736_s30  ;;  %7982 = vrot.lane.b32.xlu0 %v7971_v43, %s18736_s30  ;;  %v6389_v23 = vadd.f32 %v6380_v31, %v6264_v4  ;;  %v7131_v31 = vmul.f32 %v16832_v45, %v18745_v35 }
0x1180   : > { %v6761_v20 = vpop.permute.xlu0 %6760 }
0x1181   : > { %v6759_v34 = vpop.permute.xlu1 %6758 }
0x1182   : > { %6526 = vrot.lane.b32.xlu0 %v6388_v41, %s18736_s30  ;;  %6524 = vrot.lane.b32.xlu1 %v6387_v53, %s18736_s30  ;;  %v6770_v5 = vadd.f32 %v6759_v34, %v6645_v56  ;;  %v6646_v41 = vmul.f32 %v16814_v37, %v15127_v60  ;;  %v6647_v56 = vmul.f32 %v16830_v54, %v15129_v61 }
0x1185   : > { %v6765_v3 = vpop.permute.xlu1 %6764 }
0x1186   : > { %7849 = vrot.lane.b32.xlu0 %v7840_v48, %s18737_s0  ;;  %7847 = vrot.lane.b32.xlu1 %v7839_v9, %s18737_s0  ;;  %v7132_v48 = vmul.f32 %v16845_v47, %v18744_v0  ;;  %v6771_v9 = vadd.f32 %v6761_v20, %v6646_v41  ;;  %v7489_v20 = vmul.f32 %v16816_v7, %v15127_v60 }
0x1187   : > { %v7000_v60 = vmul.f32 %v16804_v25, %v15137_v32 }
0x118a   : > { %6530 = vrot.lane.b32.xlu0 %v6390_v46, %s18736_s30  ;;  %6528 = vrot.lane.b32.xlu1 %v6389_v23, %s18736_s30  ;;  %v7841_v46 = vmul.f32 %v17087_v44, %v17186_v42  ;;  %v6648_v44 = vmul.f32 %v16843_v15, %v15135_v36 }
0x118e   : > { %6887 = vrot.lane.b32.xlu0 %v6770_v5, %s18735_s25 }
0x1190   : > { %v7245_v13 = vpop.permute.xlu0 %7244 }
0x1191   : > { %v7255_v43 = vadd.f32 %v7245_v13, %v7130_v50  ;;  %v7243_v22 = vpop.permute.xlu1 %7242  ;;  %v7842_v50 = vmul.f32 %v17074_v29, %v17184_v49 }
0x1192   : > { %v7254_v6 = vadd.f32 %v7243_v22, %v7129_v58  ;;  %v7488_v58 = vmul.f32 %v16806_v21, %v15125_v38 }
0x1194   : > { %v13769_v51 = vpack.i.bf16 %v7255_v43, %v7254_v6  ;;  %v6763_v55 = vpop.permute.xlu0 %6762  ;;  %v6773_v6 = vadd.f32 %v6765_v3, %v6648_v44 }
0x1195   : > { %v7247_v53 = vpop.permute.xlu1 %7246  ;;  %v6772_v5 = vadd.f32 %v6763_v55, %v6647_v56 }
0x1196   : > { %13770 = vrot.lane.b32.xlu1 %v13769_v51, %s18736_s30  ;;  %v7256_v39 = vadd.f32 %v7247_v53, %v7131_v31  ;;  %v7001_v53 = vmul.f32 %v16814_v37, %v15148_v52  ;;  %v7491_v37 = vmul.f32 %v16845_v47, %v15135_v36 }
0x1198   : > { %v7249_v11 = vpop.permute.xlu0 %7248 }
0x1199   : > { %v7257_v4 = vadd.f32 %v7249_v11, %v7132_v48  ;;  %v17414_v48 = vld [vmem:[%s18649_s5 + $0x8] sm:$0xff] }
0x119a   : > { %6889 = vrot.lane.b32.xlu1 %v6771_v9, %s18735_s25 }
0x119b   : > { %v13774_v34 = vpack.i.bf16 %v7257_v4, %v7256_v39 }
0x119c   : > { %v7114_v23 = vpop.permute.xlu0 %7113 }
0x119d   : > { %13775 = vrot.lane.b32.xlu0 %v13774_v34, %s18736_s30  ;;  %v7125_v38 = vadd.f32 %v7114_v23, %v7000_v60  ;;  %v7490_v34 = vmul.f32 %v16832_v45, %v15129_v61  ;;  %v7003_v61 = vmul.f32 %v16843_v15, %v15165_v40  ;;  %v7863_v15 = vmul.f32 %v16806_v21, %v15137_v32 }
0x119e   : > { %7851 = vrot.lane.b32.xlu1 %v7841_v46, %s18737_s0 }
0x11a0   : > { %v7604_v13 = vpop.permute.xlu1 %7603 }
0x11a1   : > { %v7614_v42 = vadd.f32 %v7604_v13, %v7489_v20  ;;  %v7602_v43 = vpop.permute.xlu0 %7601  ;;  %6891 = vrot.lane.b32.xlu0 %v6772_v5, %s18735_s25  ;;  %v7002_v20 = vmul.f32 %v16830_v54, %v15150_v57 }
0x11a2   : > { %v7613_v22 = vadd.f32 %v7602_v43, %v7488_v58  ;;  %7853 = vrot.lane.b32.xlu1 %v7842_v50, %s18737_s0 }
0x11a4   : > { %v13779_v51 = vpack.i.bf16 %v7614_v42, %v7613_v22 }
0x11a5   : > { %6893 = vrot.lane.b32.xlu0 %v6773_v6, %s18735_s25  ;;  %v7864_v6 = vmul.f32 %v16816_v7, %v15148_v52  ;;  %v7866_v52 = vmul.f32 %v16845_v47, %v15165_v40  ;;  %v7865_v7 = vmul.f32 %v16832_v45, %v15150_v57  ;;  %v7735_v57 = vmul.f32 %v16818_v28, %v18742_v14 }
0x11a6   : > { %13780 = vrot.lane.b32.xlu1 %v13779_v51, %s18735_s25  ;;  %v7734_v40 = vmul.f32 %v16808_v19, %v18743_v59 }
0x11a9   : > { %7262 = vrot.lane.b32.xlu0 %v7125_v38, %s18737_s0 }
0x11d3   : > { %v13751_v29 = vpop.permute.xlu1 %13750 }
0x11d4   : > { %v13753_v49 = vunpack.i.h.bf16 %v13751_v29  ;;  %v13752_v55 = vunpack.i.l.bf16 %v13751_v29 }
0x11d6   : > { %v13181_v41 = vpack.c.bf16 %v13753_v49, %v13752_v55 }
0x11d7   : > { %v7116_v31 = vpop.permute.xlu1 %7115 }
0x11d8   : > { %v7126_v3 = vadd.f32 %v7116_v31, %v7001_v53  ;;  %13183 = vmatprep.subr.msk.bf16.mxu0 %vm15246_vm2, %v13181_v41 }
0x11d9   : > { %13186 = vmatpush3.bf16.xpose.msk.msra.mxu0 %vm15246_vm2, %v13181_v41 }
0x11da   : > { %7264 = vrot.lane.b32.xlu1 %v7126_v3, %s18737_s0 }
0x11db   : > { %v13756_v25 = vpop.permute.xlu0 %13755  ;;  %v7606_v39 = vpop.permute.xlu1 %7605 }
0x11dc   : > { %v13758_v9 = vunpack.i.h.bf16 %v13756_v25  ;;  %v13757_v11 = vunpack.i.l.bf16 %v13756_v25  ;;  %v7615_v23 = vadd.f32 %v7606_v39, %v7490_v34 }
0x11de   : > { %v13187_v4 = vpack.c.bf16 %v13758_v9, %v13757_v11 }
0x11df   : > { %v7608_v46 = vpop.permute.xlu0 %7607  ;;  %v7120_v50 = vpop.permute.xlu1 %7119 }
0x11e0   : > { %v7616_v56 = vadd.f32 %v7608_v46, %v7491_v37  ;;  %13189 = vmatprep.subr.msk.bf16.mxu0 %vm15246_vm2, %v13187_v4  ;;  %v7128_v36 = vadd.f32 %v7120_v50, %v7003_v61  ;;  %v7736_v37 = vmul.f32 %v16834_v10, %v18745_v35  ;;  %v7737_v50 = vmul.f32 %v16848_v26, %v18744_v0 }
0x11e1   : > { %13192 = vmatpush3.bf16.xpose.msk.msra.mxu0 %vm15246_vm2, %v13187_v4 }
0x11e2   : > { %v13784_v5 = vpack.i.bf16 %v7616_v56, %v7615_v23 }
0x11e3   : > { %v7118_v13 = vpop.permute.xlu0 %7117 }
0x11e4   : > { %v7127_v58 = vadd.f32 %v7118_v13, %v7002_v20  ;;  %13785 = vrot.lane.b32.xlu0 %v13784_v5, %s18735_s25 }
0x11e6   : > { %7266 = vrot.lane.b32.xlu1 %v7127_v58, %s18737_s0 }
0x11e7   : > { %v7977_v44 = vpop.permute.xlu0 %7976 }
0x11e8   : > { %7268 = vrot.lane.b32.xlu0 %v7128_v36, %s18737_s0  ;;  %v13761_v42 = vpop.permute.xlu1 %13760  ;;  %12134 = vmatmul.mubr.msk.f32.vlgmr.msra.gmra.mrb[88].mxu0 %vm1027_vm1, %v17061_v2  ;;  %v7988_v38 = vadd.f32 %v7977_v44, %v7863_v15 }
0x11e9   : > { %v13763_v43 = vunpack.i.h.bf16 %v13761_v42  ;;  %v13762_v54 = vunpack.i.l.bf16 %v13761_v42  ;;  %12136 = vmatprep.mubr.msk.f32.mxu0 %vm1027_vm1, %v17092_v8 }
0x11eb   : > { %v13209_v22 = vpack.c.bf16 %v13763_v43, %v13762_v54 }
0x11ec   : > { %v13766_v51 = vpop.permute.xlu0 %13765  ;;  %v7979_v60 = vpop.permute.xlu1 %7978  ;;  %12137 = vmatmul.mubr.msk.f32.gmra.mrb[90].mxu0 %vm1027_vm1, %v17090_v17 }
0x11ed   : > { %v13768_v29 = vunpack.i.h.bf16 %v13766_v51  ;;  %v13767_v2 = vunpack.i.l.bf16 %v13766_v51  ;;  %v7989_v49 = vadd.f32 %v7979_v60, %v7864_v6  ;;  %13211 = vmatprep.subr.msk.bf16.mxu0 %vm15246_vm2, %v13209_v22 }
0x11ee   : > { %13214 = vmatpush3.bf16.xpose.msk.msra.mxu0 %vm15246_vm2, %v13209_v22 }
0x11ef   : > { %v13215_v32 = vpack.c.bf16 %v13768_v29, %v13767_v2  ;;  %v13789_v21 = vpack.i.bf16 %v7989_v49, %v7988_v38 }
0x11f0   : > { %v7983_v8 = vpop.permute.xlu0 %7982  ;;  %v7981_v17 = vpop.permute.xlu1 %7980 }
0x11f1   : > { %v7991_v55 = vadd.f32 %v7983_v8, %v7866_v52  ;;  %v7990_v41 = vadd.f32 %v7981_v17, %v7865_v7  ;;  %13790 = vrot.lane.b32.xlu1 %v13789_v21, %s18737_s0  ;;  %13217 = vmatprep.subr.msk.bf16.mxu0 %vm15246_vm2, %v13215_v32 }
0x11f3   : > { %v13794_v53 = vpack.i.bf16 %v7991_v55, %v7990_v41 }
0x11f4   : > { %v6527_v31 = vpop.permute.xlu0 %6526  ;;  %v6525_v3 = vpop.permute.xlu1 %6524 }
0x11f5   : > { %13795 = vrot.lane.b32.xlu0 %v13794_v53, %s18737_s0  ;;  %12175 = vmatprep.mubr.msk.f32.mxu0 %vm1027_vm1, %v6525_v3 }
0x11f6   : > { %13220 = vmatpush3.bf16.xpose.msk.msra.mxu0 %vm15246_vm2, %v13215_v32 }
0x11f7   : > { %13239 = vmatprep.subr.msk.bf16.mxu0 %vm15246_vm2, %v17132_v33 }
0x11f8   : > { %v7850_v45 = vpop.permute.xlu0 %7849  ;;  %v7848_v47 = vpop.permute.xlu1 %7847 }
0x11f9   : > { %v7860_v25 = vadd.f32 %v7850_v45, %v7735_v57  ;;  %v7859_v9 = vadd.f32 %v7848_v47, %v7734_v40  ;;  %v17434_v47 = vld [vmem:[%s18649_s5 + $0x18] sm:$0xff] }
0x11fb   : > { %7998 = vrot.lane.b32.xlu0 %v7860_v25, %s18736_s30  ;;  %7996 = vrot.lane.b32.xlu1 %v7859_v9, %s18736_s30 }
0x11fc   : > { %v6531_v11 = vpop.permute.xlu0 %6530  ;;  %v6529_v39 = vpop.permute.xlu1 %6528 }
0x11fd   : > { %12176 = vmatmul.mubr.msk.f32.vlgmr.msra.gmra.mrb[92].mxu0 %vm1027_vm1, %v6527_v31  ;;  %v17422_v31 = vld [vmem:[%s18649_s5] sm:$0xff] }
0x11fe   : > { %12178 = vmatprep.mubr.msk.f32.mxu0 %vm1027_vm1, %v6529_v39  ;;  %13242 = vmatpush3.bf16.xpose.msk.msra.mxu0 %vm15246_vm2, %v17132_v33 }
0x11ff   : > { %13245 = vmatprep.subr.msk.bf16.mxu0 %vm15246_vm2, %v17138_v63 }
0x1200   : > { %v6888_v19 = vpop.permute.xlu0 %6887 }
0x1201   : > { %12179 = vmatmul.mubr.msk.f32.gmra.mrb[94].mxu0 %vm1027_vm1, %v6531_v11  ;;  %v17442_v11 = vld [vmem:[%s18649_s5 + $0x10] sm:$0xff] }
0x1202   : > { %12217 = vmatprep.mubr.msk.f32.mxu0 %vm1027_vm1, %v6888_v19 }
0x1206   : > { %13248 = vmatpush3.bf16.xpose.msk.msra.mxu0 %vm15246_vm2, %v17138_v63 }
0x1208   : > { %v13771_v28 = vpop.permute.xlu1 %13770 }
0x1209   : > { %v13773_v14 = vunpack.i.h.bf16 %v13771_v28  ;;  %v13772_v59 = vunpack.i.l.bf16 %v13771_v28 }
0x120b   : > { %v13265_v4 = vpack.c.bf16 %v13773_v14, %v13772_v59 }
0x120c   : > { %v6890_v34 = vpop.permute.xlu1 %6889 }
0x120d   : > { %12218 = vmatmul.mubr.msk.f32.vlgmr.msra.gmra.mrb[96].mxu0 %vm1027_vm1, %v6890_v34  ;;  %13267 = vmatprep.subr.msk.bf16.mxu0 %vm15246_vm2, %v13265_v4 }
0x120e   : > { %13270 = vmatpush3.bf16.xpose.msk.msra.mxu0 %vm15246_vm2, %v13265_v4 }
0x120f   : > { %v13776_v33 = vpop.permute.xlu0 %13775 }
0x1210   : > { %v13778_v46 = vunpack.i.h.bf16 %v13776_v33  ;;  %v13777_v23 = vunpack.i.l.bf16 %v13776_v33  ;;  %v7852_v63 = vpop.permute.xlu1 %7851 }
0x1211   : > { %v7861_v56 = vadd.f32 %v7852_v63, %v7736_v37 }
0x1212   : > { %v13271_v5 = vpack.c.bf16 %v13778_v46, %v13777_v23 }
0x1213   : > { %v6892_v20 = vpop.permute.xlu0 %6891  ;;  %8000 = vrot.lane.b32.xlu1 %v7861_v56, %s18736_s30 }
0x1214   : > { %v7854_v13 = vpop.permute.xlu1 %7853  ;;  %12220 = vmatprep.mubr.msk.f32.mxu0 %vm1027_vm1, %v6892_v20  ;;  %13273 = vmatprep.subr.msk.bf16.mxu0 %vm15246_vm2, %v13271_v5 }
0x1215   : > { %v7862_v61 = vadd.f32 %v7854_v13, %v7737_v50 }
0x1216   : > { %13276 = vmatpush3.bf16.xpose.msk.msra.mxu0 %vm15246_vm2, %v13271_v5 }
0x1217   : > { %v6894_v10 = vpop.permute.xlu0 %6893  ;;  %13800 = vrot.lane.b32.xlu1 %v16822_v30, %s18736_s30  ;;  %8002 = vrot.lane.b32.xlu0 %v7862_v61, %s18736_s30 }
0x1218   : > { %v13781_v35 = vpop.permute.xlu1 %13780  ;;  %12221 = vmatmul.mubr.msk.f32.gmra.mrb[98].mxu0 %vm1027_vm1, %v6894_v10 }
0x1219   : > { %v13783_v26 = vunpack.i.h.bf16 %v13781_v35  ;;  %v13782_v0 = vunpack.i.l.bf16 %v13781_v35 }
0x121b   : > { %v13293_v58 = vpack.c.bf16 %v13783_v26, %v13782_v0  ;;  %v7263_v36 = vpop.permute.xlu0 %7262  ;;  %13810 = vrot.lane.b32.xlu1 %v16822_v30, %s18737_s0  ;;  %13805 = vrot.lane.b32.xlu0 %v16852_v16, %s18736_s30 }
0x121c   : > { %12259 = vmatprep.mubr.msk.f32.mxu0 %vm1027_vm1, %v7263_v36 }
0x121d   : > { %13295 = vmatprep.subr.msk.bf16.mxu0 %vm15246_vm2, %v13293_v58 }
0x121f   : > { %13815 = vrot.lane.b32.xlu1 %v16852_v16, %s18737_s0 }
0x124c   : > { %v7265_v44 = vpop.permute.xlu1 %7264 }
0x124d   : > { %12260 = vmatmul.mubr.msk.f32.vlgmr.msra.gmra.mrb[100].mxu0 %vm1027_vm1, %v7265_v44 }
0x124e   : > { %13298 = vmatpush3.bf16.xpose.msk.msra.mxu0 %vm15246_vm2, %v13293_v58 }
0x1256   : > { %v13786_v42 = vpop.permute.xlu0 %13785 }
0x1257   : > { %v13788_v43 = vunpack.i.h.bf16 %v13786_v42  ;;  %v13787_v54 = vunpack.i.l.bf16 %v13786_v42 }
0x1258   : > { %v7267_v15 = vpop.permute.xlu1 %7266 }
0x1259   : > { %v13299_v22 = vpack.c.bf16 %v13788_v43, %v13787_v54  ;;  %12262 = vmatprep.mubr.msk.f32.mxu0 %vm1027_vm1, %v7267_v15 }
0x125a   : > { %v7269_v6 = vpop.permute.xlu0 %7268 }
0x125b   : > { %12263 = vmatmul.mubr.msk.f32.gmra.mrb[102].mxu0 %vm1027_vm1, %v7269_v6  ;;  %13301 = vmatprep.subr.msk.bf16.mxu0 %vm15246_vm2, %v13299_v22 }
0x125c   : > { %13304 = vmatpush3.bf16.xpose.msk.msra.mxu0 %vm15246_vm2, %v13299_v22  ;;  %12301 = vmatprep.mubr.msk.f32.mxu0 %vm1027_vm1, %v17162_v27 }
0x1263   : > { %v13791_v51 = vpop.permute.xlu1 %13790  ;;  %12302 = vmatmul.mubr.msk.f32.vlgmr.msra.gmra.mrb[104].mxu0 %vm1027_vm1, %v17159_v12 }
0x1264   : > { %v13793_v60 = vunpack.i.h.bf16 %v13791_v51  ;;  %v13792_v38 = vunpack.i.l.bf16 %v13791_v51  ;;  %12304 = vmatprep.mubr.msk.f32.mxu0 %vm1027_vm1, %v17174_v24 }
0x1266   : > { %v13321_v29 = vpack.c.bf16 %v13793_v60, %v13792_v38 }
0x1267   : > { %v13796_v2 = vpop.permute.xlu0 %13795  ;;  %12305 = vmatmul.mubr.msk.f32.gmra.mrb[106].mxu0 %vm1027_vm1, %v17171_v62 }
0x1268   : > { %v13798_v49 = vunpack.i.h.bf16 %v13796_v2  ;;  %v13797_v32 = vunpack.i.l.bf16 %v13796_v2  ;;  %13323 = vmatprep.subr.msk.bf16.mxu0 %vm15246_vm2, %v13321_v29 }
0x1269   : > { %13326 = vmatpush3.bf16.xpose.msk.msra.mxu0 %vm15246_vm2, %v13321_v29 }
0x126a   : > { %v13327_v27 = vpack.c.bf16 %v13798_v49, %v13797_v32 }
0x126c   : > { %13329 = vmatprep.subr.msk.bf16.mxu0 %vm15246_vm2, %v13327_v27 }
0x126d   : > { %v7997_v12 = vpop.permute.xlu1 %7996  ;;  %v7999_v24 = vpop.permute.xlu0 %7998 }
0x126e   : > { %12343 = vmatprep.mubr.msk.f32.mxu0 %vm1027_vm1, %v7997_v12 }
0x1271   : > { %13332 = vmatpush3.bf16.xpose.msk.msra.mxu0 %vm15246_vm2, %v13327_v27 }
0x1278   : > { %12344 = vmatmul.mubr.msk.f32.vlgmr.msra.gmra.mrb[108].mxu0 %vm1027_vm1, %v7999_v24 }
0x1285   : > { %v8001_v62 = vpop.permute.xlu1 %8000 }
0x1286   : > { %12346 = vmatprep.mubr.msk.f32.mxu0 %vm1027_vm1, %v8001_v62 }
0x1289   : > { %v8003_v21 = vpop.permute.xlu0 %8002  ;;  %v13801_v52 = vpop.permute.xlu1 %13800 }
0x128a   : > { %v13803_v7 = vunpack.i.h.bf16 %v13801_v52  ;;  %v13802_v8 = vunpack.i.l.bf16 %v13801_v52  ;;  %12347 = vmatmul.mubr.msk.f32.gmra.mrb[110].mxu0 %vm1027_vm1, %v8003_v21 }
0x128c   : > { %v17408_v17 = vpack.c.bf16 %v13803_v7, %v13802_v8 }
0x128e   : > { %13342 = vmatprep.subr.bf16.mxu1 %v17408_v17 }
0x12bb   : > { %v12135_v55 = vpop.f32.mrb[88].mxu0 }
0x12bc   : > { %v17417_v41 = vadd.f32 %v17414_v48, %v12135_v55  ;;  %v6243_v53 = vpop.f32.mrb[89].mxu0 }
0x12bd   : > { %v17425_v3 = vadd.f32 %v17422_v31, %v6243_v53  ;;  %v17523_v53 = vpop.permute.xlu0 %13805 }
0x12be   : > { %v8144_v57 = vsel %vm1027_vm1, %v17417_v41, -inf }
0x12bf   : > { %8145 = vmax.xlane.f32.xlu0 %v8144_v57  ;;  %v12138_v40 = vpop.f32.mrb[90].mxu0  ;;  %v8141_v45 = vsel %vm1027_vm1, %v17425_v3, -inf }
0x12c0   : > { %v17437_v25 = vadd.f32 %v17434_v47, %v12138_v40  ;;  %8142 = vmax.xlane.f32.xlu1 %v8141_v45  ;;  %v6253_v9 = vpop.f32.mrb[91].mxu0 }
0x12c1   : > { %v17445_v39 = vadd.f32 %v17442_v11, %v6253_v9  ;;  %v17528_v9 = vpop.permute.xlu1 %13810 }
0x12c2   : > { %v8150_v19 = vsel %vm1027_vm1, %v17437_v25, -inf }
0x12c3   : > { %8151 = vmax.xlane.f32.xlu0 %v8150_v19  ;;  %v8147_v28 = vsel %vm1027_vm1, %v17445_v39, -inf }
0x12c7   : > { %8148 = vmax.xlane.f32.xlu0 %v8147_v28 }
0x12d0   : > { %v12177_v14 = vpop.f32.mrb[92].mxu0 }
0x12d1   : > { %v17452_v59 = vadd.f32 %v17414_v48, %v12177_v14  ;;  %v6626_v4 = vpop.f32.mrb[93].mxu0 }
0x12d2   : > { %v17455_v34 = vadd.f32 %v17422_v31, %v6626_v4  ;;  %v17537_v4 = vpop.permute.xlu1 %13815 }
0x12d3   : > { %v8156_v33 = vsel %vm1027_vm1, %v17452_v59, -inf }
0x12d4   : > { %8157 = vmax.xlane.f32.xlu0 %v8156_v33  ;;  %v12180_v37 = vpop.f32.mrb[94].mxu0  ;;  %v8153_v46 = vsel %vm1027_vm1, %v17455_v34, -inf }
0x12d5   : > { %v17462_v23 = vadd.f32 %v17434_v47, %v12180_v37  ;;  %8154 = vmax.xlane.f32.xlu1 %v8153_v46  ;;  %v6636_v63 = vpop.f32.mrb[95].mxu0 }
0x12d6   : > { %v17465_v56 = vadd.f32 %v17442_v11, %v6636_v63 }
0x12d7   : > { %v8162_v5 = vsel %vm1027_vm1, %v17462_v23, -inf }
0x12d8   : > { %8163 = vmax.xlane.f32.xlu0 %v8162_v5  ;;  %v8159_v20 = vsel %vm1027_vm1, %v17465_v56, -inf }
0x12d9   : > { %8160 = vmax.xlane.f32.xlu1 %v8159_v20 }
0x12e0   : > { %v12219_v50 = vpop.f32.mrb[96].mxu0 }
0x12e1   : > { %v17472_v13 = vadd.f32 %v17414_v48, %v12219_v50  ;;  %v6981_v61 = vpop.f32.mrb[97].mxu0 }
0x12e2   : > { %v17475_v10 = vadd.f32 %v17422_v31, %v6981_v61 }
0x12e3   : > { %v8168_v35 = vsel %vm1027_vm1, %v17472_v13, -inf }
0x12e4   : > { %8169 = vmax.xlane.f32.xlu1 %v8168_v35  ;;  %v8165_v26 = vsel %vm1027_vm1, %v17475_v10, -inf }
0x12e8   : > { %8166 = vmax.xlane.f32.xlu1 %v8165_v26 }
0x12eb   : > { %v12222_v0 = vpop.f32.mrb[98].mxu0 }
0x12ec   : > { %v17482_v58 = vadd.f32 %v17434_v47, %v12222_v0  ;;  %v6991_v36 = vpop.f32.mrb[99].mxu0 }
0x12ed   : > { %v17485_v44 = vadd.f32 %v17442_v11, %v6991_v36 }
0x12ee   : > { %v8174_v42 = vsel %vm1027_vm1, %v17482_v58, -inf }
0x12ef   : > { %8175 = vmax.xlane.f32.xlu1 %v8174_v42  ;;  %v8171_v43 = vsel %vm1027_vm1, %v17485_v44, -inf }
0x12f3   : > { %8172 = vmax.xlane.f32.xlu1 %v8171_v43 }
0x1320   : > { %v12261_v54 = vpop.f32.mrb[100].mxu0 }
0x1321   : > { %v17492_v15 = vadd.f32 %v17414_v48, %v12261_v54  ;;  %v7364_v22 = vpop.f32.mrb[101].mxu0  ;;  %v18747_v54 = vpack.i.bf16 %v16876_v18, %v16878_v1 }
0x1322   : > { %v17495_v6 = vadd.f32 %v17422_v31, %v7364_v22 }
0x1323   : > { %v8180_v51 = vsel %vm1027_vm1, %v17492_v15, -inf }
0x1324   : > { %8181 = vmax.xlane.f32.xlu0 %v8180_v51  ;;  %v8177_v60 = vsel %vm1027_vm1, %v17495_v6, -inf }
0x1325   : > { %8178 = vmax.xlane.f32.xlu1 %v8177_v60 }
0x132e   : > { %v12264_v38 = vpop.f32.mrb[102].mxu0 }
0x132f   : > { %v17502_v29 = vadd.f32 %v17434_v47, %v12264_v38  ;;  %v7374_v2 = vpop.f32.mrb[103].mxu0 }
0x1330   : > { %v17505_v49 = vadd.f32 %v17442_v11, %v7374_v2 }
0x1331   : > { %v8186_v32 = vsel %vm1027_vm1, %v17502_v29, -inf }
0x1332   : > { %8187 = vmax.xlane.f32.xlu0 %v8186_v32  ;;  %v8183_v27 = vsel %vm1027_vm1, %v17505_v49, -inf }
0x1333   : > { %8184 = vmax.xlane.f32.xlu1 %v8183_v27 }
0x1336   : > { %v12303_v12 = vpop.f32.mrb[104].mxu0 }
0x1337   : > { %v17512_v24 = vadd.f32 %v17414_v48, %v12303_v12  ;;  %v7715_v62 = vpop.f32.mrb[105].mxu0 }
0x1338   : > { %v17542_v26 = vadd.f32 %v17422_v31, %v7715_v62 }
0x1339   : > { %v8192_v21 = vsel %vm1027_vm1, %v17512_v24, -inf }
0x133a   : > { %8193 = vmax.xlane.f32.xlu0 %v8192_v21  ;;  %v12306_v52 = vpop.f32.mrb[106].mxu0 }
0x133b   : > { %v17517_v7 = vadd.f32 %v17434_v47, %v12306_v52  ;;  %v7725_v8 = vpop.f32.mrb[107].mxu0 }
0x133c   : > { %v17546_v43 = vadd.f32 %v17442_v11, %v7725_v8 }
0x133d   : > { %v8198_v55 = vsel %vm1027_vm1, %v17517_v7, -inf }
0x133e   : > { %8199 = vmax.xlane.f32.xlu0 %v8198_v55 }
0x1344   : > { %13820 = vrot.lane.b32.xlu1 %v16822_v30, %s18735_s25 }
0x134b   : > { %v12345_v57 = vpop.f32.mrb[108].mxu0 }
0x134c   : > { %v17526_v40 = vadd.f32 %v17414_v48, %v12345_v57  ;;  %v8098_v45 = vpop.f32.mrb[109].mxu0  ;;  %v8146_v14 = vpop.xlane.xlu0 %8145 }
0x134d   : > { %v17531_v19 = vadd.f32 %v17422_v31, %v8098_v45  ;;  %v8143_v48 = vpop.xlane.xlu1 %8142 }
0x134e   : > { %v8204_v28 = vsel %vm1027_vm1, %v17526_v40, -inf  ;;  %v8213_v37 = vsub.f32 %v17425_v3, %v8143_v48 }
0x134f   : > { %8205 = vmax.xlane.f32.xlu0 %v8204_v28  ;;  %v8201_v30 = vsel %vm1027_vm1, %v17531_v19, -inf }
0x1350   : > { %v8152_v33 = vpop.xlane.xlu0 %8151  ;;  %v8237_v5 = vmul.f32 1.442695, %v8213_v37 }
0x1351   : > { %v8216_v57 = vsub.f32 %v17437_v25, %v8152_v33 }
0x1352   : > { %14022 = vpow2.f32 %v8237_v5 }
0x1353   : > { %8202 = vmax.xlane.f32.xlu0 %v8201_v30  ;;  %v8243_v28 = vmul.f32 1.442695, %v8216_v57 }
0x1354   : > { %v8149_v46 = vpop.xlane.xlu0 %8148 }
0x1355   : > { %v8215_v20 = vsub.f32 %v17445_v39, %v8149_v46  ;;  %v8189_v39 = vsel %vm1027_vm1, %v17542_v26, -inf }
0x1357   : > { %v8241_v61 = vmul.f32 1.442695, %v8215_v20 }
0x1359   : > { %14024 = vpow2.f32 %v8241_v61 }
0x135c   : > { %v17557_v22 = vpop.eup %14022 }
0x135d   : > { %v12348_v63 = vpop.f32.mrb[110].mxu0 }
0x135e   : > { %v8108_v50 = vpop.f32.mrb[111].mxu0 }
0x135f   : > { %v17591_v46 = vadd.f32 %v17442_v11, %v8108_v50 }
0x1361   : > { %v8158_v8 = vpop.xlane.xlu0 %8157 }
0x1362   : > { %v8155_v35 = vpop.xlane.xlu1 %8154  ;;  %v8218_v30 = vsub.f32 %v17452_v59, %v8158_v8 }
0x1363   : > { %v8217_v0 = vsub.f32 %v17455_v34, %v8155_v35  ;;  %v8195_v34 = vsel %vm1027_vm1, %v17546_v43, -inf  ;;  %v17561_v51 = vpop.eup %14024 }
0x1364   : > { %v8291_v18 = vsel %vm1027_vm1, %v17561_v51, 0.0  ;;  %v8247_v25 = vmul.f32 1.442695, %v8218_v30 }
0x1365   : > { %v8245_v36 = vmul.f32 1.442695, %v8217_v0 }
0x1366   : > { %v8161_v42 = vpop.xlane.xlu1 %8160 }
0x1367   : > { %v8219_v3 = vsub.f32 %v17465_v56, %v8161_v42  ;;  %14026 = vpow2.f32 %v8245_v36  ;;  %v8285_v56 = vsel %vm1027_vm1, %v17557_v22, 0.0 }
0x1368   : > { %8190 = vmax.xlane.f32.xlu1 %v8189_v39 }
0x1369   : > { %13825 = vrot.lane.b32.xlu0 %v18747_v54, %s18736_s30  ;;  %v8249_v31 = vmul.f32 1.442695, %v8219_v3 }
0x136b   : > { %14028 = vpow2.f32 %v8249_v31 }
0x136c   : > { %8196 = vmax.xlane.f32.xlu1 %v8195_v34 }
0x1370   : > { %8286 = vadd.xlane.f32.xlu1 %v8285_v56 }
0x1371   : > { %v8170_v60 = vpop.xlane.xlu1 %8169  ;;  %v17566_v1 = vpop.eup %14026 }
0x1372   : > { %v8222_v38 = vsub.f32 %v17472_v13, %v8170_v60  ;;  %v8297_v12 = vsel %vm1027_vm1, %v17566_v1, 0.0  ;;  %v8214_v13 = vsub.f32 %v17417_v41, %v8146_v14  ;;  %v17583_v41 = vadd.f32 %v17434_v47, %v12348_v63  ;;  %v8164_v14 = vpop.xlane.xlu0 %8163 }
0x1373   : > { %v8220_v33 = vsub.f32 %v17462_v23, %v8164_v14  ;;  %v8207_v63 = vsel %vm1027_vm1, %v17591_v46, -inf }
0x1374   : > { %v8255_v2 = vmul.f32 1.442695, %v8222_v38  ;;  %8292 = vadd.xlane.f32.xlu1 %v8291_v18  ;;  %v8239_v55 = vmul.f32 1.442695, %v8214_v13  ;;  %v8210_v59 = vsel %vm1027_vm1, %v17583_v41, -inf }
0x1375   : > { %v8167_v32 = vpop.xlane.xlu1 %8166  ;;  %v17571_v62 = vpop.eup %14028  ;;  %v8251_v47 = vmul.f32 1.442695, %v8220_v33 }
0x1376   : > { %14030 = vpow2.f32 %v8255_v2  ;;  %v8221_v27 = vsub.f32 %v17475_v10, %v8167_v32  ;;  %v8303_v52 = vsel %vm1027_vm1, %v17571_v62, 0.0 }
0x1378   : > { %v8253_v21 = vmul.f32 1.442695, %v8221_v27  ;;  %8298 = vadd.xlane.f32.xlu1 %v8297_v12 }
0x137a   : > { %14032 = vpow2.f32 %v8253_v21 }
0x137b   : > { %14034 = vpow2.f32 %v8239_v55 }
0x137c   : > { %8304 = vadd.xlane.f32.xlu1 %v8303_v52  ;;  %14036 = vpow2.f32 %v8243_v28  ;;  %v17613_v36 = vpop.xlane.xlu1 %8175 }
0x137d   : > { %14038 = vpow2.f32 %v8247_v25 }
0x137e   : > { %14040 = vpow2.f32 %v8251_v47 }
0x1380   : > { %v17577_v45 = vpop.eup %14030  ;;  %v8173_v42 = vpop.xlane.xlu1 %8172 }
0x1381   : > { %v8312_v10 = vsel %vm1027_vm1, %v17577_v45, 0.0 }
0x1382   : > { %8313 = vadd.xlane.f32.xlu1 %v8312_v10 }
0x1384   : > { %v17585_v48 = vpop.eup %14032 }
0x1385   : > { %v8309_v37 = vsel %vm1027_vm1, %v17585_v48, 0.0  ;;  %v17597_v5 = vpop.eup %14034 }
0x1386   : > { %8310 = vadd.xlane.f32.xlu1 %v8309_v37  ;;  %v8288_v23 = vsel %vm1027_vm1, %v17597_v5, 0.0  ;;  %v17601_v20 = vpop.eup %14036 }
0x1387   : > { %v8294_v11 = vsel %vm1027_vm1, %v17601_v20, 0.0  ;;  %v17605_v50 = vpop.eup %14038 }
0x1388   : > { %8211 = vmax.xlane.f32.xlu0 %v8210_v59  ;;  %v8300_v61 = vsel %vm1027_vm1, %v17605_v50, 0.0  ;;  %v17609_v35 = vpop.eup %14040 }
0x1389   : > { %v8306_v0 = vsel %vm1027_vm1, %v17609_v35, 0.0 }
0x138c   : > { %8208 = vmax.xlane.f32.xlu0 %v8207_v63 }
0x1390   : > { %8289 = vadd.xlane.f32.xlu0 %v8288_v23 }
0x1394   : > { %8295 = vadd.xlane.f32.xlu0 %v8294_v11 }
0x1398   : > { %8301 = vadd.xlane.f32.xlu0 %v8300_v61 }
0x139c   : > { %8307 = vadd.xlane.f32.xlu0 %v8306_v0 }
0x13b1   : > { %v8182_v3 = vpop.xlane.xlu0 %8181 }
0x13b2   : > { %v8226_v39 = vsub.f32 %v17492_v15, %v8182_v3  ;;  %v8179_v54 = vpop.xlane.xlu1 %8178 }
0x13b3   : > { %v8225_v31 = vsub.f32 %v17495_v6, %v8179_v54 }
0x13b4   : > { %v8263_v34 = vmul.f32 1.442695, %v8226_v39 }
0x13b5   : > { %v8261_v56 = vmul.f32 1.442695, %v8225_v31 }
0x13b6   : > { %14042 = vpow2.f32 %v8263_v34 }
0x13b7   : > { %14044 = vpow2.f32 %v8261_v56 }
0x13bf   : > { %v8188_v60 = vpop.xlane.xlu0 %8187 }
0x13c0   : > { %v17617_v38 = vpop.eup %14042  ;;  %v8228_v18 = vsub.f32 %v17502_v29, %v8188_v60  ;;  %v8185_v2 = vpop.xlane.xlu1 %8184 }
0x13c1   : > { %v17620_v32 = vpop.eup %14044  ;;  %v8227_v27 = vsub.f32 %v17505_v49, %v8185_v2  ;;  %v8324_v15 = vsel %vm1027_vm1, %v17617_v38, 0.0  ;;  %v18749_v2 = vld [vmem:[#allocation20_spill] sm:$0xff] }
0x13c2   : > { %v8267_v12 = vmul.f32 1.442695, %v8228_v18  ;;  %8325 = vadd.xlane.f32.xlu0 %v8324_v15  ;;  %v8321_v6 = vsel %vm1027_vm1, %v17620_v32, 0.0 }
0x13c3   : > { %v8265_v21 = vmul.f32 1.442695, %v8227_v27  ;;  %8322 = vadd.xlane.f32.xlu1 %v8321_v6 }
0x13c4   : > { %14046 = vpow2.f32 %v8267_v12  ;;  %v13821_v13 = vpop.permute.xlu1 %13820 }
0x13c5   : > { %14048 = vpow2.f32 %v8265_v21  ;;  %v13823_v52 = vunpack.i.h.bf16 %v13821_v13  ;;  %v13822_v29 = vunpack.i.l.bf16 %v13821_v13 }
0x13c7   : > { %v13349_v8 = vpack.c.bf16 %v13823_v52, %v13822_v29  ;;  %v17635_v28 = vpop.xlane.xlu0 %8193  ;;  %v8224_v29 = vsub.f32 %v17482_v58, %v17613_v36 }
0x13c9   : > { %13350 = vmatprep.subr.bf16.mxu0 %v13349_v8 }
0x13ca   : > { %13352 = vmatpush3.bf16.msra.mxu0 %v13349_v8 }
0x13cb   : > { %v17637_v30 = vpop.xlane.xlu0 %8199 }
0x13ce   : > { %v17627_v55 = vpop.eup %14046 }
0x13cf   : > { %v17629_v49 = vpop.eup %14048  ;;  %v8330_v57 = vsel %vm1027_vm1, %v17627_v55, 0.0 }
0x13d0   : > { %8331 = vadd.xlane.f32.xlu0 %v8330_v57  ;;  %v8327_v10 = vsel %vm1027_vm1, %v17629_v49, 0.0 }
0x13d1   : > { %8328 = vadd.xlane.f32.xlu1 %v8327_v10  ;;  %v8259_v10 = vmul.f32 1.442695, %v8224_v29 }
0x13dc   : > { %v8206_v14 = vpop.xlane.xlu0 %8205 }
0x13dd   : > { %v8234_v37 = vsub.f32 %v17526_v40, %v8206_v14  ;;  %v8223_v40 = vsub.f32 %v17485_v44, %v8173_v42 }
0x13df   : > { %v8279_v25 = vmul.f32 1.442695, %v8234_v37 }
0x13e0   : > { %v8203_v33 = vpop.xlane.xlu0 %8202 }
0x13e1   : > { %14050 = vpow2.f32 %v8279_v25  ;;  %v8233_v59 = vsub.f32 %v17531_v19, %v8203_v33  ;;  %v8257_v19 = vmul.f32 1.442695, %v8223_v40  ;;  %v8230_v33 = vsub.f32 %v17512_v24, %v17635_v28 }
0x13e2   : > { %13830 = vrot.lane.b32.xlu1 %v16852_v16, %s18735_s25 }
0x13e3   : > { %v8277_v47 = vmul.f32 1.442695, %v8233_v59  ;;  %v8271_v40 = vmul.f32 1.442695, %v8230_v33 }
0x13e4   : > { %v17676_v8 = vpop.permute.xlu0 %13825 }
0x13e5   : > { %14052 = vpow2.f32 %v8277_v47 }
0x13e6   : > { %14054 = vpow2.f32 %v8257_v19 }
0x13eb   : > { %v17643_v63 = vpop.eup %14050 }
0x13ec   : > { %v8348_v23 = vsel %vm1027_vm1, %v17643_v63, 0.0 }
0x13ed   : > { %8349 = vadd.xlane.f32.xlu0 %v8348_v23 }
0x13ef   : > { %v17647_v11 = vpop.eup %14052 }
0x13f0   : > { %v8345_v61 = vsel %vm1027_vm1, %v17647_v11, 0.0  ;;  %v17654_v44 = vpop.eup %14054 }
0x13f1   : > { %8346 = vadd.xlane.f32.xlu0 %v8345_v61  ;;  %v8315_v60 = vsel %vm1027_vm1, %v17654_v44, 0.0  ;;  %v8232_v61 = vsub.f32 %v17517_v7, %v17637_v30  ;;  %v13808_v7 = vunpack.i.h.bf16 %v17523_v53  ;;  %v13807_v30 = vunpack.i.l.bf16 %v17523_v53 }
0x13f2   : > { %v13812_v53 = vunpack.i.l.bf16 %v17528_v9 }
0x13f3   : > { %v8275_v24 = vmul.f32 1.442695, %v8232_v61 }
0x13f5   : > { %v8191_v0 = vpop.xlane.xlu1 %8190 }
0x13f6   : > { %v8229_v16 = vsub.f32 %v17542_v26, %v8191_v0  ;;  %v18748_v26 = vld [vmem:[#allocation12_spill] sm:$0xff] }
0x13f7   : > { %v18750_v27 = vpack.i.bf16 %v18748_v26, %v18749_v2  ;;  %v13813_v26 = vunpack.i.h.bf16 %v17528_v9 }
0x13f8   : > { %v8269_v3 = vmul.f32 1.442695, %v8229_v16 }
0x13f9   : > { %v8197_v39 = vpop.xlane.xlu1 %8196  ;;  %v13357_v9 = vpack.c.bf16 %v13813_v26, %v13812_v53 }
0x13fa   : > { %v8231_v54 = vsub.f32 %v17546_v43, %v8197_v39  ;;  %14056 = vpow2.f32 %v8269_v3 }
0x13fc   : > { %v8273_v31 = vmul.f32 1.442695, %v8231_v54 }
0x13fd   : > { %v8287_v34 = vpop.xlane.xlu1 %8286 }
0x13fe   : > { %14058 = vrcp.f32 %v8287_v34 }
0x13ff   : > { %14060 = vpow2.f32 %v8273_v31 }
0x1401   : > { %v8293_v56 = vpop.xlane.xlu1 %8292 }
0x1404   : > { %v17658_v18 = vpop.eup %14056 }
0x1405   : > { %v8299_v42 = vpop.xlane.xlu1 %8298  ;;  %v8333_v15 = vsel %vm1027_vm1, %v17658_v18, 0.0 }
0x1406   : > { %8316 = vadd.xlane.f32.xlu1 %v8315_v60  ;;  %v13345_v60 = vpack.c.bf16 %v13808_v7, %v13807_v30 }
0x1407   : > { %13835 = vrot.lane.b32.xlu0 %v18750_v27, %s18736_s30 }
0x1408   : > { %v14059_v43 = vpop.eup %14058 }
0x1409   : > { %v17666_v12 = vpop.eup %14060  ;;  %v8381_v6 = vmul.f32 %v14059_v43, %v17557_v22  ;;  %v8305_v21 = vpop.xlane.xlu1 %8304 }
0x140a   : > { %8334 = vadd.xlane.f32.xlu1 %v8333_v15  ;;  %v8339_v13 = vsel %vm1027_vm1, %v17666_v12, 0.0 }
0x140b   : > { %12357 = vmatprep.mubr.msk.f32.mxu1 %vm1027_vm1, %v8381_v6  ;;  %v13818_v6 = vunpack.i.h.bf16 %v17537_v4 }
0x140e   : > { %8340 = vadd.xlane.f32.xlu1 %v8339_v13 }
0x140f   : > { %v17672_v52 = vpop.xlane.xlu1 %8313 }
0x1413   : > { %v8311_v57 = vpop.xlane.xlu1 %8310 }
0x1414   : > { %14062 = vrcp.f32 %v8311_v57 }
0x1415   : > { %v8212_v14 = vpop.xlane.xlu0 %8211  ;;  %14064 = vpow2.f32 %v8259_v10  ;;  %v13827_v10 = vunpack.i.l.bf16 %v17676_v8 }
0x1416   : > { %v8236_v22 = vsub.f32 %v17583_v41, %v8212_v14  ;;  %14066 = vrcp.f32 %v8293_v56 }
0x1418   : > { %v8283_v59 = vmul.f32 1.442695, %v8236_v22 }
0x1419   : > { %v8209_v37 = vpop.xlane.xlu0 %8208 }
0x141a   : > { %v8235_v25 = vsub.f32 %v17591_v46, %v8209_v37 }
0x141c   : > { %v8281_v47 = vmul.f32 1.442695, %v8235_v25 }
0x141d   : > { %v8290_v23 = vpop.xlane.xlu0 %8289 }
0x141e   : > { %v14063_v58 = vpop.eup %14062  ;;  %14068 = vpow2.f32 %v8281_v47 }
0x141f   : > { %14070 = vrcp.f32 %v8290_v23  ;;  %v8389_v36 = vmul.f32 %v14063_v58, %v17585_v48  ;;  %v17686_v46 = vpop.eup %14064 }
0x1420   : > { %14072 = vpow2.f32 %v8283_v59  ;;  %v8318_v19 = vsel %vm1027_vm1, %v17686_v46, 0.0  ;;  %v14067_v48 = vpop.eup %14066 }
0x1421   : > { %14074 = vrcp.f32 %v8299_v42  ;;  %12385 = vmatprep.mubr.msk.f32.mxu0 %vm1027_vm1, %v8389_v36  ;;  %v8296_v41 = vpop.xlane.xlu0 %8295  ;;  %v8383_v56 = vmul.f32 %v14067_v48, %v17561_v51  ;;  %v18753_v48 = vmov 0.0|0.0  }
0x1422   : > { %14076 = vrcp.f32 %v8296_v41  ;;  %v18751_v41 = vld [vmem:[#allocation11_spill] sm:$0xff] }
0x1423   : > { %14078 = vpow2.f32 %v8271_v40 }
0x1424   : > { %14080 = vrcp.f32 %v8305_v21 }
0x1425   : > { %v8302_v28 = vpop.xlane.xlu0 %8301 }
0x1426   : > { %14082 = vrcp.f32 %v8302_v28  ;;  %8319 = vadd.xlane.f32.xlu0 %v8318_v19  ;;  %v18752_v19 = vld [vmem:[#allocation21_spill] sm:$0xff] }
0x1427   : > { %14084 = vpow2.f32 %v8275_v24 }
0x1428   : > { %v17690_v0 = vpop.eup %14068 }
0x1429   : > { %v14071_v16 = vpop.eup %14070  ;;  %v8308_v3 = vpop.xlane.xlu0 %8307  ;;  %v8351_v39 = vsel %vm1027_vm1, %v17690_v0, 0.0 }
0x142a   : > { %v17696_v54 = vpop.eup %14072  ;;  %v8382_v31 = vmul.f32 %v14071_v16, %v17597_v5  ;;  %14086 = vrcp.f32 %v8308_v3  ;;  %8352 = vadd.xlane.f32.xlu0 %v8351_v39 }
0x142b   : > { %v14075_v34 = vpop.eup %14074  ;;  %v8354_v5 = vsel %vm1027_vm1, %v17696_v54, 0.0 }
0x142c   : > { %v14077_v42 = vpop.eup %14076  ;;  %12358 = vmatmul.mubr.msk.f32.vlgmr.msra.gmra.mrb[144].mxu1 %vm1027_vm1, %v8382_v31  ;;  %v8385_v43 = vmul.f32 %v14075_v34, %v17566_v1 }
0x142d   : > { %13344 = vmatpush3.bf16.msra.mxu1 %v17408_v17  ;;  %12360 = vmatprep.mubr.msk.f32.mxu1 %vm1027_vm1, %v8383_v56  ;;  %v8384_v2 = vmul.f32 %v14077_v42, %v17601_v20  ;;  %v17708_v27 = vpop.eup %14078  ;;  %v13817_v17 = vunpack.i.l.bf16 %v17537_v4  ;;  %v13828_v4 = vunpack.i.h.bf16 %v17676_v8 }
0x142e   : > { %13346 = vmatprep.subr.bf16.mxu1 %v13345_v60  ;;  %8355 = vadd.xlane.f32.xlu0 %v8354_v5  ;;  %v14081_v51 = vpop.eup %14080  ;;  %v8336_v20 = vsel %vm1027_vm1, %v17708_v27, 0.0 }
0x142f   : > { %v8387_v1 = vmul.f32 %v14081_v51, %v17571_v62  ;;  %v13361_v57 = vpack.c.bf16 %v13818_v6, %v13817_v17  ;;  %v13373_v22 = vpack.c.bf16 %v13828_v4, %v13827_v10 }
0x1430   : > { %v14083_v15 = vpop.eup %14082  ;;  %12361 = vmatmul.mubr.msk.f32.gmra.mrb[146].mxu1 %vm1027_vm1, %v8384_v2 }
0x1431   : > { %v8386_v21 = vmul.f32 %v14083_v15, %v17605_v50  ;;  %13348 = vmatpush3.bf16.msra.mxu1 %v13345_v60  ;;  %12371 = vmatprep.mubr.msk.f32.mxu1 %vm1027_vm1, %v8385_v43  ;;  %v17718_v13 = vpop.eup %14084 }
0x1432   : > { %13358 = vmatprep.subr.bf16.mxu1 %v13357_v9  ;;  %8337 = vadd.xlane.f32.xlu0 %v8336_v20  ;;  %v8342_v50 = vsel %vm1027_vm1, %v17718_v13, 0.0 }
0x1434   : > { %v14087_v29 = vpop.eup %14086  ;;  %12372 = vmatmul.mubr.msk.f32.vlgmr.msra.gmra.mrb[148].mxu1 %vm1027_vm1, %v8386_v21 }
0x1435   : > { %13360 = vmatpush3.bf16.msra.mxu1 %v13357_v9  ;;  %12374 = vmatprep.mubr.msk.f32.mxu1 %vm1027_vm1, %v8387_v1  ;;  %v8388_v14 = vmul.f32 %v14087_v29, %v17609_v35  ;;  %v18754_v29 = vmov 0.0  }
0x1436   : > { %13362 = vmatprep.subr.bf16.mxu1 %v13361_v57  ;;  %8343 = vadd.xlane.f32.xlu0 %v8342_v50 }
0x1438   : > { %12375 = vmatmul.mubr.msk.f32.gmra.mrb[150].mxu1 %vm1027_vm1, %v8388_v14 }
0x1439   : > { %13364 = vmatpush3.bf16.msra.mxu1 %v13361_v57 }
0x143a   : > { %13374 = vmatprep.subr.bf16.mxu1 %v13373_v22 }
0x144f   : > { %v8326_v62 = vpop.xlane.xlu0 %8325 }
0x1450   : > { %14088 = vrcp.f32 %v8326_v62  ;;  %v8323_v8 = vpop.xlane.xlu1 %8322 }
0x1451   : > { %14090 = vrcp.f32 %v8323_v8  ;;  %v10760_v8 = vld [vmem:[%s18653_s9 + $0xc0] sm:$0xff] }
0x1452   : > { %14092 = vrcp.f32 %v17672_v52 }
0x145a   : > { %v14089_v37 = vpop.eup %14088 }
0x145b   : > { %v14091_v25 = vpop.eup %14090  ;;  %v8394_v59 = vmul.f32 %v14089_v37, %v17617_v38  ;;  %v10761_v37 = vld [vmem:[%s18653_s9 + $0xc8] sm:$0xff] }
0x145c   : > { %v8393_v33 = vmul.f32 %v14091_v25, %v17620_v32  ;;  %v14093_v61 = vpop.eup %14092  ;;  %v10762_v25 = vld [vmem:[%s18653_s9 + $0xd0] sm:$0xff] }
0x145d   : > { %v8332_v35 = vpop.xlane.xlu0 %8331  ;;  %v8390_v38 = vmul.f32 %v14093_v61, %v17577_v45 }
0x145e   : > { %14094 = vrcp.f32 %v8332_v35  ;;  %v8329_v47 = vpop.xlane.xlu1 %8328  ;;  %12399 = vmatprep.mubr.msk.f32.mxu1 %vm1027_vm1, %v8393_v33  ;;  %v13382_v33 = vpack.c.bf16 %v10761_v37, %v10760_v8 }
0x145f   : > { %14096 = vrcp.f32 %v8329_v47  ;;  %12400 = vmatmul.mubr.msk.f32.vlgmr.msra.gmra.mrb[152].mxu1 %vm1027_vm1, %v8394_v59  ;;  %v10763_v59 = vld [vmem:[%s18653_s9 + $0xd8] sm:$0xff] }
0x1460   : > { %13376 = vmatpush3.bf16.msra.mxu1 %v13373_v22  ;;  %v13385_v35 = vpack.c.bf16 %v10763_v59, %v10762_v25 }
0x1462   : > { %v13831_v23 = vpop.permute.xlu1 %13830 }
0x1463   : > { %v13833_v58 = vunpack.i.h.bf16 %v13831_v23  ;;  %v13832_v36 = vunpack.i.l.bf16 %v13831_v23 }
0x1465   : > { %v13353_v40 = vpack.c.bf16 %v13833_v58, %v13832_v36  ;;  %v10764_v58 = vld [vmem:[%s18653_s9 + $0xe0] sm:$0xff]  ;;  %v10765_v36 = vld [vmem:[%s18653_s9 + $0xe8] sm:$0xff] }
0x1466   : > { %v13388_v61 = vpack.c.bf16 %v10765_v36, %v10764_v58 }
0x1467   : > { %13354 = vmatprep.subr.bf16.mxu0 %v13353_v40 }
0x1468   : > { %v14095_v52 = vpop.eup %14094  ;;  %13356 = vmatpush3.bf16.msra.mxu0 %v13353_v40  ;;  %v10766_v40 = vld [vmem:[%s18653_s9 + $0xf0] sm:$0xff] }
0x1469   : > { %v14097_v32 = vpop.eup %14096  ;;  %13366 = vmatprep.subr.bf16.mxu0 %v18751_v41  ;;  %v8396_v28 = vmul.f32 %v14095_v52, %v17627_v55  ;;  %v10767_v52 = vld [vmem:[%s18653_s9 + $0xf8] sm:$0xff] }
0x146a   : > { %v8395_v24 = vmul.f32 %v14097_v32, %v17629_v49  ;;  %v13391_v32 = vpack.c.bf16 %v10767_v52, %v10766_v40 }
0x146b   : > { %12386 = vmatmul.mubr.msk.f32.vlgmr.msra.gmra.mrb[112].mxu0 %vm1027_vm1, %v8390_v38  ;;  %v10768_v38 = vld [vmem:[%s18653_s9 + $0x100] sm:$0xff] }
0x146c   : > { %12402 = vmatprep.mubr.msk.f32.mxu1 %vm1027_vm1, %v8395_v24  ;;  %13368 = vmatpush3.bf16.msra.mxu0 %v18751_v41  ;;  %v10769_v41 = vld [vmem:[%s18653_s9 + $0x108] sm:$0xff] }
0x146d   : > { %12403 = vmatmul.mubr.msk.f32.gmra.mrb[154].mxu1 %vm1027_vm1, %v8396_v28  ;;  %13370 = vmatprep.subr.bf16.mxu0 %v18752_v19  ;;  %v13394_v24 = vpack.c.bf16 %v10769_v41, %v10768_v38  ;;  %v10770_v28 = vld [vmem:[%s18653_s9 + $0x110] sm:$0xff] }
0x1470   : > { %13372 = vmatpush3.bf16.msra.mxu0 %v18752_v19  ;;  %v10771_v19 = vld [vmem:[%s18653_s9 + $0x118] sm:$0xff] }
0x1471   : > { %13381 = vmatprep.subr.bf16.mxu0 %v18753_v48 }
0x147a   : > { %v8350_v45 = vpop.xlane.xlu0 %8349 }
0x147b   : > { %14098 = vrcp.f32 %v8350_v45 }
0x147e   : > { %v8347_v7 = vpop.xlane.xlu0 %8346 }
0x147f   : > { %14100 = vrcp.f32 %v8347_v7  ;;  %v13397_v7 = vpack.c.bf16 %v10771_v19, %v10770_v28 }
0x1482   : > { %v13836_v49 = vpop.permute.xlu0 %13835 }
0x1483   : > { %v13838_v30 = vunpack.i.h.bf16 %v13836_v49  ;;  %v13837_v16 = vunpack.i.l.bf16 %v13836_v49 }
0x1485   : > { %v13377_v55 = vpack.c.bf16 %v13838_v30, %v13837_v16  ;;  %v14099_v3 = vpop.eup %14098  ;;  %v10772_v30 = vld [vmem:[%s18653_s9 + $0x120] sm:$0xff]  ;;  %v10773_v16 = vld [vmem:[%s18653_s9 + $0x128] sm:$0xff] }
0x1486   : > { %v8402_v34 = vmul.f32 %v14099_v3, %v17643_v63 }
0x1487   : > { %13378 = vmatprep.subr.bf16.mxu1 %v13377_v55 }
0x1488   : > { %13380 = vmatpush3.bf16.msra.mxu1 %v13377_v55 }
0x1489   : > { %v14101_v39 = vpop.eup %14100 }
0x148a   : > { %v8401_v31 = vmul.f32 %v14101_v39, %v17647_v11 }
0x148c   : > { %12427 = vmatprep.mubr.msk.f32.mxu1 %vm1027_vm1, %v8401_v31  ;;  %v13400_v31 = vpack.c.bf16 %v10773_v16, %v10772_v30 }
0x148d   : > { %12428 = vmatmul.mubr.msk.f32.vlgmr.msra.gmra.mrb[156].mxu1 %vm1027_vm1, %v8402_v34  ;;  %v10774_v34 = vld [vmem:[%s18653_s9 + $0x130] sm:$0xff] }
0x1493   : > { %v8317_v56 = vpop.xlane.xlu1 %8316 }
0x1494   : > { %14102 = vrcp.f32 %v8317_v56  ;;  %v10775_v56 = vld [vmem:[%s18653_s9 + $0x138] sm:$0xff] }
0x1497   : > { %v8335_v26 = vpop.xlane.xlu1 %8334 }
0x1498   : > { %14104 = vrcp.f32 %v8335_v26  ;;  %v10777_v26 = vld [vmem:[%s18653_s9 + $0x148] sm:$0xff] }
0x149b   : > { %v8341_v2 = vpop.xlane.xlu1 %8340 }
0x149e   : > { %v14103_v42 = vpop.eup %14102 }
0x149f   : > { %v8391_v60 = vmul.f32 %v14103_v42, %v17654_v44  ;;  %v13403_v42 = vpack.c.bf16 %v10775_v56, %v10774_v34  ;;  %v18755_v34 = vld [vmem:[#allocation9_spill] sm:$0xff] }
0x14a1   : > { %12388 = vmatprep.mubr.msk.f32.mxu0 %vm1027_vm1, %v8391_v60  ;;  %v10776_v60 = vld [vmem:[%s18653_s9 + $0x140] sm:$0xff] }
0x14a2   : > { %v14105_v63 = vpop.eup %14104 }
0x14a3   : > { %v8397_v44 = vmul.f32 %v14105_v63, %v17658_v18  ;;  %v10780_v63 = vld [vmem:[%s18653_s9 + $0x160] sm:$0xff] }
0x14b3   : > { %v8320_v53 = vpop.xlane.xlu0 %8319 }
0x14b4   : > { %14106 = vrcp.f32 %v8320_v53  ;;  %v13406_v53 = vpack.c.bf16 %v10777_v26, %v10776_v60  ;;  %v18756_v60 = vld [vmem:[#allocation10_spill] sm:$0xff] }
0x14b7   : > { %v8353_v5 = vpop.xlane.xlu0 %8352 }
0x14b8   : > { %14108 = vrcp.f32 %v8353_v5  ;;  %v10778_v5 = vld [vmem:[%s18653_s9 + $0x150] sm:$0xff] }
0x14bb   : > { %v8356_v11 = vpop.xlane.xlu0 %8355 }
0x14bc   : > { %14110 = vrcp.f32 %v8356_v11  ;;  %v10779_v11 = vld [vmem:[%s18653_s9 + $0x158] sm:$0xff] }
0x14bd   : > { %14112 = vrcp.f32 %v8341_v2  ;;  %v13409_v2 = vpack.c.bf16 %v10779_v11, %v10778_v5  ;;  %v18757_v11 = vld [vmem:[#allocation19_spill] sm:$0xff] }
0x14be   : > { %v14107_v51 = vpop.eup %14106 }
0x14bf   : > { %v8338_v43 = vpop.xlane.xlu0 %8337  ;;  %v8392_v15 = vmul.f32 %v14107_v51, %v17686_v46  ;;  %v10781_v51 = vld [vmem:[%s18653_s9 + $0x168] sm:$0xff] }
0x14c0   : > { %14114 = vrcp.f32 %v8338_v43  ;;  %v13412_v43 = vpack.c.bf16 %v10781_v51, %v10780_v63 }
0x14c1   : > { %12389 = vmatmul.mubr.msk.f32.gmra.mrb[114].mxu0 %vm1027_vm1, %v8392_v15  ;;  %v10782_v15 = vld [vmem:[%s18653_s9 + $0x170] sm:$0xff] }
0x14c2   : > { %v14109_v9 = vpop.eup %14108  ;;  %12413 = vmatprep.mubr.msk.f32.mxu0 %vm1027_vm1, %v8397_v44  ;;  %v10783_v44 = vld [vmem:[%s18653_s9 + $0x178] sm:$0xff] }
0x14c3   : > { %v8344_v6 = vpop.xlane.xlu0 %8343  ;;  %v8403_v17 = vmul.f32 %v14109_v9, %v17690_v0  ;;  %v13415_v9 = vpack.c.bf16 %v10783_v44, %v10782_v15 }
0x14c4   : > { %14116 = vrcp.f32 %v8344_v6 }
0x14c5   : > { %12430 = vmatprep.mubr.msk.f32.mxu1 %vm1027_vm1, %v8403_v17 }
0x14c6   : > { %v14111_v21 = vpop.eup %14110 }
0x14c7   : > { %v8404_v20 = vmul.f32 %v14111_v21, %v17696_v54  ;;  %v14113_v1 = vpop.eup %14112 }
0x14c8   : > { %v8399_v57 = vmul.f32 %v14113_v1, %v17666_v12 }
0x14c9   : > { %12431 = vmatmul.mubr.msk.f32.gmra.mrb[158].mxu1 %vm1027_vm1, %v8404_v20 }
0x14ca   : > { %v14115_v46 = vpop.eup %14114  ;;  %9430 = vmatprep.mubr.f32.mxu1 %v18754_v29 }
0x14cb   : > { %v8398_v18 = vmul.f32 %v14115_v46, %v17708_v27 }
0x14cd   : > { %12414 = vmatmul.mubr.msk.f32.vlgmr.msra.gmra.mrb[116].mxu0 %vm1027_vm1, %v8398_v18 }
0x14ce   : > { %v14117_v4 = vpop.eup %14116  ;;  %12416 = vmatprep.mubr.msk.f32.mxu0 %vm1027_vm1, %v8399_v57  ;;  %13383 = vmatpush1.bf16.msra.mxu0 %v13382_v33 }
0x14cf   : > { %v8400_v0 = vmul.f32 %v14117_v4, %v17718_v13  ;;  %13384 = vmatprep.subr.bf16.mxu0 %v18753_v48 }
0x14d1   : > { %12417 = vmatmul.mubr.msk.f32.gmra.mrb[118].mxu0 %vm1027_vm1, %v8400_v0 }
0x14d2   : > { %13386 = vmatpush1.bf16.msra.mxu0 %v13385_v35 }
0x14d3   : > { %13387 = vmatprep.subr.bf16.mxu0 %v18753_v48 }
0x14d6   : > { %13389 = vmatpush1.bf16.msra.mxu0 %v13388_v61 }
0x14d7   : > { %13390 = vmatprep.subr.bf16.mxu0 %v18753_v48 }
0x14da   : > { %13392 = vmatpush1.bf16.msra.mxu0 %v13391_v32 }
0x14db   : > { %13393 = vmatprep.subr.bf16.mxu0 %v18753_v48 }
0x14de   : > { %13395 = vmatpush1.bf16.msra.mxu0 %v13394_v24 }
0x14df   : > { %13396 = vmatprep.subr.bf16.mxu0 %v18753_v48 }
0x14e2   : > { %13398 = vmatpush1.bf16.msra.mxu0 %v13397_v7 }
0x14e3   : > { %13399 = vmatprep.subr.bf16.mxu0 %v18753_v48 }
0x14e6   : > { %13401 = vmatpush1.bf16.msra.mxu0 %v13400_v31 }
0x14e7   : > { %13402 = vmatprep.subr.bf16.mxu0 %v18753_v48 }
0x14ea   : > { %13404 = vmatpush1.bf16.msra.mxu0 %v13403_v42 }
0x14eb   : > { %13405 = vmatprep.subr.bf16.mxu0 %v18753_v48 }
0x14ee   : > { %13407 = vmatpush1.bf16.msra.mxu0 %v13406_v53 }
0x14ef   : > { %13408 = vmatprep.subr.bf16.mxu0 %v18753_v48 }
0x14f2   : > { %13410 = vmatpush1.bf16.msra.mxu0 %v13409_v2 }
0x14f3   : > { %13411 = vmatprep.subr.bf16.mxu0 %v18753_v48 }
0x14f6   : > { %13413 = vmatpush1.bf16.msra.mxu0 %v13412_v43  ;;  %v18758_v43 = vld [vmem:[#allocation18_spill] sm:$0xff] }
0x14f7   : > { %13414 = vmatprep.subr.bf16.mxu0 %v18753_v48 }
0x14fa   : > { %13416 = vmatpush1.bf16.msra.mxu0 %v13415_v9  ;;  %v10793_v9 = vld [vmem:[%s18656_s12 + $0x188] sm:$0xff] }
0x14ff   : > { %v17766_v54 = vpop.f32.mrb[144].mxu1 }
0x1500   : > { %v17768_v10 = vpop.f32.mrb[145].mxu1 }
0x1503   : > { %v17770_v50 = vpop.f32.mrb[146].mxu1 }
0x1504   : > { %v17772_v14 = vpop.f32.mrb[147].mxu1 }
0x1507   : > { %v17774_v27 = vpop.f32.mrb[148].mxu1 }
0x1508   : > { %v8596_v12 = vpop.f32.mrb[149].mxu1 }
0x1509   : > { %9047 = vrot.lane.b32.xlu1 %v8596_v12, %s18737_s0 }
0x150b   : > { %v17777_v22 = vpop.f32.mrb[150].mxu1 }
0x150c   : > { %v17779_v62 = vpop.f32.mrb[151].mxu1 }
0x150d   : > { %v13839_v13 = vpack.i.bf16 %v17779_v62, %v17774_v27 }
0x1532   : > { %v17797_v47 = vpop.f32.mrb[152].mxu1 }
0x1533   : > { %v8814_v23 = vpop.f32.mrb[153].mxu1 }
0x153e   : > { %v12387_v45 = vpop.f32.mrb[112].mxu0 }
0x153f   : > { %v8705_v49 = vpop.f32.mrb[113].mxu0 }
0x1540   : > { %9063 = vrot.lane.b32.xlu0 %v8705_v49, %s18735_s25  ;;  %v12404_v55 = vpop.f32.mrb[154].mxu1 }
0x1541   : > { %v8824_v3 = vpop.f32.mrb[155].mxu1 }
0x1542   : > { %v13849_v39 = vpack.i.bf16 %v8824_v3, %v17797_v47 }
0x1560   : > { %v12429_v6 = vpop.f32.mrb[156].mxu1 }
0x1561   : > { %v9024_v17 = vpop.f32.mrb[157].mxu1 }
0x1562   : > { %9095 = vrot.lane.b32.xlu1 %v9024_v17, %s18737_s0  ;;  %v10841_v17 = vld [vmem:[%s18657_s13 + $0x188] sm:$0xff] }
0x1566   : > { %9079 = vrot.lane.b32.xlu1 %v8814_v23, %s18736_s30 }
0x156a   : > { %13840 = vrot.lane.b32.xlu1 %v13839_v13, %s18737_s0 }
0x156e   : > { %9097 = vrot.lane.b32.xlu1 %v12429_v6, %s18737_s0  ;;  %v10796_v6 = vld [vmem:[%s18656_s12 + $0x1a0] sm:$0xff] }
0x157b   : > { %v9048_v27 = vpop.permute.xlu1 %9047 }
0x1594   : > { %v12390_v21 = vpop.f32.mrb[114].mxu0 }
0x1595   : > { %v8715_v20 = vpop.f32.mrb[115].mxu0 }
0x1596   : > { %v13844_v1 = vpack.i.bf16 %v8715_v20, %v12387_v45  ;;  %v10844_v20 = vld [vmem:[%s18657_s13 + $0x1a0] sm:$0xff] }
0x1598   : > { %13845 = vrot.lane.b32.xlu0 %v13844_v1, %s18735_s25  ;;  %v10792_v1 = vld [vmem:[%s18656_s12 + $0x180] sm:$0xff] }
0x159c   : > { %13850 = vrot.lane.b32.xlu0 %v13849_v39, %s18736_s30  ;;  %v12432_v48 = vpop.f32.mrb[158].mxu1 }
0x159d   : > { %v9034_v46 = vpop.f32.mrb[159].mxu1 }
0x159e   : > { %9099 = vrot.lane.b32.xlu1 %v9034_v46, %s18737_s0  ;;  %v13481_v46 = vpack.c.bf16 %v10844_v20, %v10841_v17  ;;  %v10864_v17 = vld [vmem:[%s18657_s13 + $0x240] sm:$0xff] }
0x15a0   : > { %9053 = vrot.lane.b32.xlu0 %v17777_v22, %s18737_s0  ;;  %v12415_v18 = vpop.f32.mrb[116].mxu0  ;;  %v9107_v22 = vsel %vm1027_vm1, %v17768_v10, %v9048_v27  ;;  %13482 = vmatprep.subr.bf16.mxu0 %v13481_v46  ;;  %v10871_v46 = vld [vmem:[%s18657_s13 + $0x278] sm:$0xff] }
0x15a1   : > { %v8911_v57 = vpop.f32.mrb[117].mxu0 }
0x15a2   : > { %9069 = vrot.lane.b32.xlu1 %v12390_v21, %s18735_s25  ;;  %v13417_v21 = vpack.c.bf16 %v10796_v6, %v10793_v9 }
0x15a4   : > { %v12418_v4 = vpop.f32.mrb[118].mxu0  ;;  %9101 = vrot.lane.b32.xlu0 %v12432_v48, %s18737_s0  ;;  %v10795_v48 = vld [vmem:[%s18656_s12 + $0x198] sm:$0xff]  ;;  %13418 = vmatprep.subr.bf16.mxu1 %v13417_v21  ;;  %s18603_s0 = scalar_lea.sflag [#allocation3], %s485_s1 }
0x15a5   : > { %v8921_v0 = vpop.f32.mrb[119].mxu0  ;;  %v10867_v21 = vld [vmem:[%s18657_s13 + $0x258] sm:$0xff] }
0x15a6   : > { %9085 = vrot.lane.b32.xlu1 %v12404_v55, %s18736_s30  ;;  %v13499_v20 = vpack.c.bf16 %v10867_v21, %v10864_v17  ;;  %v18147_v17 = vld [vmem:[%s18654_s10 + $0x1] ss:$0 sm:$0xff]  ;;  %s18601_s30 = scalar_lea.hbm %s18659_s15, %s10942_s17 }
0x15b2   : > { %v9064_v62 = vpop.permute.xlu0 %9063 }
0x15b3   : > { %v9111_v8 = vsel %vm4272_vm3, %v9107_v22, %v9064_v62  ;;  %v10847_v62 = vld [vmem:[%s18657_s13 + $0x1b8] sm:$0xff] }
0x15d4   : > { %v9096_v12 = vpop.permute.xlu1 %9095 }
0x15d5   : > { %v9119_v13 = vsel %vm1027_vm1, %v8911_v57, %v9096_v12  ;;  %v10840_v57 = vld [vmem:[%s18657_s13 + $0x180] sm:$0xff]  ;;  %v10802_v12 = vld [vmem:[%s18656_s12 + $0x1d0] sm:$0xff] }
0x15d6   : > { %10784 = vmatprep.mubr.msk.f32.mxu0 %vm4272_vm3, %v9119_v13  ;;  %v10850_v13 = vld [vmem:[%s18657_s13 + $0x1d0] sm:$0xff] }
0x15d8   : > { %v9080_v37 = vpop.permute.xlu1 %9079 }
0x15d9   : > { %v9115_v25 = vsel %vm4277_vm4, %v9111_v8, %v9080_v37  ;;  %v13485_v8 = vpack.c.bf16 %v10850_v13, %v10847_v62  ;;  %v10798_v37 = vld [vmem:[%s18656_s12 + $0x1b0] sm:$0xff]  ;;  %v10873_v13 = vld [vmem:[%s18657_s13 + $0x288] sm:$0xff] }
0x15da   : > { %9225 = vmatmul.mubr.f32.vlgmr.msra.gmra.mrb[120].mxu0 %v9115_v25  ;;  %v10801_v25 = vld [vmem:[%s18656_s12 + $0x1c8] sm:$0xff]  ;;  %v10870_v62 = vld [vmem:[%s18657_s13 + $0x270] sm:$0xff] }
0x15dc   : > { %v13841_v33 = vpop.permute.xlu1 %13840 }
0x15dd   : > { %v13842_v23 = vunpack.i.l.bf16 %v13841_v33  ;;  %v13843_v40 = vunpack.i.h.bf16 %v13841_v33  ;;  %v10846_v33 = vld [vmem:[%s18657_s13 + $0x1b0] sm:$0xff] }
0x15df   : > { %v9108_v10 = vsel %vm1027_vm1, %v17766_v54, %v13842_v23  ;;  %v9109_v45 = vsel %vm1027_vm1, %v17772_v14, %v13843_v40  ;;  %v10808_v23 = vld [vmem:[%s18656_s12 + $0x200] sm:$0xff]  ;;  %v10853_v40 = vld [vmem:[%s18657_s13 + $0x1e8] sm:$0xff] }
0x15e0   : > { %v9098_v59 = vpop.permute.xlu1 %9097 }
0x15e1   : > { %v9120_v35 = vsel %vm1027_vm1, %v12415_v18, %v9098_v59  ;;  %v13419_v18 = vpack.c.bf16 %v10795_v48, %v10792_v1  ;;  %v13423_v59 = vpack.c.bf16 %v10801_v25, %v10798_v37  ;;  %v10823_v1 = vld [vmem:[%s18656_s12 + $0x278] sm:$0xff]  ;;  %v10826_v48 = vld [vmem:[%s18656_s12 + $0x290] sm:$0xff]  ;;  %v10832_v37 = vld [vmem:[%s18656_s12 + $0x2c0] sm:$0xff] }
0x15e2   : > { %10785 = vmatprep.mubr.msk.f32.mxu0 %vm4272_vm3, %v9120_v35  ;;  %v10849_v35 = vld [vmem:[%s18657_s13 + $0x1c8] sm:$0xff] }
0x15e3   : > { %13420 = vmatpush1.bf16.msra.mxu1 %v13419_v18  ;;  %v13437_v18 = vpack.c.bf16 %v10826_v48, %v10823_v1  ;;  %v10877_v25 = vld [vmem:[%s18657_s13 + $0x2a8] sm:$0xff]  ;;  %v10800_v1 = vld [vmem:[%s18656_s12 + $0x1c0] sm:$0xff]  ;;  %v10803_v48 = vld [vmem:[%s18656_s12 + $0x1d8] sm:$0xff] }
0x160a   : > { %v13846_v47 = vpop.permute.xlu0 %13845 }
0x160b   : > { %v13847_v58 = vunpack.i.l.bf16 %v13846_v47  ;;  %v13848_v52 = vunpack.i.h.bf16 %v13846_v47  ;;  %v10805_v47 = vld [vmem:[%s18656_s12 + $0x1e8] sm:$0xff] }
0x160d   : > { %v9112_v38 = vsel %vm4272_vm3, %v9108_v10, %v13847_v58  ;;  %v9113_v49 = vsel %vm4272_vm3, %v9109_v45, %v13848_v52  ;;  %v13487_v58 = vpack.c.bf16 %v10849_v35, %v10846_v33  ;;  %v10804_v10 = vld [vmem:[%s18656_s12 + $0x1e0] sm:$0xff] }
0x160e   : > { %v13851_v36 = vpop.permute.xlu0 %13850  ;;  %v10828_v35 = vld [vmem:[%s18656_s12 + $0x2a0] sm:$0xff] }
0x160f   : > { %v13852_v61 = vunpack.i.l.bf16 %v13851_v36  ;;  %v13853_v41 = vunpack.i.h.bf16 %v13851_v36  ;;  %v13425_v36 = vpack.c.bf16 %v10808_v23, %v10805_v47  ;;  %v10831_v47 = vld [vmem:[%s18656_s12 + $0x2b8] sm:$0xff] }
0x1610   : > { %v9100_v32 = vpop.permute.xlu1 %9099 }
0x1611   : > { %v9121_v24 = vsel %vm1027_vm1, %v8921_v0, %v9100_v32  ;;  %v9116_v28 = vsel %vm4277_vm4, %v9112_v38, %v13852_v61  ;;  %v9117_v30 = vsel %vm4277_vm4, %v9113_v49, %v13853_v41  ;;  %v10799_v0 = vld [vmem:[%s18656_s12 + $0x1b8] sm:$0xff]  ;;  %v10856_v61 = vld [vmem:[%s18657_s13 + $0x200] sm:$0xff] }
0x1612   : > { %v9054_v19 = vpop.permute.xlu0 %9053  ;;  %9230 = vmatmul.mubr.f32.gmra.mrb[122].mxu0 %v9116_v28  ;;  %v13421_v22 = vpack.c.bf16 %v10802_v12, %v10799_v0  ;;  %v13489_v52 = vpack.c.bf16 %v10856_v61, %v10853_v40  ;;  %v10807_v32 = vld [vmem:[%s18656_s12 + $0x1f8] sm:$0xff]  ;;  %v10852_v38 = vld [vmem:[%s18657_s13 + $0x1e0] sm:$0xff]  ;;  %v10825_v0 = vld [vmem:[%s18656_s12 + $0x288] sm:$0xff] }
0x1613   : > { %10786 = vmatprep.mubr.msk.f32.mxu0 %vm4272_vm3, %v9121_v24  ;;  %v9110_v54 = vsel %vm1027_vm1, %v17770_v50, %v9054_v19  ;;  %v10855_v41 = vld [vmem:[%s18657_s13 + $0x1f8] sm:$0xff]  ;;  %v13427_v24 = vpack.c.bf16 %v10807_v32, %v10804_v10 }
0x1614   : > { %v9070_v7 = vpop.permute.xlu1 %9069  ;;  %13422 = vmatprep.subr.bf16.mxu1 %v13421_v22  ;;  %v13491_v28 = vpack.c.bf16 %v10855_v41, %v10852_v38  ;;  %v13503_v22 = vpack.c.bf16 %v10873_v13, %v10870_v62  ;;  %v10879_v40 = vld [vmem:[%s18657_s13 + $0x2b8] sm:$0xff]  ;;  %v10886_v38 = vld [vmem:[%s18657_s13 + $0x2f0] sm:$0xff] }
0x1615   : > { %v9114_v3 = vsel %vm4272_vm3, %v9110_v54, %v9070_v7  ;;  %13424 = vmatpush1.bf16.msra.mxu1 %v13423_v59  ;;  %v10811_v54 = vld [vmem:[%s18656_s12 + $0x218] sm:$0xff]  ;;  %v10880_v59 = vld [vmem:[%s18657_s13 + $0x2c0] sm:$0xff]  ;;  %v10818_v13 = vld [vmem:[%s18656_s12 + $0x250] sm:$0xff] }
0x1616   : > { %v9102_v16 = vpop.permute.xlu0 %9101  ;;  %9235 = vmatmul.mubr.f32.gmra.mrb[124].mxu0 %v9117_v30  ;;  %13426 = vmatprep.subr.bf16.mxu1 %v13425_v36  ;;  %v10814_v30 = vld [vmem:[%s18656_s12 + $0x230] sm:$0xff]  ;;  %v13505_v23 = vpack.c.bf16 %v10880_v59, %v10877_v25  ;;  %v10876_v36 = vld [vmem:[%s18657_s13 + $0x2a0] sm:$0xff]  ;;  %v10835_v61 = vld [vmem:[%s18656_s12 + $0x2d8] sm:$0xff] }
0x1617   : > { %v9122_v55 = vsel %vm1027_vm1, %v12418_v4, %v9102_v16  ;;  %v10843_v4 = vld [vmem:[%s18657_s13 + $0x198] sm:$0xff]  ;;  %v13507_v10 = vpack.c.bf16 %v10879_v40, %v10876_v36  ;;  %v10830_v59 = vld [vmem:[%s18656_s12 + $0x2b0] sm:$0xff] }
0x1618   : > { %10787 = vmatprep.mubr.msk.f32.mxu0 %vm4272_vm3, %v9122_v55  ;;  %v9086_v39 = vpop.permute.xlu1 %9085  ;;  %v13483_v27 = vpack.c.bf16 %v10843_v4, %v10840_v57  ;;  %v10859_v16 = vld [vmem:[%s18657_s13 + $0x218] sm:$0xff]  ;;  %v13429_v55 = vpack.c.bf16 %v10814_v30, %v10811_v54  ;;  %v10874_v57 = vld [vmem:[%s18657_s13 + $0x290] sm:$0xff]  ;;  %v10885_v54 = vld [vmem:[%s18657_s13 + $0x2e8] sm:$0xff] }
0x1619   : > { %v9118_v31 = vsel %vm4277_vm4, %v9114_v3, %v9086_v39  ;;  %13428 = vmatpush1.bf16.msra.mxu1 %v13427_v24  ;;  %v10862_v3 = vld [vmem:[%s18657_s13 + $0x230] sm:$0xff]  ;;  %v10883_v32 = vld [vmem:[%s18657_s13 + $0x2d8] sm:$0xff] }
0x161a   : > { %9240 = vmatmul.mubr.f32.gmra.mrb[126].mxu0 %v9118_v31  ;;  %v10810_v39 = vld [vmem:[%s18656_s12 + $0x210] sm:$0xff]  ;;  %v10813_v31 = vld [vmem:[%s18656_s12 + $0x228] sm:$0xff]  ;;  %13430 = vmatprep.subr.bf16.mxu1 %v13429_v55  ;;  %v13509_v24 = vpack.c.bf16 %v10886_v38, %v10883_v32  ;;  %v10827_v25 = vld [vmem:[%s18656_s12 + $0x298] sm:$0xff] }
0x161b   : > { %9653 = vmatprep.mubr.f32.mxu0 %v18754_v29  ;;  %13484 = vmatpush1.bf16.msra.mxu0 %v13483_v27  ;;  %v10822_v4 = vld [vmem:[%s18656_s12 + $0x270] sm:$0xff]  ;;  %v13501_v27 = vpack.c.bf16 %v10874_v57, %v10871_v46  ;;  %v13453_v57 = vpack.c.bf16 %v10803_v48, %v10800_v1  ;;  %v10875_v1 = vld [vmem:[%s18657_s13 + $0x298] sm:$0xff] }
0x161c   : > { %13486 = vmatprep.subr.bf16.mxu0 %v13485_v8  ;;  %v13439_v12 = vpack.c.bf16 %v10825_v0, %v10822_v4  ;;  %v10829_v8 = vld [vmem:[%s18656_s12 + $0x2a8] sm:$0xff]  ;;  %v10842_v40 = vld [vmem:[%s18657_s13 + $0x190] sm:$0xff] }
0x161d   : > { %v13441_v33 = vpack.c.bf16 %v10832_v37, %v10829_v8  ;;  %v10809_v4 = vld [vmem:[%s18656_s12 + $0x208] sm:$0xff]  ;;  %v10824_v37 = vld [vmem:[%s18656_s12 + $0x280] sm:$0xff] }
0x161f   : > { %13488 = vmatpush1.bf16.msra.mxu0 %v13487_v58  ;;  %v13443_v58 = vpack.c.bf16 %v10831_v47, %v10828_v35  ;;  %v10833_v35 = vld [vmem:[%s18656_s12 + $0x2c8] sm:$0xff] }
0x1620   : > { %13490 = vmatprep.subr.bf16.mxu0 %v13489_v52  ;;  %v10838_v52 = vld [vmem:[%s18656_s12 + $0x2f0] sm:$0xff]  ;;  %v13473_v47 = vpack.c.bf16 %v10833_v35, %v10830_v59  ;;  %v10890_v59 = vld [vmem:[%s18658_s14 + $0x168] sm:$0xff] }
0x1621   : > { %v13445_v41 = vpack.c.bf16 %v10838_v52, %v10835_v61  ;;  %v10845_v61 = vld [vmem:[%s18657_s13 + $0x1a8] sm:$0xff]  ;;  %v10891_v35 = vld [vmem:[%s18658_s14 + $0x170] sm:$0xff] }
0x1623   : > { %13492 = vmatpush1.bf16.msra.mxu0 %v13491_v28  ;;  %v10834_v28 = vld [vmem:[%s18656_s12 + $0x2d0] sm:$0xff] }
0x16ad   : > { %v9226_v14 = vpop.f32.mrb[120].mxu0 }
0x16ae   : > { %v17911_v56 = vadd.f32 %v9226_v14, %v18755_v34  ;;  %v9228_v50 = vpop.f32.mrb[121].mxu0  ;;  %v13493_v14 = vpack.c.bf16 %v10862_v3, %v10859_v16  ;;  %v13431_v34 = vpack.c.bf16 %v10813_v31, %v10810_v39 }
0x16af   : > { %v10858_v50 = vld [vmem:[%s18657_s13 + $0x210] sm:$0xff] }
0x16b0   : > { %9253 = vadd.xlane.f32.xlu0 %v17911_v56  ;;  %13494 = vmatprep.subr.bf16.mxu0 %v13493_v14 }
0x16b1   : > { %13432 = vmatpush1.bf16.msra.mxu1 %v13431_v34 }
0x16e5   : > { %v9231_v42 = vpop.f32.mrb[122].mxu0 }
0x16e6   : > { %v17915_v26 = vadd.f32 %v9231_v42, %v18756_v60  ;;  %v9233_v53 = vpop.f32.mrb[123].mxu0  ;;  %v10861_v42 = vld [vmem:[%s18657_s13 + $0x228] sm:$0xff] }
0x16e7   : > { %v13495_v60 = vpack.c.bf16 %v10861_v42, %v10858_v50  ;;  %v10817_v53 = vld [vmem:[%s18656_s12 + $0x248] sm:$0xff] }
0x16e8   : > { %9255 = vadd.xlane.f32.xlu1 %v17915_v26 }
0x16e9   : > { %v9236_v5 = vpop.f32.mrb[124].mxu0  ;;  %13496 = vmatpush1.bf16.msra.mxu0 %v13495_v60 }
0x16ea   : > { %v17919_v2 = vadd.f32 %v9236_v5, %v18757_v11  ;;  %v9238_v63 = vpop.f32.mrb[125].mxu0  ;;  %v10820_v5 = vld [vmem:[%s18656_s12 + $0x260] sm:$0xff]  ;;  %v10865_v11 = vld [vmem:[%s18657_s13 + $0x248] sm:$0xff] }
0x16eb   : > { %v13433_v63 = vpack.c.bf16 %v10820_v5, %v10817_v53 }
0x16ec   : > { %9257 = vadd.xlane.f32.xlu0 %v17919_v2 }
0x16ed   : > { %v9241_v51 = vpop.f32.mrb[126].mxu0  ;;  %13434 = vmatprep.subr.bf16.mxu1 %v13433_v63  ;;  %v10797_v63 = vld [vmem:[%s18656_s12 + $0x1a8] sm:$0xff] }
0x16ee   : > { %v17923_v15 = vadd.f32 %v9241_v51, %v18758_v43  ;;  %v9243_v44 = vpop.f32.mrb[127].mxu0  ;;  %v10868_v51 = vld [vmem:[%s18657_s13 + $0x260] sm:$0xff] }
0x16ef   : > { %v10816_v43 = vld [vmem:[%s18656_s12 + $0x240] sm:$0xff]  ;;  %v10819_v44 = vld [vmem:[%s18656_s12 + $0x258] sm:$0xff]  ;;  %v13497_v9 = vpack.c.bf16 %v10868_v51, %v10865_v11  ;;  %v10794_v11 = vld [vmem:[%s18656_s12 + $0x190] sm:$0xff] }
0x16f0   : > { %9259 = vadd.xlane.f32.xlu0 %v17923_v15  ;;  %v13435_v6 = vpack.c.bf16 %v10819_v44, %v10816_v43  ;;  %v13449_v51 = vpack.c.bf16 %v10797_v63, %v10794_v11  ;;  %v10851_v11 = vld [vmem:[%s18657_s13 + $0x1d8] sm:$0xff]  ;;  %v10854_v63 = vld [vmem:[%s18657_s13 + $0x1f0] sm:$0xff] }
0x16f1   : > { %13498 = vmatprep.subr.bf16.mxu0 %v13497_v9 }
0x16f2   : > { %13436 = vmatpush1.bf16.msra.mxu1 %v13435_v6  ;;  %13500 = vmatpush1.bf16.msra.mxu0 %v13499_v20  ;;  %v18153_v20 = vld [vmem:[%s18655_s11 + $0x1] ss:$0 sm:$0xff] }
0x16f3   : > { %13438 = vmatprep.subr.bf16.mxu1 %v13437_v18  ;;  %13502 = vmatprep.subr.bf16.mxu0 %v13501_v27  ;;  %v10812_v27 = vld [vmem:[%s18656_s12 + $0x220] sm:$0xff] }
0x16f6   : > { %13440 = vmatpush1.bf16.msra.mxu1 %v13439_v12  ;;  %13504 = vmatpush1.bf16.msra.mxu0 %v13503_v22  ;;  %v10815_v12 = vld [vmem:[%s18656_s12 + $0x238] sm:$0xff]  ;;  %v10821_v22 = vld [vmem:[%s18656_s12 + $0x268] sm:$0xff] }
0x16f7   : > { %13442 = vmatprep.subr.bf16.mxu1 %v13441_v33  ;;  %13506 = vmatprep.subr.bf16.mxu0 %v13505_v23  ;;  %v13461_v62 = vpack.c.bf16 %v10815_v12, %v10812_v27  ;;  %v13465_v8 = vpack.c.bf16 %v10821_v22, %v10818_v13  ;;  %v13469_v33 = vpack.c.bf16 %v10827_v25, %v10824_v37  ;;  %v10836_v23 = vld [vmem:[%s18656_s12 + $0x2e0] sm:$0xff]  ;;  %v10904_v27 = vld [vmem:[%s18658_s14 + $0x1d8] sm:$0xff]  ;;  %v10906_v37 = vld [vmem:[%s18658_s14 + $0x1e8] sm:$0xff] }
0x16f8   : > { %v10905_v12 = vld [vmem:[%s18658_s14 + $0x1e0] sm:$0xff]  ;;  %v10888_v13 = vld [vmem:[%s18658_s14 + $0x158] sm:$0xff]  ;;  %v10907_v25 = vld [vmem:[%s18658_s14 + $0x1f0] sm:$0xff] }
0x16f9   : > { %v10889_v22 = vld [vmem:[%s18658_s14 + $0x160] sm:$0xff] }
0x16fa   : > { %13444 = vmatpush1.bf16.msra.mxu1 %v13443_v58  ;;  %13508 = vmatpush1.bf16.msra.mxu0 %v13507_v10  ;;  %v10839_v58 = vld [vmem:[%s18656_s12 + $0x2f8] sm:$0xff]  ;;  %v13513_v10 = vpack.c.bf16 %v10845_v61, %v10842_v40  ;;  %v10893_v61 = vld [vmem:[%s18658_s14 + $0x180] sm:$0xff] }
0x16fb   : > { %13446 = vmatprep.subr.bf16.mxu1 %v13445_v41  ;;  %13510 = vmatprep.subr.bf16.mxu0 %v13509_v24  ;;  %v13477_v36 = vpack.c.bf16 %v10839_v58, %v10836_v23  ;;  %v10908_v23 = vld [vmem:[%s18658_s14 + $0x1f8] sm:$0xff]  ;;  %v10909_v58 = vld [vmem:[%s18658_s14 + $0x200] sm:$0xff] }
0x16fc   : > { %v10892_v40 = vld [vmem:[%s18658_s14 + $0x178] sm:$0xff] }
0x173d   : > { %v9254_v19 = vpop.xlane.xlu0 %9253 }
0x173e   : > { %v9261_v45 = vmul.f32 0.0078125, %v9254_v19  ;;  %v10837_v19 = vld [vmem:[%s18656_s12 + $0x2e8] sm:$0xff] }
0x1740   : > { %v17999_v7 = vsub.f32 %v17911_v56, %v9261_v45  ;;  %v10882_v45 = vld [vmem:[%s18657_s13 + $0x2d0] sm:$0xff] }
0x1741   : > { %v13511_v30 = vpack.c.bf16 %v10885_v54, %v10882_v45 }
0x1742   : > { %v9269_v49 = vmul.f32 %v17999_v7, %v17999_v7 }
0x1743   : > { %13512 = vmatpush1.bf16.msra.mxu0 %v13511_v30 }
0x1744   : > { %9273 = vadd.xlane.f32.xlu0 %v9269_v49  ;;  %v13447_v49 = vpack.c.bf16 %v10837_v19, %v10834_v28 }
0x1746   : > { %13448 = vmatpush1.bf16.msra.mxu1 %v13447_v49 }
0x1747   : > { %13450 = vmatprep.subr.bf16.mxu1 %v13449_v51 }
0x1775   : > { %v9256_v16 = vpop.xlane.xlu1 %9255 }
0x1776   : > { %v9262_v55 = vmul.f32 0.0078125, %v9256_v16 }
0x1778   : > { %v18124_v3 = vsub.f32 %v17915_v26, %v9262_v55 }
0x1779   : > { %v9258_v39 = vpop.xlane.xlu0 %9257 }
0x177a   : > { %v9263_v31 = vmul.f32 0.0078125, %v9258_v39  ;;  %v9270_v14 = vmul.f32 %v18124_v3, %v18124_v3 }
0x177c   : > { %v18129_v34 = vsub.f32 %v17919_v2, %v9263_v31  ;;  %9275 = vadd.xlane.f32.xlu1 %v9270_v14 }
0x177d   : > { %v9260_v50 = vpop.xlane.xlu0 %9259 }
0x177e   : > { %v9264_v42 = vmul.f32 0.0078125, %v9260_v50  ;;  %v9271_v60 = vmul.f32 %v18129_v34, %v18129_v34 }
0x1780   : > { %v18134_v53 = vsub.f32 %v17923_v15, %v9264_v42  ;;  %9277 = vadd.xlane.f32.xlu0 %v9271_v60 }
0x1782   : > { %v9272_v5 = vmul.f32 %v18134_v53, %v18134_v53 }
0x1784   : > { %9279 = vadd.xlane.f32.xlu1 %v9272_v5  ;;  %v10848_v5 = vld [vmem:[%s18657_s13 + $0x1c0] sm:$0xff] }
0x17d1   : > { %v9274_v43 = vpop.xlane.xlu0 %9273 }
0x17d2   : > { %v9281_v44 = vmul.f32 0.0078125, %v9274_v43  ;;  %v10860_v43 = vld [vmem:[%s18657_s13 + $0x220] sm:$0xff] }
0x17d4   : > { %v9285_v9 = vadd.f32 1e-05, %v9281_v44  ;;  %v10863_v44 = vld [vmem:[%s18657_s13 + $0x238] sm:$0xff] }
0x17d6   : > { %14118 = vrsqrt.f32 %v9285_v9  ;;  %v13525_v9 = vpack.c.bf16 %v10863_v44, %v10860_v43  ;;  %v10903_v43 = vld [vmem:[%s18658_s14 + $0x1d0] sm:$0xff] }
0x17e0   : > { %v14119_v6 = vpop.eup %14118 }
0x17e1   : > { %v9293_v21 = vmul.f32 %v14119_v6, %v17999_v7  ;;  %v10806_v7 = vld [vmem:[%s18656_s12 + $0x1f0] sm:$0xff] }
0x17e2   : > { %v13457_v0 = vpack.c.bf16 %v10809_v4, %v10806_v7  ;;  %v10866_v6 = vld [vmem:[%s18657_s13 + $0x250] sm:$0xff]  ;;  %v10884_v7 = vld [vmem:[%s18657_s13 + $0x2e0] sm:$0xff]  ;;  %v10887_v4 = vld [vmem:[%s18657_s13 + $0x2f8] sm:$0xff] }
0x17e3   : > { %v9303_v46 = vmul.f32 %v18147_v17, %v9293_v21 }
0x17e5   : > { %v18163_v18 = vadd.f32 %v18153_v20, %v9303_v46  ;;  %v10878_v46 = vld [vmem:[%s18657_s13 + $0x2b0] sm:$0xff] }
0x17e7   : > { %9431 = vmatmul.mubr.f32.vlgmr.msra.gmra.mrb[160].mxu1 %v18163_v18  ;;  %9654 = vmatmul.mubr.f32.vlgmr.msra.gmra.mrb[128].mxu0 %v18163_v18 }
0x17e8   : > { %13452 = vmatpush3.bf16.msra.mxu1 %v13449_v51  ;;  %9436 = vmatprep.mubr.f32.mxu1 %v18754_v29 }
0x17e9   : > { %13454 = vmatprep.subr.bf16.mxu1 %v13453_v57  ;;  %9659 = vmatprep.mubr.f32.mxu0 %v18754_v29 }
0x17ec   : > { %13456 = vmatpush3.bf16.msra.mxu1 %v13453_v57 }
0x17ed   : > { %13458 = vmatprep.subr.bf16.mxu1 %v13457_v0 }
0x17f0   : > { %13460 = vmatpush3.bf16.msra.mxu1 %v13457_v0  ;;  %v13541_v0 = vpack.c.bf16 %v10887_v4, %v10884_v7 }
0x17f1   : > { %13462 = vmatprep.subr.bf16.mxu1 %v13461_v62 }
0x17f4   : > { %13464 = vmatpush3.bf16.msra.mxu1 %v13461_v62  ;;  %v13545_v62 = vpack.c.bf16 %v10905_v12, %v10904_v27  ;;  %v10920_v27 = vld [vmem:[%s18658_s14 + $0x258] sm:$0xff]  ;;  %v10921_v12 = vld [vmem:[%s18658_s14 + $0x260] sm:$0xff] }
0x17f5   : > { %13466 = vmatprep.subr.bf16.mxu1 %v13465_v8 }
0x17f6   : > { %13546 = vmatprep.subr.bf16.mxu0 %v13545_v62  ;;  %v13577_v62 = vpack.c.bf16 %v10921_v12, %v10920_v27 }
0x17f8   : > { %13468 = vmatpush3.bf16.msra.mxu1 %v13465_v8  ;;  %v13547_v8 = vpack.c.bf16 %v10889_v22, %v10888_v13  ;;  %v10922_v22 = vld [vmem:[%s18658_s14 + $0x268] sm:$0xff] }
0x17f9   : > { %13470 = vmatprep.subr.bf16.mxu1 %v13469_v33 }
0x17fa   : > { %13548 = vmatpush3.bf16.msra.mxu0 %v13547_v8  ;;  %v10923_v8 = vld [vmem:[%s18658_s14 + $0x270] sm:$0xff] }
0x17fc   : > { %13472 = vmatpush3.bf16.msra.mxu1 %v13469_v33  ;;  %v13549_v33 = vpack.c.bf16 %v10907_v25, %v10906_v37  ;;  %v13581_v25 = vpack.c.bf16 %v10923_v8, %v10922_v22 }
0x17fd   : > { %13474 = vmatprep.subr.bf16.mxu1 %v13473_v47 }
0x17fe   : > { %13550 = vmatprep.subr.bf16.mxu0 %v13549_v33 }
0x1800   : > { %13476 = vmatpush3.bf16.msra.mxu1 %v13473_v47  ;;  %v13551_v47 = vpack.c.bf16 %v10891_v35, %v10890_v59  ;;  %v10924_v35 = vld [vmem:[%s18658_s14 + $0x278] sm:$0xff] }
0x1801   : > { %13478 = vmatprep.subr.bf16.mxu1 %v13477_v36 }
0x1802   : > { %13552 = vmatpush3.bf16.msra.mxu0 %v13551_v47  ;;  %v10925_v47 = vld [vmem:[%s18658_s14 + $0x280] sm:$0xff] }
0x1804   : > { %13480 = vmatpush3.bf16.msra.mxu1 %v13477_v36  ;;  %v13553_v36 = vpack.c.bf16 %v10909_v58, %v10908_v23 }
0x1805   : > { %13514 = vmatprep.subr.bf16.mxu1 %v13513_v10 }
0x1806   : > { %13554 = vmatprep.subr.bf16.mxu0 %v13553_v36 }
0x1809   : > { %v9276_v52 = vpop.xlane.xlu1 %9275 }
0x180a   : > { %v9282_v32 = vmul.f32 0.0078125, %v9276_v52  ;;  %v10910_v52 = vld [vmem:[%s18658_s14 + $0x208] sm:$0xff] }
0x180c   : > { %v9286_v38 = vadd.f32 1e-05, %v9282_v32  ;;  %v10911_v32 = vld [vmem:[%s18658_s14 + $0x210] sm:$0xff] }
0x180d   : > { %v9278_v41 = vpop.xlane.xlu0 %9277 }
0x180e   : > { %14120 = vrsqrt.f32 %v9286_v38  ;;  %v9283_v24 = vmul.f32 0.0078125, %v9278_v41  ;;  %v13557_v38 = vpack.c.bf16 %v10911_v32, %v10910_v52  ;;  %v10894_v41 = vld [vmem:[%s18658_s14 + $0x188] sm:$0xff] }
0x1810   : > { %v9287_v28 = vadd.f32 1e-05, %v9283_v24  ;;  %v10895_v24 = vld [vmem:[%s18658_s14 + $0x190] sm:$0xff] }
0x1811   : > { %v9280_v19 = vpop.xlane.xlu1 %9279 }
0x1812   : > { %14122 = vrsqrt.f32 %v9287_v28  ;;  %v9284_v45 = vmul.f32 0.0078125, %v9280_v19  ;;  %v13559_v28 = vpack.c.bf16 %v10895_v24, %v10894_v41  ;;  %v10912_v19 = vld [vmem:[%s18658_s14 + $0x218] sm:$0xff]  ;;  %v10927_v41 = vld [vmem:[%s18658_s14 + $0x290] sm:$0xff] }
0x1814   : > { %v9288_v49 = vadd.f32 1e-05, %v9284_v45  ;;  %v10913_v45 = vld [vmem:[%s18658_s14 + $0x220] sm:$0xff] }
0x1816   : > { %14124 = vrsqrt.f32 %v9288_v49  ;;  %v13561_v49 = vpack.c.bf16 %v10913_v45, %v10912_v19 }
0x1818   : > { %v14121_v54 = vpop.eup %14120 }
0x1819   : > { %v9294_v30 = vmul.f32 %v14121_v54, %v18124_v3  ;;  %v10896_v54 = vld [vmem:[%s18658_s14 + $0x198] sm:$0xff] }
0x181b   : > { %v9304_v16 = vmul.f32 %v18147_v17, %v9294_v30  ;;  %v10897_v30 = vld [vmem:[%s18658_s14 + $0x1a0] sm:$0xff] }
0x181c   : > { %v14123_v55 = vpop.eup %14122 }
0x181d   : > { %v9314_v39 = vadd.f32 %v18153_v20, %v9304_v16  ;;  %v9295_v31 = vmul.f32 %v14123_v55, %v18129_v34  ;;  %v13563_v16 = vpack.c.bf16 %v10897_v30, %v10896_v54  ;;  %v10914_v55 = vld [vmem:[%s18658_s14 + $0x228] sm:$0xff]  ;;  %v10928_v30 = vld [vmem:[%s18658_s14 + $0x298] sm:$0xff] }
0x181f   : > { %9437 = vmatmul.mubr.f32.gmra.mrb[162].mxu1 %v9314_v39  ;;  %9660 = vmatmul.mubr.f32.gmra.mrb[130].mxu0 %v9314_v39  ;;  %v9305_v14 = vmul.f32 %v18147_v17, %v9295_v31 }
0x1820   : > { %v14125_v50 = vpop.eup %14124  ;;  %9442 = vmatprep.mubr.f32.mxu1 %v18754_v29  ;;  %9665 = vmatprep.mubr.f32.mxu0 %v18754_v29 }
0x1821   : > { %v9315_v42 = vadd.f32 %v18153_v20, %v9305_v14  ;;  %v9296_v3 = vmul.f32 %v14125_v50, %v18134_v53  ;;  %v13517_v53 = vpack.c.bf16 %v10851_v11, %v10848_v5  ;;  %v10898_v14 = vld [vmem:[%s18658_s14 + $0x1a8] sm:$0xff]  ;;  %v10899_v50 = vld [vmem:[%s18658_s14 + $0x1b0] sm:$0xff]  ;;  %v10900_v5 = vld [vmem:[%s18658_s14 + $0x1b8] sm:$0xff] }
0x1822   : > { %v10901_v11 = vld [vmem:[%s18658_s14 + $0x1c0] sm:$0xff] }
0x1823   : > { %9443 = vmatmul.mubr.f32.gmra.mrb[164].mxu1 %v9315_v42  ;;  %9666 = vmatmul.mubr.f32.gmra.mrb[132].mxu0 %v9315_v42  ;;  %v9306_v60 = vmul.f32 %v18147_v17, %v9296_v3  ;;  %v10869_v17 = vld [vmem:[%s18657_s13 + $0x268] sm:$0xff]  ;;  %v10916_v3 = vld [vmem:[%s18658_s14 + $0x238] sm:$0xff] }
0x1824   : > { %9448 = vmatprep.mubr.f32.mxu1 %v18754_v29  ;;  %9671 = vmatprep.mubr.f32.mxu0 %v18754_v29  ;;  %v10857_v29 = vld [vmem:[%s18657_s13 + $0x208] sm:$0xff]  ;;  %v13529_v21 = vpack.c.bf16 %v10869_v17, %v10866_v6 }
0x1825   : > { %v9316_v34 = vadd.f32 %v18153_v20, %v9306_v60  ;;  %v13521_v51 = vpack.c.bf16 %v10857_v29, %v10854_v63  ;;  %v10872_v20 = vld [vmem:[%s18657_s13 + $0x280] sm:$0xff]  ;;  %v13571_v63 = vpack.c.bf16 %v10901_v11, %v10900_v5  ;;  %v10919_v29 = vld [vmem:[%s18658_s14 + $0x250] sm:$0xff] }
0x1826   : > { %v13533_v48 = vpack.c.bf16 %v10875_v1, %v10872_v20  ;;  %v10917_v60 = vld [vmem:[%s18658_s14 + $0x240] sm:$0xff] }
0x1827   : > { %9449 = vmatmul.mubr.f32.gmra.mrb[166].mxu1 %v9316_v34  ;;  %9672 = vmatmul.mubr.f32.gmra.mrb[134].mxu0 %v9316_v34 }
0x1828   : > { %12465 = vmatprep.mubr.f32.mxu1 %v18163_v18 }
0x182b   : > { %12466 = vmatmul.mubr.f32.vlgmr.msra.gmra.mrb[168].mxu1 %v9314_v39 }
0x182c   : > { %13516 = vmatpush3.bf16.msra.mxu1 %v13513_v10  ;;  %12468 = vmatprep.mubr.f32.mxu1 %v9315_v42  ;;  %v13555_v10 = vpack.c.bf16 %v10893_v61, %v10892_v40  ;;  %v13585_v40 = vpack.c.bf16 %v10925_v47, %v10924_v35 }
0x182d   : > { %13518 = vmatprep.subr.bf16.mxu1 %v13517_v53 }
0x182e   : > { %13556 = vmatpush3.bf16.msra.mxu0 %v13555_v10 }
0x182f   : > { %12469 = vmatmul.mubr.f32.gmra.mrb[170].mxu1 %v9316_v34  ;;  %13558 = vmatprep.subr.bf16.mxu0 %v13557_v38  ;;  %v10926_v38 = vld [vmem:[%s18658_s14 + $0x288] sm:$0xff] }
0x1830   : > { %13520 = vmatpush3.bf16.msra.mxu1 %v13517_v53  ;;  %12503 = vmatprep.mubr.f32.mxu1 %v18163_v18  ;;  %v10881_v18 = vld [vmem:[%s18657_s13 + $0x2c8] sm:$0xff]  ;;  %v13589_v19 = vpack.c.bf16 %v10927_v41, %v10926_v38 }
0x1831   : > { %13522 = vmatprep.subr.bf16.mxu1 %v13521_v51  ;;  %v13537_v57 = vpack.c.bf16 %v10881_v18, %v10878_v46  ;;  %v10918_v53 = vld [vmem:[%s18658_s14 + $0x248] sm:$0xff] }
0x1832   : > { %13560 = vmatpush3.bf16.msra.mxu0 %v13559_v28  ;;  %v13573_v44 = vpack.c.bf16 %v10919_v29, %v10918_v53 }
0x1833   : > { %13562 = vmatprep.subr.bf16.mxu0 %v13561_v49 }
0x1834   : > { %13524 = vmatpush3.bf16.msra.mxu1 %v13521_v51  ;;  %v10902_v51 = vld [vmem:[%s18658_s14 + $0x1c8] sm:$0xff] }
0x1835   : > { %13526 = vmatprep.subr.bf16.mxu1 %v13525_v9 }
0x1836   : > { %13564 = vmatpush3.bf16.msra.mxu0 %v13563_v16  ;;  %v10929_v16 = vld [vmem:[%s18658_s14 + $0x2a0] sm:$0xff] }
0x1838   : > { %13528 = vmatpush3.bf16.msra.mxu1 %v13525_v9  ;;  %v13575_v9 = vpack.c.bf16 %v10903_v43, %v10902_v51 }
0x1839   : > { %13530 = vmatprep.subr.bf16.mxu1 %v13529_v21 }
0x183c   : > { %13532 = vmatpush3.bf16.msra.mxu1 %v13529_v21 }
0x183d   : > { %13534 = vmatprep.subr.bf16.mxu1 %v13533_v48 }
0x1840   : > { %13536 = vmatpush3.bf16.msra.mxu1 %v13533_v48 }
0x1841   : > { %13538 = vmatprep.subr.bf16.mxu1 %v13537_v57 }
0x1844   : > { %13540 = vmatpush3.bf16.msra.mxu1 %v13537_v57 }
0x1845   : > { %13542 = vmatprep.subr.bf16.mxu1 %v13541_v0 }
0x1848   : > { %13544 = vmatpush3.bf16.msra.mxu1 %v13541_v0 }
0x1849   : > { %13578 = vmatprep.subr.bf16.mxu1 %v13577_v62 }
0x184b   : > { %12504 = vmatmul.mubr.f32.vlgmr.msra.gmra.mrb[172].mxu1 %v9314_v39  ;;  %v10915_v39 = vld [vmem:[%s18658_s14 + $0x230] sm:$0xff] }
0x184c   : > { %12506 = vmatprep.mubr.f32.mxu1 %v9315_v42  ;;  %v13565_v31 = vpack.c.bf16 %v10915_v39, %v10914_v55  ;;  %v13567_v42 = vpack.c.bf16 %v10899_v50, %v10898_v14  ;;  %13580 = vmatpush3.bf16.msra.mxu1 %v13577_v62  ;;  %v13593_v39 = vpack.c.bf16 %v10929_v16, %v10928_v30 }
0x184d   : > { %13582 = vmatprep.subr.bf16.mxu1 %v13581_v25 }
0x184e   : > { %13566 = vmatprep.subr.bf16.mxu0 %v13565_v31 }
0x184f   : > { %12507 = vmatmul.mubr.f32.gmra.mrb[174].mxu1 %v9316_v34  ;;  %13568 = vmatpush3.bf16.msra.mxu0 %v13567_v42  ;;  %v13569_v34 = vpack.c.bf16 %v10917_v60, %v10916_v3  ;;  %v10930_v3 = vld [vmem:[%s18658_s14 + $0x2a8] sm:$0x1f] }
0x1850   : > { %13584 = vmatpush3.bf16.msra.mxu1 %v13581_v25 }
0x1851   : > { %13570 = vmatprep.subr.bf16.mxu0 %v13569_v34  ;;  %13586 = vmatprep.subr.bf16.mxu1 %v13585_v40 }
0x1853   : > { %13572 = vmatpush3.bf16.msra.mxu0 %v13571_v63 }
0x1854   : > { %13574 = vmatprep.subr.bf16.mxu0 %v13573_v44  ;;  %13588 = vmatpush3.bf16.msra.mxu1 %v13585_v40 }
0x1855   : > { %13590 = vmatprep.subr.bf16.mxu1 %v13589_v19 }
0x1857   : > { %13576 = vmatpush3.bf16.msra.mxu0 %v13575_v9  ;;  %v18759_v9 = vmov -1.0  }
0x1858   : > { %13592 = vmatpush3.bf16.msra.mxu1 %v13589_v19 }
0x1859   : > { %13594 = vmatprep.subr.bf16.mxu1 %v13593_v39 }
0x185c   : > { %13596 = vmatpush3.bf16.msra.mxu1 %v13593_v39 }
0x185d   : > { %12529 = vmatprep.subr.msk.mxu1 %vm5313_vm5, %v10930_v3 }
0x1860   : > { %12530 = vmatpush3.msk.msra.mxu1 %vm5313_vm5, %v10930_v3 }
0x18ba   : > { %v18364_v6 = vpop.f32.mrb[160].mxu1  ;;  %v18366_v17 = vpop.f32.mrb[128].mxu0 }
0x18bb   : > { %v18369_v21 = vmul.f32 0.70710677, %v18366_v17  ;;  %v18371_v20 = vpop.f32.mrb[161].mxu1  ;;  %v18373_v1 = vpop.f32.mrb[129].mxu0 }
0x18bc   : > { %v18376_v48 = vmul.f32 0.70710677, %v18373_v1  ;;  %v9764_v12 = vmul.f32 0.5, %v18373_v1 }
0x18bd   : > { %v9811_v46 = vand.u32 2147483647, %v18369_v21  ;;  %vm9787_vm1 = vcmp.ge.f32.partialorder %v18369_v21, 0.0 }
0x18be   : > { %v9812_v18 = vand.u32 2147483647, %v18376_v48  ;;  %vm9788_vm2 = vcmp.ge.f32.partialorder %v18376_v48, 0.0 }
0x18bf   : > { %v9823_v57 = vmul.f32 0.3275911, %v9811_v46  ;;  %v9979_v13 = vsub.f32 0.0, %v9811_v46 }
0x18c0   : > { %v9824_v7 = vmul.f32 0.3275911, %v9812_v18  ;;  %v9980_v37 = vsub.f32 0.0, %v9812_v18 }
0x18c1   : > { %v9835_v4 = vadd.f32 1.0, %v9823_v57  ;;  %v9991_v59 = vmul.f32 %v9979_v13, %v9811_v46  ;;  %v9799_v46 = vsel %vm9787_vm1, 1.0, %v18759_v9 }
0x18c2   : > { %v9836_v0 = vadd.f32 1.0, %v9824_v7  ;;  %v9992_v36 = vmul.f32 %v9980_v37, %v9812_v18  ;;  %v9800_v7 = vsel %vm9788_vm2, 1.0, %v18759_v9 }
0x18c3   : > { %14126 = vrcp.f32 %v9835_v4  ;;  %v10003_v52 = vmul.f32 1.442695, %v9991_v59 }
0x18c4   : > { %14128 = vrcp.f32 %v9836_v0  ;;  %v10005_v28 = vmul.f32 1.442695, %v9992_v36  ;;  %v9763_v0 = vmul.f32 0.5, %v18366_v17 }
0x18c5   : > { %14130 = vpow2.f32 %v10003_v52 }
0x18c6   : > { %14132 = vpow2.f32 %v10005_v28 }
0x18cd   : > { %v14127_v33 = vpop.eup %14126 }
0x18ce   : > { %v14129_v23 = vpop.eup %14128  ;;  %v9871_v58 = vmul.f32 1.0614054, %v14127_v33 }
0x18cf   : > { %v9872_v61 = vmul.f32 1.0614054, %v14129_v23  ;;  %v14131_v53 = vpop.eup %14130 }
0x18d0   : > { %v9883_v10 = vadd.f32 -1.4531521, %v9871_v58  ;;  %v14133_v29 = vpop.eup %14132 }
0x18d1   : > { %v9884_v32 = vadd.f32 -1.4531521, %v9872_v61 }
0x18d2   : > { %v9895_v24 = vmul.f32 %v14127_v33, %v9883_v10 }
0x18d3   : > { %v9896_v45 = vmul.f32 %v14129_v23, %v9884_v32 }
0x18d4   : > { %v9907_v49 = vadd.f32 1.4214138, %v9895_v24 }
0x18d5   : > { %v9908_v54 = vadd.f32 1.4214138, %v9896_v45 }
0x18d6   : > { %v9919_v55 = vmul.f32 %v14127_v33, %v9907_v49 }
0x18d7   : > { %v9920_v31 = vmul.f32 %v14129_v23, %v9908_v54 }
0x18d8   : > { %v9931_v14 = vadd.f32 -0.28449672, %v9919_v55 }
0x18d9   : > { %v9932_v50 = vadd.f32 -0.28449672, %v9920_v31 }
0x18da   : > { %v9943_v42 = vmul.f32 %v14127_v33, %v9931_v14 }
0x18db   : > { %v9944_v60 = vmul.f32 %v14129_v23, %v9932_v50 }
0x18dc   : > { %v9955_v34 = vadd.f32 0.2548296, %v9943_v42 }
0x18dd   : > { %v9956_v5 = vadd.f32 0.2548296, %v9944_v60 }
0x18de   : > { %v9967_v11 = vmul.f32 %v14127_v33, %v9955_v34 }
0x18df   : > { %v9968_v63 = vmul.f32 %v14129_v23, %v9956_v5 }
0x18e0   : > { %v10027_v51 = vmul.f32 %v14131_v53, %v9967_v11 }
0x18e1   : > { %v10028_v43 = vmul.f32 %v14133_v29, %v9968_v63 }
0x18e2   : > { %v10039_v44 = vsub.f32 1.0, %v10027_v51 }
0x18e3   : > { %v10040_v18 = vsub.f32 1.0, %v10028_v43 }
0x18e4   : > { %v10051_v57 = vmul.f32 %v10039_v44, %v9799_v46 }
0x18e5   : > { %v10052_v4 = vmul.f32 %v10040_v18, %v9800_v7 }
0x18e6   : > { %v10063_v27 = vadd.f32 1.0, %v10051_v57 }
0x18e7   : > { %v10064_v62 = vadd.f32 1.0, %v10052_v4 }
0x18e8   : > { %v10075_v13 = vmul.f32 %v10063_v27, %v9763_v0 }
0x18e9   : > { %v10076_v21 = vmul.f32 %v10064_v62, %v9764_v12 }
0x18ea   : > { %v10087_v22 = vmul.f32 %v10075_v13, %v18364_v6 }
0x18eb   : > { %v10088_v48 = vmul.f32 %v10076_v21, %v18371_v20 }
0x18ed   : > { %10222 = vmatprep.mubr.f32.mxu0 %v10088_v48 }
0x18ee   : > { %10223 = vmatmul.mubr.f32.vlgmr.msra.gmra.mrb[136].mxu0 %v10087_v22 }
0x18f2   : > { %v18423_v8 = vpop.f32.mrb[162].mxu1  ;;  %v18425_v37 = vpop.f32.mrb[130].mxu0 }
0x18f3   : > { %v18428_v25 = vmul.f32 0.70710677, %v18425_v37  ;;  %v18430_v17 = vpop.f32.mrb[163].mxu1  ;;  %v18432_v33 = vpop.f32.mrb[131].mxu0 }
0x18f4   : > { %v18435_v1 = vmul.f32 0.70710677, %v18432_v33 }
0x18f5   : > { %v9814_v6 = vand.u32 2147483647, %v18428_v25  ;;  %vm9790_vm4 = vcmp.ge.f32.partialorder %v18428_v25, 0.0 }
0x18f6   : > { %v9815_v20 = vand.u32 2147483647, %v18435_v1  ;;  %v18439_v59 = vpop.f32.mrb[164].mxu1  ;;  %v18441_v35 = vpop.f32.mrb[132].mxu0  ;;  %vm9791_vm3 = vcmp.ge.f32.partialorder %v18435_v1, 0.0 }
0x18f7   : > { %v9826_v47 = vmul.f32 0.3275911, %v9814_v6  ;;  %v18443_v23 = vpop.f32.mrb[165].mxu1  ;;  %v18446_v36 = vmul.f32 0.70710677, %v18441_v35  ;;  %v18448_v40 = vpop.f32.mrb[133].mxu0 }
0x18f8   : > { %v9827_v58 = vmul.f32 0.3275911, %v9815_v20  ;;  %v18451_v10 = vmul.f32 0.70710677, %v18448_v40  ;;  %v9983_v14 = vsub.f32 0.0, %v9815_v20  ;;  %v9982_v5 = vsub.f32 0.0, %v9814_v6 }
0x18f9   : > { %v9838_v61 = vadd.f32 1.0, %v9826_v47  ;;  %v9817_v32 = vand.u32 2147483647, %v18446_v36  ;;  %vm9793_vm5 = vcmp.ge.f32.partialorder %v18446_v36, 0.0 }
0x18fa   : > { %v9839_v52 = vadd.f32 1.0, %v9827_v58  ;;  %v18454_v38 = vpop.f32.mrb[166].mxu1  ;;  %v18456_v41 = vpop.f32.mrb[134].mxu0  ;;  %v9818_v45 = vand.u32 2147483647, %v18451_v10  ;;  %v9995_v63 = vmul.f32 %v9983_v14, %v9815_v20  ;;  %v9994_v7 = vmul.f32 %v9982_v5, %v9814_v6 }
0x18fb   : > { %14134 = vrcp.f32 %v9838_v61  ;;  %v18458_v24 = vpop.f32.mrb[167].mxu1  ;;  %v18460_v28 = vpop.f32.mrb[135].mxu0  ;;  %v9829_v19 = vmul.f32 0.3275911, %v9817_v32  ;;  %v18464_v54 = vmul.f32 0.70710677, %v18456_v41 }
0x18fc   : > { %14136 = vrcp.f32 %v9839_v52  ;;  %v9830_v16 = vmul.f32 0.3275911, %v9818_v45  ;;  %v18469_v55 = vmul.f32 0.70710677, %v18460_v28  ;;  %v9985_v44 = vsub.f32 0.0, %v9817_v32 }
0x18fd   : > { %v9841_v49 = vadd.f32 1.0, %v9829_v19  ;;  %v9820_v39 = vand.u32 2147483647, %v18464_v54  ;;  %v9986_v4 = vsub.f32 0.0, %v9818_v45  ;;  %v10011_v27 = vmul.f32 1.442695, %v9995_v63 }
0x18fe   : > { %v18466_v30 = vpop.f32.mrb[168].mxu1  ;;  %v9842_v50 = vadd.f32 1.0, %v9830_v16  ;;  %v9821_v60 = vand.u32 2147483647, %v18469_v55  ;;  %v9997_v13 = vmul.f32 %v9985_v44, %v9817_v32  ;;  %v10009_v47 = vmul.f32 1.442695, %v9994_v7 }
0x18ff   : > { %14138 = vrcp.f32 %v9841_v49  ;;  %v18472_v31 = vpop.f32.mrb[169].mxu1  ;;  %v9832_v42 = vmul.f32 0.3275911, %v9820_v39  ;;  %v9988_v48 = vsub.f32 0.0, %v9820_v39  ;;  %v9998_v58 = vmul.f32 %v9986_v4, %v9818_v45 }
0x1900   : > { %14140 = vrcp.f32 %v9842_v50  ;;  %v9833_v29 = vmul.f32 0.3275911, %v9821_v60  ;;  %v10015_v49 = vmul.f32 1.442695, %v9997_v13  ;;  %v9989_v14 = vsub.f32 0.0, %v9821_v60 }
0x1901   : > { %v9844_v11 = vadd.f32 1.0, %v9832_v42  ;;  %v10000_v42 = vmul.f32 %v9988_v48, %v9820_v39  ;;  %v10017_v63 = vmul.f32 1.442695, %v9998_v58  ;;  %vm9794_vm8 = vcmp.ge.f32.partialorder %v18451_v10, 0.0 }
0x1902   : > { %v18474_v3 = vpop.f32.mrb[170].mxu1  ;;  %v9845_v18 = vadd.f32 1.0, %v9833_v29  ;;  %vm9796_vm9 = vcmp.ge.f32.partialorder %v18464_v54, 0.0  ;;  %vm9797_vm10 = vcmp.ge.f32.partialorder %v18469_v55, 0.0  ;;  %v9772_v54 = vmul.f32 0.5, %v18456_v41 }
0x1903   : > { %v18477_v34 = vpop.f32.mrb[171].mxu1  ;;  %14142 = vrcp.f32 %v9844_v11  ;;  %v9773_v55 = vmul.f32 0.5, %v18460_v28 }
0x1904   : > { %14144 = vrcp.f32 %v9845_v18 }
0x1905   : > { %v18479_v53 = vpop.eup %14134  ;;  %14146 = vpow2.f32 %v10011_v27  ;;  %v10021_v27 = vmul.f32 1.442695, %v10000_v42 }
0x1906   : > { %v14137_v51 = vpop.eup %14136  ;;  %v9874_v43 = vmul.f32 1.0614054, %v18479_v53  ;;  %14148 = vpow2.f32 %v10009_v47 }
0x1907   : > { %v9875_v46 = vmul.f32 1.0614054, %v14137_v51  ;;  %14150 = vpow2.f32 %v10015_v49 }
0x1908   : > { %v9886_v57 = vadd.f32 -1.4531521, %v9874_v43  ;;  %14152 = vpow2.f32 %v10017_v63 }
0x1909   : > { %v9887_v0 = vadd.f32 -1.4531521, %v9875_v46  ;;  %v18482_v12 = vpop.eup %14138  ;;  %14154 = vpow2.f32 %v10021_v27 }
0x190a   : > { %v9898_v62 = vmul.f32 %v18479_v53, %v9886_v57  ;;  %v9877_v22 = vmul.f32 1.0614054, %v18482_v12  ;;  %v18486_v61 = vpop.eup %14140  ;;  %v10001_v57 = vmul.f32 %v9989_v14, %v9821_v60 }
0x190b   : > { %v9899_v21 = vmul.f32 %v14137_v51, %v9887_v0  ;;  %v9878_v16 = vmul.f32 1.0614054, %v18486_v61 }
0x190c   : > { %v9910_v20 = vadd.f32 1.4214138, %v9898_v62  ;;  %v9889_v6 = vadd.f32 -1.4531521, %v9877_v22  ;;  %v10023_v60 = vmul.f32 1.442695, %v10001_v57 }
0x190d   : > { %v9911_v52 = vadd.f32 1.4214138, %v9899_v21  ;;  %v18491_v5 = vpop.eup %14142  ;;  %v9890_v45 = vadd.f32 -1.4531521, %v9878_v16 }
0x190e   : > { %v9922_v19 = vmul.f32 %v18479_v53, %v9910_v20  ;;  %v9901_v32 = vmul.f32 %v18482_v12, %v9889_v6  ;;  %v9880_v44 = vmul.f32 1.0614054, %v18491_v5  ;;  %v18496_v7 = vpop.eup %14144  ;;  %14156 = vpow2.f32 %v10023_v60 }
0x190f   : > { %v9923_v50 = vmul.f32 %v14137_v51, %v9911_v52  ;;  %v9902_v18 = vmul.f32 %v18486_v61, %v9890_v45  ;;  %v9881_v21 = vmul.f32 1.0614054, %v18496_v7  ;;  %v14147_v52 = vpop.eup %14146 }
0x1910   : > { %v9934_v11 = vadd.f32 -0.28449672, %v9922_v19  ;;  %v9913_v43 = vadd.f32 1.4214138, %v9901_v32  ;;  %v9892_v0 = vadd.f32 -1.4531521, %v9880_v44  ;;  %v14149_v45 = vpop.eup %14148 }
0x1911   : > { %v9935_v29 = vadd.f32 -0.28449672, %v9923_v50  ;;  %v9914_v13 = vadd.f32 1.4214138, %v9902_v18  ;;  %v9893_v58 = vadd.f32 -1.4531521, %v9881_v21 }
0x1912   : > { %v9946_v46 = vmul.f32 %v18479_v53, %v9934_v11  ;;  %v9925_v39 = vmul.f32 %v18482_v12, %v9913_v43  ;;  %v9904_v20 = vmul.f32 %v18491_v5, %v9892_v0 }
0x1913   : > { %v9947_v4 = vmul.f32 %v14137_v51, %v9935_v29  ;;  %v9926_v47 = vmul.f32 %v18486_v61, %v9914_v13  ;;  %v9905_v50 = vmul.f32 %v18496_v7, %v9893_v58  ;;  %v9766_v13 = vmul.f32 0.5, %v18425_v37 }
0x1914   : > { %v9958_v62 = vadd.f32 0.2548296, %v9946_v46  ;;  %v9937_v48 = vadd.f32 -0.28449672, %v9925_v39  ;;  %v9916_v16 = vadd.f32 1.4214138, %v9904_v20  ;;  %v14151_v46 = vpop.eup %14150 }
0x1915   : > { %v9959_v22 = vadd.f32 0.2548296, %v9947_v4  ;;  %v9938_v14 = vadd.f32 -0.28449672, %v9926_v47  ;;  %v9917_v29 = vadd.f32 1.4214138, %v9905_v50 }
0x1916   : > { %v9970_v6 = vmul.f32 %v18479_v53, %v9958_v62  ;;  %v9949_v49 = vmul.f32 %v18482_v12, %v9937_v48  ;;  %v9928_v11 = vmul.f32 %v18491_v5, %v9916_v16  ;;  %v9803_v4 = vsel %vm9791_vm3, 1.0, %v18759_v9  ;;  %v14153_v62 = vpop.eup %14152 }
0x1917   : > { %v9971_v19 = vmul.f32 %v14137_v51, %v9959_v22  ;;  %v9950_v63 = vmul.f32 %v18486_v61, %v9938_v14  ;;  %v9929_v57 = vmul.f32 %v18496_v7, %v9917_v29  ;;  %v9805_v37 = vsel %vm9793_vm5, 1.0, %v18759_v9 }
0x1918   : > { %v9961_v42 = vadd.f32 0.2548296, %v9949_v49  ;;  %v10030_v53 = vmul.f32 %v14149_v45, %v9970_v6  ;;  %v9940_v44 = vadd.f32 -0.28449672, %v9928_v11  ;;  %v9806_v6 = vsel %vm9794_vm8, 1.0, %v18759_v9  ;;  %v14155_v49 = vpop.eup %14154 }
0x1919   : > { %v10031_v32 = vmul.f32 %v14147_v52, %v9971_v19  ;;  %v9962_v18 = vadd.f32 0.2548296, %v9950_v63  ;;  %v9941_v27 = vadd.f32 -0.28449672, %v9929_v57  ;;  %v14157_v45 = vpop.eup %14156 }
0x191a   : > { %v9973_v43 = vmul.f32 %v18482_v12, %v9961_v42  ;;  %v9952_v1 = vmul.f32 %v18491_v5, %v9940_v44  ;;  %v10042_v21 = vsub.f32 1.0, %v10030_v53 }
0x191b   : > { %v10043_v51 = vsub.f32 1.0, %v10031_v32  ;;  %v9974_v0 = vmul.f32 %v18486_v61, %v9962_v18  ;;  %v9953_v60 = vmul.f32 %v18496_v7, %v9941_v27  ;;  %v9802_v61 = vsel %vm9790_vm4, 1.0, %v18759_v9 }
0x191c   : > { %v10033_v39 = vmul.f32 %v14151_v46, %v9973_v43  ;;  %v9964_v48 = vadd.f32 0.2548296, %v9952_v1  ;;  %v10054_v32 = vmul.f32 %v10042_v21, %v9802_v61  ;;  %v9769_v43 = vmul.f32 0.5, %v18441_v35 }
0x191d   : > { %v10055_v22 = vmul.f32 %v10043_v51, %v9803_v4  ;;  %v10034_v58 = vmul.f32 %v14153_v62, %v9974_v0  ;;  %v9965_v14 = vadd.f32 0.2548296, %v9953_v60  ;;  %v9767_v51 = vmul.f32 0.5, %v18432_v33 }
0x191e   : > { %v18516_v12 = vpop.f32.mrb[172].mxu1  ;;  %v10045_v47 = vsub.f32 1.0, %v10033_v39  ;;  %v9976_v19 = vmul.f32 %v18491_v5, %v9964_v48  ;;  %v9808_v18 = vsel %vm9796_vm9, 1.0, %v18759_v9  ;;  %v10066_v39 = vadd.f32 1.0, %v10054_v32 }
0x191f   : > { %v18519_v20 = vpop.f32.mrb[173].mxu1  ;;  %v18523_v52 = vmul.f32 0.70710677, %v18516_v12  ;;  %v10046_v16 = vsub.f32 1.0, %v10034_v58  ;;  %v10067_v25 = vadd.f32 1.0, %v10055_v22  ;;  %v9977_v5 = vmul.f32 %v18496_v7, %v9965_v14 }
0x1920   : > { %v10036_v42 = vmul.f32 %v14155_v49, %v9976_v19  ;;  %v18538_v11 = vmul.f32 0.70710677, %v18519_v20  ;;  %v10057_v10 = vmul.f32 %v10045_v47, %v9805_v37  ;;  %v9770_v35 = vmul.f32 0.5, %v18448_v40 }
0x1921   : > { %v9816_v50 = vand.u32 2147483647, %v18523_v52  ;;  %v10058_v63 = vmul.f32 %v10046_v16, %v9806_v6  ;;  %v10037_v57 = vmul.f32 %v14157_v45, %v9977_v5  ;;  %v10079_v27 = vmul.f32 %v10067_v25, %v9767_v51 }
0x1922   : > { %v18540_v36 = vpop.f32.mrb[174].mxu1  ;;  %v10048_v44 = vsub.f32 1.0, %v10036_v42  ;;  %v9813_v46 = vand.u32 2147483647, %v18538_v11  ;;  %v10069_v62 = vadd.f32 1.0, %v10057_v10  ;;  %v9809_v22 = vsel %vm9797_vm10, 1.0, %v18759_v9 }
0x1923   : > { %v9828_v29 = vmul.f32 0.3275911, %v9816_v50  ;;  %v18543_v53 = vpop.f32.mrb[175].mxu1  ;;  %v10070_v7 = vadd.f32 1.0, %v10058_v63  ;;  %v10049_v33 = vsub.f32 1.0, %v10037_v57  ;;  %v10078_v60 = vmul.f32 %v10066_v39, %v9766_v13 }
0x1924   : > { %v10060_v1 = vmul.f32 %v10048_v44, %v9808_v18  ;;  %v9825_v0 = vmul.f32 0.3275911, %v9813_v46  ;;  %v18557_v58 = vmul.f32 0.70710677, %v18540_v36  ;;  %v18560_v37 = vmul.f32 0.70710677, %v18543_v53 }
0x1925   : > { %v9840_v4 = vadd.f32 1.0, %v9828_v29  ;;  %v10061_v47 = vmul.f32 %v10049_v33, %v9809_v22  ;;  %v10082_v61 = vmul.f32 %v10070_v7, %v9770_v35  ;;  %v10081_v6 = vmul.f32 %v10069_v62, %v9769_v43 }
0x1926   : > { %v10072_v21 = vadd.f32 1.0, %v10060_v1  ;;  %v9837_v48 = vadd.f32 1.0, %v9825_v0  ;;  %v9822_v19 = vand.u32 2147483647, %v18557_v58  ;;  %v10091_v49 = vmul.f32 %v10079_v27, %v18430_v17 }
0x1927   : > { %14158 = vrcp.f32 %v9840_v4  ;;  %v10073_v40 = vadd.f32 1.0, %v10061_v47  ;;  %v9819_v41 = vand.u32 2147483647, %v18560_v37  ;;  %v9984_v14 = vsub.f32 0.0, %v9816_v50 }
0x1928   : > { %14160 = vrcp.f32 %v9837_v48  ;;  %v10084_v16 = vmul.f32 %v10072_v21, %v9772_v54  ;;  %v9834_v32 = vmul.f32 0.3275911, %v9822_v19  ;;  %10227 = vmatprep.mubr.f32.mxu0 %v10091_v49  ;;  %v10090_v13 = vmul.f32 %v10078_v60, %v18423_v8 }
0x1929   : > { %v10085_v28 = vmul.f32 %v10073_v40, %v9773_v55  ;;  %v9831_v25 = vmul.f32 0.3275911, %v9819_v41  ;;  %v10094_v42 = vmul.f32 %v10082_v61, %v18443_v23  ;;  %v10093_v10 = vmul.f32 %v10081_v6, %v18439_v59 }
0x192a   : > { %v9846_v45 = vadd.f32 1.0, %v9834_v32  ;;  %v9981_v5 = vsub.f32 0.0, %v9813_v46  ;;  %10228 = vmatmul.mubr.f32.gmra.mrb[138].mxu0 %v10090_v13  ;;  %v10096_v17 = vmul.f32 %v10084_v16, %v18454_v38  ;;  %v9996_v43 = vmul.f32 %v9984_v14, %v9816_v50 }
0x192b   : > { %v10097_v63 = vmul.f32 %v10085_v28, %v18458_v24  ;;  %v9843_v29 = vadd.f32 1.0, %v9831_v25  ;;  %10232 = vmatprep.mubr.f32.mxu0 %v10094_v42  ;;  %v9990_v39 = vsub.f32 0.0, %v9822_v19  ;;  %v9987_v0 = vsub.f32 0.0, %v9819_v41 }
0x192c   : > { %14162 = vrcp.f32 %v9846_v45  ;;  %v9993_v57 = vmul.f32 %v9981_v5, %v9813_v46  ;;  %v10013_v23 = vmul.f32 1.442695, %v9996_v43  ;;  %vm9792_vm11 = vcmp.ge.f32.partialorder %v18523_v52, 0.0 }
0x192d   : > { %14164 = vrcp.f32 %v9843_v29  ;;  %v10002_v33 = vmul.f32 %v9990_v39, %v9822_v19  ;;  %v9999_v22 = vmul.f32 %v9987_v0, %v9819_v41  ;;  %v9804_v43 = vsel %vm9792_vm11, 1.0, %v18759_v9 }
0x192e   : > { %10233 = vmatmul.mubr.f32.gmra.mrb[140].mxu0 %v10093_v10  ;;  %v10007_v1 = vmul.f32 1.442695, %v9993_v57  ;;  %14166 = vpow2.f32 %v10013_v23  ;;  %vm9789_vm12 = vcmp.ge.f32.partialorder %v18538_v11, 0.0  ;;  %v9768_v52 = vmul.f32 0.5, %v18516_v12 }
0x192f   : > { %10237 = vmatprep.mubr.f32.mxu0 %v10097_v63  ;;  %v10025_v61 = vmul.f32 1.442695, %v10002_v33  ;;  %v10019_v16 = vmul.f32 1.442695, %v9999_v22  ;;  %vm9798_vm13 = vcmp.ge.f32.partialorder %v18557_v58, 0.0  ;;  %vm9795_vm14 = vcmp.ge.f32.partialorder %v18560_v37, 0.0 }
0x1930   : > { %14168 = vpow2.f32 %v10007_v1  ;;  %v9771_v37 = vmul.f32 0.5, %v18543_v53 }
0x1931   : > { %v14159_v51 = vpop.eup %14158  ;;  %14170 = vpow2.f32 %v10025_v61 }
0x1932   : > { %v9876_v44 = vmul.f32 1.0614054, %v14159_v51  ;;  %v14161_v18 = vpop.eup %14160  ;;  %10238 = vmatmul.mubr.f32.gmra.mrb[142].mxu0 %v10096_v17  ;;  %14172 = vpow2.f32 %v10019_v16 }
0x1933   : > { %v9873_v4 = vmul.f32 1.0614054, %v14161_v18 }
0x1934   : > { %v9888_v8 = vadd.f32 -1.4531521, %v9876_v44 }
0x1935   : > { %v9885_v24 = vadd.f32 -1.4531521, %v9873_v4 }
0x1936   : > { %v9900_v59 = vmul.f32 %v14159_v51, %v9888_v8  ;;  %v14163_v27 = vpop.eup %14162 }
0x1937   : > { %v9897_v38 = vmul.f32 %v14161_v18, %v9885_v24  ;;  %v14165_v35 = vpop.eup %14164  ;;  %v9882_v46 = vmul.f32 1.0614054, %v14163_v27  ;;  %v9801_v24 = vsel %vm9789_vm12, 1.0, %v18759_v9 }
0x1938   : > { %v9912_v7 = vadd.f32 1.4214138, %v9900_v59  ;;  %v9879_v54 = vmul.f32 1.0614054, %v14165_v35  ;;  %v14167_v19 = vpop.eup %14166 }
0x1939   : > { %v9909_v62 = vadd.f32 1.4214138, %v9897_v38  ;;  %v9894_v47 = vadd.f32 -1.4531521, %v9882_v46 }
0x193a   : > { %v9924_v50 = vmul.f32 %v14159_v51, %v9912_v7  ;;  %v9891_v6 = vadd.f32 -1.4531521, %v9879_v54  ;;  %v14169_v5 = vpop.eup %14168 }
0x193b   : > { %v9921_v48 = vmul.f32 %v14161_v18, %v9909_v62  ;;  %v9906_v49 = vmul.f32 %v14163_v27, %v9894_v47  ;;  %v14171_v38 = vpop.eup %14170 }
0x193c   : > { %v9936_v21 = vadd.f32 -0.28449672, %v9924_v50  ;;  %v9903_v14 = vmul.f32 %v14165_v35, %v9891_v6  ;;  %v9765_v50 = vmul.f32 0.5, %v18519_v20  ;;  %v14173_v33 = vpop.eup %14172  ;;  %v9807_v20 = vsel %vm9795_vm14, 1.0, %v18759_v9 }
0x193d   : > { %v9933_v60 = vadd.f32 -0.28449672, %v9921_v48  ;;  %v9918_v25 = vadd.f32 1.4214138, %v9906_v49 }
0x193e   : > { %v9948_v55 = vmul.f32 %v14159_v51, %v9936_v21  ;;  %v9915_v42 = vadd.f32 1.4214138, %v9903_v14 }
0x193f   : > { %v9945_v28 = vmul.f32 %v14161_v18, %v9933_v60  ;;  %v9930_v45 = vmul.f32 %v14163_v27, %v9918_v25 }
0x1940   : > { %v9960_v40 = vadd.f32 0.2548296, %v9948_v55  ;;  %v9927_v63 = vmul.f32 %v14165_v35, %v9915_v42 }
0x1941   : > { %v9957_v13 = vadd.f32 0.2548296, %v9945_v28  ;;  %v9942_v17 = vadd.f32 -0.28449672, %v9930_v45 }
0x1942   : > { %v9972_v32 = vmul.f32 %v14159_v51, %v9960_v40  ;;  %v9939_v44 = vadd.f32 -0.28449672, %v9927_v63 }
0x1943   : > { %v9969_v10 = vmul.f32 %v14161_v18, %v9957_v13  ;;  %v9954_v57 = vmul.f32 %v14163_v27, %v9942_v17 }
0x1944   : > { %v10032_v41 = vmul.f32 %v14167_v19, %v9972_v32  ;;  %v9951_v4 = vmul.f32 %v14165_v35, %v9939_v44 }
0x1945   : > { %v10029_v51 = vmul.f32 %v14169_v5, %v9969_v10  ;;  %v9966_v18 = vadd.f32 0.2548296, %v9954_v57 }
0x1946   : > { %v10044_v29 = vsub.f32 1.0, %v10032_v41  ;;  %v9963_v7 = vadd.f32 0.2548296, %v9951_v4 }
0x1947   : > { %v10041_v23 = vsub.f32 1.0, %v10029_v51  ;;  %v9978_v0 = vmul.f32 %v14163_v27, %v9966_v18  ;;  %v9810_v27 = vsel %vm9798_vm13, 1.0, %v18759_v9 }
0x1948   : > { %v10056_v8 = vmul.f32 %v10044_v29, %v9804_v43  ;;  %v9975_v62 = vmul.f32 %v14165_v35, %v9963_v7 }
0x1949   : > { %v10053_v39 = vmul.f32 %v10041_v23, %v9801_v24  ;;  %v10038_v46 = vmul.f32 %v14171_v38, %v9978_v0 }
0x194a   : > { %v10068_v59 = vadd.f32 1.0, %v10056_v8  ;;  %v10035_v22 = vmul.f32 %v14173_v33, %v9975_v62 }
0x194b   : > { %v10065_v11 = vadd.f32 1.0, %v10053_v39  ;;  %v10050_v48 = vsub.f32 1.0, %v10038_v46 }
0x194c   : > { %v10080_v1 = vmul.f32 %v10068_v59, %v9768_v52  ;;  %v10047_v55 = vsub.f32 1.0, %v10035_v22 }
0x194d   : > { %v10077_v12 = vmul.f32 %v10065_v11, %v9765_v50  ;;  %v10062_v47 = vmul.f32 %v10050_v48, %v9810_v27 }
0x194e   : > { %v10092_v21 = vmul.f32 %v18466_v30, %v10080_v1  ;;  %v10059_v35 = vmul.f32 %v10047_v55, %v9807_v20  ;;  %v9774_v30 = vmul.f32 0.5, %v18540_v36 }
0x194f   : > { %v10089_v54 = vmul.f32 %v10077_v12, %v18472_v31  ;;  %v10074_v58 = vadd.f32 1.0, %v10062_v47 }
0x1950   : > { %v10071_v60 = vadd.f32 1.0, %v10059_v35 }
0x1951   : > { %12531 = vmatprep.mubr.msk.f32.mxu1 %vm5300_vm7, %v10089_v54  ;;  %v10086_v61 = vmul.f32 %v10074_v58, %v9774_v30 }
0x1952   : > { %12532 = vmatmul.mubr.msk.f32.vlgmr.msra.gmra.mrb[176].mxu1 %vm5300_vm7, %v10092_v21  ;;  %v10083_v6 = vmul.f32 %v10071_v60, %v9771_v37 }
0x1953   : > { %v10098_v31 = vmul.f32 %v18474_v3, %v10086_v61 }
0x1954   : > { %v10095_v40 = vmul.f32 %v10083_v6, %v18477_v34 }
0x1956   : > { %12534 = vmatprep.mubr.msk.f32.mxu1 %vm5300_vm7, %v10095_v40 }
0x1957   : > { %12535 = vmatmul.mubr.msk.f32.gmra.mrb[178].mxu1 %vm5300_vm7, %v10098_v31 }
0x19c1   : > { %v11544_v9 = vpop.f32.mrb[136].mxu0 }
0x19c2   : > { %v11545_v49 = vpop.f32.mrb[137].mxu0 }
0x19c3   : > { %v11546_v36 = vadd.f32 %v11545_v49, %v11544_v9 }
0x19fd   : > { %v11547_v16 = vpop.f32.mrb[138].mxu0 }
0x19fe   : > { %v11548_v28 = vpop.f32.mrb[139].mxu0 }
0x19ff   : > { %v11549_v14 = vadd.f32 %v11548_v28, %v11547_v16 }
0x1a01   : > { %v11550_v32 = vpop.f32.mrb[140].mxu0 }
0x1a02   : > { %v11551_v53 = vpop.f32.mrb[141].mxu0 }
0x1a03   : > { %v11552_v25 = vadd.f32 %v11551_v53, %v11550_v32 }
0x1a05   : > { %v11553_v19 = vpop.f32.mrb[142].mxu0 }
0x1a06   : > { %v11554_v13 = vpop.f32.mrb[143].mxu0 }
0x1a07   : > { %v11555_v42 = vadd.f32 %v11554_v13, %v11553_v19 }
0x1a25   : > { %v12533_v3 = vpop.f32.mrb[176].mxu1 }
0x1a26   : > { %v10315_v34 = vadd.f32 %v12533_v3, %v11549_v14  ;;  %v10309_v41 = vpop.f32.mrb[177].mxu1 }
0x1a27   : > { %v10310_v45 = vadd.f32 %v11546_v36, %v10309_v41 }
0x1a28   : > { %v10329_v10 = vadd.f32 %v10315_v34, %v17915_v26 }
0x1a29   : > { %v10328_v63 = vadd.f32 %v10310_v45, %v17911_v56 }
0x1a2a   : > { %10333 = vst [vmem:[%s487_s16 + $0x8] sm:$0xff] %v10329_v10  ;;  %v12536_v5 = vpop.f32.mrb[178].mxu1 }
0x1a2b   : > { %10332 = vst [vmem:[%s487_s16] sm:$0xff] %v10328_v63  ;;  %v10325_v29 = vadd.f32 %v12536_v5, %v11555_v42  ;;  %v10319_v17 = vpop.f32.mrb[179].mxu1 }
0x1a2c   : > { %v10320_v43 = vadd.f32 %v11552_v25, %v10319_v17 }
0x1a2d   : > { %v10331_v51 = vadd.f32 %v10325_v29, %v17923_v15 }
0x1a2e   : > { %v10330_v26 = vadd.f32 %v10320_v43, %v17919_v2 }
0x1a2f   : > { %10335 = vst [vmem:[%s487_s16 + $0x18] sm:$0xff] %v10331_v51 }
0x1a30   : > { %10334 = vst [vmem:[%s487_s16 + $0x10] sm:$0xff] %v10330_v26 }
0x1a31   : > { %14199 = shalt.err (!%p14196_p3)
}
0x1a32   : > { %s14200_s1 = scalar_lea.hbm %s18601_s30, 512  ;;  %s14204_s17 = scalar_lea.hbm %s18659_s15, 1024 }
0x1a33   : > { %p14201_p4 = scmp.ne.s32.totalorder %s18601_s30, %s14200_s1  ;;  %p14205_p9 = scmp.lt.u32.totalorder %s18601_s30, %s18659_s15 }
0x1a34   : > { %p14206_p10 = scmp.lt.u32.totalorder %s14204_s17, %s14200_s1  ;;  %p14208_p12 = scmp.lt.u32.totalorder %s14200_s1, %s18601_s30 }
0x1a35   : > { %p14202_p7 = pnand %p14201_p4, %p14377_p5 }
0x1a36   : > { %p14207_p11 = por %p14206_p10, %p14205_p9 }
0x1a37   : > { %p14203_p8 = pneg %p14202_p7 }
0x1a38   : > { %p14209_p13 = por %p14208_p12, %p14207_p11 }
0x1a3a   : > { %p14210_p0 = pnand %p14209_p13, %p14203_p8 }
0x1a3c   : > { %14213 = shalt.err (!%p14210_p0)
}
0x1a3d   : > { %s14257_s22 = smov 128   ;;  %s14258_s24 = smov 8  }
0x1a3e   : > { %13597 = dma.vmem_to_hbm [thread:$0]  (%p14377_p5), %s18594_s26, 512, %s18601_s30, %s18603_s0, %s14257_s22, %s14257_s22, %s14258_s24  }
0x1a3f PF: > { %p13603_p1 = scmp.ge.s32.totalorder %s14248_s21, 2  ;;  %s10365_s29 = sand.u32 1, %s14236_s18  }
0x1a40   : > { %s10366_s1 = scalar_lea.sflag [#allocation3], %s10365_s29 }
0x1a41   : > { %p13600_p2 = pnand %p13603_p1, %p14381_p6 }
0x1a43   : > { %14231 = dma.done.wait (!%p13600_p2), %s10366_s1, 512  }
0x1a44   : > { %14233 = vsyncadd (!%p13600_p2), %s10366_s1, 4294966784  ;;  %s18761_s21 = sld [smem:[#allocation6_spill]]  ;;  %s18762_s23 = sld [smem:[#allocation5_spill]] }
0x1a45   : > { %s18763_s20 = sld [smem:[#allocation7_spill]]  ;;  %s18764_s18 = smov %s14240_s19 }
0x1a4a   : > { %p25_p3 = scmp.ge.s32.totalorder %s18761_s21, 4   ;;  %s18765_s19 = smov %s18762_s23 }
0x1a4c   :  { %27 = sbr.rel (!%p25_p3) target bundleno = 6 (0x6), region = 124 }
0x1a53   :  { %10371 = vsyncpa [#allocation3], 1 }
0x1a54   :  { %10373 = vsyncpa [#allocation3 + $0x1], 1 }

</bundles_post_ra>
